<compile_context>
chip_gen: v5e
topology: v5e:2x2
jax: 0.10.0
libtpu: 0.0.40
codegen_flags: <defaults>
</compile_context>

<pallas_src>
import functools

import numpy as np

import jax
import jax.numpy as jnp
from jax.experimental import pallas as pl
from jax.experimental.pallas import tpu as pltpu


# ----------------------------------------------------------------------------
# Kernel 1: 3x3x3 conv (pad=1) as one [Co,27*Cin] @ [27*Cin,M] matmul per
#           sample, fused with per-sample BN partial statistics (sum, M2).
# ----------------------------------------------------------------------------
def _conv3x3x3_stats_kernel(x_ref, w_ref, mask_ref, y_ref, stats_ref,
                            *, Hp, Wp, M, inv_cnt):
    # x_ref:     [Cin, Lflat] bf16  zero-padded input, (Dp,Hp,Wp) flattened
    # w_ref:     [Co, 27*Cin] bf16  tap-major (kd, kh, kw, ci)
    # mask_ref:  [1, M]       f32   1.0 on valid (non-halo) columns
    # y_ref:     [Co, M]      bf16  pre-BN conv output (lane-dense)
    # stats_ref: [Co, 2]      f32   col 0: sum, col 1: M2 (valid columns only)

    # Build the transposed im2col block in VMEM: each tap is one contiguous,
    # full-lane-width slice of length M stacked along sublanes (no reshapes).
    pieces = []
    for kd in range(3):
        for kh in range(3):
            for kw in range(3):
                off = kd * Hp * Wp + kh * Wp + kw
                pieces.append(x_ref[:, pl.ds(off, M)])        # [Cin, M] bf16
    cols = jnp.concatenate(pieces, axis=0)                     # [27*Cin, M]

    # bf16 MXU operands, f32 accumulation.  (conv1 bias intentionally omitted:
    # it is cancelled exactly by the training-mode BN mean subtraction.)
    y = jnp.dot(w_ref[...], cols, preferred_element_type=jnp.float32)  # [Co, M]

    # Per-sample BN partial statistics over valid (non-halo) columns.
    mask = mask_ref[...]                                       # [1, M]
    s1 = jnp.sum(y * mask, axis=1, keepdims=True)              # [Co, 1]
    mean_n = s1 * inv_cnt
    dev = (y - mean_n) * mask
    m2 = jnp.sum(dev * dev, axis=1, keepdims=True)             # [Co, 1]
    stats_ref[...] = jnp.concatenate([s1, m2], axis=1)         # [Co, 2]

    y_ref[...] = y.astype(y_ref.dtype)


# ----------------------------------------------------------------------------
# Kernel 2: BN normalize + ReLU + 1x1x1 conv (+bias) + softmax over channels.
# Operates on lane-dense [Co, M] tiles, one sample per grid step.
# ----------------------------------------------------------------------------
def _bn_relu_pwconv_softmax_kernel(y_ref, scale_ref, shift_ref, w2_ref, b2_ref,
                                   o_ref):
    y = y_ref[...].astype(jnp.float32)                          # [Co, M]
    z = jnp.maximum(y * scale_ref[...] + shift_ref[...], 0.0)   # BN + ReLU

    # 1x1x1 conv: logits[c2, m] = sum_c1 w2[c2, c1] * z[c1, m] + b2[c2]
    logits = jnp.dot(w2_ref[...], z,
                     preferred_element_type=jnp.float32) + b2_ref[...]

    # softmax over the channel (sublane) axis, exact divide
    m = jnp.max(logits, axis=0, keepdims=True)
    e = jnp.exp(logits - m)
    o_ref[...] = (e / jnp.sum(e, axis=0, keepdims=True)).astype(o_ref.dtype)


# ----------------------------------------------------------------------------
# Wrapper
# ----------------------------------------------------------------------------
def _vmem_limit(block_bytes):
    # need-based + headroom; capped well below v7x's 64 MiB physical VMEM.
    need = 2 * block_bytes + (8 << 20)
    return int(min(max(need, 16 << 20), 48 << 20))


def prepare_params(params):
    """Hoist weight reshapes / casts out of the per-call path (done once)."""
    w1 = params["w1"]                                    # [Co, Cin, 3, 3, 3]
    Co, Cin = w1.shape[0], w1.shape[1]
    # [Co, 27*Cin], tap-major (kd, kh, kw, ci) to match the in-kernel stacking.
    w1m = jnp.transpose(w1, (0, 2, 3, 4, 1)).reshape(Co, 27 * Cin)
    return {
        "w1m": w1m.astype(jnp.bfloat16),
        "w2m": params["w2"].reshape(Co, Co).astype(jnp.float32),
        "g1": params["g1"].astype(jnp.float32),
        "be1": params["be1"].astype(jnp.float32),
        "b2": params["b2"].astype(jnp.float32),
        # conv1 bias (params["b1"]) dropped: cancelled by training-mode BN.
    }


@jax.jit
def output_block_forward(x, prep):
    """x: [N, Cin, D, H, W] (NCDHW). Returns softmax probabilities, NCDHW, f32."""
    eps = 1e-5
    N, Cin, D, H, W = x.shape
    w1m = prep["w1m"]
    Co = w1m.shape[0]
    Dp, Hp, Wp = D + 2, H + 2, W + 2
    M = D * Hp * Wp                           # one column per (d, hp, wp)
    max_off = 2 * Hp * Wp + 2 * Wp + 2        # largest 3x3x3 tap offset
    Lflat = ((Dp * Hp * Wp + 2 * Wp + 2 + 127) // 128) * 128
    assert Lflat >= max_off + M

    # Zero-pad the halo, flatten (Dp,Hp,Wp), stage as bf16 for the MXU.
    xp = jnp.pad(x, ((0, 0), (0, 0), (1, 1), (1, 1), (1, 1)))
    x_flat = xp.reshape(N, Cin, Dp * Hp * Wp).astype(jnp.bfloat16)
    x_flat = jnp.pad(x_flat, ((0, 0), (0, 0), (0, Lflat - Dp * Hp * Wp)))

    # Static validity mask for the halo columns carried inside M (constant).
    mi = np.arange(M)
    valid = ((mi % Wp) < W) & (((mi // Wp) % Hp) < H)
    maskf = jnp.asarray(valid.astype(np.float32).reshape(1, M))

    cnt = float(D * H * W)

    # ---------------- pass 1: conv3x3x3 + per-sample BN partial stats --------
    k1 = functools.partial(_conv3x3x3_stats_kernel, Hp=Hp, Wp=Wp, M=M,
                           inv_cnt=1.0 / cnt)
    k1_block_bytes = (Cin * Lflat * 2 + Co * 27 * Cin * 2 + M * 4
                      + Co * M * 2 + 27 * Cin * M * 2 + Co * M * 4)
    y1, stats = pl.pallas_call(
        k1,
        out_shape=(jax.ShapeDtypeStruct((N, Co, M), jnp.bfloat16),
                   jax.ShapeDtypeStruct((N, Co, 2), jnp.float32)),
        grid=(N,),
        in_specs=[
            pl.BlockSpec((None, Cin, Lflat), lambda n: (n, 0, 0)),
            pl.BlockSpec((Co, 27 * Cin), lambda n: (0, 0)),       # resident
            pl.BlockSpec((1, M), lambda n: (0, 0)),               # resident
        ],
        out_specs=(
            pl.BlockSpec((None, Co, M), lambda n: (n, 0, 0)),
            pl.BlockSpec((None, Co, 2), lambda n: (n, 0, 0)),     # per-n partials
        ),
        compiler_params=pltpu.CompilerParams(
            dimension_semantics=("parallel",),     # per-sample partials -> safe
            vmem_limit_bytes=_vmem_limit(k1_block_bytes)),
        cost_estimate=pl.CostEstimate(
            flops=int(2 * N * M * 27 * Cin * Co),
            transcendentals=0,
            bytes_accessed=int(N * Cin * Lflat * 2 + Co * 27 * Cin * 2
                               + M * 4 + N * Co * M * 2 + N * Co * 2 * 4)),
    )(x_flat, w1m, maskf)

    # ------------- finalize BN statistics (Chan/Welford combine) -------------
    sums = stats[:, :, 0]                                    # [N, Co]
    m2s = stats[:, :, 1]                                     # [N, Co]
    total = float(N) * cnt
    mean_n = sums / cnt
    mean = jnp.sum(sums, axis=0) / total                     # [Co]
    m2_tot = jnp.sum(m2s, axis=0) + cnt * jnp.sum(
        (mean_n - mean[None, :]) ** 2, axis=0)
    var = jnp.maximum(m2_tot / total, 0.0)                   # biased variance
    inv = jax.lax.rsqrt(var + eps)
    scale = (prep["g1"] * inv).reshape(Co, 1)
    shift = (prep["be1"] - prep["g1"] * inv * mean).reshape(Co, 1)
    b2c = prep["b2"].reshape(Co, 1)

    # ------------- pass 2: normalize + ReLU + 1x1x1 conv + softmax -----------
    k2_block_bytes = Co * M * 2 + Co * M * 4 + 3 * Co * 4 + Co * Co * 4
    out_flat = pl.pallas_call(
        _bn_relu_pwconv_softmax_kernel,
        out_shape=jax.ShapeDtypeStruct((N, Co, M), jnp.float32),
        grid=(N,),
        in_specs=[
            pl.BlockSpec((None, Co, M), lambda n: (n, 0, 0)),
            pl.BlockSpec((Co, 1), lambda n: (0, 0)),
            pl.BlockSpec((Co, 1), lambda n: (0, 0)),
            pl.BlockSpec((Co, Co), lambda n: (0, 0)),
            pl.BlockSpec((Co, 1), lambda n: (0, 0)),
        ],
        out_specs=pl.BlockSpec((None, Co, M), lambda n: (n, 0, 0)),
        compiler_params=pltpu.CompilerParams(
            dimension_semantics=("parallel",),
            vmem_limit_bytes=_vmem_limit(k2_block_bytes)),
        cost_estimate=pl.CostEstimate(
            flops=int(N * M * (2 * Co * Co + 8 * Co)),
            transcendentals=int(N * M * Co),
            bytes_accessed=int(N * Co * M * (2 + 4))),
    )(y1, scale, shift, prep["w2m"], b2c)

    # [N, Co, D*Hp*Wp] -> [N, Co, D, H, W]: already NCDHW, just strip the halo.
    out = out_flat.reshape(N, Co, D, Hp, Wp)[:, :, :, :H, :W]
    return out


# ----------------------------------------------------------------------------
# Pure-JAX reference (PyTorch OutputBlock semantics, training-mode BN)
# ----------------------------------------------------------------------------
def _ref_output_block(x, p, eps=1e-5):
    hi = jax.lax.Precision.HIGHEST
    y = jax.lax.conv_general_dilated(
        x, p["w1"], window_strides=(1, 1, 1), padding=[(1, 1)] * 3,
        dimension_numbers=("NCDHW", "OIDHW", "NCDHW"), precision=hi)
    y = y + p["b1"].reshape(1, -1, 1, 1, 1)
    mean = jnp.mean(y, axis=(0, 2, 3, 4), keepdims=True)
    var = jnp.mean(jnp.square(y - mean), axis=(0, 2, 3, 4), keepdims=True)
    y = (y - mean) * jax.lax.rsqrt(var + eps)
    y = y * p["g1"].reshape(1, -1, 1, 1, 1) + p["be1"].reshape(1, -1, 1, 1, 1)
    y = jnp.maximum(y, 0.0)
    y = jax.lax.conv_general_dilated(
        y, p["w2"], window_strides=(1, 1, 1), padding=[(0, 0)] * 3,
        dimension_numbers=("NCDHW", "OIDHW", "NCDHW"), precision=hi)
    y = y + p["b2"].reshape(1, -1, 1, 1, 1)
    return jax.nn.softmax(y, axis=1)


# ----------------------------------------------------------------------------
if __name__ == "__main__":
    key = jax.random.PRNGKey(0)
    N, Cin, Co, D, H, W = 2, 8, 4, 8, 16, 16        # in_channels=8, out_channels=4

    ks = jax.random.split(key, 8)
    params = {
        "w1": 0.2 * jax.random.normal(ks[0], (Co, Cin, 3, 3, 3), jnp.float32),
        "b1": 0.1 * jax.random.normal(ks[1], (Co,), jnp.float32),
        "g1": 1.0 + 0.1 * jax.random.normal(ks[2], (Co,), jnp.float32),
        "be1": 0.1 * jax.random.normal(ks[3], (Co,), jnp.float32),
        "w2": 0.3 * jax.random.normal(ks[4], (Co, Co, 1, 1, 1), jnp.float32),
        "b2": 0.1 * jax.random.normal(ks[5], (Co,), jnp.float32),
    }
    x = jax.random.normal(ks[6], (N, Cin, D, H, W), jnp.float32)

    prep = prepare_params(params)                   # weight prep hoisted out of jit path
    out = jax.block_until_ready(output_block_forward(x, prep))
    assert out.shape == (N, Co, D, H, W)

    # silent correctness checks (bf16 MXU operands -> relaxed tolerance vs f32 ref)
    ref = jax.block_until_ready(_ref_output_block(x, params))
    max_err = float(jnp.max(jnp.abs(out - ref)))
    assert jnp.allclose(out, ref, atol=1e-2, rtol=1e-2), max_err
    assert jnp.allclose(jnp.sum(out, axis=1), 1.0, atol=1e-4), "softmax sums"

    print("KERNEL_OK")
</pallas_src>

<mosaic_0001>
module attributes {stable_mosaic.version = 11 : i64} {
  func.func @_conv3x3x3_stats_kernel(%arg0: i32, %arg1: memref<1x8x3328xbf16, #tpu.memory_space<vmem>>, %arg2: memref<4x216xbf16, #tpu.memory_space<vmem>>, %arg3: memref<1x2592xf32, #tpu.memory_space<vmem>>, %arg4: memref<1x4x2592xbf16, #tpu.memory_space<vmem>>, %arg5: memref<1x4x2xf32, #tpu.memory_space<vmem>>) attributes {dimension_semantics = [#tpu.dimension_semantics<parallel>], iteration_bounds = array<i64: 2>, scalar_prefetch = 0 : i64, scratch_operands = 0 : i64, tpu.core_type = #tpu.core_type<tc>, window_params = [{transform_indices = @transform_0, window_bounds = array<i64: 1, 8, 3328>}, {pipeline_mode = #tpu.pipeline_mode<synchronous>, transform_indices = @transform_1, window_bounds = array<i64: 4, 216>}, {pipeline_mode = #tpu.pipeline_mode<synchronous>, transform_indices = @transform_2, window_bounds = array<i64: 1, 2592>}, {transform_indices = @transform_3, window_bounds = array<i64: 1, 4, 2592>}, {transform_indices = @transform_4, window_bounds = array<i64: 1, 4, 2>}]} {
    %c0 = arith.constant 0 : index
    %c0_0 = arith.constant 0 : index
    %c0_1 = arith.constant 0 : index
    %0 = vector.load %arg1[%c0, %c0_0, %c0_1] : memref<1x8x3328xbf16, #tpu.memory_space<vmem>>, vector<1x8x2592xbf16>
    %1 = vector.shape_cast %0 : vector<1x8x2592xbf16> to vector<8x2592xbf16>
    %c0_2 = arith.constant 0 : index
    %c0_3 = arith.constant 0 : index
    %c1 = arith.constant 1 : index
    %2 = vector.load %arg1[%c0_2, %c0_3, %c1] : memref<1x8x3328xbf16, #tpu.memory_space<vmem>>, vector<1x8x2592xbf16>
    %3 = vector.shape_cast %2 : vector<1x8x2592xbf16> to vector<8x2592xbf16>
    %c0_4 = arith.constant 0 : index
    %c0_5 = arith.constant 0 : index
    %c2 = arith.constant 2 : index
    %4 = vector.load %arg1[%c0_4, %c0_5, %c2] : memref<1x8x3328xbf16, #tpu.memory_space<vmem>>, vector<1x8x2592xbf16>
    %5 = vector.shape_cast %4 : vector<1x8x2592xbf16> to vector<8x2592xbf16>
    %c0_6 = arith.constant 0 : index
    %c0_7 = arith.constant 0 : index
    %c18 = arith.constant 18 : index
    %6 = vector.load %arg1[%c0_6, %c0_7, %c18] : memref<1x8x3328xbf16, #tpu.memory_space<vmem>>, vector<1x8x2592xbf16>
    %7 = vector.shape_cast %6 : vector<1x8x2592xbf16> to vector<8x2592xbf16>
    %c0_8 = arith.constant 0 : index
    %c0_9 = arith.constant 0 : index
    %c19 = arith.constant 19 : index
    %8 = vector.load %arg1[%c0_8, %c0_9, %c19] : memref<1x8x3328xbf16, #tpu.memory_space<vmem>>, vector<1x8x2592xbf16>
    %9 = vector.shape_cast %8 : vector<1x8x2592xbf16> to vector<8x2592xbf16>
    %c0_10 = arith.constant 0 : index
    %c0_11 = arith.constant 0 : index
    %c20 = arith.constant 20 : index
    %10 = vector.load %arg1[%c0_10, %c0_11, %c20] : memref<1x8x3328xbf16, #tpu.memory_space<vmem>>, vector<1x8x2592xbf16>
    %11 = vector.shape_cast %10 : vector<1x8x2592xbf16> to vector<8x2592xbf16>
    %c0_12 = arith.constant 0 : index
    %c0_13 = arith.constant 0 : index
    %c36 = arith.constant 36 : index
    %12 = vector.load %arg1[%c0_12, %c0_13, %c36] : memref<1x8x3328xbf16, #tpu.memory_space<vmem>>, vector<1x8x2592xbf16>
    %13 = vector.shape_cast %12 : vector<1x8x2592xbf16> to vector<8x2592xbf16>
    %c0_14 = arith.constant 0 : index
    %c0_15 = arith.constant 0 : index
    %c37 = arith.constant 37 : index
    %14 = vector.load %arg1[%c0_14, %c0_15, %c37] : memref<1x8x3328xbf16, #tpu.memory_space<vmem>>, vector<1x8x2592xbf16>
    %15 = vector.shape_cast %14 : vector<1x8x2592xbf16> to vector<8x2592xbf16>
    %c0_16 = arith.constant 0 : index
    %c0_17 = arith.constant 0 : index
    %c38 = arith.constant 38 : index
    %16 = vector.load %arg1[%c0_16, %c0_17, %c38] : memref<1x8x3328xbf16, #tpu.memory_space<vmem>>, vector<1x8x2592xbf16>
    %17 = vector.shape_cast %16 : vector<1x8x2592xbf16> to vector<8x2592xbf16>
    %c0_18 = arith.constant 0 : index
    %c0_19 = arith.constant 0 : index
    %c324 = arith.constant 324 : index
    %18 = vector.load %arg1[%c0_18, %c0_19, %c324] : memref<1x8x3328xbf16, #tpu.memory_space<vmem>>, vector<1x8x2592xbf16>
    %19 = vector.shape_cast %18 : vector<1x8x2592xbf16> to vector<8x2592xbf16>
    %c0_20 = arith.constant 0 : index
    %c0_21 = arith.constant 0 : index
    %c325 = arith.constant 325 : index
    %20 = vector.load %arg1[%c0_20, %c0_21, %c325] : memref<1x8x3328xbf16, #tpu.memory_space<vmem>>, vector<1x8x2592xbf16>
    %21 = vector.shape_cast %20 : vector<1x8x2592xbf16> to vector<8x2592xbf16>
    %c0_22 = arith.constant 0 : index
    %c0_23 = arith.constant 0 : index
    %c326 = arith.constant 326 : index
    %22 = vector.load %arg1[%c0_22, %c0_23, %c326] : memref<1x8x3328xbf16, #tpu.memory_space<vmem>>, vector<1x8x2592xbf16>
    %23 = vector.shape_cast %22 : vector<1x8x2592xbf16> to vector<8x2592xbf16>
    %c0_24 = arith.constant 0 : index
    %c0_25 = arith.constant 0 : index
    %c342 = arith.constant 342 : index
    %24 = vector.load %arg1[%c0_24, %c0_25, %c342] : memref<1x8x3328xbf16, #tpu.memory_space<vmem>>, vector<1x8x2592xbf16>
    %25 = vector.shape_cast %24 : vector<1x8x2592xbf16> to vector<8x2592xbf16>
    %c0_26 = arith.constant 0 : index
    %c0_27 = arith.constant 0 : index
    %c343 = arith.constant 343 : index
    %26 = vector.load %arg1[%c0_26, %c0_27, %c343] : memref<1x8x3328xbf16, #tpu.memory_space<vmem>>, vector<1x8x2592xbf16>
    %27 = vector.shape_cast %26 : vector<1x8x2592xbf16> to vector<8x2592xbf16>
    %c0_28 = arith.constant 0 : index
    %c0_29 = arith.constant 0 : index
    %c344 = arith.constant 344 : index
    %28 = vector.load %arg1[%c0_28, %c0_29, %c344] : memref<1x8x3328xbf16, #tpu.memory_space<vmem>>, vector<1x8x2592xbf16>
    %29 = vector.shape_cast %28 : vector<1x8x2592xbf16> to vector<8x2592xbf16>
    %c0_30 = arith.constant 0 : index
    %c0_31 = arith.constant 0 : index
    %c360 = arith.constant 360 : index
    %30 = vector.load %arg1[%c0_30, %c0_31, %c360] : memref<1x8x3328xbf16, #tpu.memory_space<vmem>>, vector<1x8x2592xbf16>
    %31 = vector.shape_cast %30 : vector<1x8x2592xbf16> to vector<8x2592xbf16>
    %c0_32 = arith.constant 0 : index
    %c0_33 = arith.constant 0 : index
    %c361 = arith.constant 361 : index
    %32 = vector.load %arg1[%c0_32, %c0_33, %c361] : memref<1x8x3328xbf16, #tpu.memory_space<vmem>>, vector<1x8x2592xbf16>
    %33 = vector.shape_cast %32 : vector<1x8x2592xbf16> to vector<8x2592xbf16>
    %c0_34 = arith.constant 0 : index
    %c0_35 = arith.constant 0 : index
    %c362 = arith.constant 362 : index
    %34 = vector.load %arg1[%c0_34, %c0_35, %c362] : memref<1x8x3328xbf16, #tpu.memory_space<vmem>>, vector<1x8x2592xbf16>
    %35 = vector.shape_cast %34 : vector<1x8x2592xbf16> to vector<8x2592xbf16>
    %c0_36 = arith.constant 0 : index
    %c0_37 = arith.constant 0 : index
    %c648 = arith.constant 648 : index
    %36 = vector.load %arg1[%c0_36, %c0_37, %c648] : memref<1x8x3328xbf16, #tpu.memory_space<vmem>>, vector<1x8x2592xbf16>
    %37 = vector.shape_cast %36 : vector<1x8x2592xbf16> to vector<8x2592xbf16>
    %c0_38 = arith.constant 0 : index
    %c0_39 = arith.constant 0 : index
    %c649 = arith.constant 649 : index
    %38 = vector.load %arg1[%c0_38, %c0_39, %c649] : memref<1x8x3328xbf16, #tpu.memory_space<vmem>>, vector<1x8x2592xbf16>
    %39 = vector.shape_cast %38 : vector<1x8x2592xbf16> to vector<8x2592xbf16>
    %c0_40 = arith.constant 0 : index
    %c0_41 = arith.constant 0 : index
    %c650 = arith.constant 650 : index
    %40 = vector.load %arg1[%c0_40, %c0_41, %c650] : memref<1x8x3328xbf16, #tpu.memory_space<vmem>>, vector<1x8x2592xbf16>
    %41 = vector.shape_cast %40 : vector<1x8x2592xbf16> to vector<8x2592xbf16>
    %c0_42 = arith.constant 0 : index
    %c0_43 = arith.constant 0 : index
    %c666 = arith.constant 666 : index
    %42 = vector.load %arg1[%c0_42, %c0_43, %c666] : memref<1x8x3328xbf16, #tpu.memory_space<vmem>>, vector<1x8x2592xbf16>
    %43 = vector.shape_cast %42 : vector<1x8x2592xbf16> to vector<8x2592xbf16>
    %c0_44 = arith.constant 0 : index
    %c0_45 = arith.constant 0 : index
    %c667 = arith.constant 667 : index
    %44 = vector.load %arg1[%c0_44, %c0_45, %c667] : memref<1x8x3328xbf16, #tpu.memory_space<vmem>>, vector<1x8x2592xbf16>
    %45 = vector.shape_cast %44 : vector<1x8x2592xbf16> to vector<8x2592xbf16>
    %c0_46 = arith.constant 0 : index
    %c0_47 = arith.constant 0 : index
    %c668 = arith.constant 668 : index
    %46 = vector.load %arg1[%c0_46, %c0_47, %c668] : memref<1x8x3328xbf16, #tpu.memory_space<vmem>>, vector<1x8x2592xbf16>
    %47 = vector.shape_cast %46 : vector<1x8x2592xbf16> to vector<8x2592xbf16>
    %c0_48 = arith.constant 0 : index
    %c0_49 = arith.constant 0 : index
    %c684 = arith.constant 684 : index
    %48 = vector.load %arg1[%c0_48, %c0_49, %c684] : memref<1x8x3328xbf16, #tpu.memory_space<vmem>>, vector<1x8x2592xbf16>
    %49 = vector.shape_cast %48 : vector<1x8x2592xbf16> to vector<8x2592xbf16>
    %c0_50 = arith.constant 0 : index
    %c0_51 = arith.constant 0 : index
    %c685 = arith.constant 685 : index
    %50 = vector.load %arg1[%c0_50, %c0_51, %c685] : memref<1x8x3328xbf16, #tpu.memory_space<vmem>>, vector<1x8x2592xbf16>
    %51 = vector.shape_cast %50 : vector<1x8x2592xbf16> to vector<8x2592xbf16>
    %c0_52 = arith.constant 0 : index
    %c0_53 = arith.constant 0 : index
    %c686 = arith.constant 686 : index
    %52 = vector.load %arg1[%c0_52, %c0_53, %c686] : memref<1x8x3328xbf16, #tpu.memory_space<vmem>>, vector<1x8x2592xbf16>
    %53 = vector.shape_cast %52 : vector<1x8x2592xbf16> to vector<8x2592xbf16>
    %54 = tpu.concatenate %1, %3, %5, %7, %9, %11, %13, %15, %17, %19, %21, %23, %25, %27, %29, %31 in 0 : vector<8x2592xbf16>, vector<8x2592xbf16>, vector<8x2592xbf16>, vector<8x2592xbf16>, vector<8x2592xbf16>, vector<8x2592xbf16>, vector<8x2592xbf16>, vector<8x2592xbf16>, vector<8x2592xbf16>, vector<8x2592xbf16>, vector<8x2592xbf16>, vector<8x2592xbf16>, vector<8x2592xbf16>, vector<8x2592xbf16>, vector<8x2592xbf16>, vector<8x2592xbf16> -> vector<128x2592xbf16>
    %55 = tpu.concatenate %33, %35, %37, %39, %41, %43, %45, %47, %49, %51, %53 in 0 : vector<8x2592xbf16>, vector<8x2592xbf16>, vector<8x2592xbf16>, vector<8x2592xbf16>, vector<8x2592xbf16>, vector<8x2592xbf16>, vector<8x2592xbf16>, vector<8x2592xbf16>, vector<8x2592xbf16>, vector<8x2592xbf16>, vector<8x2592xbf16> -> vector<88x2592xbf16>
    %56 = tpu.concatenate %54, %55 in 0 : vector<128x2592xbf16>, vector<88x2592xbf16> -> vector<216x2592xbf16>
    %c0_54 = arith.constant 0 : index
    %c0_55 = arith.constant 0 : index
    %57 = vector.load %arg2[%c0_54, %c0_55] : memref<4x216xbf16, #tpu.memory_space<vmem>>, vector<4x216xbf16>
    %cst = arith.constant dense<0.000000e+00> : vector<4x2592xf32>
    %58 = tpu.matmul %57, %56, %cst {dimension_numbers = #tpu.dot_dimension_numbers<[1], [0], [0], [1], [0, 0, 1, 1], [], []>} : vector<4x216xbf16>, vector<216x2592xbf16>, vector<4x2592xf32> -> vector<4x2592xf32>
    %c0_56 = arith.constant 0 : index
    %c0_57 = arith.constant 0 : index
    %59 = vector.load %arg3[%c0_56, %c0_57] : memref<1x2592xf32, #tpu.memory_space<vmem>>, vector<1x2592xf32>
    %60 = vector.broadcast %59 : vector<1x2592xf32> to vector<4x2592xf32>
    %61 = arith.mulf %58, %60 : vector<4x2592xf32>
    %cst_58 = arith.constant dense<0.000000e+00> : vector<4xf32>
    %62 = vector.multi_reduction <add>, %61, %cst_58 [1] : vector<4x2592xf32> to vector<4xf32>
    %63 = vector.shape_cast %62 : vector<4xf32> to vector<4x1xf32>
    %cst_59 = arith.constant 4.8828125E-4 : f32
    %64 = vector.broadcast %cst_59 : f32 to vector<4x1xf32>
    %65 = arith.mulf %63, %64 : vector<4x1xf32>
    %66 = vector.broadcast %65 : vector<4x1xf32> to vector<4x2592xf32>
    %67 = arith.subf %58, %66 : vector<4x2592xf32>
    %68 = vector.broadcast %59 : vector<1x2592xf32> to vector<4x2592xf32>
    %69 = arith.mulf %67, %68 : vector<4x2592xf32>
    %70 = arith.mulf %69, %69 : vector<4x2592xf32>
    %cst_60 = arith.constant dense<0.000000e+00> : vector<4xf32>
    %71 = vector.multi_reduction <add>, %70, %cst_60 [1] : vector<4x2592xf32> to vector<4xf32>
    %72 = vector.shape_cast %71 : vector<4xf32> to vector<4x1xf32>
    %73 = tpu.concatenate %63, %72 in 1 : vector<4x1xf32>, vector<4x1xf32> -> vector<4x2xf32>
    %c0_61 = arith.constant 0 : index
    %c0_62 = arith.constant 0 : index
    %c0_63 = arith.constant 0 : index
    %74 = vector.load %arg5[%c0_61, %c0_62, %c0_63] : memref<1x4x2xf32, #tpu.memory_space<vmem>>, vector<1x4x2xf32>
    %75 = vector.shape_cast %74 : vector<1x4x2xf32> to vector<4x2xf32>
    %76 = vector.shape_cast %73 : vector<4x2xf32> to vector<1x4x2xf32>
    tpu.vector_store %arg5[%c0_61, %c0_62, %c0_63], %76 {strides = array<i32>} : memref<1x4x2xf32, #tpu.memory_space<vmem>>, vector<1x4x2xf32>,
    %77 = arith.truncf %58 : vector<4x2592xf32> to vector<4x2592xbf16>
    %c0_64 = arith.constant 0 : index
    %c0_65 = arith.constant 0 : index
    %c0_66 = arith.constant 0 : index
    %78 = vector.load %arg4[%c0_64, %c0_65, %c0_66] : memref<1x4x2592xbf16, #tpu.memory_space<vmem>>, vector<1x4x2592xbf16>
    %79 = vector.shape_cast %78 : vector<1x4x2592xbf16> to vector<4x2592xbf16>
    %80 = vector.shape_cast %77 : vector<4x2592xbf16> to vector<1x4x2592xbf16>
    tpu.vector_store %arg4[%c0_64, %c0_65, %c0_66], %80 {strides = array<i32>} : memref<1x4x2592xbf16, #tpu.memory_space<vmem>>, vector<1x4x2592xbf16>,
    return
  }
  func.func @transform_0(%arg0: i32) -> (i32, i32, i32) {
    %c0_i32 = arith.constant 0 : i32
    %c0_i32_0 = arith.constant 0 : i32
    %c0_i32_1 = arith.constant 0 : i32
    return %arg0, %c0_i32, %c0_i32_0 : i32, i32, i32
  }
  func.func @transform_1(%arg0: i32) -> (i32, i32) {
    %c0_i32 = arith.constant 0 : i32
    %c0_i32_0 = arith.constant 0 : i32
    %c0_i32_1 = arith.constant 0 : i32
    return %c0_i32, %c0_i32_0 : i32, i32
  }
  func.func @transform_2(%arg0: i32) -> (i32, i32) {
    %c0_i32 = arith.constant 0 : i32
    %c0_i32_0 = arith.constant 0 : i32
    %c0_i32_1 = arith.constant 0 : i32
    return %c0_i32, %c0_i32_0 : i32, i32
  }
  func.func @transform_3(%arg0: i32) -> (i32, i32, i32) {
    %c0_i32 = arith.constant 0 : i32
    %c0_i32_0 = arith.constant 0 : i32
    %c0_i32_1 = arith.constant 0 : i32
    return %arg0, %c0_i32, %c0_i32_0 : i32, i32, i32
  }
  func.func @transform_4(%arg0: i32) -> (i32, i32, i32) {
    %c0_i32 = arith.constant 0 : i32
    %c0_i32_0 = arith.constant 0 : i32
    %c0_i32_1 = arith.constant 0 : i32
    return %arg0, %c0_i32, %c0_i32_0 : i32, i32, i32
  }
}

module attributes {stable_mosaic.version = 11 : i64} {
  func.func @_bn_relu_pwconv_softmax_kernel(%arg0: i32, %arg1: memref<1x4x2592xbf16, #tpu.memory_space<vmem>>, %arg2: memref<4x1xf32, #tpu.memory_space<vmem>>, %arg3: memref<4x1xf32, #tpu.memory_space<vmem>>, %arg4: memref<4x4xf32, #tpu.memory_space<vmem>>, %arg5: memref<4x1xf32, #tpu.memory_space<vmem>>, %arg6: memref<1x4x2592xf32, #tpu.memory_space<vmem>>) attributes {dimension_semantics = [#tpu.dimension_semantics<parallel>], iteration_bounds = array<i64: 2>, scalar_prefetch = 0 : i64, scratch_operands = 0 : i64, tpu.core_type = #tpu.core_type<tc>, window_params = [{transform_indices = @transform_0, window_bounds = array<i64: 1, 4, 2592>}, {pipeline_mode = #tpu.pipeline_mode<synchronous>, transform_indices = @transform_1, window_bounds = array<i64: 4, 1>}, {pipeline_mode = #tpu.pipeline_mode<synchronous>, transform_indices = @transform_2, window_bounds = array<i64: 4, 1>}, {pipeline_mode = #tpu.pipeline_mode<synchronous>, transform_indices = @transform_3, window_bounds = array<i64: 4, 4>}, {pipeline_mode = #tpu.pipeline_mode<synchronous>, transform_indices = @transform_4, window_bounds = array<i64: 4, 1>}, {transform_indices = @transform_5, window_bounds = array<i64: 1, 4, 2592>}]} {
    %c0 = arith.constant 0 : index
    %c0_0 = arith.constant 0 : index
    %c0_1 = arith.constant 0 : index
    %0 = vector.load %arg1[%c0, %c0_0, %c0_1] : memref<1x4x2592xbf16, #tpu.memory_space<vmem>>, vector<1x4x2592xbf16>
    %1 = vector.shape_cast %0 : vector<1x4x2592xbf16> to vector<4x2592xbf16>
    %2 = arith.extf %1 : vector<4x2592xbf16> to vector<4x2592xf32>
    %c0_2 = arith.constant 0 : index
    %c0_3 = arith.constant 0 : index
    %3 = vector.load %arg2[%c0_2, %c0_3] : memref<4x1xf32, #tpu.memory_space<vmem>>, vector<4x1xf32>
    %4 = vector.broadcast %3 : vector<4x1xf32> to vector<4x2592xf32>
    %5 = arith.mulf %2, %4 : vector<4x2592xf32>
    %c0_4 = arith.constant 0 : index
    %c0_5 = arith.constant 0 : index
    %6 = vector.load %arg3[%c0_4, %c0_5] : memref<4x1xf32, #tpu.memory_space<vmem>>, vector<4x1xf32>
    %7 = vector.broadcast %6 : vector<4x1xf32> to vector<4x2592xf32>
    %8 = arith.addf %5, %7 : vector<4x2592xf32>
    %cst = arith.constant 0.000000e+00 : f32
    %9 = vector.broadcast %cst : f32 to vector<4x2592xf32>
    %10 = arith.maximumf %8, %9 : vector<4x2592xf32>
    %c0_6 = arith.constant 0 : index
    %c0_7 = arith.constant 0 : index
    %11 = vector.load %arg4[%c0_6, %c0_7] : memref<4x4xf32, #tpu.memory_space<vmem>>, vector<4x4xf32>
    %cst_8 = arith.constant dense<0.000000e+00> : vector<4x2592xf32>
    %12 = tpu.matmul %11, %10, %cst_8 {dimension_numbers = #tpu.dot_dimension_numbers<[1], [0], [0], [1], [0, 0, 1, 1], [], []>} : vector<4x4xf32>, vector<4x2592xf32>, vector<4x2592xf32> -> vector<4x2592xf32>
    %c0_9 = arith.constant 0 : index
    %c0_10 = arith.constant 0 : index
    %13 = vector.load %arg5[%c0_9, %c0_10] : memref<4x1xf32, #tpu.memory_space<vmem>>, vector<4x1xf32>
    %14 = vector.broadcast %13 : vector<4x1xf32> to vector<4x2592xf32>
    %15 = arith.addf %12, %14 : vector<4x2592xf32>
    %cst_11 = arith.constant dense<0xFF800000> : vector<2592xf32>
    %16 = vector.multi_reduction <maximumf>, %15, %cst_11 [0] : vector<4x2592xf32> to vector<2592xf32>
    %17 = vector.shape_cast %16 : vector<2592xf32> to vector<1x2592xf32>
    %18 = vector.broadcast %17 : vector<1x2592xf32> to vector<4x2592xf32>
    %19 = arith.subf %15, %18 : vector<4x2592xf32>
    %20 = math.exp %19 : vector<4x2592xf32>
    %cst_12 = arith.constant dense<0.000000e+00> : vector<2592xf32>
    %21 = vector.multi_reduction <add>, %20, %cst_12 [0] : vector<4x2592xf32> to vector<2592xf32>
    %22 = vector.shape_cast %21 : vector<2592xf32> to vector<1x2592xf32>
    %23 = vector.broadcast %22 : vector<1x2592xf32> to vector<4x2592xf32>
    %24 = arith.divf %20, %23 : vector<4x2592xf32>
    %c0_13 = arith.constant 0 : index
    %c0_14 = arith.constant 0 : index
    %c0_15 = arith.constant 0 : index
    %25 = vector.load %arg6[%c0_13, %c0_14, %c0_15] : memref<1x4x2592xf32, #tpu.memory_space<vmem>>, vector<1x4x2592xf32>
    %26 = vector.shape_cast %25 : vector<1x4x2592xf32> to vector<4x2592xf32>
    %27 = vector.shape_cast %24 : vector<4x2592xf32> to vector<1x4x2592xf32>
    tpu.vector_store %arg6[%c0_13, %c0_14, %c0_15], %27 {strides = array<i32>} : memref<1x4x2592xf32, #tpu.memory_space<vmem>>, vector<1x4x2592xf32>,
    return
  }
  func.func @transform_0(%arg0: i32) -> (i32, i32, i32) {
    %c0_i32 = arith.constant 0 : i32
    %c0_i32_0 = arith.constant 0 : i32
    %c0_i32_1 = arith.constant 0 : i32
    return %arg0, %c0_i32, %c0_i32_0 : i32, i32, i32
  }
  func.func @transform_1(%arg0: i32) -> (i32, i32) {
    %c0_i32 = arith.constant 0 : i32
    %c0_i32_0 = arith.constant 0 : i32
    %c0_i32_1 = arith.constant 0 : i32
    return %c0_i32, %c0_i32_0 : i32, i32
  }
  func.func @transform_2(%arg0: i32) -> (i32, i32) {
    %c0_i32 = arith.constant 0 : i32
    %c0_i32_0 = arith.constant 0 : i32
    %c0_i32_1 = arith.constant 0 : i32
    return %c0_i32, %c0_i32_0 : i32, i32
  }
  func.func @transform_3(%arg0: i32) -> (i32, i32) {
    %c0_i32 = arith.constant 0 : i32
    %c0_i32_0 = arith.constant 0 : i32
    %c0_i32_1 = arith.constant 0 : i32
    return %c0_i32, %c0_i32_0 : i32, i32
  }
  func.func @transform_4(%arg0: i32) -> (i32, i32) {
    %c0_i32 = arith.constant 0 : i32
    %c0_i32_0 = arith.constant 0 : i32
    %c0_i32_1 = arith.constant 0 : i32
    return %c0_i32, %c0_i32_0 : i32, i32
  }
  func.func @transform_5(%arg0: i32) -> (i32, i32, i32) {
    %c0_i32 = arith.constant 0 : i32
    %c0_i32_0 = arith.constant 0 : i32
    %c0_i32_1 = arith.constant 0 : i32
    return %arg0, %c0_i32, %c0_i32_0 : i32, i32, i32
  }
}

</mosaic_0001>

<bundles_post_ra>
// kernel: output_block_forward.3
= control target key start
LH: loop header
LB: loop body
LE: loop exit
PB: predicated region body
PF: predicated region fallthrough
CT: control target
= control target key end

     0   :  { %s1793_s18 = smov 0   ;;  %s2483_s0 = inlined_call_operand.vmem [shape: bf16[2,4,2592], index: 0, kind: input, shape index: {}]   ;;  %s2484_s1 = inlined_call_operand.vmem [shape: f32[4,1], index: 1, kind: input, shape index: {}]   ;;  %s2485_s2 = inlined_call_operand.vmem [shape: f32[4,1], index: 2, kind: input, shape index: {}]   ;;  %s2486_s3 = inlined_call_operand.vmem [shape: f32[4,4], index: 3, kind: input, shape index: {}]   ;;  %s2487_s4 = inlined_call_operand.vmem [shape: f32[4,1], index: 4, kind: input, shape index: {}]   ;;  %s2488_s5 = inlined_call_operand.vmem [shape: f32[2,4,2592], index: 5, kind: output, shape index: {}]  }
   0x1 LB: > { %s1604_s19 = sadd.s32 4294967295, %s1759_s18   ;;  %p1608_p0 = scmp.ge.s32.totalorder %s1759_s18, 1  ;;  %s1759_s18 = sphi %s1793_s18, %s15_s18  }
   0x2   : > { %p187_p1 = scmp.lt.s32.totalorder %s1759_s18, 3 }
   0x4   : > { %p188_p2 = pnand %p1608_p0, %p187_p1 }
   0x5   : > { %p215_p3 = scmp.lt.s32.totalorder (!%p188_p2), %s1604_s19, 1 }
   0x6   : > { %191 = sbr.rel (%p188_p2) target bundleno = 477 (0x1dd), region = 40 }
   0xb   : > { %v242_v0 = vld [vmem:[%s2484_s1] sm:$0xf]  ;;  %v1761_v1 = vmov 0   ;;  %s2524_s19 = smov (!%p215_p3, %s1604_s19), 1  ;;  %v1762_v3 = vmov 839922192  }
   0xc   : > { %1667 = vset.pattern.permute.xlu0 %v1761_v1  ;;  %1668 = vset.pattern.permute.xlu1 %v1761_v1  ;;  %v263_v2 = vld [vmem:[%s2485_s2] sm:$0xf]  ;;  %s1655_s24 = smul.u32 42, %s2524_s19  ;;  %v248_v4 = vunpack.c.l.s4 %v1762_v3  ;;  %vm352_vm0 = vcmask 1043456   ;;  %vm348_vm1 = vcmask 31744  }
   0xd   : > { %245 = vperm.xlu0 %1667, %v242_v0   ;;  %v296_v12 = vld [vmem:[%s2487_s4] sm:$0xf]  ;;  %s1656_s7 = smul.u32 84, %s2524_s19 }
   0xe   : > { %s1813_s27 = scalar_lea.vmem %s2483_s0, %s1655_s24  ;;  %v249_v6 = vunpack.c.0.s8 %v248_v4  ;;  %299 = vperm.xlu1 %1668, %v296_v12   ;;  %v1846_v47 = vld [vmem:[%s2486_s3] sm:$0xf] }
   0xf   : > { %v225_v7 = vld [vmem:[%s1813_s27] sm:$0xff]  ;;  %v226_v8 = vld [vmem:[%s1813_s27 + $0x8] sm:$0xff]  ;;  %v227_v16 = vld [vmem:[%s1813_s27 + $0x10] sm:$0xff]  ;;  %s2081_s10 = scalar_lea.vmem %s2488_s5, %s1656_s7 }
  0x10   : > { %v231_v10 = vunpack.c.l.bf16 %v225_v7  ;;  %v232_v11 = vunpack.c.h.bf16 %v225_v7  ;;  %v233_v13 = vunpack.c.l.bf16 %v226_v8  ;;  %v234_v14 = vunpack.c.h.bf16 %v226_v8  ;;  %v228_v21 = vld [vmem:[%s1813_s27 + $0x18] sm:$0xff]  ;;  %v229_v37 = vld [vmem:[%s1813_s27 + $0x20] sm:$0xff]  ;;  %v230_v44 = vld [vmem:[%s1813_s27 + $0x28] sm:$0x3] }
  0x11   : > { %v235_v24 = vunpack.c.l.bf16 %v227_v16  ;;  %v236_v26 = vunpack.c.h.bf16 %v227_v16  ;;  %v237_v31 = vunpack.c.l.bf16 %v228_v21  ;;  %v238_v36 = vunpack.c.h.bf16 %v228_v21 }
  0x12   : > { %v239_v42 = vunpack.c.l.bf16 %v229_v37  ;;  %v240_v48 = vunpack.c.h.bf16 %v229_v37  ;;  %v241_v55 = vunpack.c.l.bf16 %v230_v44 }
  0x15   : > { %266 = vperm.xlu0 %1667, %v263_v2  }
  0x7f   : > { %v246_v5 = vpop.permute.xlu0 %245 }
  0x80   : > { %v1817_v9 = vperm.slane %v246_v5, %v249_v6 }
  0x82   : > { %v252_v18 = vmul.f32 %v1817_v9, %v231_v10  ;;  %v253_v19 = vmul.f32 %v1817_v9, %v232_v11  ;;  %v254_v20 = vmul.f32 %v1817_v9, %v233_v13  ;;  %v255_v22 = vmul.f32 %v1817_v9, %v234_v14 }
  0x83   : > { %v256_v34 = vmul.f32 %v1817_v9, %v235_v24  ;;  %v257_v35 = vmul.f32 %v1817_v9, %v236_v26  ;;  %v258_v40 = vmul.f32 %v1817_v9, %v237_v31  ;;  %v259_v43 = vmul.f32 %v1817_v9, %v238_v36 }
  0x84   : > { %v260_v54 = vmul.f32 %v1817_v9, %v239_v42  ;;  %v261_v60 = vmul.f32 %v1817_v9, %v240_v48  ;;  %v262_v1 = vmul.f32 %v1817_v9, %v241_v55 }
  0x87   : > { %v267_v15 = vpop.permute.xlu0 %266 }
  0x88   : > { %v1823_v17 = vperm.slane %v267_v15, %v249_v6 }
  0x8a   : > { %v273_v23 = vadd.f32 %v1823_v17, %v252_v18  ;;  %v274_v25 = vadd.f32 %v1823_v17, %v253_v19  ;;  %v275_v27 = vadd.f32 %v1823_v17, %v254_v20  ;;  %v276_v28 = vadd.f32 %v1823_v17, %v255_v22  ;;  %v1918_v19 = vpop.permute.xlu1 %299 }
  0x8b   : > { %v277_v38 = vadd.f32 %v1823_v17, %v256_v34  ;;  %v278_v39 = vadd.f32 %v1823_v17, %v257_v35  ;;  %v279_v41 = vadd.f32 %v1823_v17, %v258_v40  ;;  %v280_v51 = vadd.f32 %v1823_v17, %v259_v43 }
  0x8c   : > { %v284_v29 = vmax.f32 %v273_v23, 0.0  ;;  %v285_v30 = vmax.f32 %v274_v25, 0.0  ;;  %v286_v32 = vmax.f32 %v275_v27, 0.0  ;;  %v287_v33 = vmax.f32 %v276_v28, 0.0 }
  0x8d   : > { %v288_v45 = vmax.f32 %v277_v38, 0.0  ;;  %v289_v46 = vmax.f32 %v278_v39, 0.0  ;;  %v290_v53 = vmax.f32 %v279_v41, 0.0  ;;  %v281_v59 = vadd.f32 %v1823_v17, %v260_v54 }
  0x8e   : > { %313 = vst [vmem:[#allocation1] ss:$2 sm:$0xff] %v284_v29  ;;  %v291_v62 = vmax.f32 %v280_v51, 0.0  ;;  %v282_v0 = vadd.f32 %v1823_v17, %v261_v60  ;;  %v283_v3 = vadd.f32 %v1823_v17, %v262_v1 }
  0x8f   : > { %315 = vst [vmem:[#allocation1 + $0x10] ss:$2 sm:$0xff] %v285_v30  ;;  %v292_v2 = vmax.f32 %v281_v59, 0.0 }
  0x90   : > { %317 = vst [vmem:[#allocation1 + $0x20] ss:$2 sm:$0xff] %v286_v32  ;;  %v293_v6 = vmax.f32 %v282_v0, 0.0  ;;  %v294_v10 = vmax.f32 %v283_v3, 0.0 }
  0x91   : > { %319 = vst [vmem:[#allocation1 + $0x30] ss:$2 sm:$0xff] %v287_v33 }
  0x95   : > { %v320_v49 = vld.sshfl [vmem:[#allocation1] sm:$0xff pattern:$0x75316420]  ;;  %v321_v50 = vld.sshfl [vmem:[#allocation1 + $0x8] sm:$0xff pattern:$0x75316420] }
  0x96   : > { %1611 = vmatpush.msk.msra.mxu0 %vm352_vm0, %v320_v49  ;;  %328 = vst [vmem:[#allocation1] ss:$2 sm:$0xff] %v288_v45  ;;  %1613 = vmatpush.msk.msra.mxu1 %vm352_vm0, %v321_v50  ;;  %v322_v52 = vld.sshfl [vmem:[#allocation1 + $0x10] sm:$0xff pattern:$0x75316420] }
  0x97   : > { %1615 = vmatpush.msk.msra.mxu2 %vm352_vm0, %v322_v52  ;;  %v323_v56 = vld.sshfl [vmem:[#allocation1 + $0x18] sm:$0xff pattern:$0x75316420]  ;;  %1612 = vmatmul.msk.f32.vlgmr.msra.gmra.mxu0 %vm348_vm1, %v1846_v47  ;;  %v324_v57 = vld.sshfl [vmem:[#allocation1 + $0x20] sm:$0xff pattern:$0x75316420] }
  0x98   : > { %329 = vst [vmem:[#allocation1 + $0x10] ss:$2 sm:$0xff] %v289_v46  ;;  %1617 = vmatpush.msk.msra.mxu3 %vm352_vm0, %v323_v56  ;;  %1614 = vmatmul.msk.f32.vlgmr.msra.gmra.mxu1 %vm348_vm1, %v1846_v47  ;;  %v325_v58 = vld.sshfl [vmem:[#allocation1 + $0x28] sm:$0xff pattern:$0x75316420] }
  0x99   : > { %1616 = vmatmul.msk.f32.vlgmr.msra.gmra.mxu2 %vm348_vm1, %v1846_v47  ;;  %1618 = vmatmul.msk.f32.vlgmr.msra.gmra.mxu3 %vm348_vm1, %v1846_v47  ;;  %330 = vst [vmem:[#allocation1 + $0x20] ss:$2 sm:$0xff] %v290_v53  ;;  %v326_v61 = vld.sshfl [vmem:[#allocation1 + $0x30] sm:$0xff pattern:$0x75316420] }
  0x9a   : > { %1619 = vmatpush.msk.msrb.mxu0 %vm352_vm0, %v324_v57  ;;  %1621 = vmatpush.msk.msrb.mxu1 %vm352_vm0, %v325_v58  ;;  %v327_v63 = vld.sshfl [vmem:[#allocation1 + $0x38] sm:$0xff pattern:$0x75316420] }
  0x9b   : > { %1623 = vmatpush.msk.msrb.mxu2 %vm352_vm0, %v326_v61  ;;  %331 = vst [vmem:[#allocation1 + $0x30] ss:$2 sm:$0xff] %v291_v62  ;;  %1625 = vmatpush.msk.msrb.mxu3 %vm352_vm0, %v327_v63 }
  0x9d   : > { %v332_v4 = vld.sshfl [vmem:[#allocation1] sm:$0xff pattern:$0x75316420]  ;;  %v333_v5 = vld.sshfl [vmem:[#allocation1 + $0x8] sm:$0xff pattern:$0x75316420] }
  0x9e   : > { %1627 = vmatpush.msk.msra.mxu0 %vm352_vm0, %v332_v4  ;;  %340 = vst [vmem:[#allocation1] ss:$2 sm:$0xff] %v292_v2  ;;  %1629 = vmatpush.msk.msra.mxu1 %vm352_vm0, %v333_v5 }
  0x9f   : > { %v334_v7 = vld.sshfl [vmem:[#allocation1 + $0x10] sm:$0xff pattern:$0x75316420]  ;;  %v335_v8 = vld.sshfl [vmem:[#allocation1 + $0x18] sm:$0xff pattern:$0x75316420]  ;;  %1620 = vmatmul.msk.f32.vlgmr.msrb.gmra.mxu0 %vm348_vm1, %v1846_v47 }
  0xa0   : > { %1631 = vmatpush.msk.msra.mxu2 %vm352_vm0, %v334_v7  ;;  %341 = vst [vmem:[#allocation1 + $0x10] ss:$2 sm:$0xff] %v293_v6  ;;  %1633 = vmatpush.msk.msra.mxu3 %vm352_vm0, %v335_v8  ;;  %v336_v9 = vld.sshfl [vmem:[#allocation1 + $0x20] sm:$0xff pattern:$0x75316420] }
  0xa1   : > { %1622 = vmatmul.msk.f32.vlgmr.msrb.gmra.mxu1 %vm348_vm1, %v1846_v47  ;;  %1624 = vmatmul.msk.f32.vlgmr.msrb.gmra.mxu2 %vm348_vm1, %v1846_v47  ;;  %v337_v11 = vld.sshfl [vmem:[#allocation1 + $0x28] sm:$0xff pattern:$0x75316420] }
  0xa2   : > { %1626 = vmatmul.msk.f32.vlgmr.msrb.gmra.mxu3 %vm348_vm1, %v1846_v47  ;;  %1635 = vmatpush.msk.msrb.mxu0 %vm352_vm0, %v336_v9  ;;  %342 = vst [vmem:[#allocation1 + $0x20] ss:$2 sm:$0xff] %v294_v10  ;;  %v338_v12 = vld.sshfl [vmem:[#allocation1 + $0x30] sm:$0xff pattern:$0x75316420] }
  0xa3   : > { %1637 = vmatpush.msk.msrb.mxu1 %vm352_vm0, %v337_v11  ;;  %1639 = vmatpush.msk.msrb.mxu2 %vm352_vm0, %v338_v12  ;;  %v339_v13 = vld.sshfl [vmem:[#allocation1 + $0x38] sm:$0xff pattern:$0x75316420] }
  0xa4   : > { %1641 = vmatpush.msk.msrb.mxu3 %vm352_vm0, %v339_v13 }
  0xa5   : > { %v343_v14 = vld.sshfl [vmem:[#allocation1] sm:$0xff pattern:$0x75316420]  ;;  %v344_v15 = vld.sshfl [vmem:[#allocation1 + $0x8] sm:$0xff pattern:$0x75316420] }
  0xa7   : > { %1628 = vmatmul.msk.f32.vlgmr.msra.gmra.mxu0 %vm348_vm1, %v1846_v47  ;;  %v345_v16 = vld.sshfl [vmem:[#allocation1 + $0x10] sm:$0xff pattern:$0x75316420]  ;;  %v346_v17 = vld.sshfl [vmem:[#allocation1 + $0x18] sm:$0xff pattern:$0x75316420] }
  0xa8   : > { %1643 = vmatpush.msk.msra.mxu0 %vm352_vm0, %v343_v14 }
  0xa9   : > { %1630 = vmatmul.msk.f32.vlgmr.msra.gmra.mxu1 %vm348_vm1, %v1846_v47  ;;  %1632 = vmatmul.msk.f32.vlgmr.msra.gmra.mxu2 %vm348_vm1, %v1846_v47  ;;  %v347_v18 = vld.sshfl [vmem:[#allocation1 + $0x20] sm:$0xff pattern:$0x75316420] }
  0xaa   : > { %1634 = vmatmul.msk.f32.vlgmr.msra.gmra.mxu3 %vm348_vm1, %v1846_v47  ;;  %1645 = vmatpush.msk.msra.mxu1 %vm352_vm0, %v344_v15 }
  0xab   : > { %1647 = vmatpush.msk.msra.mxu2 %vm352_vm0, %v345_v16  ;;  %1649 = vmatpush.msk.msra.mxu3 %vm352_vm0, %v346_v17 }
  0xaf   : > { %1636 = vmatmul.msk.f32.vlgmr.msrb.gmra.mxu0 %vm348_vm1, %v1846_v47 }
  0xb0   : > { %1651 = vmatpush.msk.msrb.mxu0 %vm352_vm0, %v347_v18 }
  0xb1   : > { %1638 = vmatmul.msk.f32.vlgmr.msrb.gmra.mxu1 %vm348_vm1, %v1846_v47  ;;  %1640 = vmatmul.msk.f32.vlgmr.msrb.gmra.mxu2 %vm348_vm1, %v1846_v47 }
  0xb2   : > { %1642 = vmatmul.msk.f32.vlgmr.msrb.gmra.mxu3 %vm348_vm1, %v1846_v47 }
  0xb7   : > { %1644 = vmatmul.msk.f32.vlgmr.msra.gmra.mxu0 %vm348_vm1, %v1846_v47 }
  0xb9   : > { %1646 = vmatmul.msk.f32.vlgmr.msra.gmra.mxu1 %vm348_vm1, %v1846_v47  ;;  %1648 = vmatmul.msk.f32.vlgmr.msra.gmra.mxu2 %vm348_vm1, %v1846_v47 }
  0xba   : > { %1650 = vmatmul.msk.f32.vlgmr.msra.gmra.mxu3 %vm348_vm1, %v1846_v47 }
  0xbf   : > { %1652 = vmatmul.msk.f32.vlgmr.msrb.gmra.mxu0 %vm348_vm1, %v1846_v47 }
 0x114   : > { %v412_v20 = vpop.f32.mrf.mxu0 }
 0x115   : > { %v413_v21 = vadd.f32 %v412_v20, %v1918_v19  ;;  %v432_v22 = vpop.f32.mrf.mxu1 }
 0x116   : > { %v433_v23 = vadd.f32 %v432_v22, %v1918_v19 }
 0x117   : > { %v815_v24 = vsel %vm352_vm0, %v413_v21, -inf }
 0x118   : > { %v816_v25 = vrot.slane %v815_v24, 4  ;;  %v822_v26 = vsel %vm352_vm0, %v433_v23, -inf }
 0x119   : > { %v823_v27 = vrot.slane %v822_v26, 4 }
 0x11a   : > { %v817_v28 = vmax.f32 %v815_v24, %v816_v25 }
 0x11b   : > { %v824_v29 = vmax.f32 %v822_v26, %v823_v27 }
 0x11c   : > { %v818_v30 = vrot.slane %v817_v28, 2  ;;  %v452_v31 = vpop.f32.mrf.mxu2  ;;  %v472_v32 = vpop.f32.mrf.mxu3 }
 0x11d   : > { %v825_v33 = vrot.slane %v824_v29, 2  ;;  %v1925_v34 = vadd.f32 %v452_v31, %v1918_v19  ;;  %v1928_v35 = vadd.f32 %v472_v32, %v1918_v19  ;;  %v492_v36 = vpop.f32.mrf.mxu0 }
 0x11e   : > { %v819_v37 = vmax.f32 %v817_v28, %v818_v30  ;;  %v1931_v38 = vadd.f32 %v492_v36, %v1918_v19  ;;  %v512_v39 = vpop.f32.mrf.mxu1 }
 0x11f   : > { %v826_v40 = vmax.f32 %v824_v29, %v825_v33  ;;  %v829_v41 = vsel %vm352_vm0, %v1925_v34, -inf  ;;  %v836_v42 = vsel %vm352_vm0, %v1928_v35, -inf  ;;  %v1938_v43 = vadd.f32 %v512_v39, %v1918_v19 }
 0x120   : > { %v820_v44 = vrot.slane %v819_v37, 1  ;;  %v830_v45 = vrot.slane %v829_v41, 4  ;;  %v837_v46 = vrot.slane %v836_v42, 4  ;;  %v843_v47 = vsel %vm352_vm0, %v1931_v38, -inf }
 0x121   : > { %v827_v48 = vrot.slane %v826_v40, 1  ;;  %v844_v49 = vrot.slane %v843_v47, 4  ;;  %v850_v50 = vsel %vm352_vm0, %v1938_v43, -inf }
 0x122   : > { %v821_v51 = vmax.f32 %v819_v37, %v820_v44  ;;  %v831_v52 = vmax.f32 %v829_v41, %v830_v45  ;;  %v838_v53 = vmax.f32 %v836_v42, %v837_v46  ;;  %v851_v54 = vrot.slane %v850_v50, 4 }
 0x123   : > { %v828_v55 = vmax.f32 %v826_v40, %v827_v48  ;;  %v845_v56 = vmax.f32 %v843_v47, %v844_v49 }
 0x124   : > { %v963_v57 = vsub.f32 %v413_v21, %v821_v51  ;;  %v832_v58 = vrot.slane %v831_v52, 2  ;;  %v839_v59 = vrot.slane %v838_v53, 2  ;;  %v852_v60 = vmax.f32 %v850_v50, %v851_v54  ;;  %v532_v61 = vpop.f32.mrf.mxu2 }
 0x125   : > { %v964_v62 = vsub.f32 %v433_v23, %v828_v55  ;;  %v846_v63 = vrot.slane %v845_v56, 2  ;;  %v1945_v0 = vadd.f32 %v532_v61, %v1918_v19  ;;  %v552_v1 = vpop.f32.mrf.mxu3  ;;  %v572_v13 = vpop.f32.mrf.mxu0 }
 0x126   : > { %v984_v2 = vmul.f32 1.442695, %v963_v57  ;;  %v833_v3 = vmax.f32 %v831_v52, %v832_v58  ;;  %v840_v4 = vmax.f32 %v838_v53, %v839_v59  ;;  %v853_v5 = vrot.slane %v852_v60, 2  ;;  %v592_v22 = vpop.f32.mrf.mxu1 }
 0x127   : > { %v986_v6 = vmul.f32 1.442695, %v964_v62  ;;  %v847_v7 = vmax.f32 %v845_v56, %v846_v63  ;;  %v857_v8 = vsel %vm352_vm0, %v1945_v0, -inf  ;;  %v1950_v9 = vadd.f32 %v552_v1, %v1918_v19 }
 0x128   : > { %1669 = vpow2.f32 %v984_v2  ;;  %v834_v10 = vrot.slane %v833_v3, 1  ;;  %v841_v11 = vrot.slane %v840_v4, 1  ;;  %v854_v12 = vmax.f32 %v852_v60, %v853_v5 }
 0x129   : > { %1671 = vpow2.f32 %v986_v6  ;;  %v848_v14 = vrot.slane %v847_v7, 1  ;;  %v858_v15 = vrot.slane %v857_v8, 4  ;;  %v864_v16 = vsel %vm352_vm0, %v1950_v9, -inf }
 0x12a   : > { %v835_v17 = vmax.f32 %v833_v3, %v834_v10  ;;  %v842_v18 = vmax.f32 %v840_v4, %v841_v11  ;;  %v855_v20 = vrot.slane %v854_v12, 1  ;;  %v865_v21 = vrot.slane %v864_v16, 4 }
 0x12b   : > { %v849_v23 = vmax.f32 %v847_v7, %v848_v14  ;;  %v859_v24 = vmax.f32 %v857_v8, %v858_v15  ;;  %v1955_v25 = vadd.f32 %v572_v13, %v1918_v19  ;;  %v1963_v33 = vadd.f32 %v592_v22, %v1918_v19 }
 0x12c   : > { %v965_v26 = vsub.f32 %v1925_v34, %v835_v17  ;;  %v966_v27 = vsub.f32 %v1928_v35, %v842_v18  ;;  %v856_v28 = vmax.f32 %v854_v12, %v855_v20  ;;  %v866_v29 = vmax.f32 %v864_v16, %v865_v21  ;;  %v612_v22 = vpop.f32.mrf.mxu2 }
 0x12d   : > { %v967_v30 = vsub.f32 %v1931_v38, %v849_v23  ;;  %v860_v31 = vrot.slane %v859_v24, 2  ;;  %v871_v32 = vsel %vm352_vm0, %v1955_v25, -inf  ;;  %v878_v51 = vsel %vm352_vm0, %v1963_v33, -inf }
 0x12e   : > { %v1965_v36 = vpop.eup %1669  ;;  %v988_v37 = vmul.f32 1.442695, %v965_v26  ;;  %v990_v39 = vmul.f32 1.442695, %v966_v27  ;;  %v968_v40 = vsub.f32 %v1938_v43, %v856_v28  ;;  %v867_v34 = vrot.slane %v866_v29, 2 }
 0x12f   : > { %v1968_v41 = vpop.eup %1671  ;;  %v1026_v35 = vsel %vm352_vm0, %v1965_v36, 0.0  ;;  %v992_v38 = vmul.f32 1.442695, %v967_v30  ;;  %v861_v42 = vmax.f32 %v859_v24, %v860_v31  ;;  %v872_v44 = vrot.slane %v871_v32, 4 }
 0x130   : > { %v1027_v45 = vrot.slane %v1026_v35, 4  ;;  %v1033_v46 = vsel %vm352_vm0, %v1968_v41, 0.0  ;;  %1673 = vpow2.f32 %v988_v37  ;;  %v994_v47 = vmul.f32 1.442695, %v968_v40 }
 0x131   : > { %v1034_v48 = vrot.slane %v1033_v46, 4  ;;  %1675 = vpow2.f32 %v990_v39  ;;  %v862_v49 = vrot.slane %v861_v42, 1  ;;  %v868_v50 = vmax.f32 %v866_v29, %v867_v34 }
 0x132   : > { %v1028_v43 = vadd.f32 %v1027_v45, %v1026_v35  ;;  %1677 = vpow2.f32 %v992_v38  ;;  %v873_v54 = vmax.f32 %v871_v32, %v872_v44  ;;  %v879_v61 = vrot.slane %v878_v51, 4 }
 0x133   : > { %v1035_v52 = vadd.f32 %v1034_v48, %v1033_v46  ;;  %1679 = vpow2.f32 %v994_v47  ;;  %v863_v53 = vmax.f32 %v861_v42, %v862_v49  ;;  %v869_v56 = vrot.slane %v868_v50, 1 }
 0x134   : > { %v1029_v55 = vrot.slane %v1028_v43, 2  ;;  %v874_v3 = vrot.slane %v873_v54, 2  ;;  %v1995_v16 = vmax.f32 %v878_v51, %v879_v61  ;;  %v2004_v29 = vadd.f32 %v612_v22, %v1918_v19 }
 0x135   : > { %v1036_v57 = vrot.slane %v1035_v52, 2  ;;  %v969_v58 = vsub.f32 %v1945_v0, %v863_v53  ;;  %v870_v0 = vmax.f32 %v868_v50, %v869_v56 }
 0x136   : > { %v1977_v59 = vpop.eup %1673  ;;  %v1030_v60 = vadd.f32 %v1029_v55, %v1028_v43  ;;  %v875_v24 = vmax.f32 %v873_v54, %v874_v3  ;;  %v881_v28 = vrot.slane %v1995_v16, 2  ;;  %v2048_v22 = vsel %vm352_vm0, %v2004_v29, -inf }
 0x137   : > { %v1979_v62 = vpop.eup %1675  ;;  %v1037_v63 = vadd.f32 %v1036_v57, %v1035_v52  ;;  %v1040_v1 = vsel %vm352_vm0, %v1977_v59, 0.0  ;;  %v996_v2 = vmul.f32 1.442695, %v969_v58  ;;  %v970_v23 = vsub.f32 %v1950_v9, %v870_v0 }
 0x138   : > { %v1983_v4 = vpop.eup %1677  ;;  %v1031_v5 = vrot.slane %v1030_v60, 1  ;;  %v1041_v6 = vrot.slane %v1040_v1, 4  ;;  %v1047_v7 = vsel %vm352_vm0, %v1979_v62, 0.0  ;;  %v876_v35 = vrot.slane %v875_v24, 1 }
 0x139   : > { %v1987_v8 = vpop.eup %1679  ;;  %v1038_v10 = vrot.slane %v1037_v63, 1  ;;  %v1048_v11 = vrot.slane %v1047_v7, 4  ;;  %v1054_v12 = vsel %vm352_vm0, %v1983_v4, 0.0  ;;  %1681 = vpow2.f32 %v996_v2 }
 0x13a   : > { %v1991_v13 = vadd.f32 %v1031_v5, %v1030_v60  ;;  %v1042_v14 = vadd.f32 %v1041_v6, %v1040_v1  ;;  %v1061_v15 = vsel %vm352_vm0, %v1987_v8, 0.0  ;;  %v1055_v20 = vrot.slane %v1054_v12, 4 }
 0x13b   : > { %v1997_v17 = vadd.f32 %v1038_v10, %v1037_v63  ;;  %v1049_v18 = vadd.f32 %v1048_v11, %v1047_v7  ;;  %v1062_v21 = vrot.slane %v1061_v15, 4  ;;  %v998_v34 = vmul.f32 1.442695, %v970_v23 }
 0x13c   : > { %1683 = vrcp.f32 %v1991_v13  ;;  %v1043_v26 = vrot.slane %v1042_v14, 2  ;;  %v1182_v31 = vand.u32 2147483647, %v1991_v13  ;;  %v1184_v32 = vand.u32 2147483648, %v1991_v13 }
 0x13d   : > { %1685 = vrcp.f32 %v1997_v17  ;;  %v1050_v27 = vrot.slane %v1049_v18, 2  ;;  %v1056_v37 = vadd.f32 %v1055_v20, %v1054_v12  ;;  %v1063_v39 = vadd.f32 %v1062_v21, %v1061_v15 }
 0x13e   : > { %v1044_v40 = vadd.f32 %v1043_v26, %v1042_v14  ;;  %vm1178_vm2 = vweird.f32 %v1991_v13  ;;  %vm1193_vm3 = vweird.f32 %v1997_v17  ;;  %v1197_v46 = vand.u32 2147483647, %v1997_v17 }
 0x13f   : > { %v2006_v30 = vpop.eup %1681  ;;  %v1051_v9 = vadd.f32 %v1050_v27, %v1049_v18  ;;  %v1057_v38 = vrot.slane %v1056_v37, 2  ;;  %v1064_v42 = vrot.slane %v1063_v39, 2  ;;  %v1199_v47 = vand.u32 2147483648, %v1997_v17 }
 0x140   : > { %v1068_v44 = vsel %vm352_vm0, %v2006_v30, 0.0  ;;  %v1045_v48 = vrot.slane %v1044_v40, 1  ;;  %vm2017_vm4 = vcmp.eq.f32.partialorder %v1182_v31, 8.507059e+37  ;;  %v1185_v52 = vor.u32 1.1754944e-38, %v1184_v32 }
 0x141   : > { %v1052_v49 = vrot.slane %v1051_v9, 1  ;;  %v1058_v53 = vadd.f32 %v1057_v38, %v1056_v37  ;;  %v1065_v54 = vadd.f32 %v1064_v42, %v1063_v39  ;;  %v1069_v58 = vrot.slane %v1068_v44, 4 }
 0x142   : > { %v1684_v45 = vpop.eup %1683  ;;  %v2022_v56 = vadd.f32 %v1045_v48, %v1044_v40  ;;  %1687 = vpow2.f32 %v998_v34  ;;  %vm2026_vm5 = vcmp.eq.f32.partialorder %v1197_v46, 8.507059e+37  ;;  %v1200_v3 = vor.u32 1.1754944e-38, %v1199_v47 }
 0x143   : > { %v1686_v50 = vpop.eup %1685  ;;  %v1174_v43 = vmul.f32 %v1684_v45, %v1991_v13  ;;  %v2024_v57 = vadd.f32 %v1052_v49, %v1051_v9  ;;  %v1059_v61 = vrot.slane %v1058_v53, 1  ;;  %v1066_v63 = vrot.slane %v1065_v54, 1 }
 0x144   : > { %v1189_v55 = vmul.f32 %v1686_v50, %v1997_v17  ;;  %1689 = vrcp.f32 %v2022_v56  ;;  %vm1179_vm6 = vweird.f32 %v1684_v45  ;;  %v2032_v6 = vmax.f32 %v875_v24, %v876_v35 }
 0x145   : > { %v1175_v60 = vsub.f32 1.0, %v1174_v43  ;;  %1691 = vrcp.f32 %v2024_v57  ;;  %vm1194_vm7 = vweird.f32 %v1686_v50  ;;  %v1212_v0 = vand.u32 2147483647, %v2022_v56  ;;  %vm1180_vm8 = vmor %vm1178_vm2, %vm1179_vm6 }
 0x146   : > { %v1190_v1 = vsub.f32 1.0, %v1189_v55  ;;  %v1070_v10 = vadd.f32 %v1069_v58, %v1068_v44  ;;  %v1214_v12 = vand.u32 2147483648, %v2022_v56  ;;  %v2036_v14 = vadd.f32 %v1059_v61, %v1058_v53  ;;  %vm1195_vm9 = vmor %vm1193_vm3, %vm1194_vm7 }
 0x147   : > { %v1176_v5 = vmul.f32 %v1684_v45, %v1175_v60  ;;  %v2038_v15 = vadd.f32 %v1066_v63, %v1065_v54  ;;  %v1227_v20 = vand.u32 2147483647, %v2024_v57  ;;  %v2044_v21 = vmax.f32 %v1995_v16, %v881_v28 }
 0x148   : > { %v1191_v7 = vmul.f32 %v1686_v50, %v1190_v1  ;;  %v2050_v23 = vpop.eup %1687  ;;  %vm1208_vm10 = vweird.f32 %v2022_v56  ;;  %v1229_v13 = vand.u32 2147483648, %v2024_v57  ;;  %1693 = vrcp.f32 %v2036_v14 }
 0x149   : > { %v1177_v11 = vadd.f32 %v1684_v45, %v1176_v5  ;;  %vm1223_vm11 = vweird.f32 %v2024_v57  ;;  %1695 = vrcp.f32 %v2038_v15  ;;  %v1071_v28 = vrot.slane %v1070_v10, 2 }
 0x14a   : > { %v1192_v18 = vadd.f32 %v1686_v50, %v1191_v7  ;;  %v1690_v26 = vpop.eup %1689  ;;  %vm2065_vm12 = vcmp.eq.f32.partialorder %v1212_v0, 8.507059e+37  ;;  %v1215_v39 = vor.u32 1.1754944e-38, %v1214_v12  ;;  %v1244_v40 = vand.u32 2147483648, %v2036_v14 }
 0x14b   : > { %v1181_v24 = vsel %vm1180_vm8, %v1684_v45, %v1177_v11  ;;  %v1692_v31 = vpop.eup %1691  ;;  %v1204_v32 = vmul.f32 %v1690_v26, %v2022_v56  ;;  %vm2072_vm13 = vcmp.eq.f32.partialorder %v1227_v20, 8.507059e+37  ;;  %v1242_v38 = vand.u32 2147483647, %v2036_v14 }
 0x14c   : > { %v1186_v16 = vsel %vm2017_vm4, %v1185_v52, %v1181_v24  ;;  %v1196_v27 = vsel %vm1195_vm9, %v1686_v50, %v1192_v18  ;;  %v1219_v34 = vmul.f32 %v1692_v31, %v2024_v57  ;;  %vm1209_vm14 = vweird.f32 %v1690_v26 }
 0x14d   : > { %v1201_v17 = vsel %vm2026_vm5, %v1200_v3, %v1196_v27  ;;  %v1187_v42 = vmul.f32 %v1965_v36, %v1186_v16  ;;  %v1205_v44 = vsub.f32 1.0, %v1204_v32  ;;  %v1230_v45 = vor.u32 1.1754944e-38, %v1229_v13  ;;  %vm1210_vm4 = vmor %vm1208_vm10, %vm1209_vm14  ;;  %v632_v32 = vpop.f32.mrf.mxu3 }
 0x14e   : > { %v1202_v9 = vmul.f32 %v1968_v41, %v1201_v17  ;;  %v1220_v41 = vsub.f32 1.0, %v1219_v34  ;;  %vm1224_vm15 = vweird.f32 %v1692_v31  ;;  %vm1238_vm1 = vweird.f32 %v2036_v14  ;;  %v1694_v48 = vpop.eup %1693 }
 0x14f   : > { %v1072_v47 = vadd.f32 %v1071_v28, %v1070_v10  ;;  %v1206_v49 = vmul.f32 %v1690_v26, %v1205_v44  ;;  %v1245_v50 = vor.u32 1.1754944e-38, %v1244_v40  ;;  %v1075_v36 = vsel %vm352_vm0, %v2050_v23, 0.0  ;;  %v1696_v51 = vpop.eup %1695  ;;  %vm1225_vm5 = vmor %vm1223_vm11, %vm1224_vm15 }
 0x150   : > { %v1508_v46 = vrot.slane %v1202_v9, 4  ;;  %v971_v43 = vsub.f32 %v1955_v25, %v2032_v6  ;;  %v1221_v53 = vmul.f32 %v1692_v31, %v1220_v41  ;;  %v1234_v54 = vmul.f32 %v1694_v48, %v2036_v14  ;;  %v672_v9 = vpop.f32.mrf.mxu1 }
 0x151   : > { %vm2090_vm2 = vcmp.eq.f32.partialorder %v1242_v38, 8.507059e+37  ;;  %v1257_v58 = vand.u32 2147483647, %v2038_v15  ;;  %v1207_v60 = vadd.f32 %v1690_v26, %v1206_v49  ;;  %vm1239_vm3 = vweird.f32 %v1694_v48 }
 0x152   : > { %v1518_v52 = vsel %vm352_vm0, %v1187_v42, %v1508_v46  ;;  %v1249_v61 = vmul.f32 %v1696_v51, %v2038_v15  ;;  %v1259_v63 = vand.u32 2147483648, %v2038_v15  ;;  %v1222_v25 = vadd.f32 %v1692_v31, %v1221_v53  ;;  %vm1240_vm8 = vmor %vm1238_vm1, %vm1239_vm3  ;;  %v692_v53 = vpop.f32.mrf.mxu2 }
 0x153   : > { %1538 = vst [vmem:[%s2081_s10] sm:$0xff] %v1518_v52  ;;  %v1235_v1 = vsub.f32 1.0, %v1234_v54  ;;  %v1073_v2 = vrot.slane %v1072_v47, 1  ;;  %v1076_v3 = vrot.slane %v1075_v36, 4  ;;  %v1211_v5 = vsel %vm1210_vm4, %v1690_v26, %v1207_v60 }
 0x154   : > { %v1250_v6 = vsub.f32 1.0, %v1249_v61  ;;  %v1000_v7 = vmul.f32 1.442695, %v971_v43  ;;  %v883_v0 = vrot.slane %v2044_v21, 1  ;;  %v1216_v10 = vsel %vm2065_vm12, %v1215_v39, %v1211_v5 }
 0x155   : > { %v1226_v11 = vsel %vm1225_vm5, %v1692_v31, %v1222_v25  ;;  %v1236_v12 = vmul.f32 %v1694_v48, %v1235_v1  ;;  %v2107_v56 = vadd.f32 %v1073_v2, %v1072_v47  ;;  %vm1254_vm6 = vweird.f32 %v1696_v51 }
 0x156   : > { %v1231_v18 = vsel %vm2072_vm13, %v1230_v45, %v1226_v11  ;;  %v1251_v20 = vmul.f32 %v1696_v51, %v1250_v6  ;;  %v1077_v24 = vadd.f32 %v1076_v3, %v1075_v36  ;;  %vm1253_vm7 = vweird.f32 %v2038_v15 }
 0x157   : > { %v1232_v57 = vmul.f32 %v1979_v62, %v1231_v18  ;;  %v1237_v13 = vadd.f32 %v1694_v48, %v1236_v12  ;;  %1697 = vrcp.f32 %v2107_v56  ;;  %v1217_v26 = vmul.f32 %v1977_v59, %v1216_v10  ;;  %vm1255_vm9 = vmor %vm1253_vm7, %vm1254_vm6  ;;  %v652_v59 = vpop.f32.mrf.mxu0 }
 0x158   : > { %v1252_v16 = vadd.f32 %v1696_v51, %v1251_v20  ;;  %v1260_v27 = vor.u32 1.1754944e-38, %v1259_v63  ;;  %v1078_v28 = vrot.slane %v1077_v24, 2  ;;  %1699 = vpow2.f32 %v1000_v7 }
 0x159   : > { %v1509_v31 = vrot.slane %v1232_v57, 4  ;;  %v1241_v17 = vsel %vm1240_vm8, %v1694_v48, %v1237_v13  ;;  %v884_v62 = vmax.f32 %v2044_v21, %v883_v0  ;;  %vm1258_vm10 = vcmp.eq.f32.partialorder %v1257_v58, 8.507059e+37 }
 0x15a   : > { %v1246_v15 = vsel %vm2090_vm2, %v1245_v50, %v1241_v17  ;;  %v1256_v37 = vsel %vm1255_vm9, %v1696_v51, %v1252_v16  ;;  %v1079_v40 = vadd.f32 %v1078_v28, %v1077_v24  ;;  %v886_v38 = vrot.slane %v2048_v22, 4 }
 0x15b   : > { %v1519_v14 = vsel %vm352_vm0, %v1217_v26, %v1509_v31  ;;  %v1261_v39 = vsel %vm1258_vm10, %v1260_v27, %v1256_v37  ;;  %v972_v35 = vsub.f32 %v1963_v33, %v884_v62  ;;  %v2127_v21 = vadd.f32 %v632_v32, %v1918_v19 }
 0x15c   : > { %1539 = vst [vmem:[%s2081_s10 + $0x8] sm:$0xff] %v1519_v14  ;;  %v1262_v34 = vmul.f32 %v1987_v8, %v1261_v39  ;;  %v1247_v44 = vmul.f32 %v1983_v4, %v1246_v15  ;;  %v1080_v45 = vrot.slane %v1079_v40, 1  ;;  %v2133_v46 = vadd.f32 %v652_v59, %v1918_v19 }
 0x15d   : > { %v2129_v42 = vpop.eup %1697  ;;  %v1002_v47 = vmul.f32 1.442695, %v972_v35  ;;  %v2138_v33 = vadd.f32 %v672_v9, %v1918_v19  ;;  %v887_v50 = vmax.f32 %v2048_v22, %v886_v38  ;;  %v892_v4 = vsel %vm352_vm0, %v2127_v21, -inf }
 0x15e   : > { %v1510_v41 = vrot.slane %v1262_v34, 4  ;;  %v1264_v8 = vmul.f32 %v2129_v42, %v2107_v56  ;;  %v2140_v48 = vpop.eup %1699  ;;  %v2142_v49 = vadd.f32 %v1080_v45, %v1079_v40  ;;  %v899_v36 = vsel %vm352_vm0, %v2133_v46, -inf }
 0x15f   : > { %v1082_v52 = vsel %vm352_vm0, %v2140_v48, 0.0  ;;  %1701 = vpow2.f32 %v1002_v47  ;;  %v1272_v54 = vand.u32 2147483647, %v2107_v56  ;;  %v1274_v55 = vand.u32 2147483648, %v2107_v56 }
 0x160   : > { %v1520_v43 = vsel %vm352_vm0, %v1247_v44, %v1510_v41  ;;  %v1265_v51 = vsub.f32 1.0, %v1264_v8  ;;  %1703 = vrcp.f32 %v2142_v49  ;;  %v1083_v58 = vrot.slane %v1082_v52, 4 }
 0x161   : > { %1540 = vst [vmem:[%s2081_s10 + $0x10] sm:$0xff] %v1520_v43  ;;  %v888_v60 = vrot.slane %v887_v50, 2  ;;  %v893_v61 = vrot.slane %v892_v4, 4  ;;  %vm1269_vm11 = vweird.f32 %v2129_v42  ;;  %v900_v63 = vrot.slane %v899_v36, 4 }
 0x162   : > { %v1266_v22 = vmul.f32 %v2129_v42, %v1265_v51  ;;  %v906_v25 = vsel %vm352_vm0, %v2138_v33, -inf  ;;  %v2161_v1 = vadd.f32 %v692_v53, %v1918_v19  ;;  %v1084_v3 = vadd.f32 %v1083_v58, %v1082_v52  ;;  %v712_v52 = vpop.f32.mrf.mxu3 }
 0x163   : > { %v889_v5 = vmax.f32 %v887_v50, %v888_v60  ;;  %v894_v6 = vmax.f32 %v892_v4, %v893_v61  ;;  %vm1268_vm12 = vweird.f32 %v2107_v56  ;;  %v1275_v7 = vor.u32 1.1754944e-38, %v1274_v55 }
 0x164   : > { %v1267_v2 = vadd.f32 %v2129_v42, %v1266_v22  ;;  %v901_v0 = vmax.f32 %v899_v36, %v900_v63  ;;  %v907_v10 = vrot.slane %v906_v25, 4  ;;  %vm1283_vm13 = vweird.f32 %v2142_v49  ;;  %vm2171_vm14 = vmor %vm1268_vm12, %vm1269_vm11 }
 0x165   : > { %v2165_v11 = vpop.eup %1701  ;;  %v1287_v12 = vand.u32 2147483647, %v2142_v49  ;;  %v1085_v18 = vrot.slane %v1084_v3, 2  ;;  %v890_v20 = vrot.slane %v889_v5, 1  ;;  %v895_v24 = vrot.slane %v894_v6, 2 }
 0x166   : > { %v1704_v57 = vpop.eup %1703  ;;  %vm2175_vm15 = vcmp.eq.f32.partialorder %v1272_v54, 8.507059e+37  ;;  %v1089_v26 = vsel %vm352_vm0, %v2165_v11, 0.0  ;;  %v902_v16 = vrot.slane %v901_v0, 2  ;;  %v908_v27 = vmax.f32 %v906_v25, %v907_v10 }
 0x167   : > { %v913_v28 = vsel %vm352_vm0, %v2161_v1, -inf  ;;  %v1271_v31 = vsel %vm2171_vm14, %v2129_v42, %v1267_v2  ;;  %v1279_v17 = vmul.f32 %v1704_v57, %v2142_v49  ;;  %v1289_v62 = vand.u32 2147483648, %v2142_v49 }
 0x168   : > { %v1086_v32 = vadd.f32 %v1085_v18, %v1084_v3  ;;  %v1090_v15 = vrot.slane %v1089_v26, 4  ;;  %v891_v37 = vmax.f32 %v889_v5, %v890_v20  ;;  %v896_v59 = vmax.f32 %v894_v6, %v895_v24 }
 0x169   : > { %v903_v14 = vmax.f32 %v901_v0, %v902_v16  ;;  %v1280_v39 = vsub.f32 1.0, %v1279_v17  ;;  %v909_v9 = vrot.slane %v908_v27, 2  ;;  %v914_v34 = vrot.slane %v913_v28, 4 }
 0x16a   : > { %v1087_v40 = vrot.slane %v1086_v32, 1  ;;  %v1091_v35 = vadd.f32 %v1090_v15, %v1089_v26  ;;  %v973_v38 = vsub.f32 %v2004_v29, %v891_v37  ;;  %v897_v44 = vrot.slane %v896_v59, 1 }
 0x16b   : > { %v904_v45 = vrot.slane %v903_v14, 1  ;;  %v1281_v41 = vmul.f32 %v1704_v57, %v1280_v39  ;;  %vm1284_vm1 = vweird.f32 %v1704_v57  ;;  %v910_v8 = vmax.f32 %v908_v27, %v909_v9 }
 0x16c   : > { %v2189_v42 = vadd.f32 %v1087_v40, %v1086_v32  ;;  %v1092_v47 = vrot.slane %v1091_v35, 2  ;;  %v1004_v50 = vmul.f32 1.442695, %v973_v38  ;;  %v898_v4 = vmax.f32 %v896_v59, %v897_v44  ;;  %vm1285_vm3 = vmor %vm1283_vm13, %vm1284_vm1 }
 0x16d   : > { %v905_v36 = vmax.f32 %v903_v14, %v904_v45  ;;  %v1282_v43 = vadd.f32 %v1704_v57, %v1281_v41  ;;  %vm1288_vm2 = vcmp.eq.f32.partialorder %v1287_v12, 8.507059e+37  ;;  %v915_v51 = vmax.f32 %v913_v28, %v914_v34 }
 0x16e   : > { %1705 = vrcp.f32 %v2189_v42  ;;  %v1290_v29 = vor.u32 1.1754944e-38, %v1289_v62  ;;  %v1093_v53 = vadd.f32 %v1092_v47, %v1091_v35  ;;  %v974_v54 = vsub.f32 %v2127_v21, %v898_v4 }
 0x16f   : > { %1707 = vpow2.f32 %v1004_v50  ;;  %v1276_v55 = vsel %vm2175_vm15, %v1275_v7, %v1271_v31  ;;  %v1286_v22 = vsel %vm1285_vm3, %v1704_v57, %v1282_v43  ;;  %v975_v58 = vsub.f32 %v2133_v46, %v905_v36  ;;  %v732_v46 = vpop.f32.mrf.mxu0 }
 0x170   : > { %v911_v60 = vrot.slane %v910_v8, 1  ;;  %v1291_v61 = vsel %vm1288_vm2, %v1290_v29, %v1286_v22  ;;  %v1094_v63 = vrot.slane %v1093_v53, 1  ;;  %v1006_v25 = vmul.f32 1.442695, %v974_v54 }
 0x171   : > { %v2199_v2 = vadd.f32 %v712_v52, %v1918_v19  ;;  %v1292_v49 = vmul.f32 %v2050_v23, %v1291_v61  ;;  %v1008_v3 = vmul.f32 1.442695, %v975_v58  ;;  %v916_v6 = vrot.slane %v915_v51, 2 }
 0x172   : > { %v912_v5 = vmax.f32 %v910_v8, %v911_v60  ;;  %v1277_v21 = vmul.f32 %v2006_v30, %v1276_v55  ;;  %v1304_v0 = vand.u32 2147483648, %v2189_v42  ;;  %v2204_v7 = vadd.f32 %v1094_v63, %v1093_v53  ;;  %v752_v63 = vpop.f32.mrf.mxu1 }
 0x173   : > { %1709 = vpow2.f32 %v1006_v25  ;;  %v1511_v12 = vrot.slane %v1292_v49, 4  ;;  %v917_v20 = vmax.f32 %v915_v51, %v916_v6  ;;  %v920_v30 = vsel %vm352_vm0, %v2199_v2, -inf }
 0x174   : > { %v2206_v10 = vpop.eup %1705  ;;  %1711 = vpow2.f32 %v1008_v3  ;;  %v976_v18 = vsub.f32 %v2138_v33, %v912_v5  ;;  %v1302_v13 = vand.u32 2147483647, %v2189_v42  ;;  %v2221_v33 = vadd.f32 %v732_v46, %v1918_v19 }
 0x175   : > { %v2209_v23 = vpop.eup %1707  ;;  %v1294_v24 = vmul.f32 %v2206_v10, %v2189_v42  ;;  %1713 = vrcp.f32 %v2204_v7  ;;  %v1521_v57 = vsel %vm352_vm0, %v1277_v21, %v1511_v12  ;;  %v918_v28 = vrot.slane %v917_v20, 1 }
 0x176   : > { %v1096_v56 = vsel %vm352_vm0, %v2209_v23, 0.0  ;;  %1541 = vst [vmem:[%s2081_s10 + $0x18] sm:$0xff] %v1521_v57  ;;  %v1010_v27 = vmul.f32 1.442695, %v976_v18  ;;  %vm1298_vm4 = vweird.f32 %v2189_v42  ;;  %vm1299_vm5 = vweird.f32 %v2206_v10 }
 0x177   : > { %v1295_v26 = vsub.f32 1.0, %v1294_v24  ;;  %v1097_v16 = vrot.slane %v1096_v56, 4  ;;  %v1305_v31 = vor.u32 1.1754944e-38, %v1304_v0  ;;  %v921_v17 = vrot.slane %v920_v30, 4  ;;  %vm2251_vm8 = vmor %vm1298_vm4, %vm1299_vm5 }
 0x178   : > { %1715 = vpow2.f32 %v1010_v27  ;;  %v919_v37 = vmax.f32 %v917_v20, %v918_v28  ;;  %vm2231_vm6 = vcmp.eq.f32.partialorder %v1302_v13, 8.507059e+37  ;;  %vm1313_vm7 = vweird.f32 %v2204_v7 }
 0x179   : > { %v2226_v62 = vpop.eup %1709  ;;  %v1296_v32 = vmul.f32 %v2206_v10, %v1295_v26  ;;  %v1098_v15 = vadd.f32 %v1097_v16, %v1096_v56  ;;  %v1317_v39 = vand.u32 2147483647, %v2204_v7  ;;  %v922_v9 = vmax.f32 %v920_v30, %v921_v17 }
 0x17a   : > { %v2229_v59 = vpop.eup %1711  ;;  %v1103_v40 = vsel %vm352_vm0, %v2226_v62, 0.0  ;;  %v927_v34 = vsel %vm352_vm0, %v2221_v33, -inf  ;;  %v1319_v47 = vand.u32 2147483648, %v2204_v7  ;;  %v977_v4 = vsub.f32 %v2161_v1, %v919_v37 }
 0x17b   : > { %v1714_v35 = vpop.eup %1713  ;;  %v1297_v38 = vadd.f32 %v2206_v10, %v1296_v32  ;;  %v1099_v44 = vrot.slane %v1098_v15, 2  ;;  %v1104_v45 = vrot.slane %v1103_v40, 4  ;;  %v1110_v41 = vsel %vm352_vm0, %v2229_v59, 0.0 }
 0x17c   : > { %v1309_v8 = vmul.f32 %v1714_v35, %v2204_v7  ;;  %v1111_v50 = vrot.slane %v1110_v41, 4  ;;  %v923_v51 = vrot.slane %v922_v9, 2  ;;  %v928_v52 = vrot.slane %v927_v34, 4 }
 0x17d   : > { %v1100_v36 = vadd.f32 %v1099_v44, %v1098_v15  ;;  %v1105_v43 = vadd.f32 %v1104_v45, %v1103_v40  ;;  %vm1314_vm9 = vweird.f32 %v1714_v35  ;;  %v1012_v55 = vmul.f32 1.442695, %v977_v4 }
 0x17e   : > { %v1310_v53 = vsub.f32 1.0, %v1309_v8  ;;  %v1112_v54 = vadd.f32 %v1111_v50, %v1110_v41  ;;  %v2255_v22 = vpop.eup %1715  ;;  %v1301_v1 = vsel %vm2251_vm8, %v2206_v10, %v1297_v38  ;;  %v924_v61 = vmax.f32 %v922_v9, %v923_v51  ;;  %vm1315_vm11 = vmor %vm1313_vm7, %vm1314_vm9  ;;  %v792_v8 = vpop.f32.mrf.mxu3 }
 0x17f   : > { %v1101_v58 = vrot.slane %v1100_v36, 1  ;;  %v1106_v60 = vrot.slane %v1105_v43, 2  ;;  %v1117_v49 = vsel %vm352_vm0, %v2255_v22, 0.0  ;;  %1717 = vpow2.f32 %v1012_v55 }
 0x180   : > { %v1311_v25 = vmul.f32 %v1714_v35, %v1310_v53  ;;  %v1113_v42 = vrot.slane %v1112_v54, 2  ;;  %v1118_v6 = vrot.slane %v1117_v49, 4  ;;  %v925_v21 = vrot.slane %v924_v61, 1 }
 0x181   : > { %v2262_v3 = vadd.f32 %v1101_v58, %v1100_v36  ;;  %v1107_v5 = vadd.f32 %v1106_v60, %v1105_v43  ;;  %vm1318_vm10 = vcmp.eq.f32.partialorder %v1317_v39, 8.507059e+37  ;;  %v2265_v10 = vadd.f32 %v752_v63, %v1918_v19 }
 0x182   : > { %v1312_v0 = vadd.f32 %v1714_v35, %v1311_v25  ;;  %v1114_v46 = vadd.f32 %v1113_v42, %v1112_v54  ;;  %v1306_v12 = vsel %vm2231_vm6, %v1305_v31, %v1301_v1  ;;  %v1320_v18 = vor.u32 1.1754944e-38, %v1319_v47  ;;  %v772_v1 = vpop.f32.mrf.mxu2 }
 0x183   : > { %1719 = vrcp.f32 %v2262_v3  ;;  %v929_v20 = vmax.f32 %v927_v34, %v928_v52  ;;  %v1108_v30 = vrot.slane %v1107_v5, 1  ;;  %v1119_v13 = vadd.f32 %v1118_v6, %v1117_v49 }
 0x184   : > { %v1316_v24 = vsel %vm1315_vm11, %v1714_v35, %v1312_v0  ;;  %v1115_v57 = vrot.slane %v1114_v46, 1  ;;  %v926_v26 = vmax.f32 %v924_v61, %v925_v21  ;;  %v934_v7 = vsel %vm352_vm0, %v2265_v10, -inf }
 0x185   : > { %v1321_v56 = vsel %vm1318_vm10, %v1320_v18, %v1316_v24  ;;  %v2273_v16 = vpop.eup %1717  ;;  %v2276_v28 = vadd.f32 %v1108_v30, %v1107_v5  ;;  %v1307_v17 = vmul.f32 %v2140_v48, %v1306_v12  ;;  %v1332_v32 = vand.u32 2147483647, %v2262_v3 }
 0x186   : > { %v1322_v27 = vmul.f32 %v2165_v11, %v1321_v56  ;;  %v2278_v31 = vadd.f32 %v1115_v57, %v1114_v46  ;;  %v1120_v15 = vrot.slane %v1119_v13, 2  ;;  %v978_v14 = vsub.f32 %v2199_v2, %v926_v26 }
 0x187   : > { %1721 = vrcp.f32 %v2276_v28  ;;  %v930_v39 = vrot.slane %v929_v20, 2  ;;  %v1334_v40 = vand.u32 2147483648, %v2262_v3  ;;  %v1124_v9 = vsel %vm352_vm0, %v2273_v16, 0.0 }
 0x188   : > { %v1512_v37 = vrot.slane %v1322_v27, 4  ;;  %1723 = vrcp.f32 %v2278_v31  ;;  %v935_v34 = vrot.slane %v934_v7, 4  ;;  %vm1328_vm12 = vweird.f32 %v2262_v3 }
 0x189   : > { %v1720_v11 = vpop.eup %1719  ;;  %v1121_v38 = vadd.f32 %v1120_v15, %v1119_v13  ;;  %v1125_v2 = vrot.slane %v1124_v9, 4  ;;  %v1014_v45 = vmul.f32 1.442695, %v978_v14  ;;  %v931_v41 = vmax.f32 %v929_v20, %v930_v39 }
 0x18a   : > { %v1522_v48 = vsel %vm352_vm0, %v1307_v17, %v1512_v37  ;;  %v1324_v35 = vmul.f32 %v1720_v11, %v2262_v3  ;;  %vm2294_vm13 = vcmp.eq.f32.partialorder %v1332_v32, 8.507059e+37  ;;  %v1335_v47 = vor.u32 1.1754944e-38, %v1334_v40 }
 0x18b   : > { %1542 = vst [vmem:[%s2081_s10 + $0x20] sm:$0xff] %v1522_v48  ;;  %vm1343_vm14 = vweird.f32 %v2276_v28  ;;  %v1122_v50 = vrot.slane %v1121_v38, 1  ;;  %v936_v4 = vmax.f32 %v934_v7, %v935_v34  ;;  %v1347_v51 = vand.u32 2147483647, %v2276_v28 }
 0x18c   : > { %v1325_v44 = vsub.f32 1.0, %v1324_v35  ;;  %v1126_v52 = vadd.f32 %v1125_v2, %v1124_v9  ;;  %1725 = vpow2.f32 %v1014_v45  ;;  %vm1329_vm15 = vweird.f32 %v1720_v11 }
 0x18d   : > { %v1722_v36 = vpop.eup %1721  ;;  %v2303_v54 = vadd.f32 %v1122_v50, %v1121_v38  ;;  %v932_v55 = vrot.slane %v931_v41, 1  ;;  %v1349_v60 = vand.u32 2147483648, %v2276_v28  ;;  %v1362_v42 = vand.u32 2147483647, %v2278_v31  ;;  %vm2312_vm1 = vmor %vm1328_vm12, %vm1329_vm15 }
 0x18e   : > { %v1326_v43 = vmul.f32 %v1720_v11, %v1325_v44  ;;  %v2300_v29 = vpop.eup %1723  ;;  %v1339_v53 = vmul.f32 %v1722_v36, %v2276_v28  ;;  %v1127_v63 = vrot.slane %v1126_v52, 2  ;;  %v937_v49 = vrot.slane %v936_v4, 2 }
 0x18f   : > { %v1354_v61 = vmul.f32 %v2300_v29, %v2278_v31  ;;  %1727 = vrcp.f32 %v2303_v54  ;;  %vm2316_vm2 = vcmp.eq.f32.partialorder %v1347_v51, 8.507059e+37  ;;  %vm1358_vm3 = vweird.f32 %v2278_v31  ;;  %v812_v51 = vpop.f32.mrf.mxu0 }
 0x190   : > { %v1327_v58 = vadd.f32 %v1720_v11, %v1326_v43  ;;  %v1340_v25 = vsub.f32 1.0, %v1339_v53  ;;  %v1128_v0 = vadd.f32 %v1127_v63, %v1126_v52  ;;  %v2322_v46 = vadd.f32 %v772_v1, %v1918_v19 }
 0x191   : > { %v1355_v21 = vsub.f32 1.0, %v1354_v61  ;;  %vm1344_vm4 = vweird.f32 %v1722_v36  ;;  %v933_v3 = vmax.f32 %v931_v41, %v932_v55  ;;  %v1350_v24 = vor.u32 1.1754944e-38, %v1349_v60 }
 0x192   : > { %v1331_v12 = vsel %vm2312_vm1, %v1720_v11, %v1327_v58  ;;  %v1341_v18 = vmul.f32 %v1722_v36, %v1340_v25  ;;  %v2326_v20 = vpop.eup %1725  ;;  %v1364_v57 = vand.u32 2147483648, %v2278_v31  ;;  %v1129_v13 = vrot.slane %v1128_v0, 1  ;;  %vm1345_vm5 = vmor %vm1343_vm14, %vm1344_vm4 }
 0x193   : > { %v1356_v30 = vmul.f32 %v2300_v29, %v1355_v21  ;;  %v1131_v26 = vsel %vm352_vm0, %v2326_v20, 0.0  ;;  %v979_v27 = vsub.f32 %v2221_v33, %v933_v3  ;;  %v938_v7 = vmax.f32 %v936_v4, %v937_v49 }
 0x194   : > { %v1342_v56 = vadd.f32 %v1722_v36, %v1341_v18  ;;  %v1336_v17 = vsel %vm2294_vm13, %v1335_v47, %v1331_v12  ;;  %vm1359_vm6 = vweird.f32 %v2300_v29  ;;  %v2338_v32 = vadd.f32 %v1129_v13, %v1128_v0 }
 0x195   : > { %v941_v15 = vsel %vm352_vm0, %v2322_v46, -inf  ;;  %v1728_v37 = vpop.eup %1727  ;;  %vm2342_vm7 = vcmp.eq.f32.partialorder %v1362_v42, 8.507059e+37  ;;  %v1132_v33 = vrot.slane %v1131_v26, 4  ;;  %v1016_v11 = vmul.f32 1.442695, %v979_v27  ;;  %vm2360_vm9 = vmor %vm1358_vm3, %vm1359_vm6 }
 0x196   : > { %v1346_v14 = vsel %vm1345_vm5, %v1722_v36, %v1342_v56  ;;  %v939_v40 = vrot.slane %v938_v7, 1  ;;  %v1357_v9 = vadd.f32 %v2300_v29, %v1356_v30  ;;  %v1369_v34 = vmul.f32 %v1728_v37, %v2303_v54 }
 0x197   : > { %v1351_v28 = vsel %vm2316_vm2, %v1350_v24, %v1346_v14  ;;  %v942_v48 = vrot.slane %v941_v15, 4  ;;  %v1365_v38 = vor.u32 1.1754944e-38, %v1364_v57  ;;  %vm1373_vm8 = vweird.f32 %v2303_v54 }
 0x198   : > { %v1352_v35 = vmul.f32 %v2226_v62, %v1351_v28  ;;  %1729 = vrcp.f32 %v2338_v32  ;;  %v1337_v44 = vmul.f32 %v2209_v23, %v1336_v17  ;;  %v1370_v2 = vsub.f32 1.0, %v1369_v34 }
 0x199   : > { %v1377_v45 = vand.u32 2147483647, %v2303_v54  ;;  %v1379_v41 = vand.u32 2147483648, %v2303_v54  ;;  %v1133_v50 = vadd.f32 %v1132_v33, %v1131_v26  ;;  %1731 = vpow2.f32 %v1016_v11 }
 0x19a   : > { %v1513_v47 = vrot.slane %v1352_v35, 4  ;;  %v940_v4 = vmax.f32 %v938_v7, %v939_v40  ;;  %v1361_v23 = vsel %vm2360_vm9, %v2300_v29, %v1357_v9  ;;  %v1371_v36 = vmul.f32 %v1728_v37, %v1370_v2 }
 0x19b   : > { %vm1374_vm10 = vweird.f32 %v1728_v37  ;;  %v943_v43 = vmax.f32 %v941_v15, %v942_v48  ;;  %v1134_v53 = vrot.slane %v1133_v50, 2  ;;  %v2370_v55 = vadd.f32 %v792_v8, %v1918_v19 }
 0x19c   : > { %v1523_v52 = vsel %vm352_vm0, %v1337_v44, %v1513_v47  ;;  %v980_v31 = vsub.f32 %v2265_v10, %v940_v4  ;;  %v1372_v1 = vadd.f32 %v1728_v37, %v1371_v36  ;;  %vm1378_vm11 = vcmp.eq.f32.partialorder %v1377_v45, 8.507059e+37  ;;  %vm1375_vm12 = vmor %vm1373_vm8, %vm1374_vm10 }
 0x19d   : > { %1543 = vst [vmem:[%s2081_s10 + $0x28] sm:$0xff] %v1523_v52  ;;  %v1380_v58 = vor.u32 1.1754944e-38, %v1379_v41  ;;  %v944_v60 = vrot.slane %v943_v43, 2  ;;  %v1135_v29 = vadd.f32 %v1134_v53, %v1133_v50  ;;  %v948_v25 = vsel %vm352_vm0, %v2370_v55, -inf }
 0x19e   : > { %v2373_v61 = vpop.eup %1729  ;;  %v1018_v63 = vmul.f32 1.442695, %v980_v31  ;;  %v2380_v10 = vadd.f32 %v812_v51, %v1918_v19  ;;  %v1366_v42 = vsel %vm2342_vm7, %v1365_v38, %v1361_v23  ;;  %v1376_v49 = vsel %vm1375_vm12, %v1728_v37, %v1372_v1 }
 0x19f   : > { %v945_v5 = vmax.f32 %v943_v43, %v944_v60  ;;  %vm955_vm13 = vcmask 257024   ;;  %v2384_v6 = vpop.eup %1731  ;;  %v1381_v21 = vsel %vm1378_vm11, %v1380_v58, %v1376_v49  ;;  %v1136_v0 = vrot.slane %v1135_v29, 1 }
 0x1a0   : > { %1733 = vpow2.f32 %v1018_v63  ;;  %v949_v54 = vrot.slane %v948_v25, 4  ;;  %v1382_v12 = vmul.f32 %v2255_v22, %v1381_v21  ;;  %v1384_v18 = vmul.f32 %v2373_v61, %v2338_v32 }
 0x1a1   : > { %v1138_v19 = vsel %vm352_vm0, %v2384_v6, 0.0  ;;  %v946_v3 = vrot.slane %v945_v5, 1  ;;  %v2391_v24 = vadd.f32 %v1136_v0, %v1135_v29  ;;  %v956_v13 = vsel %vm955_vm13, %v2380_v10, -inf }
 0x1a2   : > { %v1139_v30 = vrot.slane %v1138_v19, 4  ;;  %v950_v57 = vmax.f32 %v948_v25, %v949_v54  ;;  %v1367_v56 = vmul.f32 %v2229_v59, %v1366_v42  ;;  %v1514_v26 = vrot.slane %v1382_v12, 4 }
 0x1a3   : > { %v947_v27 = vmax.f32 %v945_v5, %v946_v3  ;;  %v957_v22 = vrot.slane %v956_v13, 4  ;;  %1735 = vrcp.f32 %v2391_v24  ;;  %v1385_v17 = vsub.f32 1.0, %v1384_v18 }
 0x1a4   : > { %v1524_v7 = vsel %vm352_vm0, %v1367_v56, %v1514_v26  ;;  %v1140_v15 = vadd.f32 %v1139_v30, %v1138_v19  ;;  %v951_v39 = vrot.slane %v950_v57, 2  ;;  %v1392_v28 = vand.u32 2147483647, %v2338_v32 }
 0x1a5   : > { %v981_v37 = vsub.f32 %v2322_v46, %v947_v27  ;;  %1544 = vst [vmem:[%s2081_s10 + $0x30] sm:$0xff] %v1524_v7  ;;  %v958_v33 = vmax.f32 %v956_v13, %v957_v22  ;;  %v1386_v35 = vmul.f32 %v2373_v61, %v1385_v17  ;;  %vm1388_vm14 = vweird.f32 %v2338_v32 }
 0x1a6   : > { %v2399_v14 = vpop.eup %1733  ;;  %v1141_v11 = vrot.slane %v1140_v15, 2  ;;  %v952_v34 = vmax.f32 %v950_v57, %v951_v39  ;;  %v1394_v41 = vand.u32 2147483648, %v2338_v32  ;;  %vm2409_vm15 = vcmp.eq.f32.partialorder %v1392_v28, 8.507059e+37 }
 0x1a7   : > { %v1145_v59 = vsel %vm352_vm0, %v2399_v14, 0.0  ;;  %v1020_v40 = vmul.f32 1.442695, %v981_v37  ;;  %v959_v48 = vrot.slane %v958_v33, 2  ;;  %v1387_v36 = vadd.f32 %v2373_v61, %v1386_v35 }
 0x1a8   : > { %v1146_v9 = vrot.slane %v1145_v59, 4  ;;  %v1142_v38 = vadd.f32 %v1141_v11, %v1140_v15  ;;  %v953_v2 = vrot.slane %v952_v34, 1  ;;  %vm1389_vm1 = vweird.f32 %v2373_v61 }
 0x1a9   : > { %1737 = vpow2.f32 %v1020_v40  ;;  %v1736_v46 = vpop.eup %1735  ;;  %v960_v45 = vmax.f32 %v958_v33, %v959_v48  ;;  %v1409_v52 = vand.u32 2147483648, %v2391_v24  ;;  %v1407_v29 = vand.u32 2147483647, %v2391_v24  ;;  %vm2425_vm3 = vmor %vm1388_vm14, %vm1389_vm1 }
 0x1aa   : > { %v1147_v44 = vadd.f32 %v1146_v9, %v1145_v59  ;;  %v1399_v8 = vmul.f32 %v1736_v46, %v2391_v24  ;;  %v1143_v47 = vrot.slane %v1142_v38, 1  ;;  %v954_v4 = vmax.f32 %v952_v34, %v953_v2 }
 0x1ab   : > { %v961_v23 = vrot.slane %v960_v45, 1  ;;  %vm1404_vm2 = vweird.f32 %v1736_v46  ;;  %vm1403_vm4 = vweird.f32 %v2391_v24  ;;  %v1391_v49 = vsel %vm2425_vm3, %v2373_v61, %v1387_v36 }
 0x1ac   : > { %v1148_v50 = vrot.slane %v1147_v44, 2  ;;  %v1400_v43 = vsub.f32 1.0, %v1399_v8  ;;  %v2415_v51 = vadd.f32 %v1143_v47, %v1142_v38  ;;  %v982_v31 = vsub.f32 %v2370_v55, %v954_v4  ;;  %vm1405_vm5 = vmor %vm1403_vm4, %vm1404_vm2 }
 0x1ad   : > { %v962_v1 = vmax.f32 %v960_v45, %v961_v23  ;;  %v1395_v32 = vor.u32 1.1754944e-38, %v1394_v41  ;;  %v1410_v54 = vor.u32 1.1754944e-38, %v1409_v52  ;;  %vm1408_vm6 = vcmp.eq.f32.partialorder %v1407_v29, 8.507059e+37 }
 0x1ae   : > { %v1149_v53 = vadd.f32 %v1148_v50, %v1147_v44  ;;  %v1401_v60 = vmul.f32 %v1736_v46, %v1400_v43  ;;  %1739 = vrcp.f32 %v2415_v51  ;;  %v1022_v42 = vmul.f32 1.442695, %v982_v31 }
 0x1af   : > { %v2419_v58 = vpop.eup %1737  ;;  %v983_v0 = vsub.f32 %v2380_v10, %v962_v1  ;;  %v1396_v24 = vsel %vm2409_vm15, %v1395_v32, %v1391_v49  ;;  %vm1418_vm7 = vweird.f32 %v2415_v51  ;;  %v1424_v48 = vand.u32 2147483648, %v2415_v51 }
 0x1b0   : > { %v1150_v25 = vrot.slane %v1149_v53, 1  ;;  %v1152_v55 = vsel %vm352_vm0, %v2419_v58, 0.0  ;;  %v1402_v5 = vadd.f32 %v1736_v46, %v1401_v60  ;;  %1741 = vpow2.f32 %v1022_v42 }
 0x1b1   : > { %v1153_v21 = vrot.slane %v1152_v55, 4  ;;  %v1024_v3 = vmul.f32 1.442695, %v983_v0  ;;  %v1397_v56 = vmul.f32 %v2273_v16, %v1396_v24  ;;  %v1422_v44 = vand.u32 2147483647, %v2415_v51 }
 0x1b2   : > { %v1151_v12 = vadd.f32 %v1150_v25, %v1149_v53  ;;  %v1406_v18 = vsel %vm1405_vm5, %v1736_v46, %v1402_v5  ;;  %v1425_v4 = vor.u32 1.1754944e-38, %v1424_v48 }
 0x1b3   : > { %v1154_v19 = vadd.f32 %v1153_v21, %v1152_v55  ;;  %v1411_v30 = vsel %vm1408_vm6, %v1410_v54, %v1406_v18  ;;  %vm1423_vm14 = vcmp.eq.f32.partialorder %v1422_v44, 8.507059e+37 }
 0x1b4   : > { %1743 = vrcp.f32 %v1151_v12  ;;  %v1740_v61 = vpop.eup %1739  ;;  %v1412_v57 = vmul.f32 %v2326_v20, %v1411_v30  ;;  %v1439_v35 = vand.u32 2147483648, %v1151_v12  ;;  %v1437_v45 = vand.u32 2147483647, %v1151_v12 }
 0x1b5   : > { %v1155_v13 = vrot.slane %v1154_v19, 2  ;;  %1745 = vpow2.f32 %v1024_v3  ;;  %v1414_v10 = vmul.f32 %v1740_v61, %v2415_v51  ;;  %vm1419_vm8 = vweird.f32 %v1740_v61 }
 0x1b6   : > { %v1515_v26 = vrot.slane %v1412_v57, 4  ;;  %v2441_v22 = vpop.eup %1741  ;;  %vm2459_vm10 = vmor %vm1418_vm7, %vm1419_vm8  ;;  %vm1433_vm11 = vweird.f32 %v1151_v12  ;;  %v1440_v23 = vor.u32 1.1754944e-38, %v1439_v35  ;;  %vm1438_vm15 = vcmp.eq.f32.partialorder %v1437_v45, 8.507059e+37 }
 0x1b7   : > { %v1156_v27 = vadd.f32 %v1155_v13, %v1154_v19  ;;  %v1415_v7 = vsub.f32 1.0, %v1414_v10  ;;  %v1159_v37 = vsel %vm352_vm0, %v2441_v22, 0.0 }
 0x1b8   : > { %v1525_v17 = vsel %vm352_vm0, %v1397_v56, %v1515_v26  ;;  %v1160_v33 = vrot.slane %v1159_v37, 4 }
 0x1b9   : > { %v1157_v15 = vrot.slane %v1156_v27, 1  ;;  %1545 = vst [vmem:[%s2081_s10 + $0x38] sm:$0xff] %v1525_v17  ;;  %v1416_v20 = vmul.f32 %v1740_v61, %v1415_v7 }
 0x1ba   : > { %v1744_v39 = vpop.eup %1743  ;;  %v1161_v16 = vadd.f32 %v1160_v33, %v1159_v37 }
 0x1bb   : > { %v2447_v11 = vpop.eup %1745  ;;  %v1429_v59 = vmul.f32 %v1744_v39, %v1151_v12  ;;  %v2449_v40 = vadd.f32 %v1157_v15, %v1156_v27  ;;  %v1417_v9 = vadd.f32 %v1740_v61, %v1416_v20  ;;  %vm1434_vm9 = vweird.f32 %v1744_v39 }
 0x1bc   : > { %v1166_v28 = vsel %vm955_vm13, %v2447_v11, 0.0  ;;  %v1162_v38 = vrot.slane %v1161_v16, 2  ;;  %vm1435_vm12 = vmor %vm1433_vm11, %vm1434_vm9 }
 0x1bd   : > { %v1430_v34 = vsub.f32 1.0, %v1429_v59  ;;  %1747 = vrcp.f32 %v2449_v40  ;;  %v1167_v46 = vrot.slane %v1166_v28, 4  ;;  %v1421_v62 = vsel %vm2459_vm10, %v1740_v61, %v1417_v9 }
 0x1be   : > { %v1163_v8 = vadd.f32 %v1162_v38, %v1161_v16  ;;  %v1426_v53 = vsel %vm1423_vm14, %v1425_v4, %v1421_v62  ;;  %v1454_v19 = vand.u32 2147483648, %v2449_v40  ;;  %vm1448_vm2 = vweird.f32 %v2449_v40 }
 0x1bf   : > { %v1431_v2 = vmul.f32 %v1744_v39, %v1430_v34  ;;  %v1168_v47 = vadd.f32 %v1167_v46, %v1166_v28  ;;  %v1427_v25 = vmul.f32 %v2384_v6, %v1426_v53 }
 0x1c0   : > { %v1164_v36 = vrot.slane %v1163_v8, 1  ;;  %v1455_v10 = vor.u32 1.1754944e-38, %v1454_v19 }
 0x1c1   : > { %v1432_v50 = vadd.f32 %v1744_v39, %v1431_v2  ;;  %v1169_v43 = vrot.slane %v1168_v47, 2 }
 0x1c2   : > { %v1165_v60 = vadd.f32 %v1164_v36, %v1163_v8 }
 0x1c3   : > { %v1748_v52 = vpop.eup %1747  ;;  %v1436_v51 = vsel %vm1435_vm12, %v1744_v39, %v1432_v50  ;;  %v1170_v63 = vadd.f32 %v1169_v43, %v1168_v47 }
 0x1c4   : > { %v1441_v31 = vsel %vm1438_vm15, %v1440_v23, %v1436_v51  ;;  %v1444_v1 = vmul.f32 %v1748_v52, %v2449_v40  ;;  %1749 = vrcp.f32 %v1165_v60  ;;  %vm1449_vm1 = vweird.f32 %v1748_v52 }
 0x1c5   : > { %v1442_v29 = vmul.f32 %v2399_v14, %v1441_v31  ;;  %v1171_v49 = vrot.slane %v1170_v63, 1  ;;  %v1452_v14 = vand.u32 2147483647, %v2449_v40  ;;  %v1469_v3 = vand.u32 2147483648, %v1165_v60  ;;  %vm1450_vm4 = vmor %vm1448_vm2, %vm1449_vm1 }
 0x1c6   : > { %v1445_v42 = vsub.f32 1.0, %v1444_v1  ;;  %v1467_v30 = vand.u32 2147483647, %v1165_v60  ;;  %vm1463_vm5 = vweird.f32 %v1165_v60 }
 0x1c7   : > { %v1516_v55 = vrot.slane %v1442_v29, 4  ;;  %v1172_v21 = vadd.f32 %v1171_v49, %v1170_v63  ;;  %vm1453_vm6 = vcmp.eq.f32.partialorder %v1452_v14, 8.507059e+37  ;;  %v1470_v56 = vor.u32 1.1754944e-38, %v1469_v3 }
 0x1c8   : > { %v1446_v0 = vmul.f32 %v1748_v52, %v1445_v42  ;;  %vm1468_vm8 = vcmp.eq.f32.partialorder %v1467_v30, 8.507059e+37 }
 0x1c9   : > { %v1526_v5 = vsel %vm352_vm0, %v1427_v25, %v1516_v55  ;;  %1751 = vrcp.f32 %v1172_v21  ;;  %v1482_v7 = vand.u32 2147483647, %v1172_v21  ;;  %v1484_v17 = vand.u32 2147483648, %v1172_v21 }
 0x1ca   : > { %1546 = vst [vmem:[%s2081_s10 + $0x40] sm:$0xff] %v1526_v5  ;;  %v1750_v32 = vpop.eup %1749  ;;  %v1447_v12 = vadd.f32 %v1748_v52, %v1446_v0  ;;  %vm1478_vm10 = vweird.f32 %v1172_v21 }
 0x1cb   : > { %v1459_v54 = vmul.f32 %v1750_v32, %v1165_v60  ;;  %vm1464_vm3 = vweird.f32 %v1750_v32  ;;  %v1485_v16 = vor.u32 1.1754944e-38, %v1484_v17  ;;  %vm1483_vm12 = vcmp.eq.f32.partialorder %v1482_v7, 8.507059e+37 }
 0x1cc   : > { %v1451_v57 = vsel %vm1450_vm4, %v1748_v52, %v1447_v12  ;;  %vm1465_vm7 = vmor %vm1463_vm5, %vm1464_vm3 }
 0x1cd   : > { %v1460_v18 = vsub.f32 1.0, %v1459_v54  ;;  %v1456_v15 = vsel %vm1453_vm6, %v1455_v10, %v1451_v57 }
 0x1ce   : > { %v1457_v59 = vmul.f32 %v2419_v58, %v1456_v15 }
 0x1cf   : > { %v1752_v6 = vpop.eup %1751  ;;  %v1461_v24 = vmul.f32 %v1750_v32, %v1460_v18 }
 0x1d0   : > { %v1474_v61 = vmul.f32 %v1752_v6, %v1172_v21  ;;  %vm1479_vm9 = vweird.f32 %v1752_v6 }
 0x1d1   : > { %v1462_v13 = vadd.f32 %v1750_v32, %v1461_v24  ;;  %vm1480_vm11 = vmor %vm1478_vm10, %vm1479_vm9 }
 0x1d2   : > { %v1475_v26 = vsub.f32 1.0, %v1474_v61 }
 0x1d3   : > { %v1466_v27 = vsel %vm1465_vm7, %v1750_v32, %v1462_v13 }
 0x1d4   : > { %v1471_v37 = vsel %vm1468_vm8, %v1470_v56, %v1466_v27  ;;  %v1476_v39 = vmul.f32 %v1752_v6, %v1475_v26 }
 0x1d5   : > { %v1472_v20 = vmul.f32 %v2441_v22, %v1471_v37 }
 0x1d6   : > { %v1477_v33 = vadd.f32 %v1752_v6, %v1476_v39 }
 0x1d7   : > { %v1517_v40 = vrot.slane %v1472_v20, 4 }
 0x1d8   : > { %v1481_v28 = vsel %vm1480_vm11, %v1752_v6, %v1477_v33 }
 0x1d9   : > { %v1527_v9 = vsel %vm352_vm0, %v1457_v59, %v1517_v40  ;;  %v1486_v34 = vsel %vm1483_vm12, %v1485_v16, %v1481_v28 }
 0x1da   : > { %1547 = vst [vmem:[%s2081_s10 + $0x48] sm:$0xff] %v1527_v9  ;;  %v1487_v48 = vmul.f32 %v2447_v11, %v1486_v34 }
 0x1dc   : > { %1548 = vst.msk [vmem:[%s2081_s10 + $0x50] sm:$0xf] %vm955_vm13, %v1487_v48 }
 0x1dd PF: > { %s15_s18 = sadd.s32 1, %s1759_s18  }
 0x1de   : > { %p12_p4 = scmp.ge.s32.totalorder %s15_s18, 4  }
 0x1e0   :  { %14 = sbr.rel (!%p12_p4) target bundleno = 1 (0x1), region = 73 }

// kernel: output_block_forward.2
= control target key start
LH: loop header
LB: loop body
LE: loop exit
PB: predicated region body
PF: predicated region fallthrough
CT: control target
= control target key end

     0   :  { %s4577_s15 = smov 0   ;;  %s9301_s0 = inlined_call_operand.vmem [shape: bf16[2,8,3328], index: 0, kind: input, shape index: {}]   ;;  %s9302_s1 = inlined_call_operand.vmem [shape: bf16[4,216], index: 1, kind: input, shape index: {}]   ;;  %s9303_s2 = inlined_call_operand.vmem [shape: f32[1,2592], index: 2, kind: input, shape index: {}]   ;;  %s9304_s3 = inlined_call_operand.vmem [shape: bf16[2,4,2592], index: 3, kind: output, shape index: {0}]   ;;  %s9305_s4 = inlined_call_operand.vmem [shape: f32[2,4,2], index: 4, kind: output, shape index: {1}]  }
   0x1 LB: > { %s4455_s16 = sadd.s32 4294967295, %s4527_s15   ;;  %p4459_p0 = scmp.ge.s32.totalorder %s4527_s15, 1  ;;  %s4527_s15 = sphi %s4577_s15, %s15_s15  }
   0x2   : > { %p165_p1 = scmp.lt.s32.totalorder %s4527_s15, 3 }
   0x4   : > { %p166_p2 = pnand %p4459_p0, %p165_p1 }
   0x6   : > { %169 = sbr.rel (%p166_p2) target bundleno = 2389 (0x955), region = 32 }
   0xb   : > { %p195_p3 = scmp.lt.s32.totalorder %s4455_s16, 1  ;;  %s4529_s21 = smov 127   ;;  %vm393_vm0 = vcmask 1031168   ;;  %vm456_vm1 = vcmask 900096   ;;  %vm1249_vm2 = vcmask 1043456   ;;  %vm519_vm3 = vcmask 891904  }
   0xc   : > { %s4530_s22 = smov 126   ;;  %s4531_s23 = smov 110   ;;  %vm582_vm4 = vcmask 883712   ;;  %vm645_vm5 = vcmask 752640   ;;  %vm708_vm6 = vcmask 744448   ;;  %vm1031_vm7 = vcmask 343040  }
   0xd   : > { %s10194_s16 = smov (!%p195_p3, %s4455_s16), 1  ;;  %s4532_s24 = smov 109   ;;  %vm1094_vm8 = vcmask 334848   ;;  %vm1227_vm9 = vcmask 195584   ;;  %vm1157_vm10 = vcmask 326656   ;;  %vm968_vm11 = vcmask 474112  }
   0xe   : > { %s4486_s17 = smul.u32 104, %s10194_s16  ;;  %s4533_s25 = smov 108   ;;  %vm905_vm12 = vcmask 482304   ;;  %vm842_vm13 = vcmask 490496   ;;  %vm771_vm14 = vcmask 736256   ;;  %vm330_vm15 = vcmask 1039360  }
   0xf   : > { %s4534_s26 = smov 92   ;;  %s4535_s27 = smov 91  }
  0x10   : > { %s4591_s20 = scalar_lea.vmem %s9301_s0, %s4486_s17  ;;  %s4536_s28 = smov 90  }
  0x11   : > { %v212_v0 = vld [vmem:[%s4591_s20 + $0x10] sm:$0xff]  ;;  %v211_v1 = vld [vmem:[%s4591_s20 + $0x8] sm:$0xff]  ;;  %v210_v2 = vld [vmem:[%s4591_s20] sm:$0xff]  ;;  %s4537_s29 = smov 60   ;;  %s4538_s30 = smov 59  }
  0x12   : > { %v250_v3 = vunpack.c.l.b16 %v212_v0  ;;  %v248_v4 = vunpack.c.l.b16 %v211_v1  ;;  %v246_v5 = vunpack.c.l.b16 %v210_v2  ;;  %v251_v9 = vunpack.c.h.b16 %v212_v0  ;;  %v214_v15 = vld [vmem:[%s4591_s20 + $0x20] sm:$0xff]  ;;  %v213_v16 = vld [vmem:[%s4591_s20 + $0x18] sm:$0xff]  ;;  %v215_v23 = vld [vmem:[%s4591_s20 + $0x28] sm:$0xff]  ;;  %s4539_s5 = smov 58   ;;  %s4540_s6 = smov 42  }
  0x13   : > { %v249_v10 = vunpack.c.h.b16 %v211_v1  ;;  %v247_v11 = vunpack.c.h.b16 %v210_v2  ;;  %v254_v17 = vunpack.c.l.b16 %v214_v15  ;;  %v253_v18 = vunpack.c.h.b16 %v213_v16  ;;  %v217_v30 = vld [vmem:[%s4591_s20 + $0x38] sm:$0xff]  ;;  %v216_v31 = vld [vmem:[%s4591_s20 + $0x30] sm:$0xff]  ;;  %v218_v38 = vld [vmem:[%s4591_s20 + $0x40] sm:$0xff]  ;;  %s4541_s7 = smov 41   ;;  %s4542_s8 = smov 40  }
  0x14   : > { %v4596_v6 = vpack.c.b16 %v250_v3, %v250_v3  ;;  %v4598_v7 = vpack.c.b16 %v248_v4, %v248_v4  ;;  %v4600_v8 = vpack.c.b16 %v246_v5, %v246_v5  ;;  %v4608_v12 = vpack.c.b16 %v251_v9, %v251_v9  ;;  %v220_v45 = vld [vmem:[%s4591_s20 + $0x50] sm:$0xf]  ;;  %v219_v46 = vld [vmem:[%s4591_s20 + $0x48] sm:$0xff]  ;;  %s4543_s9 = smov 24   ;;  %s4544_s10 = smov 97  }
  0x15   : > { %v4610_v13 = vpack.c.b16 %v249_v10, %v249_v10  ;;  %v4612_v14 = vpack.c.b16 %v247_v11, %v247_v11  ;;  %v252_v19 = vunpack.c.l.b16 %v213_v16  ;;  %v4622_v20 = vpack.c.b16 %v254_v17, %v254_v17  ;;  %s4545_s11 = smov 96   ;;  %s4546_s12 = smov 95  }
  0x16   : > { %9517 = vst [vmem:[#allocation2_spill] sm:$0xff] %v4596_v6  ;;  %296 = vrot.lane.b32.xlu2 %v4596_v6, %s4529_s21  ;;  %292 = vrot.lane.b32.xlu1 %v4598_v7, %s4529_s21  ;;  %v4624_v21 = vpack.c.b16 %v253_v18, %v253_v18  ;;  %v257_v24 = vunpack.c.h.b16 %v215_v23  ;;  %v256_v25 = vunpack.c.l.b16 %v215_v23  ;;  %v255_v26 = vunpack.c.h.b16 %v214_v15  ;;  %s4547_s13 = smov 79   ;;  %s4548_s14 = smov 78  }
  0x17   : > { %9518 = vst [vmem:[#allocation3_spill] sm:$0xff] %v4598_v7  ;;  %288 = vrot.lane.b32.xlu0 %v4600_v8, %s4529_s21  ;;  %v4626_v22 = vpack.c.b16 %v252_v19, %v252_v19  ;;  %v260_v32 = vunpack.c.l.b16 %v217_v30  ;;  %v259_v33 = vunpack.c.h.b16 %v216_v31  ;;  %v258_v34 = vunpack.c.l.b16 %v216_v31  ;;  %s4549_s17 = smov 77   ;;  %s4550_s18 = smov 61  }
  0x18   : > { %9519 = vst [vmem:[#allocation4_spill] sm:$0xff] %v4600_v8  ;;  %v4635_v27 = vpack.c.b16 %v257_v24, %v257_v24  ;;  %v4637_v28 = vpack.c.b16 %v256_v25, %v256_v25  ;;  %v4639_v29 = vpack.c.b16 %v255_v26, %v255_v26  ;;  %v263_v39 = vunpack.c.h.b16 %v218_v38  ;;  %s4551_s19 = smov 23  }
  0x19   : > { %9520 = vst [vmem:[#allocation5_spill] sm:$0xff] %v4608_v12  ;;  %v4649_v35 = vpack.c.b16 %v260_v32, %v260_v32  ;;  %v4651_v36 = vpack.c.b16 %v259_v33, %v259_v33  ;;  %v4653_v37 = vpack.c.b16 %v258_v34, %v258_v34  ;;  %v262_v40 = vunpack.c.l.b16 %v218_v38 }
  0x1a   : > { %9521 = vst [vmem:[#allocation6_spill] sm:$0xff] %v4610_v13  ;;  %v261_v41 = vunpack.c.h.b16 %v217_v30  ;;  %v4662_v42 = vpack.c.b16 %v263_v39, %v263_v39  ;;  %v266_v47 = vunpack.c.l.b16 %v220_v45  ;;  %v265_v48 = vunpack.c.h.b16 %v219_v46 }
  0x1b   : > { %9522 = vst [vmem:[#allocation7_spill] sm:$0xff] %v4612_v14  ;;  %v4664_v43 = vpack.c.b16 %v262_v40, %v262_v40  ;;  %v264_v49 = vunpack.c.l.b16 %v219_v46 }
  0x1c   : > { %9523 = vst [vmem:[#allocation8_spill] sm:$0xff] %v4622_v20  ;;  %v4666_v44 = vpack.c.b16 %v261_v41, %v261_v41  ;;  %v4676_v50 = vpack.c.b16 %v266_v47, %v266_v47  ;;  %v4678_v51 = vpack.c.b16 %v265_v48, %v265_v48 }
  0x1d   : > { %9524 = vst [vmem:[#allocation9_spill] sm:$0xff] %v4624_v21  ;;  %v4680_v52 = vpack.c.b16 %v264_v49, %v264_v49 }
  0x1e   : > { %298 = vrot.lane.b32.xlu2 %v4608_v12, %s4529_s21  ;;  %294 = vrot.lane.b32.xlu1 %v4610_v13, %s4529_s21  ;;  %9525 = vst [vmem:[#allocation10_spill] sm:$0xff] %v4626_v22 }
  0x1f   : > { %290 = vrot.lane.b32.xlu0 %v4612_v14, %s4529_s21  ;;  %9526 = vst [vmem:[#allocation11_spill] sm:$0xff] %v4635_v27 }
  0x20   : > { %9527 = vst [vmem:[#allocation12_spill] sm:$0xff] %v4637_v28 }
  0x21   : > { %9528 = vst [vmem:[#allocation13_spill] sm:$0xff] %v4639_v29 }
  0x22   : > { %9529 = vst [vmem:[#allocation14_spill] sm:$0xff] %v4649_v35 }
  0x23   : > { %9530 = vst [vmem:[#allocation15_spill] sm:$0xff] %v4651_v36 }
  0x24   : > { %9531 = vst [vmem:[#allocation16_spill] sm:$0xff] %v4653_v37 }
  0x25   : > { %9532 = vst [vmem:[#allocation17_spill] sm:$0xff] %v4662_v42 }
  0x26   : > { %304 = vrot.lane.b32.xlu2 %v4622_v20, %s4529_s21  ;;  %302 = vrot.lane.b32.xlu1 %v4624_v21, %s4529_s21  ;;  %9533 = vst [vmem:[#allocation18_spill] sm:$0xff] %v4664_v43 }
  0x27   : > { %300 = vrot.lane.b32.xlu0 %v4626_v22, %s4529_s21  ;;  %9534 = vst [vmem:[#allocation19_spill] sm:$0xff] %v4666_v44 }
  0x28   : > { %9535 = vst [vmem:[#allocation20_spill] sm:$0xff] %v4676_v50 }
  0x29   : > { %9536 = vst [vmem:[#allocation21_spill] sm:$0xff] %v4678_v51 }
  0x2a   : > { %9537 = vst [vmem:[#allocation22_spill] sm:$0xff] %v4680_v52 }
  0x2e   : > { %310 = vrot.lane.b32.xlu2 %v4635_v27, %s4529_s21  ;;  %308 = vrot.lane.b32.xlu1 %v4637_v28, %s4529_s21 }
  0x2f   : > { %306 = vrot.lane.b32.xlu0 %v4639_v29, %s4529_s21 }
  0x36   : > { %316 = vrot.lane.b32.xlu2 %v4649_v35, %s4529_s21  ;;  %314 = vrot.lane.b32.xlu1 %v4651_v36, %s4529_s21 }
  0x37   : > { %312 = vrot.lane.b32.xlu0 %v4653_v37, %s4529_s21 }
  0x3e   : > { %322 = vrot.lane.b32.xlu2 %v4662_v42, %s4529_s21  ;;  %320 = vrot.lane.b32.xlu1 %v4664_v43, %s4529_s21 }
  0x3f   : > { %318 = vrot.lane.b32.xlu0 %v4666_v44, %s4529_s21 }
  0x46   : > { %328 = vrot.lane.b32.xlu2 %v4676_v50, %s4529_s21  ;;  %326 = vrot.lane.b32.xlu1 %v4678_v51, %s4529_s21 }
  0x47   : > { %324 = vrot.lane.b32.xlu0 %v4680_v52, %s4529_s21 }
  0x4e   : > { %355 = vrot.lane.b32.xlu2 %v4598_v7, %s4530_s22  ;;  %353 = vrot.lane.b32.xlu1 %v4612_v14, %s4530_s22 }
  0x4f   : > { %351 = vrot.lane.b32.xlu0 %v4600_v8, %s4530_s22 }
  0x56   : > { %361 = vrot.lane.b32.xlu2 %v4608_v12, %s4530_s22  ;;  %359 = vrot.lane.b32.xlu1 %v4596_v6, %s4530_s22 }
  0x57   : > { %357 = vrot.lane.b32.xlu0 %v4610_v13, %s4530_s22 }
  0x5e   : > { %367 = vrot.lane.b32.xlu2 %v4622_v20, %s4530_s22  ;;  %365 = vrot.lane.b32.xlu1 %v4624_v21, %s4530_s22 }
  0x5f   : > { %363 = vrot.lane.b32.xlu0 %v4626_v22, %s4530_s22 }
  0x66   : > { %373 = vrot.lane.b32.xlu2 %v4635_v27, %s4530_s22  ;;  %371 = vrot.lane.b32.xlu1 %v4637_v28, %s4530_s22 }
  0x67   : > { %369 = vrot.lane.b32.xlu0 %v4639_v29, %s4530_s22 }
  0x6e   : > { %379 = vrot.lane.b32.xlu2 %v4649_v35, %s4530_s22  ;;  %377 = vrot.lane.b32.xlu1 %v4651_v36, %s4530_s22 }
  0x6f   : > { %375 = vrot.lane.b32.xlu0 %v4653_v37, %s4530_s22 }
  0x70   : > { %v4703_v53 = vpop.permute.xlu2 %296 }
  0x71   : > { %9538 = vst [vmem:[#allocation23_spill] sm:$0xff] %v4703_v53 }
  0x76   : > { %385 = vrot.lane.b32.xlu2 %v4662_v42, %s4530_s22  ;;  %383 = vrot.lane.b32.xlu1 %v4664_v43, %s4530_s22 }
  0x77   : > { %381 = vrot.lane.b32.xlu0 %v4666_v44, %s4530_s22 }
  0x78   : > { %v4708_v54 = vpop.permute.xlu2 %298 }
  0x79   : > { %9539 = vst [vmem:[#allocation24_spill] sm:$0xff] %v4708_v54 }
  0x7e   : > { %391 = vrot.lane.b32.xlu2 %v4676_v50, %s4530_s22  ;;  %389 = vrot.lane.b32.xlu1 %v4678_v51, %s4530_s22 }
  0x7f   : > { %387 = vrot.lane.b32.xlu0 %v4680_v52, %s4530_s22  ;;  %s4487_s22 = smul.u32 42, %s10194_s16 }
  0x80   : > { %v4713_v55 = vpop.permute.xlu2 %304 }
  0x81   : > { %9540 = vst [vmem:[#allocation25_spill] sm:$0xff] %v4713_v55 }
  0x86   : > { %418 = vrot.lane.b32.xlu2 %v4598_v7, %s4531_s23  ;;  %416 = vrot.lane.b32.xlu1 %v4612_v14, %s4531_s23 }
  0x87   : > { %414 = vrot.lane.b32.xlu0 %v4600_v8, %s4531_s23 }
  0x88   : > { %v4721_v56 = vpop.permute.xlu2 %310  ;;  %v4723_v57 = vpop.permute.xlu1 %292 }
  0x89   : > { %9541 = vst [vmem:[#allocation26_spill] sm:$0xff] %v4721_v56  ;;  %v4725_v58 = vpop.permute.xlu0 %288 }
  0x8a   : > { %9542 = vst [vmem:[#allocation27_spill] sm:$0xff] %v4723_v57 }
  0x8b   : > { %9543 = vst [vmem:[#allocation28_spill] sm:$0xff] %v4725_v58 }
  0x8e   : > { %424 = vrot.lane.b32.xlu2 %v4608_v12, %s4531_s23  ;;  %422 = vrot.lane.b32.xlu1 %v4596_v6, %s4531_s23 }
  0x8f   : > { %420 = vrot.lane.b32.xlu0 %v4610_v13, %s4531_s23 }
  0x90   : > { %v4733_v59 = vpop.permute.xlu2 %316  ;;  %v4735_v60 = vpop.permute.xlu1 %294 }
  0x91   : > { %9544 = vst [vmem:[#allocation29_spill] sm:$0xff] %v4733_v59  ;;  %v4737_v61 = vpop.permute.xlu0 %290 }
  0x92   : > { %9545 = vst [vmem:[#allocation30_spill] sm:$0xff] %v4735_v60 }
  0x93   : > { %9546 = vst [vmem:[#allocation31_spill] sm:$0xff] %v4737_v61 }
  0x96   : > { %430 = vrot.lane.b32.xlu2 %v4622_v20, %s4531_s23  ;;  %428 = vrot.lane.b32.xlu1 %v4624_v21, %s4531_s23 }
  0x97   : > { %426 = vrot.lane.b32.xlu0 %v4626_v22, %s4531_s23 }
  0x98   : > { %v4745_v62 = vpop.permute.xlu2 %322  ;;  %v4747_v63 = vpop.permute.xlu1 %302 }
  0x99   : > { %9547 = vst [vmem:[#allocation32_spill] sm:$0xff] %v4745_v62  ;;  %v4749_v0 = vpop.permute.xlu0 %300 }
  0x9a   : > { %9548 = vst [vmem:[#allocation33_spill] sm:$0xff] %v4747_v63 }
  0x9b   : > { %9549 = vst [vmem:[#allocation34_spill] sm:$0xff] %v4749_v0 }
  0x9e   : > { %436 = vrot.lane.b32.xlu2 %v4635_v27, %s4531_s23  ;;  %434 = vrot.lane.b32.xlu1 %v4637_v28, %s4531_s23 }
  0x9f   : > { %432 = vrot.lane.b32.xlu0 %v4639_v29, %s4531_s23 }
  0xa0   : > { %v4757_v1 = vpop.permute.xlu2 %328  ;;  %v4759_v2 = vpop.permute.xlu1 %308 }
  0xa1   : > { %9550 = vst [vmem:[#allocation35_spill] sm:$0xff] %v4757_v1  ;;  %v4761_v3 = vpop.permute.xlu0 %306 }
  0xa2   : > { %9551 = vst [vmem:[#allocation36_spill] sm:$0xff] %v4759_v2 }
  0xa3   : > { %9552 = vst [vmem:[#allocation37_spill] sm:$0xff] %v4761_v3 }
  0xa6   : > { %442 = vrot.lane.b32.xlu2 %v4649_v35, %s4531_s23  ;;  %440 = vrot.lane.b32.xlu1 %v4651_v36, %s4531_s23 }
  0xa7   : > { %438 = vrot.lane.b32.xlu0 %v4653_v37, %s4531_s23 }
  0xa8   : > { %v4769_v4 = vpop.permute.xlu2 %355  ;;  %v4771_v5 = vpop.permute.xlu1 %314 }
  0xa9   : > { %9553 = vst [vmem:[#allocation38_spill] sm:$0xff] %v4769_v4  ;;  %v4773_v9 = vpop.permute.xlu0 %312 }
  0xaa   : > { %9554 = vst [vmem:[#allocation39_spill] sm:$0xff] %v4771_v5 }
  0xab   : > { %9555 = vst [vmem:[#allocation40_spill] sm:$0xff] %v4773_v9 }
  0xae   : > { %448 = vrot.lane.b32.xlu2 %v4662_v42, %s4531_s23  ;;  %446 = vrot.lane.b32.xlu1 %v4664_v43, %s4531_s23 }
  0xaf   : > { %444 = vrot.lane.b32.xlu0 %v4666_v44, %s4531_s23 }
  0xb0   : > { %v4781_v10 = vpop.permute.xlu2 %361  ;;  %v4783_v11 = vpop.permute.xlu1 %320 }
  0xb1   : > { %9556 = vst [vmem:[#allocation41_spill] sm:$0xff] %v4783_v11  ;;  %v4785_v15 = vpop.permute.xlu0 %318 }
  0xb2   : > { %9557 = vst [vmem:[#allocation42_spill] sm:$0xff] %v4785_v15 }
  0xb6   : > { %454 = vrot.lane.b32.xlu2 %v4676_v50, %s4531_s23  ;;  %452 = vrot.lane.b32.xlu1 %v4678_v51, %s4531_s23 }
  0xb7   : > { %450 = vrot.lane.b32.xlu0 %v4680_v52, %s4531_s23 }
  0xb8   : > { %v4793_v16 = vpop.permute.xlu2 %367  ;;  %v4795_v17 = vpop.permute.xlu1 %326 }
  0xb9   : > { %9558 = vst [vmem:[#allocation43_spill] sm:$0xff] %v4795_v17  ;;  %v4797_v18 = vpop.permute.xlu0 %324 }
  0xba   : > { %9559 = vst [vmem:[#allocation44_spill] sm:$0xff] %v4797_v18 }
  0xbe   : > { %481 = vrot.lane.b32.xlu2 %v4598_v7, %s4532_s24  ;;  %479 = vrot.lane.b32.xlu1 %v4612_v14, %s4532_s24 }
  0xbf   : > { %477 = vrot.lane.b32.xlu0 %v4600_v8, %s4532_s24 }
  0xc0   : > { %v4805_v19 = vpop.permute.xlu2 %373  ;;  %v4807_v23 = vpop.permute.xlu1 %353 }
  0xc1   : > { %9560 = vst [vmem:[#allocation45_spill] sm:$0xff] %v4807_v23  ;;  %v4809_v24 = vpop.permute.xlu0 %351 }
  0xc2   : > { %9561 = vst [vmem:[#allocation46_spill] sm:$0xff] %v4809_v24 }
  0xc6   : > { %487 = vrot.lane.b32.xlu2 %v4608_v12, %s4532_s24  ;;  %485 = vrot.lane.b32.xlu1 %v4596_v6, %s4532_s24 }
  0xc7   : > { %483 = vrot.lane.b32.xlu0 %v4610_v13, %s4532_s24 }
  0xc8   : > { %v4817_v25 = vpop.permute.xlu2 %379  ;;  %v4819_v26 = vpop.permute.xlu1 %359 }
  0xc9   : > { %9562 = vst [vmem:[#allocation47_spill] sm:$0xff] %v4819_v26  ;;  %v4821_v30 = vpop.permute.xlu0 %357  ;;  %v398_v59 = vsel %vm393_vm0, %v4819_v26, %v4781_v10 }
  0xca   : > { %9563 = vst [vmem:[#allocation48_spill] sm:$0xff] %v4821_v30  ;;  %v396_v2 = vsel %vm393_vm0, %v4769_v4, %v4821_v30 }
  0xce   : > { %493 = vrot.lane.b32.xlu2 %v4622_v20, %s4532_s24  ;;  %491 = vrot.lane.b32.xlu1 %v4624_v21, %s4532_s24 }
  0xcf   : > { %489 = vrot.lane.b32.xlu0 %v4626_v22, %s4532_s24 }
  0xd0   : > { %v4829_v31 = vpop.permute.xlu2 %385  ;;  %v366_v32 = vpop.permute.xlu1 %365 }
  0xd1   : > { %v364_v33 = vpop.permute.xlu0 %363  ;;  %v401_v60 = vsel %vm393_vm0, %v366_v32, %v4793_v16 }
  0xd6   : > { %499 = vrot.lane.b32.xlu2 %v4635_v27, %s4532_s24  ;;  %497 = vrot.lane.b32.xlu1 %v4637_v28, %s4532_s24 }
  0xd7   : > { %495 = vrot.lane.b32.xlu0 %v4639_v29, %s4532_s24 }
  0xd8   : > { %v4837_v34 = vpop.permute.xlu2 %391  ;;  %v4839_v38 = vpop.permute.xlu1 %371 }
  0xd9   : > { %9564 = vst [vmem:[#allocation49_spill] sm:$0xff] %v4837_v34  ;;  %v4841_v39 = vpop.permute.xlu0 %369 }
  0xde   : > { %505 = vrot.lane.b32.xlu2 %v4649_v35, %s4532_s24  ;;  %503 = vrot.lane.b32.xlu1 %v4651_v36, %s4532_s24 }
  0xdf   : > { %501 = vrot.lane.b32.xlu0 %v4653_v37, %s4532_s24 }
  0xe0   : > { %v4849_v40 = vpop.permute.xlu2 %418  ;;  %v4851_v41 = vpop.permute.xlu1 %377 }
  0xe1   : > { %9565 = vst [vmem:[#allocation50_spill] sm:$0xff] %v4849_v40  ;;  %v4853_v45 = vpop.permute.xlu0 %375 }
  0xe6   : > { %511 = vrot.lane.b32.xlu2 %v4662_v42, %s4532_s24  ;;  %509 = vrot.lane.b32.xlu1 %v4664_v43, %s4532_s24 }
  0xe7   : > { %507 = vrot.lane.b32.xlu0 %v4666_v44, %s4532_s24 }
  0xe8   : > { %v425_v46 = vpop.permute.xlu2 %424  ;;  %v4861_v47 = vpop.permute.xlu1 %383 }
  0xe9   : > { %v4863_v48 = vpop.permute.xlu0 %381 }
  0xee   : > { %517 = vrot.lane.b32.xlu2 %v4676_v50, %s4532_s24  ;;  %515 = vrot.lane.b32.xlu1 %v4678_v51, %s4532_s24 }
  0xef   : > { %513 = vrot.lane.b32.xlu0 %v4680_v52, %s4532_s24 }
  0xf0   : > { %v431_v49 = vpop.permute.xlu2 %430  ;;  %v4871_v1 = vpop.permute.xlu1 %389 }
  0xf1   : > { %v4873_v17 = vpop.permute.xlu0 %387 }
  0xf6   : > { %544 = vrot.lane.b32.xlu2 %v4598_v7, %s4533_s25  ;;  %542 = vrot.lane.b32.xlu1 %v4612_v14, %s4533_s25 }
  0xf7   : > { %540 = vrot.lane.b32.xlu0 %v4600_v8, %s4533_s25 }
  0xf8   : > { %v437_v62 = vpop.permute.xlu2 %436  ;;  %v4881_v18 = vpop.permute.xlu1 %416 }
  0xf9   : > { %9566 = vst [vmem:[#allocation51_spill] sm:$0xff] %v4881_v18  ;;  %v4883_v11 = vpop.permute.xlu0 %414 }
  0xfa   : > { %9567 = vst [vmem:[#allocation52_spill] sm:$0xff] %v4883_v11 }
  0xfe   : > { %550 = vrot.lane.b32.xlu2 %v4608_v12, %s4533_s25  ;;  %548 = vrot.lane.b32.xlu1 %v4596_v6, %s4533_s25 }
  0xff   : > { %546 = vrot.lane.b32.xlu0 %v4610_v13, %s4533_s25 }
 0x100   : > { %v4891_v15 = vpop.permute.xlu2 %442  ;;  %v4893_v5 = vpop.permute.xlu1 %422 }
 0x101   : > { %9568 = vst [vmem:[#allocation53_spill] sm:$0xff] %v4893_v5  ;;  %v461_v9 = vsel %vm456_vm1, %v4893_v5, %v425_v46  ;;  %v4900_v56 = vpop.permute.xlu0 %420 }
 0x102   : > { %9569 = vst [vmem:[#allocation54_spill] sm:$0xff] %v4900_v56  ;;  %v459_v3 = vsel %vm456_vm1, %v4849_v40, %v4900_v56  ;;  %v4909_v55 = vsel %vm1249_vm2, %v398_v59, %v461_v9  ;;  %v399_v59 = vsel %vm393_vm0, %v4781_v10, %v364_v33  ;;  %v400_v9 = vsel %vm393_vm0, %v364_v33, %v366_v32 }
 0x103   : > { %9570 = vst [vmem:[#allocation55_spill] sm:$0xff] %v4909_v55  ;;  %v4912_v63 = vsel %vm1249_vm2, %v396_v2, %v459_v3  ;;  %v403_v33 = vsel %vm393_vm0, %v4841_v39, %v4839_v38 }
 0x104   : > { %9571 = vst [vmem:[#allocation56_spill] sm:$0xff] %v4912_v63 }
 0x106   : > { %556 = vrot.lane.b32.xlu2 %v4622_v20, %s4533_s25  ;;  %554 = vrot.lane.b32.xlu1 %v4624_v21, %s4533_s25 }
 0x107   : > { %552 = vrot.lane.b32.xlu0 %v4626_v22, %s4533_s25 }
 0x108   : > { %v4920_v0 = vpop.permute.xlu2 %448  ;;  %v429_v54 = vpop.permute.xlu1 %428 }
 0x109   : > { %v464_v2 = vsel %vm456_vm1, %v429_v54, %v431_v49  ;;  %v427_v3 = vpop.permute.xlu0 %426 }
 0x10a   : > { %v462_v55 = vsel %vm456_vm1, %v425_v46, %v427_v3  ;;  %v463_v63 = vsel %vm456_vm1, %v427_v3, %v429_v54  ;;  %v4931_v53 = vsel %vm1249_vm2, %v401_v60, %v464_v2  ;;  %v402_v60 = vsel %vm393_vm0, %v4793_v16, %v4841_v39 }
 0x10b   : > { %9572 = vst [vmem:[#allocation57_spill] sm:$0xff] %v4931_v53  ;;  %v4934_v30 = vsel %vm1249_vm2, %v399_v59, %v462_v55  ;;  %v4937_v26 = vsel %vm1249_vm2, %v400_v9, %v463_v63  ;;  %v404_v55 = vsel %vm393_vm0, %v4839_v38, %v4805_v19  ;;  %v407_v39 = vsel %vm393_vm0, %v4851_v41, %v4817_v25 }
 0x10c   : > { %9573 = vst [vmem:[#allocation58_spill] sm:$0xff] %v4934_v30 }
 0x10d   : > { %9574 = vst [vmem:[#allocation59_spill] sm:$0xff] %v4937_v26 }
 0x10e   : > { %562 = vrot.lane.b32.xlu2 %v4635_v27, %s4533_s25  ;;  %560 = vrot.lane.b32.xlu1 %v4637_v28, %s4533_s25 }
 0x10f   : > { %558 = vrot.lane.b32.xlu0 %v4639_v29, %s4533_s25 }
 0x110   : > { %v4945_v10 = vpop.permute.xlu2 %454  ;;  %v435_v54 = vpop.permute.xlu1 %434 }
 0x111   : > { %9575 = vst [vmem:[#allocation60_spill] sm:$0xff] %v4945_v10  ;;  %v467_v63 = vsel %vm456_vm1, %v435_v54, %v437_v62  ;;  %v433_v32 = vpop.permute.xlu0 %432 }
 0x112   : > { %v465_v46 = vsel %vm456_vm1, %v431_v49, %v433_v32  ;;  %v466_v59 = vsel %vm456_vm1, %v433_v32, %v435_v54  ;;  %v4960_v2 = vsel %vm1249_vm2, %v404_v55, %v467_v63  ;;  %v405_v49 = vsel %vm393_vm0, %v4805_v19, %v4853_v45 }
 0x113   : > { %9576 = vst [vmem:[#allocation61_spill] sm:$0xff] %v4960_v2  ;;  %v4963_v3 = vsel %vm1249_vm2, %v402_v60, %v465_v46  ;;  %v4966_v9 = vsel %vm1249_vm2, %v403_v33, %v466_v59  ;;  %v406_v60 = vsel %vm393_vm0, %v4853_v45, %v4851_v41  ;;  %v410_v45 = vsel %vm393_vm0, %v4861_v47, %v4829_v31 }
 0x114   : > { %9577 = vst [vmem:[#allocation62_spill] sm:$0xff] %v4963_v3  ;;  %v408_v59 = vsel %vm393_vm0, %v4817_v25, %v4863_v48 }
 0x115   : > { %9578 = vst [vmem:[#allocation63_spill] sm:$0xff] %v4966_v9 }
 0x116   : > { %568 = vrot.lane.b32.xlu2 %v4649_v35, %s4533_s25  ;;  %566 = vrot.lane.b32.xlu1 %v4651_v36, %s4533_s25 }
 0x117   : > { %564 = vrot.lane.b32.xlu0 %v4653_v37, %s4533_s25 }
 0x118   : > { %v4974_v16 = vpop.permute.xlu2 %481  ;;  %v441_v38 = vpop.permute.xlu1 %440 }
 0x119   : > { %9579 = vst [vmem:[#allocation64_spill] sm:$0xff] %v4974_v16  ;;  %v470_v54 = vsel %vm456_vm1, %v441_v38, %v4891_v15  ;;  %v439_v55 = vpop.permute.xlu0 %438 }
 0x11a   : > { %v468_v63 = vsel %vm456_vm1, %v437_v62, %v439_v55  ;;  %v469_v32 = vsel %vm456_vm1, %v439_v55, %v441_v38  ;;  %v4990_v33 = vsel %vm1249_vm2, %v407_v39, %v470_v54 }
 0x11b   : > { %9580 = vst [vmem:[#allocation65_spill] sm:$0xff] %v4990_v33  ;;  %v4993_v46 = vsel %vm1249_vm2, %v405_v49, %v468_v63  ;;  %v4996_v19 = vsel %vm1249_vm2, %v406_v60, %v469_v32  ;;  %v409_v49 = vsel %vm393_vm0, %v4863_v48, %v4861_v47  ;;  %v413_v48 = vsel %vm393_vm0, %v4871_v1, %v4837_v34 }
 0x11c   : > { %9581 = vst [vmem:[#allocation66_spill] sm:$0xff] %v4993_v46  ;;  %v411_v32 = vsel %vm393_vm0, %v4829_v31, %v4873_v17 }
 0x11d   : > { %9582 = vst [vmem:[#allocation67_spill] sm:$0xff] %v4996_v19 }
 0x11e   : > { %574 = vrot.lane.b32.xlu2 %v4662_v42, %s4533_s25  ;;  %572 = vrot.lane.b32.xlu1 %v4664_v43, %s4533_s25 }
 0x11f   : > { %570 = vrot.lane.b32.xlu0 %v4666_v44, %s4533_s25 }
 0x120   : > { %v5004_v62 = vpop.permute.xlu2 %487  ;;  %v447_v41 = vpop.permute.xlu1 %446 }
 0x121   : > { %v473_v38 = vsel %vm456_vm1, %v447_v41, %v4920_v0  ;;  %v445_v39 = vpop.permute.xlu0 %444 }
 0x122   : > { %v471_v54 = vsel %vm456_vm1, %v4891_v15, %v445_v39  ;;  %v472_v55 = vsel %vm456_vm1, %v445_v39, %v447_v41  ;;  %v5021_v60 = vsel %vm1249_vm2, %v410_v45, %v473_v38 }
 0x123   : > { %9583 = vst [vmem:[#allocation68_spill] sm:$0xff] %v5021_v60  ;;  %v5024_v63 = vsel %vm1249_vm2, %v408_v59, %v471_v54  ;;  %v5027_v25 = vsel %vm1249_vm2, %v409_v49, %v472_v55  ;;  %v412_v59 = vsel %vm393_vm0, %v4873_v17, %v4871_v1 }
 0x124   : > { %9584 = vst [vmem:[#allocation69_spill] sm:$0xff] %v5024_v63 }
 0x125   : > { %9585 = vst [vmem:[#allocation70_spill] sm:$0xff] %v5027_v25 }
 0x126   : > { %580 = vrot.lane.b32.xlu2 %v4676_v50, %s4533_s25  ;;  %578 = vrot.lane.b32.xlu1 %v4678_v51, %s4533_s25 }
 0x127   : > { %576 = vrot.lane.b32.xlu0 %v4680_v52, %s4533_s25  ;;  %s8602_s25 = scalar_lea.vmem %s9304_s3, %s4487_s22 }
 0x128   : > { %v5035_v15 = vpop.permute.xlu2 %493  ;;  %v453_v47 = vpop.permute.xlu1 %452 }
 0x129   : > { %v476_v41 = vsel %vm456_vm1, %v453_v47, %v4945_v10  ;;  %v451_v45 = vpop.permute.xlu0 %450 }
 0x12a   : > { %v474_v38 = vsel %vm456_vm1, %v4920_v0, %v451_v45  ;;  %v475_v39 = vsel %vm456_vm1, %v451_v45, %v453_v47  ;;  %v5052_v49 = vsel %vm1249_vm2, %v413_v48, %v476_v41 }
 0x12b   : > { %9586 = vst [vmem:[#allocation71_spill] sm:$0xff] %v5052_v49  ;;  %v5055_v54 = vsel %vm1249_vm2, %v411_v32, %v474_v38  ;;  %v5058_v31 = vsel %vm1249_vm2, %v412_v59, %v475_v39 }
 0x12c   : > { %9587 = vst [vmem:[#allocation72_spill] sm:$0xff] %v5055_v54 }
 0x12d   : > { %9588 = vst [vmem:[#allocation73_spill] sm:$0xff] %v5058_v31 }
 0x12e   : > { %607 = vrot.lane.b32.xlu2 %v4598_v7, %s4534_s26  ;;  %605 = vrot.lane.b32.xlu1 %v4612_v14, %s4534_s26 }
 0x12f   : > { %603 = vrot.lane.b32.xlu0 %v4600_v8, %s4534_s26 }
 0x130   : > { %v5066_v0 = vpop.permute.xlu2 %499  ;;  %v5068_v1 = vpop.permute.xlu1 %479 }
 0x131   : > { %9589 = vst [vmem:[#allocation74_spill] sm:$0xff] %v5068_v1  ;;  %v5070_v17 = vpop.permute.xlu0 %477 }
 0x132   : > { %9590 = vst [vmem:[#allocation75_spill] sm:$0xff] %v5070_v17 }
 0x136   : > { %613 = vrot.lane.b32.xlu2 %v4608_v12, %s4534_s26  ;;  %611 = vrot.lane.b32.xlu1 %v4596_v6, %s4534_s26 }
 0x137   : > { %609 = vrot.lane.b32.xlu0 %v4610_v13, %s4534_s26 }
 0x138   : > { %v5078_v55 = vpop.permute.xlu2 %505  ;;  %v5080_v47 = vpop.permute.xlu1 %485 }
 0x139   : > { %9591 = vst [vmem:[#allocation76_spill] sm:$0xff] %v5080_v47  ;;  %v5082_v48 = vpop.permute.xlu0 %483  ;;  %v524_v53 = vsel %vm519_vm3, %v5080_v47, %v5004_v62 }
 0x13a   : > { %9592 = vst [vmem:[#allocation77_spill] sm:$0xff] %v5082_v48  ;;  %v522_v56 = vsel %vm519_vm3, %v4974_v16, %v5082_v48 }
 0x13e   : > { %619 = vrot.lane.b32.xlu2 %v4622_v20, %s4534_s26  ;;  %617 = vrot.lane.b32.xlu1 %v4624_v21, %s4534_s26 }
 0x13f   : > { %615 = vrot.lane.b32.xlu0 %v4626_v22, %s4534_s26 }
 0x140   : > { %v5090_v32 = vpop.permute.xlu2 %511  ;;  %v492_v41 = vpop.permute.xlu1 %491 }
 0x141   : > { %v490_v45 = vpop.permute.xlu0 %489 }
 0x146   : > { %625 = vrot.lane.b32.xlu2 %v4635_v27, %s4534_s26  ;;  %623 = vrot.lane.b32.xlu1 %v4637_v28, %s4534_s26 }
 0x147   : > { %621 = vrot.lane.b32.xlu0 %v4639_v29, %s4534_s26 }
 0x148   : > { %v5098_v59 = vpop.permute.xlu2 %517  ;;  %v5100_v38 = vpop.permute.xlu1 %497 }
 0x149   : > { %9593 = vst [vmem:[#allocation78_spill] sm:$0xff] %v5098_v59  ;;  %v5102_v39 = vpop.permute.xlu0 %495 }
 0x14e   : > { %631 = vrot.lane.b32.xlu2 %v4649_v35, %s4534_s26  ;;  %629 = vrot.lane.b32.xlu1 %v4651_v36, %s4534_s26 }
 0x14f   : > { %627 = vrot.lane.b32.xlu0 %v4653_v37, %s4534_s26 }
 0x150   : > { %v5110_v34 = vpop.permute.xlu2 %544  ;;  %v5112_v10 = vpop.permute.xlu1 %503 }
 0x151   : > { %9594 = vst [vmem:[#allocation79_spill] sm:$0xff] %v5110_v34  ;;  %v5114_v49 = vpop.permute.xlu0 %501 }
 0x156   : > { %637 = vrot.lane.b32.xlu2 %v4662_v42, %s4534_s26  ;;  %635 = vrot.lane.b32.xlu1 %v4664_v43, %s4534_s26 }
 0x157   : > { %633 = vrot.lane.b32.xlu0 %v4666_v44, %s4534_s26 }
 0x158   : > { %v551_v31 = vpop.permute.xlu2 %550  ;;  %v5122_v54 = vpop.permute.xlu1 %509 }
 0x159   : > { %v5124_v60 = vpop.permute.xlu0 %507 }
 0x15e   : > { %643 = vrot.lane.b32.xlu2 %v4676_v50, %s4534_s26  ;;  %641 = vrot.lane.b32.xlu1 %v4678_v51, %s4534_s26 }
 0x15f   : > { %639 = vrot.lane.b32.xlu0 %v4680_v52, %s4534_s26 }
 0x160   : > { %v557_v25 = vpop.permute.xlu2 %556  ;;  %v5132_v63 = vpop.permute.xlu1 %515 }
 0x161   : > { %v5134_v33 = vpop.permute.xlu0 %513 }
 0x166   : > { %670 = vrot.lane.b32.xlu2 %v4598_v7, %s4535_s27  ;;  %668 = vrot.lane.b32.xlu1 %v4612_v14, %s4535_s27 }
 0x167   : > { %666 = vrot.lane.b32.xlu0 %v4600_v8, %s4535_s27 }
 0x168   : > { %v563_v19 = vpop.permute.xlu2 %562  ;;  %v5142_v46 = vpop.permute.xlu1 %542 }
 0x169   : > { %9595 = vst [vmem:[#allocation80_spill] sm:$0xff] %v5142_v46  ;;  %v5144_v2 = vpop.permute.xlu0 %540 }
 0x16a   : > { %9596 = vst [vmem:[#allocation81_spill] sm:$0xff] %v5144_v2 }
 0x16e   : > { %676 = vrot.lane.b32.xlu2 %v4608_v12, %s4535_s27  ;;  %674 = vrot.lane.b32.xlu1 %v4596_v6, %s4535_s27 }
 0x16f   : > { %672 = vrot.lane.b32.xlu0 %v4610_v13, %s4535_s27 }
 0x170   : > { %v5152_v9 = vpop.permute.xlu2 %568  ;;  %v5154_v3 = vpop.permute.xlu1 %548 }
 0x171   : > { %9597 = vst [vmem:[#allocation82_spill] sm:$0xff] %v5154_v3  ;;  %v587_v26 = vsel %vm582_vm4, %v5154_v3, %v551_v31  ;;  %v5161_v30 = vpop.permute.xlu0 %546 }
 0x172   : > { %9598 = vst [vmem:[#allocation83_spill] sm:$0xff] %v5161_v30  ;;  %v585_v5 = vsel %vm582_vm4, %v5110_v34, %v5161_v30  ;;  %v5170_v58 = vsel %vm1249_vm2, %v524_v53, %v587_v26  ;;  %v527_v30 = vsel %vm519_vm3, %v492_v41, %v5035_v15  ;;  %v525_v53 = vsel %vm519_vm3, %v5004_v62, %v490_v45 }
 0x173   : > { %9599 = vst [vmem:[#allocation84_spill] sm:$0xff] %v5170_v58  ;;  %v5173_v61 = vsel %vm1249_vm2, %v522_v56, %v585_v5  ;;  %v526_v26 = vsel %vm519_vm3, %v490_v45, %v492_v41  ;;  %v529_v41 = vsel %vm519_vm3, %v5102_v39, %v5100_v38 }
 0x174   : > { %9600 = vst [vmem:[#allocation85_spill] sm:$0xff] %v5173_v61 }
 0x176   : > { %682 = vrot.lane.b32.xlu2 %v4622_v20, %s4535_s27  ;;  %680 = vrot.lane.b32.xlu1 %v4624_v21, %s4535_s27 }
 0x177   : > { %678 = vrot.lane.b32.xlu0 %v4626_v22, %s4535_s27 }
 0x178   : > { %v5181_v48 = vpop.permute.xlu2 %574  ;;  %v555_v47 = vpop.permute.xlu1 %554 }
 0x179   : > { %v590_v56 = vsel %vm582_vm4, %v555_v47, %v557_v25  ;;  %v553_v5 = vpop.permute.xlu0 %552 }
 0x17a   : > { %v588_v58 = vsel %vm582_vm4, %v551_v31, %v553_v5  ;;  %v589_v61 = vsel %vm582_vm4, %v553_v5, %v555_v47  ;;  %v5192_v3 = vsel %vm1249_vm2, %v527_v30, %v590_v56 }
 0x17b   : > { %9601 = vst [vmem:[#allocation86_spill] sm:$0xff] %v5192_v3  ;;  %v5195_v57 = vsel %vm1249_vm2, %v525_v53, %v588_v58  ;;  %v5198_v4 = vsel %vm1249_vm2, %v526_v26, %v589_v61  ;;  %v530_v58 = vsel %vm519_vm3, %v5100_v38, %v5066_v0  ;;  %v528_v61 = vsel %vm519_vm3, %v5035_v15, %v5102_v39 }
 0x17c   : > { %9602 = vst [vmem:[#allocation87_spill] sm:$0xff] %v5195_v57  ;;  %v533_v38 = vsel %vm519_vm3, %v5112_v10, %v5078_v55  ;;  %v531_v39 = vsel %vm519_vm3, %v5066_v0, %v5114_v49 }
 0x17d   : > { %9603 = vst [vmem:[#allocation88_spill] sm:$0xff] %v5198_v4 }
 0x17e   : > { %688 = vrot.lane.b32.xlu2 %v4635_v27, %s4535_s27  ;;  %686 = vrot.lane.b32.xlu1 %v4637_v28, %s4535_s27 }
 0x17f   : > { %684 = vrot.lane.b32.xlu0 %v4639_v29, %s4535_s27 }
 0x180   : > { %v5206_v62 = vpop.permute.xlu2 %580  ;;  %v561_v31 = vpop.permute.xlu1 %560 }
 0x181   : > { %9604 = vst [vmem:[#allocation89_spill] sm:$0xff] %v5206_v62  ;;  %v593_v30 = vsel %vm582_vm4, %v561_v31, %v563_v19  ;;  %v559_v47 = vpop.permute.xlu0 %558 }
 0x182   : > { %v591_v45 = vsel %vm582_vm4, %v557_v25, %v559_v47  ;;  %v592_v53 = vsel %vm582_vm4, %v559_v47, %v561_v31  ;;  %v5221_v56 = vsel %vm1249_vm2, %v530_v58, %v593_v30 }
 0x183   : > { %9605 = vst [vmem:[#allocation90_spill] sm:$0xff] %v5221_v56  ;;  %v5224_v5 = vsel %vm1249_vm2, %v528_v61, %v591_v45  ;;  %v5227_v26 = vsel %vm1249_vm2, %v529_v41, %v592_v53  ;;  %v532_v61 = vsel %vm519_vm3, %v5114_v49, %v5112_v10  ;;  %v536_v49 = vsel %vm519_vm3, %v5122_v54, %v5090_v32 }
 0x184   : > { %9606 = vst [vmem:[#allocation91_spill] sm:$0xff] %v5224_v5  ;;  %v534_v53 = vsel %vm519_vm3, %v5078_v55, %v5124_v60 }
 0x185   : > { %9607 = vst [vmem:[#allocation92_spill] sm:$0xff] %v5227_v26 }
 0x186   : > { %694 = vrot.lane.b32.xlu2 %v4649_v35, %s4535_s27  ;;  %692 = vrot.lane.b32.xlu1 %v4651_v36, %s4535_s27 }
 0x187   : > { %690 = vrot.lane.b32.xlu0 %v4653_v37, %s4535_s27 }
 0x188   : > { %v5235_v25 = vpop.permute.xlu2 %607  ;;  %v567_v15 = vpop.permute.xlu1 %566 }
 0x189   : > { %9608 = vst [vmem:[#allocation93_spill] sm:$0xff] %v5235_v25  ;;  %v596_v31 = vsel %vm582_vm4, %v567_v15, %v5152_v9  ;;  %v565_v58 = vpop.permute.xlu0 %564 }
 0x18a   : > { %v594_v30 = vsel %vm582_vm4, %v563_v19, %v565_v58  ;;  %v595_v47 = vsel %vm582_vm4, %v565_v58, %v567_v15  ;;  %v5251_v41 = vsel %vm1249_vm2, %v533_v38, %v596_v31 }
 0x18b   : > { %9609 = vst [vmem:[#allocation94_spill] sm:$0xff] %v5251_v41  ;;  %v5254_v45 = vsel %vm1249_vm2, %v531_v39, %v594_v30  ;;  %v5257_v0 = vsel %vm1249_vm2, %v532_v61, %v595_v47  ;;  %v535_v39 = vsel %vm519_vm3, %v5124_v60, %v5122_v54  ;;  %v539_v54 = vsel %vm519_vm3, %v5132_v63, %v5098_v59 }
 0x18c   : > { %9610 = vst [vmem:[#allocation95_spill] sm:$0xff] %v5254_v45  ;;  %v537_v47 = vsel %vm519_vm3, %v5090_v32, %v5134_v33 }
 0x18d   : > { %9611 = vst [vmem:[#allocation96_spill] sm:$0xff] %v5257_v0 }
 0x18e   : > { %700 = vrot.lane.b32.xlu2 %v4662_v42, %s4535_s27  ;;  %698 = vrot.lane.b32.xlu1 %v4664_v43, %s4535_s27 }
 0x18f   : > { %696 = vrot.lane.b32.xlu0 %v4666_v44, %s4535_s27 }
 0x190   : > { %v5265_v10 = vpop.permute.xlu2 %613  ;;  %v573_v19 = vpop.permute.xlu1 %572 }
 0x191   : > { %v599_v15 = vsel %vm582_vm4, %v573_v19, %v5181_v48  ;;  %v571_v38 = vpop.permute.xlu0 %570 }
 0x192   : > { %v597_v31 = vsel %vm582_vm4, %v5152_v9, %v571_v38  ;;  %v598_v58 = vsel %vm582_vm4, %v571_v38, %v573_v19  ;;  %v5282_v61 = vsel %vm1249_vm2, %v536_v49, %v599_v15 }
 0x193   : > { %9612 = vst [vmem:[#allocation97_spill] sm:$0xff] %v5282_v61  ;;  %v5285_v30 = vsel %vm1249_vm2, %v534_v53, %v597_v31  ;;  %v5288_v55 = vsel %vm1249_vm2, %v535_v39, %v598_v58  ;;  %v538_v53 = vsel %vm519_vm3, %v5134_v33, %v5132_v63 }
 0x194   : > { %9613 = vst [vmem:[#allocation98_spill] sm:$0xff] %v5285_v30 }
 0x195   : > { %9614 = vst [vmem:[#allocation99_spill] sm:$0xff] %v5288_v55 }
 0x196   : > { %706 = vrot.lane.b32.xlu2 %v4676_v50, %s4535_s27  ;;  %704 = vrot.lane.b32.xlu1 %v4678_v51, %s4535_s27 }
 0x197   : > { %702 = vrot.lane.b32.xlu0 %v4680_v52, %s4535_s27 }
 0x198   : > { %v5296_v9 = vpop.permute.xlu2 %619  ;;  %v579_v60 = vpop.permute.xlu1 %578 }
 0x199   : > { %v602_v19 = vsel %vm582_vm4, %v579_v60, %v5206_v62  ;;  %v577_v49 = vpop.permute.xlu0 %576 }
 0x19a   : > { %v600_v15 = vsel %vm582_vm4, %v5181_v48, %v577_v49  ;;  %v601_v38 = vsel %vm582_vm4, %v577_v49, %v579_v60  ;;  %v5313_v39 = vsel %vm1249_vm2, %v539_v54, %v602_v19 }
 0x19b   : > { %9615 = vst [vmem:[#allocation100_spill] sm:$0xff] %v5313_v39  ;;  %v5316_v31 = vsel %vm1249_vm2, %v537_v47, %v600_v15  ;;  %v5319_v32 = vsel %vm1249_vm2, %v538_v53, %v601_v38 }
 0x19c   : > { %9616 = vst [vmem:[#allocation101_spill] sm:$0xff] %v5316_v31 }
 0x19d   : > { %9617 = vst [vmem:[#allocation102_spill] sm:$0xff] %v5319_v32 }
 0x19e   : > { %733 = vrot.lane.b32.xlu2 %v4598_v7, %s4536_s28  ;;  %731 = vrot.lane.b32.xlu1 %v4612_v14, %s4536_s28 }
 0x19f   : > { %729 = vrot.lane.b32.xlu0 %v4600_v8, %s4536_s28 }
 0x1a0   : > { %v5327_v33 = vpop.permute.xlu2 %625  ;;  %v5329_v63 = vpop.permute.xlu1 %605 }
 0x1a1   : > { %9618 = vst [vmem:[#allocation103_spill] sm:$0xff] %v5329_v63  ;;  %v5331_v48 = vpop.permute.xlu0 %603 }
 0x1a2   : > { %9619 = vst [vmem:[#allocation104_spill] sm:$0xff] %v5331_v48 }
 0x1a6   : > { %739 = vrot.lane.b32.xlu2 %v4608_v12, %s4536_s28  ;;  %737 = vrot.lane.b32.xlu1 %v4596_v6, %s4536_s28 }
 0x1a7   : > { %735 = vrot.lane.b32.xlu0 %v4610_v13, %s4536_s28 }
 0x1a8   : > { %v5339_v58 = vpop.permute.xlu2 %631  ;;  %v5341_v60 = vpop.permute.xlu1 %611 }
 0x1a9   : > { %9620 = vst [vmem:[#allocation105_spill] sm:$0xff] %v5341_v60  ;;  %v5343_v54 = vpop.permute.xlu0 %609  ;;  %v650_v5 = vsel %vm645_vm5, %v5341_v60, %v5265_v10 }
 0x1aa   : > { %9621 = vst [vmem:[#allocation106_spill] sm:$0xff] %v5343_v54  ;;  %v648_v14 = vsel %vm645_vm5, %v5235_v25, %v5343_v54 }
 0x1ae   : > { %745 = vrot.lane.b32.xlu2 %v4622_v20, %s4536_s28  ;;  %743 = vrot.lane.b32.xlu1 %v4624_v21, %s4536_s28 }
 0x1af   : > { %741 = vrot.lane.b32.xlu0 %v4626_v22, %s4536_s28 }
 0x1b0   : > { %v5351_v47 = vpop.permute.xlu2 %637  ;;  %v618_v19 = vpop.permute.xlu1 %617 }
 0x1b1   : > { %v616_v49 = vpop.permute.xlu0 %615 }
 0x1b6   : > { %751 = vrot.lane.b32.xlu2 %v4635_v27, %s4536_s28  ;;  %749 = vrot.lane.b32.xlu1 %v4637_v28, %s4536_s28 }
 0x1b7   : > { %747 = vrot.lane.b32.xlu0 %v4639_v29, %s4536_s28 }
 0x1b8   : > { %v5359_v53 = vpop.permute.xlu2 %643  ;;  %v5361_v15 = vpop.permute.xlu1 %623 }
 0x1b9   : > { %9622 = vst [vmem:[#allocation107_spill] sm:$0xff] %v5359_v53  ;;  %v5363_v38 = vpop.permute.xlu0 %621 }
 0x1be   : > { %757 = vrot.lane.b32.xlu2 %v4649_v35, %s4536_s28  ;;  %755 = vrot.lane.b32.xlu1 %v4651_v36, %s4536_s28 }
 0x1bf   : > { %753 = vrot.lane.b32.xlu0 %v4653_v37, %s4536_s28 }
 0x1c0   : > { %v5371_v59 = vpop.permute.xlu2 %670  ;;  %v5373_v62 = vpop.permute.xlu1 %629 }
 0x1c1   : > { %v5375_v39 = vpop.permute.xlu0 %627 }
 0x1c6   : > { %763 = vrot.lane.b32.xlu2 %v4662_v42, %s4536_s28  ;;  %761 = vrot.lane.b32.xlu1 %v4664_v43, %s4536_s28 }
 0x1c7   : > { %759 = vrot.lane.b32.xlu0 %v4666_v44, %s4536_s28 }
 0x1c8   : > { %v677_v32 = vpop.permute.xlu2 %676  ;;  %v5383_v31 = vpop.permute.xlu1 %635 }
 0x1c9   : > { %v5385_v61 = vpop.permute.xlu0 %633 }
 0x1ce   : > { %769 = vrot.lane.b32.xlu2 %v4676_v50, %s4536_s28  ;;  %767 = vrot.lane.b32.xlu1 %v4678_v51, %s4536_s28 }
 0x1cf   : > { %765 = vrot.lane.b32.xlu0 %v4680_v52, %s4536_s28 }
 0x1d0   : > { %v683_v55 = vpop.permute.xlu2 %682  ;;  %v5393_v30 = vpop.permute.xlu1 %641 }
 0x1d1   : > { %v5395_v41 = vpop.permute.xlu0 %639 }
 0x1d6   : > { %804 = vrot.lane.b32.xlu2 %v4596_v6, %s4537_s29  ;;  %802 = vrot.lane.b32.xlu1 %v4610_v13, %s4537_s29 }
 0x1d7   : > { %800 = vrot.lane.b32.xlu0 %v4598_v7, %s4537_s29 }
 0x1d8   : > { %v689_v50 = vpop.permute.xlu2 %688  ;;  %v5403_v0 = vpop.permute.xlu1 %668 }
 0x1d9   : > { %v5405_v45 = vpop.permute.xlu0 %666 }
 0x1da   : > { %9623 = vst [vmem:[#allocation108_spill] sm:$0xff] %v5405_v45 }
 0x1de   : > { %810 = vrot.lane.b32.xlu2 %v4624_v21, %s4537_s29  ;;  %808 = vrot.lane.b32.xlu1 %v4626_v22, %s4537_s29 }
 0x1df   : > { %806 = vrot.lane.b32.xlu0 %v4608_v12, %s4537_s29 }
 0x1e0   : > { %v5413_v56 = vpop.permute.xlu2 %694  ;;  %v5415_v26 = vpop.permute.xlu1 %674 }
 0x1e1   : > { %9624 = vst [vmem:[#allocation109_spill] sm:$0xff] %v5415_v26  ;;  %v713_v3 = vsel %vm708_vm6, %v5415_v26, %v677_v32  ;;  %v5422_v4 = vpop.permute.xlu0 %672 }
 0x1e2   : > { %9625 = vst [vmem:[#allocation110_spill] sm:$0xff] %v5422_v4  ;;  %v711_v57 = vsel %vm708_vm6, %v5371_v59, %v5422_v4  ;;  %v5428_v8 = vsel %vm1249_vm2, %v650_v5, %v713_v3  ;;  %v653_v5 = vsel %vm645_vm5, %v618_v19, %v5296_v9 }
 0x1e3   : > { %9626 = vst [vmem:[#allocation111_spill] sm:$0xff] %v5428_v8  ;;  %v5434_v11 = vsel %vm1249_vm2, %v648_v14, %v711_v57  ;;  %v651_v8 = vsel %vm645_vm5, %v5265_v10, %v616_v49 }
 0x1e4   : > { %9627 = vst [vmem:[#allocation112_spill] sm:$0xff] %v5434_v11  ;;  %v652_v11 = vsel %vm645_vm5, %v616_v49, %v618_v19  ;;  %v655_v19 = vsel %vm645_vm5, %v5363_v38, %v5361_v15 }
 0x1e6   : > { %816 = vrot.lane.b32.xlu2 %v4637_v28, %s4537_s29  ;;  %814 = vrot.lane.b32.xlu1 %v4639_v29, %s4537_s29 }
 0x1e7   : > { %812 = vrot.lane.b32.xlu0 %v4622_v20, %s4537_s29 }
 0x1e8   : > { %v5442_v60 = vpop.permute.xlu2 %700  ;;  %v681_v3 = vpop.permute.xlu1 %680 }
 0x1e9   : > { %v716_v14 = vsel %vm708_vm6, %v681_v3, %v683_v55  ;;  %v679_v57 = vpop.permute.xlu0 %678 }
 0x1ea   : > { %v714_v54 = vsel %vm708_vm6, %v677_v32, %v679_v57  ;;  %v715_v4 = vsel %vm708_vm6, %v679_v57, %v681_v3  ;;  %v5453_v26 = vsel %vm1249_vm2, %v653_v5, %v716_v14  ;;  %v657_v57 = vsel %vm645_vm5, %v5327_v33, %v5375_v39 }
 0x1eb   : > { %9628 = vst [vmem:[#allocation113_spill] sm:$0xff] %v5453_v26  ;;  %v5456_v24 = vsel %vm1249_vm2, %v651_v8, %v714_v54  ;;  %v5459_v23 = vsel %vm1249_vm2, %v652_v11, %v715_v4  ;;  %v656_v8 = vsel %vm645_vm5, %v5361_v15, %v5327_v33  ;;  %v654_v4 = vsel %vm645_vm5, %v5296_v9, %v5363_v38 }
 0x1ec   : > { %9629 = vst [vmem:[#allocation114_spill] sm:$0xff] %v5456_v24  ;;  %v659_v38 = vsel %vm645_vm5, %v5373_v62, %v5339_v58 }
 0x1ed   : > { %9630 = vst [vmem:[#allocation115_spill] sm:$0xff] %v5459_v23 }
 0x1ee   : > { %822 = vrot.lane.b32.xlu2 %v4651_v36, %s4537_s29  ;;  %820 = vrot.lane.b32.xlu1 %v4653_v37, %s4537_s29 }
 0x1ef   : > { %818 = vrot.lane.b32.xlu0 %v4635_v27, %s4537_s29 }
 0x1f0   : > { %v5467_v10 = vpop.permute.xlu2 %706  ;;  %v687_v32 = vpop.permute.xlu1 %686 }
 0x1f1   : > { %9631 = vst [vmem:[#allocation116_spill] sm:$0xff] %v5467_v10  ;;  %v719_v11 = vsel %vm708_vm6, %v687_v32, %v689_v50  ;;  %v685_v54 = vpop.permute.xlu0 %684 }
 0x1f2   : > { %v717_v49 = vsel %vm708_vm6, %v683_v55, %v685_v54  ;;  %v718_v3 = vsel %vm708_vm6, %v685_v54, %v687_v32  ;;  %v5482_v5 = vsel %vm1249_vm2, %v656_v8, %v719_v11 }
 0x1f3   : > { %9632 = vst [vmem:[#allocation117_spill] sm:$0xff] %v5482_v5  ;;  %v5485_v14 = vsel %vm1249_vm2, %v654_v4, %v717_v49  ;;  %v5488_v9 = vsel %vm1249_vm2, %v655_v19, %v718_v3  ;;  %v658_v4 = vsel %vm645_vm5, %v5375_v39, %v5373_v62  ;;  %v222_v19 = vld [vmem:[%s4591_s20 + $0x58] sm:$0xf]  ;;  %v221_v3 = vld [vmem:[%s4591_s20 + $0x50] sm:$0xff]  ;;  %v662_v39 = vsel %vm645_vm5, %v5383_v31, %v5351_v47 }
 0x1f4   : > { %9633 = vst [vmem:[#allocation118_spill] sm:$0xff] %v5485_v14  ;;  %v794_v62 = vunpack.c.l.b16 %v221_v3 }
 0x1f5   : > { %9634 = vst [vmem:[#allocation119_spill] sm:$0xff] %v5488_v9  ;;  %v796_v9 = vunpack.c.l.b16 %v222_v19 }
 0x1f6   : > { %828 = vrot.lane.b32.xlu2 %v4664_v43, %s4537_s29  ;;  %826 = vrot.lane.b32.xlu1 %v4666_v44, %s4537_s29 }
 0x1f7   : > { %824 = vrot.lane.b32.xlu0 %v4649_v35, %s4537_s29 }
 0x1f8   : > { %v5496_v55 = vpop.permute.xlu2 %733  ;;  %v693_v15 = vpop.permute.xlu1 %692 }
 0x1f9   : > { %9635 = vst [vmem:[#allocation120_spill] sm:$0xff] %v5496_v55  ;;  %v722_v32 = vsel %vm708_vm6, %v693_v15, %v5413_v56  ;;  %v691_v8 = vpop.permute.xlu0 %690 }
 0x1fa   : > { %v720_v11 = vsel %vm708_vm6, %v689_v50, %v691_v8  ;;  %v721_v54 = vsel %vm708_vm6, %v691_v8, %v693_v15  ;;  %v5513_v49 = vsel %vm1249_vm2, %v659_v38, %v722_v32  ;;  %v795_v50 = vunpack.c.h.b16 %v221_v3 }
 0x1fb   : > { %9636 = vst [vmem:[#allocation121_spill] sm:$0xff] %v5513_v49  ;;  %v5517_v5 = vsel %vm1249_vm2, %v657_v57, %v720_v11  ;;  %v5520_v33 = vsel %vm1249_vm2, %v658_v4, %v721_v54  ;;  %v660_v57 = vsel %vm645_vm5, %v5339_v58, %v5385_v61  ;;  %v661_v32 = vsel %vm645_vm5, %v5385_v61, %v5383_v31 }
 0x1fc   : > { %9637 = vst [vmem:[#allocation122_spill] sm:$0xff] %v5517_v5  ;;  %v5541_v11 = vpack.c.b16 %v796_v9, %v796_v9  ;;  %v5546_v3 = vpack.c.b16 %v795_v50, %v795_v50  ;;  %v5551_v58 = vpack.c.b16 %v794_v62, %v794_v62  ;;  %v665_v50 = vsel %vm645_vm5, %v5393_v30, %v5359_v53 }
 0x1fd   : > { %9638 = vst [vmem:[#allocation123_spill] sm:$0xff] %v5520_v33  ;;  %v663_v62 = vsel %vm645_vm5, %v5351_v47, %v5395_v41 }
 0x1fe   : > { %834 = vrot.lane.b32.xlu2 %v4678_v51, %s4537_s29  ;;  %832 = vrot.lane.b32.xlu1 %v4680_v52, %s4537_s29  ;;  %9640 = vst [vmem:[#allocation125_spill] sm:$0xff] %v5546_v3 }
 0x1ff   : > { %830 = vrot.lane.b32.xlu0 %v4662_v42, %s4537_s29  ;;  %9642 = vst [vmem:[#allocation127_spill] sm:$0xff] %v5551_v58 }
 0x200   : > { %v5531_v15 = vpop.permute.xlu2 %739  ;;  %v699_v38 = vpop.permute.xlu1 %698 }
 0x201   : > { %9639 = vst [vmem:[#allocation124_spill] sm:$0xff] %v5531_v15  ;;  %v725_v8 = vsel %vm708_vm6, %v699_v38, %v5442_v60  ;;  %v697_v4 = vpop.permute.xlu0 %696 }
 0x202   : > { %v723_v54 = vsel %vm708_vm6, %v5413_v56, %v697_v4  ;;  %v724_v19 = vsel %vm708_vm6, %v697_v4, %v699_v38  ;;  %v5549_v49 = vsel %vm1249_vm2, %v662_v39, %v725_v8 }
 0x203   : > { %9641 = vst [vmem:[#allocation126_spill] sm:$0xff] %v5549_v49  ;;  %v5554_v61 = vsel %vm1249_vm2, %v660_v57, %v723_v54  ;;  %v5557_v31 = vsel %vm1249_vm2, %v661_v32, %v724_v19  ;;  %v664_v57 = vsel %vm645_vm5, %v5395_v41, %v5393_v30 }
 0x204   : > { %9643 = vst [vmem:[#allocation128_spill] sm:$0xff] %v5554_v61 }
 0x205   : > { %9644 = vst [vmem:[#allocation129_spill] sm:$0xff] %v5557_v31 }
 0x206   : > { %840 = vrot.lane.b32.xlu2 %v5541_v11, %s4537_s29  ;;  %838 = vrot.lane.b32.xlu1 %v5546_v3, %s4537_s29 }
 0x207   : > { %836 = vrot.lane.b32.xlu0 %v5551_v58, %s4537_s29 }
 0x208   : > { %v5565_v56 = vpop.permute.xlu2 %745  ;;  %v705_v9 = vpop.permute.xlu1 %704 }
 0x209   : > { %9645 = vst [vmem:[#allocation130_spill] sm:$0xff] %v5565_v56  ;;  %v728_v39 = vsel %vm708_vm6, %v705_v9, %v5467_v10  ;;  %v703_v38 = vpop.permute.xlu0 %702 }
 0x20a   : > { %v726_v32 = vsel %vm708_vm6, %v5442_v60, %v703_v38  ;;  %v727_v8 = vsel %vm708_vm6, %v703_v38, %v705_v9  ;;  %v5582_v4 = vsel %vm1249_vm2, %v665_v50, %v728_v39 }
 0x20b   : > { %9646 = vst [vmem:[#allocation131_spill] sm:$0xff] %v5582_v4  ;;  %v5585_v54 = vsel %vm1249_vm2, %v663_v62, %v726_v32  ;;  %v5588_v47 = vsel %vm1249_vm2, %v664_v57, %v727_v8 }
 0x20c   : > { %9647 = vst [vmem:[#allocation132_spill] sm:$0xff] %v5585_v54 }
 0x20d   : > { %9648 = vst [vmem:[#allocation133_spill] sm:$0xff] %v5588_v47 }
 0x20e   : > { %867 = vrot.lane.b32.xlu2 %v4596_v6, %s4538_s30  ;;  %865 = vrot.lane.b32.xlu1 %v4610_v13, %s4538_s30 }
 0x20f   : > { %863 = vrot.lane.b32.xlu0 %v4598_v7, %s4538_s30 }
 0x210   : > { %v5596_v41 = vpop.permute.xlu2 %751  ;;  %v5598_v30 = vpop.permute.xlu1 %731 }
 0x211   : > { %9649 = vst [vmem:[#allocation134_spill] sm:$0xff] %v5596_v41  ;;  %v5600_v60 = vpop.permute.xlu0 %729 }
 0x216   : > { %873 = vrot.lane.b32.xlu2 %v4624_v21, %s4538_s30  ;;  %871 = vrot.lane.b32.xlu1 %v4626_v22, %s4538_s30 }
 0x217   : > { %869 = vrot.lane.b32.xlu0 %v4608_v12, %s4538_s30 }
 0x218   : > { %v5608_v19 = vpop.permute.xlu2 %757  ;;  %v5610_v9 = vpop.permute.xlu1 %737 }
 0x219   : > { %9650 = vst [vmem:[#allocation135_spill] sm:$0xff] %v5608_v19  ;;  %v5612_v50 = vpop.permute.xlu0 %735 }
 0x21a   : > { %9651 = vst [vmem:[#allocation136_spill] sm:$0xff] %v5610_v9 }
 0x21b   : > { %9652 = vst [vmem:[#allocation137_spill] sm:$0xff] %v5612_v50 }
 0x21e   : > { %879 = vrot.lane.b32.xlu2 %v4637_v28, %s4538_s30  ;;  %877 = vrot.lane.b32.xlu1 %v4639_v29, %s4538_s30 }
 0x21f   : > { %875 = vrot.lane.b32.xlu0 %v4622_v20, %s4538_s30 }
 0x220   : > { %v5620_v62 = vpop.permute.xlu2 %763  ;;  %v5622_v39 = vpop.permute.xlu1 %743 }
 0x221   : > { %9653 = vst [vmem:[#allocation138_spill] sm:$0xff] %v5620_v62  ;;  %v5624_v38 = vpop.permute.xlu0 %741 }
 0x222   : > { %9654 = vst [vmem:[#allocation139_spill] sm:$0xff] %v5622_v39 }
 0x223   : > { %9655 = vst [vmem:[#allocation140_spill] sm:$0xff] %v5624_v38 }
 0x226   : > { %885 = vrot.lane.b32.xlu2 %v4651_v36, %s4538_s30  ;;  %883 = vrot.lane.b32.xlu1 %v4653_v37, %s4538_s30 }
 0x227   : > { %881 = vrot.lane.b32.xlu0 %v4635_v27, %s4538_s30 }
 0x228   : > { %v5632_v57 = vpop.permute.xlu2 %769  ;;  %v5634_v32 = vpop.permute.xlu1 %749 }
 0x229   : > { %9656 = vst [vmem:[#allocation141_spill] sm:$0xff] %v5632_v57  ;;  %v5636_v8 = vpop.permute.xlu0 %747 }
 0x22a   : > { %9657 = vst [vmem:[#allocation142_spill] sm:$0xff] %v5634_v32 }
 0x22b   : > { %9658 = vst [vmem:[#allocation143_spill] sm:$0xff] %v5636_v8 }
 0x22e   : > { %891 = vrot.lane.b32.xlu2 %v4664_v43, %s4538_s30  ;;  %889 = vrot.lane.b32.xlu1 %v4666_v44, %s4538_s30 }
 0x22f   : > { %887 = vrot.lane.b32.xlu0 %v4649_v35, %s4538_s30 }
 0x230   : > { %v5644_v53 = vpop.permute.xlu2 %804  ;;  %v5646_v10 = vpop.permute.xlu1 %755 }
 0x231   : > { %9659 = vst [vmem:[#allocation144_spill] sm:$0xff] %v5644_v53  ;;  %v5648_v4 = vpop.permute.xlu0 %753 }
 0x232   : > { %9660 = vst [vmem:[#allocation145_spill] sm:$0xff] %v5646_v10 }
 0x233   : > { %9661 = vst [vmem:[#allocation146_spill] sm:$0xff] %v5648_v4 }
 0x236   : > { %897 = vrot.lane.b32.xlu2 %v4678_v51, %s4538_s30  ;;  %895 = vrot.lane.b32.xlu1 %v4680_v52, %s4538_s30 }
 0x237   : > { %893 = vrot.lane.b32.xlu0 %v4662_v42, %s4538_s30 }
 0x238   : > { %v5656_v47 = vpop.permute.xlu2 %810  ;;  %v5658_v57 = vpop.permute.xlu1 %761 }
 0x239   : > { %9662 = vst [vmem:[#allocation147_spill] sm:$0xff] %v5656_v47  ;;  %v5660_v54 = vpop.permute.xlu0 %759 }
 0x23a   : > { %9663 = vst [vmem:[#allocation148_spill] sm:$0xff] %v5658_v57 }
 0x23b   : > { %9664 = vst [vmem:[#allocation149_spill] sm:$0xff] %v5660_v54 }
 0x23e   : > { %903 = vrot.lane.b32.xlu2 %v5541_v11, %s4538_s30  ;;  %901 = vrot.lane.b32.xlu1 %v5546_v3, %s4538_s30 }
 0x23f   : > { %899 = vrot.lane.b32.xlu0 %v5551_v58, %s4538_s30 }
 0x240   : > { %v5668_v49 = vpop.permute.xlu2 %816  ;;  %v5670_v62 = vpop.permute.xlu1 %767 }
 0x241   : > { %9665 = vst [vmem:[#allocation150_spill] sm:$0xff] %v5668_v49  ;;  %v5672_v31 = vpop.permute.xlu0 %765 }
 0x242   : > { %9666 = vst [vmem:[#allocation151_spill] sm:$0xff] %v5670_v62 }
 0x243   : > { %9667 = vst [vmem:[#allocation152_spill] sm:$0xff] %v5672_v31 }
 0x246   : > { %930 = vrot.lane.b32.xlu2 %v4596_v6, %s4539_s5  ;;  %928 = vrot.lane.b32.xlu1 %v4610_v13, %s4539_s5 }
 0x247   : > { %926 = vrot.lane.b32.xlu0 %v4598_v7, %s4539_s5 }
 0x248   : > { %v5680_v61 = vpop.permute.xlu2 %822  ;;  %v5682_v57 = vpop.permute.xlu1 %802 }
 0x249   : > { %9668 = vst [vmem:[#allocation153_spill] sm:$0xff] %v5680_v61  ;;  %v5684_v54 = vpop.permute.xlu0 %800 }
 0x24e   : > { %936 = vrot.lane.b32.xlu2 %v4624_v21, %s4539_s5  ;;  %934 = vrot.lane.b32.xlu1 %v4626_v22, %s4539_s5 }
 0x24f   : > { %932 = vrot.lane.b32.xlu0 %v4608_v12, %s4539_s5 }
 0x250   : > { %v5692_v62 = vpop.permute.xlu2 %828  ;;  %v5694_v31 = vpop.permute.xlu1 %808 }
 0x251   : > { %9669 = vst [vmem:[#allocation154_spill] sm:$0xff] %v5692_v62  ;;  %v5696_v19 = vpop.permute.xlu0 %806 }
 0x252   : > { %9670 = vst [vmem:[#allocation155_spill] sm:$0xff] %v5694_v31 }
 0x253   : > { %9671 = vst [vmem:[#allocation156_spill] sm:$0xff] %v5696_v19 }
 0x256   : > { %942 = vrot.lane.b32.xlu2 %v4637_v28, %s4539_s5  ;;  %940 = vrot.lane.b32.xlu1 %v4639_v29, %s4539_s5 }
 0x257   : > { %938 = vrot.lane.b32.xlu0 %v4622_v20, %s4539_s5 }
 0x258   : > { %v5704_v33 = vpop.permute.xlu2 %834  ;;  %v5706_v10 = vpop.permute.xlu1 %814 }
 0x259   : > { %9672 = vst [vmem:[#allocation157_spill] sm:$0xff] %v5704_v33  ;;  %v5708_v5 = vpop.permute.xlu0 %812 }
 0x25a   : > { %9673 = vst [vmem:[#allocation158_spill] sm:$0xff] %v5706_v10 }
 0x25b   : > { %9674 = vst [vmem:[#allocation159_spill] sm:$0xff] %v5708_v5 }
 0x25e   : > { %948 = vrot.lane.b32.xlu2 %v4651_v36, %s4539_s5  ;;  %946 = vrot.lane.b32.xlu1 %v4653_v37, %s4539_s5 }
 0x25f   : > { %944 = vrot.lane.b32.xlu0 %v4635_v27, %s4539_s5 }
 0x260   : > { %v5716_v62 = vpop.permute.xlu2 %840  ;;  %v5718_v4 = vpop.permute.xlu1 %820 }
 0x261   : > { %9675 = vst [vmem:[#allocation160_spill] sm:$0xff] %v5716_v62  ;;  %v5720_v41 = vpop.permute.xlu0 %818 }
 0x262   : > { %9676 = vst [vmem:[#allocation161_spill] sm:$0xff] %v5718_v4 }
 0x263   : > { %9677 = vst [vmem:[#allocation162_spill] sm:$0xff] %v5720_v41 }
 0x266   : > { %954 = vrot.lane.b32.xlu2 %v4664_v43, %s4539_s5  ;;  %952 = vrot.lane.b32.xlu1 %v4666_v44, %s4539_s5 }
 0x267   : > { %950 = vrot.lane.b32.xlu0 %v4649_v35, %s4539_s5 }
 0x268   : > { %v5728_v33 = vpop.permute.xlu2 %867  ;;  %v5730_v61 = vpop.permute.xlu1 %826 }
 0x269   : > { %9678 = vst [vmem:[#allocation163_spill] sm:$0xff] %v5728_v33  ;;  %v5732_v32 = vpop.permute.xlu0 %824 }
 0x26a   : > { %9679 = vst [vmem:[#allocation164_spill] sm:$0xff] %v5730_v61 }
 0x26b   : > { %9680 = vst [vmem:[#allocation165_spill] sm:$0xff] %v5732_v32 }
 0x26e   : > { %960 = vrot.lane.b32.xlu2 %v4678_v51, %s4539_s5  ;;  %958 = vrot.lane.b32.xlu1 %v4680_v52, %s4539_s5 }
 0x26f   : > { %956 = vrot.lane.b32.xlu0 %v4662_v42, %s4539_s5 }
 0x270   : > { %v5740_v62 = vpop.permute.xlu2 %873  ;;  %v5742_v4 = vpop.permute.xlu1 %832 }
 0x271   : > { %9681 = vst [vmem:[#allocation166_spill] sm:$0xff] %v5740_v62  ;;  %v5744_v14 = vpop.permute.xlu0 %830 }
 0x272   : > { %9682 = vst [vmem:[#allocation167_spill] sm:$0xff] %v5742_v4 }
 0x273   : > { %9683 = vst [vmem:[#allocation168_spill] sm:$0xff] %v5744_v14 }
 0x276   : > { %966 = vrot.lane.b32.xlu2 %v5541_v11, %s4539_s5  ;;  %964 = vrot.lane.b32.xlu1 %v5546_v3, %s4539_s5 }
 0x277   : > { %962 = vrot.lane.b32.xlu0 %v5551_v58, %s4539_s5 }
 0x278   : > { %v5752_v61 = vpop.permute.xlu2 %879  ;;  %v5754_v32 = vpop.permute.xlu1 %838 }
 0x279   : > { %9684 = vst [vmem:[#allocation169_spill] sm:$0xff] %v5752_v61  ;;  %v5756_v8 = vpop.permute.xlu0 %836 }
 0x27a   : > { %9685 = vst [vmem:[#allocation170_spill] sm:$0xff] %v5754_v32 }
 0x27b   : > { %9686 = vst [vmem:[#allocation171_spill] sm:$0xff] %v5756_v8 }
 0x27e   : > { %993 = vrot.lane.b32.xlu2 %v4596_v6, %s4540_s6  ;;  %991 = vrot.lane.b32.xlu1 %v4610_v13, %s4540_s6 }
 0x27f   : > { %989 = vrot.lane.b32.xlu0 %v4598_v7, %s4540_s6 }
 0x280   : > { %v5764_v4 = vpop.permute.xlu2 %885  ;;  %v5766_v14 = vpop.permute.xlu1 %865 }
 0x281   : > { %9687 = vst [vmem:[#allocation172_spill] sm:$0xff] %v5764_v4  ;;  %v5768_v26 = vpop.permute.xlu0 %863 }
 0x286   : > { %999 = vrot.lane.b32.xlu2 %v4624_v21, %s4540_s6  ;;  %997 = vrot.lane.b32.xlu1 %v4626_v22, %s4540_s6 }
 0x287   : > { %995 = vrot.lane.b32.xlu0 %v4608_v12, %s4540_s6 }
 0x288   : > { %v5776_v32 = vpop.permute.xlu2 %891  ;;  %v5778_v8 = vpop.permute.xlu1 %871 }
 0x289   : > { %9688 = vst [vmem:[#allocation173_spill] sm:$0xff] %v5776_v32  ;;  %v5780_v41 = vpop.permute.xlu0 %869 }
 0x28a   : > { %9689 = vst [vmem:[#allocation174_spill] sm:$0xff] %v5778_v8 }
 0x28b   : > { %9690 = vst [vmem:[#allocation175_spill] sm:$0xff] %v5780_v41 }
 0x28e   : > { %1005 = vrot.lane.b32.xlu2 %v4637_v28, %s4540_s6  ;;  %1003 = vrot.lane.b32.xlu1 %v4639_v29, %s4540_s6 }
 0x28f   : > { %1001 = vrot.lane.b32.xlu0 %v4622_v20, %s4540_s6 }
 0x290   : > { %v5788_v4 = vpop.permute.xlu2 %897  ;;  %v5790_v56 = vpop.permute.xlu1 %877 }
 0x291   : > { %9691 = vst [vmem:[#allocation176_spill] sm:$0xff] %v5788_v4  ;;  %v5792_v49 = vpop.permute.xlu0 %875 }
 0x292   : > { %9692 = vst [vmem:[#allocation177_spill] sm:$0xff] %v5790_v56 }
 0x293   : > { %9693 = vst [vmem:[#allocation178_spill] sm:$0xff] %v5792_v49 }
 0x296   : > { %1011 = vrot.lane.b32.xlu2 %v4651_v36, %s4540_s6  ;;  %1009 = vrot.lane.b32.xlu1 %v4653_v37, %s4540_s6 }
 0x297   : > { %1007 = vrot.lane.b32.xlu0 %v4635_v27, %s4540_s6 }
 0x298   : > { %v5800_v32 = vpop.permute.xlu2 %903  ;;  %v5802_v61 = vpop.permute.xlu1 %883 }
 0x299   : > { %9694 = vst [vmem:[#allocation179_spill] sm:$0xff] %v5800_v32  ;;  %v5804_v23 = vpop.permute.xlu0 %881 }
 0x29a   : > { %9695 = vst [vmem:[#allocation180_spill] sm:$0xff] %v5802_v61 }
 0x29b   : > { %9696 = vst [vmem:[#allocation181_spill] sm:$0xff] %v5804_v23 }
 0x29e   : > { %1017 = vrot.lane.b32.xlu2 %v4664_v43, %s4540_s6  ;;  %1015 = vrot.lane.b32.xlu1 %v4666_v44, %s4540_s6 }
 0x29f   : > { %1013 = vrot.lane.b32.xlu0 %v4649_v35, %s4540_s6 }
 0x2a0   : > { %v5812_v4 = vpop.permute.xlu2 %930  ;;  %v5814_v39 = vpop.permute.xlu1 %889 }
 0x2a1   : > { %9697 = vst [vmem:[#allocation182_spill] sm:$0xff] %v5812_v4  ;;  %v5816_v10 = vpop.permute.xlu0 %887 }
 0x2a2   : > { %9698 = vst [vmem:[#allocation183_spill] sm:$0xff] %v5814_v39 }
 0x2a3   : > { %9699 = vst [vmem:[#allocation184_spill] sm:$0xff] %v5816_v10 }
 0x2a6   : > { %1023 = vrot.lane.b32.xlu2 %v4678_v51, %s4540_s6  ;;  %1021 = vrot.lane.b32.xlu1 %v4680_v52, %s4540_s6 }
 0x2a7   : > { %1019 = vrot.lane.b32.xlu0 %v4662_v42, %s4540_s6 }
 0x2a8   : > { %v5824_v32 = vpop.permute.xlu2 %936  ;;  %v5826_v61 = vpop.permute.xlu1 %895 }
 0x2a9   : > { %9700 = vst [vmem:[#allocation185_spill] sm:$0xff] %v5824_v32  ;;  %v5828_v23 = vpop.permute.xlu0 %893 }
 0x2aa   : > { %9701 = vst [vmem:[#allocation186_spill] sm:$0xff] %v5826_v61 }
 0x2ab   : > { %9702 = vst [vmem:[#allocation187_spill] sm:$0xff] %v5828_v23 }
 0x2ae   : > { %1029 = vrot.lane.b32.xlu2 %v5541_v11, %s4540_s6  ;;  %1027 = vrot.lane.b32.xlu1 %v5546_v3, %s4540_s6 }
 0x2af   : > { %1025 = vrot.lane.b32.xlu0 %v5551_v58, %s4540_s6  ;;  %s4462_s6 = sshll.u32 %s10194_s16, 2 }
 0x2b0   : > { %v5836_v39 = vpop.permute.xlu2 %942  ;;  %v5838_v10 = vpop.permute.xlu1 %901 }
 0x2b1   : > { %9703 = vst [vmem:[#allocation188_spill] sm:$0xff] %v5836_v39  ;;  %v5840_v56 = vpop.permute.xlu0 %899 }
 0x2b2   : > { %9704 = vst [vmem:[#allocation189_spill] sm:$0xff] %v5838_v10 }
 0x2b3   : > { %9705 = vst [vmem:[#allocation190_spill] sm:$0xff] %v5840_v56 }
 0x2b6   : > { %1056 = vrot.lane.b32.xlu2 %v4596_v6, %s4541_s7  ;;  %1054 = vrot.lane.b32.xlu1 %v4610_v13, %s4541_s7 }
 0x2b7   : > { %1052 = vrot.lane.b32.xlu0 %v4598_v7, %s4541_s7 }
 0x2b8   : > { %v5848_v61 = vpop.permute.xlu2 %948  ;;  %v5850_v23 = vpop.permute.xlu1 %928 }
 0x2b9   : > { %9706 = vst [vmem:[#allocation191_spill] sm:$0xff] %v5848_v61  ;;  %v5852_v24 = vpop.permute.xlu0 %926 }
 0x2be   : > { %1062 = vrot.lane.b32.xlu2 %v4624_v21, %s4541_s7  ;;  %1060 = vrot.lane.b32.xlu1 %v4626_v22, %s4541_s7 }
 0x2bf   : > { %1058 = vrot.lane.b32.xlu0 %v4608_v12, %s4541_s7 }
 0x2c0   : > { %v5860_v10 = vpop.permute.xlu2 %954  ;;  %v5862_v56 = vpop.permute.xlu1 %934 }
 0x2c1   : > { %9707 = vst [vmem:[#allocation192_spill] sm:$0xff] %v5860_v10  ;;  %v5864_v39 = vpop.permute.xlu0 %932 }
 0x2c2   : > { %9708 = vst [vmem:[#allocation193_spill] sm:$0xff] %v5862_v56 }
 0x2c3   : > { %9709 = vst [vmem:[#allocation194_spill] sm:$0xff] %v5864_v39 }
 0x2c6   : > { %1068 = vrot.lane.b32.xlu2 %v4637_v28, %s4541_s7  ;;  %1066 = vrot.lane.b32.xlu1 %v4639_v29, %s4541_s7 }
 0x2c7   : > { %1064 = vrot.lane.b32.xlu0 %v4622_v20, %s4541_s7 }
 0x2c8   : > { %v5872_v61 = vpop.permute.xlu2 %960  ;;  %v5874_v38 = vpop.permute.xlu1 %940 }
 0x2c9   : > { %9710 = vst [vmem:[#allocation195_spill] sm:$0xff] %v5872_v61  ;;  %v5876_v5 = vpop.permute.xlu0 %938 }
 0x2ca   : > { %9711 = vst [vmem:[#allocation196_spill] sm:$0xff] %v5874_v38 }
 0x2cb   : > { %9712 = vst [vmem:[#allocation197_spill] sm:$0xff] %v5876_v5 }
 0x2ce   : > { %1074 = vrot.lane.b32.xlu2 %v4651_v36, %s4541_s7  ;;  %1072 = vrot.lane.b32.xlu1 %v4653_v37, %s4541_s7 }
 0x2cf   : > { %1070 = vrot.lane.b32.xlu0 %v4635_v27, %s4541_s7 }
 0x2d0   : > { %v5884_v10 = vpop.permute.xlu2 %966  ;;  %v5886_v49 = vpop.permute.xlu1 %946 }
 0x2d1   : > { %9713 = vst [vmem:[#allocation198_spill] sm:$0xff] %v5884_v10  ;;  %v5888_v15 = vpop.permute.xlu0 %944 }
 0x2d2   : > { %9714 = vst [vmem:[#allocation199_spill] sm:$0xff] %v5886_v49 }
 0x2d3   : > { %9715 = vst [vmem:[#allocation200_spill] sm:$0xff] %v5888_v15 }
 0x2d6   : > { %1080 = vrot.lane.b32.xlu2 %v4664_v43, %s4541_s7  ;;  %1078 = vrot.lane.b32.xlu1 %v4666_v44, %s4541_s7 }
 0x2d7   : > { %1076 = vrot.lane.b32.xlu0 %v4649_v35, %s4541_s7 }
 0x2d8   : > { %v5896_v61 = vpop.permute.xlu2 %993  ;;  %v5898_v38 = vpop.permute.xlu1 %952 }
 0x2d9   : > { %9716 = vst [vmem:[#allocation201_spill] sm:$0xff] %v5898_v38  ;;  %v5900_v5 = vpop.permute.xlu0 %950 }
 0x2da   : > { %9717 = vst [vmem:[#allocation202_spill] sm:$0xff] %v5900_v5 }
 0x2de   : > { %1086 = vrot.lane.b32.xlu2 %v4678_v51, %s4541_s7  ;;  %1084 = vrot.lane.b32.xlu1 %v4680_v52, %s4541_s7 }
 0x2df   : > { %1082 = vrot.lane.b32.xlu0 %v4662_v42, %s4541_s7 }
 0x2e0   : > { %v5908_v10 = vpop.permute.xlu2 %999  ;;  %v5910_v49 = vpop.permute.xlu1 %958 }
 0x2e1   : > { %9718 = vst [vmem:[#allocation203_spill] sm:$0xff] %v5910_v49  ;;  %v5912_v15 = vpop.permute.xlu0 %956 }
 0x2e2   : > { %9719 = vst [vmem:[#allocation204_spill] sm:$0xff] %v5912_v15 }
 0x2e6   : > { %1092 = vrot.lane.b32.xlu2 %v5541_v11, %s4541_s7  ;;  %1090 = vrot.lane.b32.xlu1 %v5546_v3, %s4541_s7 }
 0x2e7   : > { %1088 = vrot.lane.b32.xlu0 %v5551_v58, %s4541_s7 }
 0x2e8   : > { %v5920_v38 = vpop.permute.xlu2 %1005  ;;  %v5922_v5 = vpop.permute.xlu1 %964 }
 0x2e9   : > { %9720 = vst [vmem:[#allocation205_spill] sm:$0xff] %v5922_v5  ;;  %v5924_v47 = vpop.permute.xlu0 %962 }
 0x2ea   : > { %9721 = vst [vmem:[#allocation206_spill] sm:$0xff] %v5924_v47 }
 0x2ee   : > { %1119 = vrot.lane.b32.xlu2 %v4596_v6, %s4542_s8  ;;  %1117 = vrot.lane.b32.xlu1 %v4610_v13, %s4542_s8 }
 0x2ef   : > { %1115 = vrot.lane.b32.xlu0 %v4598_v7, %s4542_s8 }
 0x2f0   : > { %v5932_v49 = vpop.permute.xlu2 %1011  ;;  %v5934_v15 = vpop.permute.xlu1 %991 }
 0x2f1   : > { %v5936_v62 = vpop.permute.xlu0 %989 }
 0x2f6   : > { %1125 = vrot.lane.b32.xlu2 %v4624_v21, %s4542_s8  ;;  %1123 = vrot.lane.b32.xlu1 %v4626_v22, %s4542_s8 }
 0x2f7   : > { %1121 = vrot.lane.b32.xlu0 %v4608_v12, %s4542_s8 }
 0x2f8   : > { %v5944_v5 = vpop.permute.xlu2 %1017  ;;  %v5946_v47 = vpop.permute.xlu1 %997 }
 0x2f9   : > { %9722 = vst [vmem:[#allocation207_spill] sm:$0xff] %v5946_v47  ;;  %v5948_v32 = vpop.permute.xlu0 %995 }
 0x2fa   : > { %9723 = vst [vmem:[#allocation208_spill] sm:$0xff] %v5948_v32 }
 0x2fe   : > { %1131 = vrot.lane.b32.xlu2 %v4637_v28, %s4542_s8  ;;  %1129 = vrot.lane.b32.xlu1 %v4639_v29, %s4542_s8 }
 0x2ff   : > { %1127 = vrot.lane.b32.xlu0 %v4622_v20, %s4542_s8 }
 0x300   : > { %v5956_v50 = vpop.permute.xlu2 %1023  ;;  %v1004_v9 = vpop.permute.xlu1 %1003 }
 0x301   : > { %v1002_v19 = vpop.permute.xlu0 %1001 }
 0x306   : > { %1137 = vrot.lane.b32.xlu2 %v4651_v36, %s4542_s8  ;;  %1135 = vrot.lane.b32.xlu1 %v4653_v37, %s4542_s8 }
 0x307   : > { %1133 = vrot.lane.b32.xlu0 %v4635_v27, %s4542_s8 }
 0x308   : > { %v5964_v31 = vpop.permute.xlu2 %1029  ;;  %v5966_v41 = vpop.permute.xlu1 %1009 }
 0x309   : > { %9724 = vst [vmem:[#allocation209_spill] sm:$0xff] %v5964_v31  ;;  %v5968_v8 = vpop.permute.xlu0 %1007 }
 0x30e   : > { %1143 = vrot.lane.b32.xlu2 %v4664_v43, %s4542_s8  ;;  %1141 = vrot.lane.b32.xlu1 %v4666_v44, %s4542_s8 }
 0x30f   : > { %1139 = vrot.lane.b32.xlu0 %v4649_v35, %s4542_s8 }
 0x310   : > { %v5976_v39 = vpop.permute.xlu2 %1056  ;;  %v5978_v56 = vpop.permute.xlu1 %1015 }
 0x311   : > { %v5980_v18 = vpop.permute.xlu0 %1013 }
 0x316   : > { %1149 = vrot.lane.b32.xlu2 %v4678_v51, %s4542_s8  ;;  %1147 = vrot.lane.b32.xlu1 %v4680_v52, %s4542_s8 }
 0x317   : > { %1145 = vrot.lane.b32.xlu0 %v4662_v42, %s4542_s8 }
 0x318   : > { %v1063_v40 = vpop.permute.xlu2 %1062  ;;  %v5988_v17 = vpop.permute.xlu1 %1021 }
 0x319   : > { %v5990_v1 = vpop.permute.xlu0 %1019 }
 0x31e   : > { %1155 = vrot.lane.b32.xlu2 %v5541_v11, %s4542_s8  ;;  %1153 = vrot.lane.b32.xlu1 %v5546_v3, %s4542_s8 }
 0x31f   : > { %1151 = vrot.lane.b32.xlu0 %v5551_v58, %s4542_s8 }
 0x320   : > { %v1069_v16 = vpop.permute.xlu2 %1068  ;;  %v5998_v2 = vpop.permute.xlu1 %1027 }
 0x321   : > { %v6000_v46 = vpop.permute.xlu0 %1025 }
 0x326   : > { %1187 = vrot.lane.b32.xlu2 %v4596_v6, %s4543_s9  ;;  %1185 = vrot.lane.b32.xlu1 %v4610_v13, %s4543_s9 }
 0x327   : > { %1183 = vrot.lane.b32.xlu0 %v4598_v7, %s4543_s9  ;;  %v1036_v7 = vsel %vm1031_vm7, %v5946_v47, %v5908_v10 }
 0x328   : > { %v1075_v11 = vpop.permute.xlu2 %1074  ;;  %v6008_v34 = vpop.permute.xlu1 %1054 }
 0x329   : > { %v6010_v25 = vpop.permute.xlu0 %1052 }
 0x32e   : > { %1193 = vrot.lane.b32.xlu2 %v4624_v21, %s4543_s9  ;;  %1191 = vrot.lane.b32.xlu1 %v4626_v22, %s4543_s9  ;;  %v1034_v22 = vsel %vm1031_vm7, %v5896_v61, %v5948_v32 }
 0x32f   : > { %1189 = vrot.lane.b32.xlu0 %v4608_v12, %s4543_s9 }
 0x330   : > { %v6018_v6 = vpop.permute.xlu2 %1080  ;;  %v6020_v13 = vpop.permute.xlu1 %1060 }
 0x331   : > { %v1099_v45 = vsel %vm1094_vm8, %v6020_v13, %v1063_v40  ;;  %v6027_v21 = vpop.permute.xlu0 %1058 }
 0x332   : > { %9725 = vst [vmem:[#allocation210_spill] sm:$0xff] %v6027_v21  ;;  %v1097_v12 = vsel %vm1094_vm8, %v5976_v39, %v6027_v21  ;;  %v6036_v48 = vsel %vm1249_vm2, %v1036_v7, %v1099_v45  ;;  %v1039_v21 = vsel %vm1031_vm7, %v1004_v9, %v5920_v38  ;;  %v1037_v7 = vsel %vm1031_vm7, %v5908_v10, %v1002_v19 }
 0x333   : > { %9726 = vst [vmem:[#allocation211_spill] sm:$0xff] %v6036_v48  ;;  %v6039_v63 = vsel %vm1249_vm2, %v1034_v22, %v1097_v12  ;;  %v1038_v45 = vsel %vm1031_vm7, %v1002_v19, %v1004_v9  ;;  %v1041_v19 = vsel %vm1031_vm7, %v5968_v8, %v5966_v41 }
 0x334   : > { %9727 = vst [vmem:[#allocation212_spill] sm:$0xff] %v6039_v63 }
 0x336   : > { %1199 = vrot.lane.b32.xlu2 %v4637_v28, %s4543_s9  ;;  %1197 = vrot.lane.b32.xlu1 %v4639_v29, %s4543_s9 }
 0x337   : > { %1195 = vrot.lane.b32.xlu0 %v4622_v20, %s4543_s9 }
 0x338   : > { %v6047_v32 = vpop.permute.xlu2 %1086  ;;  %v1067_v47 = vpop.permute.xlu1 %1066 }
 0x339   : > { %v1102_v12 = vsel %vm1094_vm8, %v1067_v47, %v1069_v16  ;;  %v1065_v22 = vpop.permute.xlu0 %1064 }
 0x33a   : > { %v1100_v28 = vsel %vm1094_vm8, %v1063_v40, %v1065_v22  ;;  %v1101_v48 = vsel %vm1094_vm8, %v1065_v22, %v1067_v47  ;;  %v6058_v63 = vsel %vm1249_vm2, %v1039_v21, %v1102_v12  ;;  %v1042_v21 = vsel %vm1031_vm7, %v5966_v41, %v5932_v49 }
 0x33b   : > { %9728 = vst [vmem:[#allocation213_spill] sm:$0xff] %v6058_v63  ;;  %v6061_v29 = vsel %vm1249_vm2, %v1037_v7, %v1100_v28  ;;  %v6064_v20 = vsel %vm1249_vm2, %v1038_v45, %v1101_v48  ;;  %v1040_v28 = vsel %vm1031_vm7, %v5920_v38, %v5968_v8  ;;  %v1045_v8 = vsel %vm1031_vm7, %v5978_v56, %v5944_v5 }
 0x33c   : > { %9729 = vst [vmem:[#allocation214_spill] sm:$0xff] %v6061_v29  ;;  %v1043_v45 = vsel %vm1031_vm7, %v5932_v49, %v5980_v18  ;;  %v233_v29 = vld [vmem:[%s4591_s20 + $0x5c] sm:$0xff] }
 0x33d   : > { %9730 = vst [vmem:[#allocation215_spill] sm:$0xff] %v6064_v20 }
 0x33e   : > { %1205 = vrot.lane.b32.xlu2 %v4651_v36, %s4543_s9  ;;  %1203 = vrot.lane.b32.xlu1 %v4653_v37, %s4543_s9 }
 0x33f   : > { %1201 = vrot.lane.b32.xlu0 %v4635_v27, %s4543_s9 }
 0x340   : > { %v6072_v40 = vpop.permute.xlu2 %1092  ;;  %v1073_v10 = vpop.permute.xlu1 %1072 }
 0x341   : > { %9731 = vst [vmem:[#allocation216_spill] sm:$0xff] %v6072_v40  ;;  %v1105_v48 = vsel %vm1094_vm8, %v1073_v10, %v1075_v11  ;;  %v1071_v47 = vpop.permute.xlu0 %1070 }
 0x342   : > { %v1103_v9 = vsel %vm1094_vm8, %v1069_v16, %v1071_v47  ;;  %v1104_v7 = vsel %vm1094_vm8, %v1071_v47, %v1073_v10  ;;  %v6087_v12 = vsel %vm1249_vm2, %v1042_v21, %v1105_v48 }
 0x343   : > { %9732 = vst [vmem:[#allocation217_spill] sm:$0xff] %v6087_v12  ;;  %v6090_v22 = vsel %vm1249_vm2, %v1040_v28, %v1103_v9  ;;  %v6093_v38 = vsel %vm1249_vm2, %v1041_v19, %v1104_v7  ;;  %v1044_v28 = vsel %vm1031_vm7, %v5980_v18, %v5978_v56  ;;  %v223_v9 = vld [vmem:[%s4591_s20 + $0x58] sm:$0xff] }
 0x344   : > { %9733 = vst [vmem:[#allocation218_spill] sm:$0xff] %v6090_v22  ;;  %v1179_v18 = vunpack.c.l.b16 %v223_v9  ;;  %v229_v12 = vld [vmem:[%s4591_s20 + $0x3c] sm:$0xff]  ;;  %v231_v22 = vld [vmem:[%s4591_s20 + $0x4c] sm:$0xff] }
 0x345   : > { %9734 = vst [vmem:[#allocation219_spill] sm:$0xff] %v6093_v38  ;;  %v1959_v63 = vunpack.c.l.b16 %v231_v22 }
 0x346   : > { %1211 = vrot.lane.b32.xlu2 %v4664_v43, %s4543_s9  ;;  %1209 = vrot.lane.b32.xlu1 %v4666_v44, %s4543_s9  ;;  %v230_v43 = vld [vmem:[%s4591_s20 + $0x44] sm:$0xff] }
 0x347   : > { %1207 = vrot.lane.b32.xlu0 %v4649_v35, %s4543_s9  ;;  %v6300_v36 = vpack.c.b16 %v1959_v63, %v1959_v63 }
 0x348   : > { %v6101_v16 = vpop.permute.xlu2 %1119  ;;  %v1079_v41 = vpop.permute.xlu1 %1078 }
 0x349   : > { %v1108_v10 = vsel %vm1094_vm8, %v1079_v41, %v6018_v6  ;;  %v1077_v21 = vpop.permute.xlu0 %1076  ;;  %9753 = vst [vmem:[#allocation238_spill] sm:$0xff] %v6300_v36 }
 0x34a   : > { %v1106_v48 = vsel %vm1094_vm8, %v1075_v11, %v1077_v21  ;;  %v1107_v47 = vsel %vm1094_vm8, %v1077_v21, %v1079_v41  ;;  %v6117_v19 = vsel %vm1249_vm2, %v1045_v8, %v1108_v10  ;;  %v1048_v41 = vsel %vm1031_vm7, %v5988_v17, %v5956_v50 }
 0x34b   : > { %9735 = vst [vmem:[#allocation220_spill] sm:$0xff] %v6117_v19  ;;  %v6121_v7 = vsel %vm1249_vm2, %v1043_v45, %v1106_v48  ;;  %v6124_v49 = vsel %vm1249_vm2, %v1044_v28, %v1107_v47  ;;  %v1046_v8 = vsel %vm1031_vm7, %v5944_v5, %v5990_v1  ;;  %v6145_v48 = vpack.c.b16 %v1179_v18, %v1179_v18 }
 0x34c   : > { %9736 = vst [vmem:[#allocation221_spill] sm:$0xff] %v6121_v7  ;;  %v1047_v19 = vsel %vm1031_vm7, %v5990_v1, %v5988_v17  ;;  %v1051_v17 = vsel %vm1031_vm7, %v5998_v2, %v5964_v31 }
 0x34d   : > { %9737 = vst [vmem:[#allocation222_spill] sm:$0xff] %v6124_v49 }
 0x34e   : > { %1217 = vrot.lane.b32.xlu2 %v4678_v51, %s4543_s9  ;;  %1215 = vrot.lane.b32.xlu1 %v4680_v52, %s4543_s9  ;;  %9738 = vst [vmem:[#allocation223_spill] sm:$0xff] %v6145_v48 }
 0x34f   : > { %1213 = vrot.lane.b32.xlu0 %v4662_v42, %s4543_s9 }
 0x350   : > { %v6132_v56 = vpop.permute.xlu2 %1125  ;;  %v1085_v11 = vpop.permute.xlu1 %1084 }
 0x351   : > { %v1111_v45 = vsel %vm1094_vm8, %v1085_v11, %v6047_v32  ;;  %v1083_v10 = vpop.permute.xlu0 %1082 }
 0x352   : > { %v1109_v21 = vsel %vm1094_vm8, %v6018_v6, %v1083_v10  ;;  %v1110_v28 = vsel %vm1094_vm8, %v1083_v10, %v1085_v11  ;;  %v6148_v47 = vsel %vm1249_vm2, %v1048_v41, %v1111_v45  ;;  %v1180_v6 = vunpack.c.h.b16 %v223_v9 }
 0x353   : > { %9739 = vst [vmem:[#allocation224_spill] sm:$0xff] %v6148_v47  ;;  %v6154_v5 = vsel %vm1249_vm2, %v1046_v8, %v1109_v21  ;;  %v6157_v51 = vsel %vm1249_vm2, %v1047_v19, %v1110_v28  ;;  %v1049_v41 = vsel %vm1031_vm7, %v5956_v50, %v6000_v46  ;;  %v1050_v10 = vsel %vm1031_vm7, %v6000_v46, %v5998_v2  ;;  %v224_v28 = vld [vmem:[%s4591_s20 + $0x14] sm:$0xff] }
 0x354   : > { %9740 = vst [vmem:[#allocation225_spill] sm:$0xff] %v6154_v5  ;;  %v6184_v21 = vpack.c.b16 %v1180_v6, %v1180_v6  ;;  %v228_v5 = vld [vmem:[%s4591_s20 + $0x34] sm:$0xff] }
 0x355   : > { %9741 = vst [vmem:[#allocation226_spill] sm:$0xff] %v6157_v51 }
 0x356   : > { %1223 = vrot.lane.b32.xlu2 %v6145_v48, %s4543_s9  ;;  %1221 = vrot.lane.b32.xlu1 %v5546_v3, %s4543_s9  ;;  %9743 = vst [vmem:[#allocation228_spill] sm:$0xff] %v6184_v21 }
 0x357   : > { %1219 = vrot.lane.b32.xlu0 %v5551_v58, %s4543_s9 }
 0x358   : > { %v6165_v18 = vpop.permute.xlu2 %1131  ;;  %v1091_v1 = vpop.permute.xlu1 %1090 }
 0x359   : > { %v1114_v19 = vsel %vm1094_vm8, %v1091_v1, %v6072_v40  ;;  %v1089_v11 = vpop.permute.xlu0 %1088 }
 0x35a   : > { %v1112_v8 = vsel %vm1094_vm8, %v6047_v32, %v1089_v11  ;;  %v1113_v9 = vsel %vm1094_vm8, %v1089_v11, %v1091_v1  ;;  %v6179_v45 = vsel %vm1249_vm2, %v1051_v17, %v1114_v19  ;;  %v1945_v32 = vunpack.c.l.b16 %v224_v28  ;;  %v225_v17 = vld [vmem:[%s4591_s20 + $0x1c] sm:$0xff] }
 0x35b   : > { %9742 = vst [vmem:[#allocation227_spill] sm:$0xff] %v6179_v45  ;;  %v6188_v31 = vsel %vm1249_vm2, %v1049_v41, %v1112_v8  ;;  %v6191_v50 = vsel %vm1249_vm2, %v1050_v10, %v1113_v9  ;;  %v1948_v19 = vunpack.c.h.b16 %v225_v17  ;;  %v1947_v11 = vunpack.c.l.b16 %v225_v17 }
 0x35c   : > { %9744 = vst [vmem:[#allocation229_spill] sm:$0xff] %v6188_v31  ;;  %v6205_v1 = vpack.c.b16 %v1945_v32, %v1945_v32  ;;  %v1946_v41 = vunpack.c.h.b16 %v224_v28  ;;  %v226_v31 = vld [vmem:[%s4591_s20 + $0x24] sm:$0xff] }
 0x35d   : > { %9745 = vst [vmem:[#allocation230_spill] sm:$0xff] %v6191_v50  ;;  %v6220_v32 = vpack.c.b16 %v1948_v19, %v1948_v19  ;;  %v6222_v40 = vpack.c.b16 %v1947_v11, %v1947_v11  ;;  %v227_v50 = vld [vmem:[%s4591_s20 + $0x2c] sm:$0xff]  ;;  %v1950_v17 = vunpack.c.h.b16 %v226_v31  ;;  %v1949_v19 = vunpack.c.l.b16 %v226_v31 }
 0x35e   : > { %1924 = vrot.lane.b32.xlu2 %v5546_v3, %s4529_s21  ;;  %1922 = vrot.lane.b32.xlu1 %v5551_v58, %s4529_s21  ;;  %v6224_v45 = vpack.c.b16 %v1946_v41, %v1946_v41  ;;  %v1951_v28 = vunpack.c.l.b16 %v227_v50  ;;  %v1954_v31 = vunpack.c.h.b16 %v228_v5  ;;  %v1953_v58 = vunpack.c.l.b16 %v228_v5 }
 0x35f   : > { %1225 = vrot.lane.b32.xlu0 %v6184_v21, %s4543_s9  ;;  %v6244_v51 = vpack.c.b16 %v1949_v19, %v1949_v19  ;;  %v1957_v5 = vunpack.c.l.b16 %v230_v43  ;;  %s208_s9 = scalar_lea.vmem %s9305_s4, %s4462_s6 }
 0x360   : > { %v6199_v2 = vpop.permute.xlu2 %1137  ;;  %v6201_v46 = vpop.permute.xlu1 %1117  ;;  %v6240_v47 = vpack.c.b16 %v1951_v28, %v1951_v28  ;;  %v1952_v28 = vunpack.c.h.b16 %v227_v50  ;;  %v6259_v19 = vpack.c.b16 %v1954_v31, %v1954_v31  ;;  %v6261_v7 = vpack.c.b16 %v1953_v58, %v1953_v58 }
 0x361   : > { %v6203_v6 = vpop.permute.xlu0 %1115  ;;  %v1956_v50 = vunpack.c.h.b16 %v229_v12  ;;  %v1955_v31 = vunpack.c.l.b16 %v229_v12  ;;  %v6279_v44 = vpack.c.b16 %v1957_v5, %v1957_v5  ;;  %v1960_v12 = vunpack.c.h.b16 %v231_v22 }
 0x362   : > { %v6263_v52 = vpack.c.b16 %v1952_v28, %v1952_v28  ;;  %v1958_v5 = vunpack.c.h.b16 %v230_v43  ;;  %v1963_v43 = vunpack.c.l.b16 %v233_v29 }
 0x363   : > { %v6281_v38 = vpack.c.b16 %v1956_v50, %v1956_v50  ;;  %v6283_v35 = vpack.c.b16 %v1955_v31, %v1955_v31  ;;  %v6298_v31 = vpack.c.b16 %v1960_v12, %v1960_v12 }
 0x364   : > { %v6302_v27 = vpack.c.b16 %v1958_v5, %v1958_v5 }
 0x365   : > { %9748 = vst [vmem:[#allocation233_spill] sm:$0xff] %v6281_v38 }
 0x366   : > { %1987 = vrot.lane.b32.xlu2 %v6205_v1, %s4544_s10  ;;  %1928 = vrot.lane.b32.xlu1 %v6184_v21, %s4529_s21  ;;  %9749 = vst [vmem:[#allocation234_spill] sm:$0xff] %v6283_v35 }
 0x367   : > { %1926 = vrot.lane.b32.xlu0 %v6145_v48, %s4529_s21  ;;  %v6242_v48 = vpack.c.b16 %v1950_v17, %v1950_v17  ;;  %9752 = vst [vmem:[#allocation237_spill] sm:$0xff] %v6298_v31 }
 0x368   : > { %v6214_v8 = vpop.permute.xlu2 %1143  ;;  %v6216_v9 = vpop.permute.xlu1 %1123  ;;  %9754 = vst [vmem:[#allocation239_spill] sm:$0xff] %v6302_v27 }
 0x369   : > { %v6218_v10 = vpop.permute.xlu0 %1121 }
 0x36e   : > { %1993 = vrot.lane.b32.xlu2 %v6220_v32, %s4544_s10  ;;  %1991 = vrot.lane.b32.xlu1 %v6222_v40, %s4544_s10 }
 0x36f   : > { %1989 = vrot.lane.b32.xlu0 %v6224_v45, %s4544_s10 }
 0x370   : > { %v6234_v21 = vpop.permute.xlu2 %1149  ;;  %v6236_v11 = vpop.permute.xlu1 %1129 }
 0x371   : > { %9746 = vst [vmem:[#allocation231_spill] sm:$0xff] %v6234_v21  ;;  %v6238_v41 = vpop.permute.xlu0 %1127 }
 0x376   : > { %1999 = vrot.lane.b32.xlu2 %v6240_v47, %s4544_s10  ;;  %1997 = vrot.lane.b32.xlu1 %v6242_v48, %s4544_s10 }
 0x377   : > { %1995 = vrot.lane.b32.xlu0 %v6244_v51, %s4544_s10 }
 0x378   : > { %v6253_v3 = vpop.permute.xlu2 %1155  ;;  %v6255_v17 = vpop.permute.xlu1 %1135 }
 0x379   : > { %9747 = vst [vmem:[#allocation232_spill] sm:$0xff] %v6253_v3  ;;  %v6257_v49 = vpop.permute.xlu0 %1133  ;;  %v232_v3 = vld [vmem:[%s4591_s20 + $0x54] sm:$0xff] }
 0x37a   : > { %v1962_v22 = vunpack.c.h.b16 %v232_v3  ;;  %v1961_v12 = vunpack.c.l.b16 %v232_v3 }
 0x37c   : > { %v6320_v21 = vpack.c.b16 %v1962_v22, %v1962_v22 }
 0x37e   : > { %2005 = vrot.lane.b32.xlu2 %v6259_v19, %s4544_s10  ;;  %2003 = vrot.lane.b32.xlu1 %v6261_v7, %s4544_s10  ;;  %9758 = vst [vmem:[#allocation243_spill] sm:$0xff] %v6320_v21 }
 0x37f   : > { %2001 = vrot.lane.b32.xlu0 %v6263_v52, %s4544_s10 }
 0x380   : > { %v6273_v42 = vpop.permute.xlu2 %1187  ;;  %v6275_v58 = vpop.permute.xlu1 %1141 }
 0x381   : > { %v6277_v28 = vpop.permute.xlu0 %1139 }
 0x386   : > { %2011 = vrot.lane.b32.xlu2 %v6279_v44, %s4544_s10  ;;  %2009 = vrot.lane.b32.xlu1 %v6281_v38, %s4544_s10  ;;  %v1096_v38 = vsel %vm1094_vm8, %v6008_v34, %v5976_v39 }
 0x387   : > { %2007 = vrot.lane.b32.xlu0 %v6283_v35, %s4544_s10  ;;  %v234_v35 = vld [vmem:[%s4591_s20 + $0x64] sm:$0xf] }
 0x388   : > { %v6292_v37 = vpop.permute.xlu2 %1193  ;;  %v6294_v50 = vpop.permute.xlu1 %1147  ;;  %v1965_v3 = vunpack.c.l.b16 %v234_v35  ;;  %v1158_v35 = vsel %vm1157_vm10, %v6203_v6, %v6201_v46  ;;  %v1033_v6 = vsel %vm1031_vm7, %v5934_v15, %v5896_v61 }
 0x389   : > { %9750 = vst [vmem:[#allocation235_spill] sm:$0xff] %v6294_v50  ;;  %v6296_v20 = vpop.permute.xlu0 %1145  ;;  %v6318_v50 = vpack.c.b16 %v1963_v43, %v1963_v43  ;;  %v1760_v39 = vsel %vm1249_vm2, %v1033_v6, %v1096_v38  ;;  %v1162_v38 = vsel %vm1157_vm10, %v6216_v9, %v6132_v56  ;;  %v9766_v6 = vld [vmem:[#allocation108_spill] sm:$0xff] }
 0x38a   : > { %9751 = vst [vmem:[#allocation236_spill] sm:$0xff] %v6296_v20 }
 0x38b   : > { %9757 = vst [vmem:[#allocation242_spill] sm:$0xff] %v6318_v50 }
 0x38e   : > { %2017 = vrot.lane.b32.xlu2 %v6298_v31, %s4544_s10  ;;  %2015 = vrot.lane.b32.xlu1 %v6300_v36, %s4544_s10  ;;  %v6322_v31 = vpack.c.b16 %v1961_v12, %v1961_v12  ;;  %v1159_v12 = vsel %vm1157_vm10, %v6201_v46, %v6101_v16  ;;  %v1095_v46 = vsel %vm1094_vm8, %v6010_v25, %v6008_v34 }
 0x38f   : > { %2013 = vrot.lane.b32.xlu0 %v6302_v27, %s4544_s10  ;;  %v970_v34 = vsel %vm968_vm11, %v5850_v23, %v5812_v4  ;;  %v969_v25 = vsel %vm968_vm11, %v5852_v24, %v5850_v23  ;;  %v907_v23 = vsel %vm905_vm12, %v5766_v14, %v5728_v33 }
 0x390   : > { %v6312_v20 = vpop.permute.xlu2 %1199  ;;  %v6314_v63 = vpop.permute.xlu1 %1153  ;;  %9759 = vst [vmem:[#allocation244_spill] sm:$0xff] %v6322_v31  ;;  %v1676_v24 = vsel %vm1249_vm2, %v907_v23, %v970_v34  ;;  %v9767_v34 = vld [vmem:[#allocation93_spill] sm:$0xff]  ;;  %v1164_v23 = vsel %vm1157_vm10, %v6238_v41, %v6236_v11 }
 0x391   : > { %9755 = vst [vmem:[#allocation240_spill] sm:$0xff] %v6314_v63  ;;  %v6316_v5 = vpop.permute.xlu0 %1151 }
 0x392   : > { %9756 = vst [vmem:[#allocation241_spill] sm:$0xff] %v6316_v5  ;;  %v1964_v5 = vunpack.c.h.b16 %v233_v29  ;;  %v6343_v29 = vpack.c.b16 %v1965_v3, %v1965_v3 }
 0x394   : > { %9760 = vst [vmem:[#allocation245_spill] sm:$0xff] %v6343_v29  ;;  %v6346_v36 = vpack.c.b16 %v1964_v5, %v1964_v5 }
 0x396   : > { %2023 = vrot.lane.b32.xlu2 %v6318_v50, %s4544_s10  ;;  %2021 = vrot.lane.b32.xlu1 %v6320_v21, %s4544_s10  ;;  %9761 = vst [vmem:[#allocation246_spill] sm:$0xff] %v6346_v36 }
 0x397   : > { %2019 = vrot.lane.b32.xlu0 %v6322_v31, %s4544_s10 }
 0x398   : > { %v6331_v43 = vpop.permute.xlu2 %1205  ;;  %v1186_v22 = vpop.permute.xlu1 %1185 }
 0x399   : > { %v1184_v63 = vpop.permute.xlu0 %1183  ;;  %v1229_v50 = vsel %vm1227_vm9, %v1186_v22, %v6273_v42 }
 0x39a   : > { %v1228_v21 = vsel %vm1227_vm9, %v1184_v63, %v1186_v22  ;;  %v1844_v31 = vsel %vm1249_vm2, %v1159_v12, %v1229_v50  ;;  %v772_v12 = vsel %vm771_vm14, %v5600_v60, %v5598_v30 }
 0x39b   : > { %v1840_v27 = vsel %vm1249_vm2, %v1158_v35, %v1228_v21  ;;  %3534 = vmatpush.bf16.msra.mxu2 %v1844_v31  ;;  %v1032_v21 = vsel %vm1031_vm7, %v5936_v62, %v5934_v15  ;;  %v906_v62 = vsel %vm905_vm12, %v5768_v26, %v5766_v14  ;;  %v1160_v26 = vsel %vm1157_vm10, %v6101_v16, %v6218_v10 }
 0x39c   : > { %3508 = vmatpush.bf16.msra.mxu0 %v1840_v27  ;;  %v1756_v27 = vsel %vm1249_vm2, %v1032_v21, %v1095_v46  ;;  %v1672_v3 = vsel %vm1249_vm2, %v906_v62, %v969_v25  ;;  %v844_v14 = vsel %vm842_vm13, %v5682_v57, %v5644_v53  ;;  %v843_v16 = vsel %vm842_vm13, %v5684_v54, %v5682_v57  ;;  %v9764_v46 = vld [vmem:[#allocation103_spill] sm:$0xff] }
 0x39d   : > { %v710_v54 = vsel %vm708_vm6, %v5403_v0, %v5371_v59  ;;  %v1588_v57 = vsel %vm1249_vm2, %v772_v12, %v843_v16  ;;  %v709_v21 = vsel %vm708_vm6, %v9766_v6, %v5403_v0  ;;  %v647_v59 = vsel %vm645_vm5, %v9764_v46, %v9767_v34  ;;  %v9774_v12 = vld [vmem:[#allocation64_spill] sm:$0xff]  ;;  %v9778_v6 = vld [vmem:[#allocation51_spill] sm:$0xff]  ;;  %v9779_v34 = vld [vmem:[#allocation45_spill] sm:$0xff] }
 0x39e   : > { %2050 = vrot.lane.b32.xlu2 %v6205_v1, %s4545_s11  ;;  %2027 = vrot.lane.b32.xlu1 %v6343_v29, %s4544_s10  ;;  %v1165_v25 = vsel %vm1157_vm10, %v6236_v11, %v6165_v18  ;;  %v1163_v62 = vsel %vm1157_vm10, %v6132_v56, %v6238_v41 }
 0x39f   : > { %2025 = vrot.lane.b32.xlu0 %v6346_v36, %s4544_s10  ;;  %3535 = vmatpush.bf16.msra.mxu2 %v1760_v39 }
 0x3a0   : > { %3509 = vmatpush.bf16.msra.mxu0 %v1756_v27  ;;  %v6374_v15 = vpop.permute.xlu2 %1211  ;;  %v6376_v61 = vpop.permute.xlu1 %1191 }
 0x3a1   : > { %v1232_v50 = vsel %vm1227_vm9, %v6376_v61, %v6292_v37  ;;  %v6387_v31 = vpop.permute.xlu0 %1189 }
 0x3a2   : > { %v1230_v63 = vsel %vm1227_vm9, %v6273_v42, %v6387_v31  ;;  %v6400_v5 = vsel %vm1249_vm2, %v1162_v38, %v1232_v50  ;;  %v773_v42 = vsel %vm771_vm14, %v5598_v30, %v5496_v55  ;;  %v9765_v30 = vld [vmem:[#allocation104_spill] sm:$0xff]  ;;  %v1508_v50 = vsel %vm1249_vm2, %v647_v59, %v710_v54  ;;  %v9780_v59 = vld [vmem:[#allocation46_spill] sm:$0xff] }
 0x3a3   : > { %9762 = vst [vmem:[#allocation247_spill] sm:$0xff] %v6400_v5  ;;  %3536 = vmatpush.bf16.msra.mxu2 %v1676_v24  ;;  %v6407_v22 = vsel %vm1249_vm2, %v1160_v26, %v1230_v63  ;;  %v1592_v35 = vsel %vm1249_vm2, %v773_v42, %v844_v14  ;;  %v646_v60 = vsel %vm645_vm5, %v9765_v30, %v9764_v46  ;;  %v9770_v14 = vld [vmem:[#allocation80_spill] sm:$0xff] }
 0x3a4   : > { %9763 = vst [vmem:[#allocation248_spill] sm:$0xff] %v6407_v22  ;;  %3510 = vmatpush.bf16.msra.mxu0 %v1672_v3  ;;  %v1504_v56 = vsel %vm1249_vm2, %v646_v60, %v709_v21  ;;  %v9769_v3 = vld [vmem:[#allocation79_spill] sm:$0xff]  ;;  %v9777_v60 = vld [vmem:[#allocation50_spill] sm:$0xff] }
 0x3a5   : > { %v584_v16 = vsel %vm582_vm4, %v9770_v14, %v9769_v3  ;;  %v458_v21 = vsel %vm456_vm1, %v9778_v6, %v9777_v60  ;;  %v1231_v60 = vsel %vm1227_vm9, %v6387_v31, %v6376_v61  ;;  %v1161_v61 = vsel %vm1157_vm10, %v6218_v10, %v6216_v9  ;;  %v9793_v9 = vld [vmem:[#allocation210_spill] sm:$0xff] }
 0x3a6   : > { %2056 = vrot.lane.b32.xlu2 %v6220_v32, %s4545_s11  ;;  %2054 = vrot.lane.b32.xlu1 %v6222_v40, %s4545_s11  ;;  %v1098_v10 = vsel %vm1094_vm8, %v9793_v9, %v6020_v13  ;;  %vm3204_vm8 = vcmask 187392  }
 0x3a7   : > { %2052 = vrot.lane.b32.xlu0 %v6224_v45, %s4545_s11  ;;  %3537 = vmatpush.bf16.msra.mxu2 %v1592_v35  ;;  %v9775_v35 = vld [vmem:[#allocation74_spill] sm:$0xff] }
 0x3a8   : > { %3511 = vmatpush.bf16.msra.mxu0 %v1588_v57  ;;  %v6435_v39 = vpop.permute.xlu2 %1217  ;;  %v1198_v27 = vpop.permute.xlu1 %1197  ;;  %v521_v54 = vsel %vm519_vm3, %v9775_v35, %v9774_v12  ;;  %v9776_v57 = vld [vmem:[#allocation75_spill] sm:$0xff] }
 0x3a9   : > { %v1235_v38 = vsel %vm1227_vm9, %v1198_v27, %v6312_v20  ;;  %v1196_v0 = vpop.permute.xlu0 %1195  ;;  %v520_v46 = vsel %vm519_vm3, %v9776_v57, %v9775_v35  ;;  %v1424_v30 = vsel %vm1249_vm2, %v521_v54, %v584_v16  ;;  %v9785_v54 = vld [vmem:[#allocation27_spill] sm:$0xff] }
 0x3aa   : > { %v1233_v24 = vsel %vm1227_vm9, %v6292_v37, %v1196_v0  ;;  %v1234_v26 = vsel %vm1227_vm9, %v1196_v0, %v1198_v27  ;;  %v6456_v63 = vsel %vm1249_vm2, %v1165_v25, %v1235_v38  ;;  %v9773_v37 = vld [vmem:[#allocation81_spill] sm:$0xff]  ;;  %v394_v25 = vsel %vm393_vm0, %v9780_v59, %v9779_v34  ;;  %v9786_v57 = vld [vmem:[#allocation31_spill] sm:$0xff] }
 0x3ab   : > { %9768 = vst [vmem:[#allocation103_spill] sm:$0xff] %v6456_v63  ;;  %3538 = vmatpush.bf16.msra.mxu2 %v1508_v50  ;;  %v6463_v42 = vsel %vm1249_vm2, %v1163_v62, %v1233_v24  ;;  %v6466_v11 = vsel %vm1249_vm2, %v1164_v23, %v1234_v26  ;;  %v583_v41 = vsel %vm582_vm4, %v9773_v37, %v9770_v14  ;;  %v9781_v62 = vld [vmem:[#allocation52_spill] sm:$0xff]  ;;  %v9783_v23 = vld [vmem:[#allocation38_spill] sm:$0xff] }
 0x3ac   : > { %9771 = vst [vmem:[#allocation104_spill] sm:$0xff] %v6463_v42  ;;  %3512 = vmatpush.bf16.msra.mxu0 %v1504_v56  ;;  %v1420_v27 = vsel %vm1249_vm2, %v520_v46, %v583_v41  ;;  %v457_v38 = vsel %vm456_vm1, %v9781_v62, %v9778_v6  ;;  %v395_v24 = vsel %vm393_vm0, %v9779_v34, %v9783_v23  ;;  %v9790_v6 = vld [vmem:[#allocation7_spill] sm:$0xff] }
 0x3ad   : > { %9772 = vst [vmem:[#allocation108_spill] sm:$0xff] %v6466_v11  ;;  %v1168_v26 = vsel %vm1157_vm10, %v6255_v17, %v6199_v2  ;;  %v1166_v56 = vsel %vm1157_vm10, %v6165_v18, %v6257_v49  ;;  %v1340_v16 = vsel %vm1249_vm2, %v395_v24, %v458_v21  ;;  %v1167_v37 = vsel %vm1157_vm10, %v6257_v49, %v6255_v17 }
 0x3ae   : > { %2062 = vrot.lane.b32.xlu2 %v6240_v47, %s4545_s11  ;;  %2060 = vrot.lane.b32.xlu1 %v6242_v48, %s4545_s11  ;;  %v1336_v18 = vsel %vm1249_vm2, %v394_v25, %v457_v38  ;;  %v332_v46 = vsel %vm330_vm15, %v9786_v57, %v9785_v54  ;;  %v1852_v25 = vsel %vm1249_vm2, %v1161_v61, %v1231_v60  ;;  %v9808_v61 = vld [vmem:[#allocation236_spill] sm:$0xff] }
 0x3af   : > { %2058 = vrot.lane.b32.xlu0 %v6244_v51, %s4545_s11  ;;  %3539 = vmatpush.bf16.msra.mxu2 %v1424_v30  ;;  %v1256_v21 = vsel %vm1249_vm2, %v9790_v6, %v332_v46  ;;  %v1171_v62 = vsel %vm1157_vm10, %v6275_v58, %v6214_v8  ;;  %v1169_v38 = vsel %vm1157_vm10, %v6199_v2, %v6277_v28  ;;  %v9804_v46 = vld [vmem:[#allocation175_spill] sm:$0xff] }
 0x3b0   : > { %3513 = vmatpush.bf16.msra.mxu0 %v1420_v27  ;;  %v6494_v0 = vpop.permute.xlu2 %1223  ;;  %v1204_v50 = vpop.permute.xlu1 %1203  ;;  %v9791_v27 = vld [vmem:[#allocation4_spill] sm:$0xff]  ;;  %v1170_v24 = vsel %vm1157_vm10, %v6277_v28, %v6275_v58  ;;  %v9799_v28 = vld [vmem:[#allocation193_spill] sm:$0xff] }
 0x3b1   : > { %9782 = vst [vmem:[#allocation93_spill] sm:$0xff] %v6494_v0  ;;  %v1238_v3 = vsel %vm1227_vm9, %v1204_v50, %v6331_v43  ;;  %v1202_v14 = vpop.permute.xlu0 %1201 }
 0x3b2   : > { %v1236_v41 = vsel %vm1227_vm9, %v6312_v20, %v1202_v14  ;;  %v1237_v12 = vsel %vm1227_vm9, %v1202_v14, %v1204_v50  ;;  %v6515_v35 = vsel %vm1249_vm2, %v1168_v26, %v1238_v3  ;;  %v9789_v20 = vld [vmem:[#allocation28_spill] sm:$0xff]  ;;  %v9795_v3 = vld [vmem:[#allocation207_spill] sm:$0xff] }
 0x3b3   : > { %9784 = vst [vmem:[#allocation79_spill] sm:$0xff] %v6515_v35  ;;  %3540 = vmatpush.bf16.msra.mxu2 %v1340_v16  ;;  %v6522_v30 = vsel %vm1249_vm2, %v1166_v56, %v1236_v41  ;;  %v6525_v49 = vsel %vm1249_vm2, %v1167_v37, %v1237_v12  ;;  %v331_v17 = vsel %vm330_vm15, %v9789_v20, %v9786_v57  ;;  %v9796_v14 = vld [vmem:[#allocation208_spill] sm:$0xff]  ;;  %v9801_v12 = vld [vmem:[#allocation233_spill] sm:$0xff]  ;;  %v9803_v57 = vld [vmem:[#allocation174_spill] sm:$0xff] }
 0x3b4   : > { %9787 = vst [vmem:[#allocation80_spill] sm:$0xff] %v6522_v30  ;;  %3514 = vmatpush.bf16.msra.mxu0 %v1336_v18  ;;  %v1252_v34 = vsel %vm1249_vm2, %v9791_v27, %v331_v17  ;;  %v1035_v16 = vsel %vm1031_vm7, %v9796_v14, %v9795_v3  ;;  %v9802_v18 = vld [vmem:[#allocation234_spill] sm:$0xff]  ;;  %v909_v20 = vsel %vm905_vm12, %v9804_v46, %v9803_v57  ;;  %v9807_v27 = vld [vmem:[#allocation235_spill] sm:$0xff]  ;;  %vm2407_vm7 = vcmask 498688  }
 0x3b5   : > { %9788 = vst [vmem:[#allocation81_spill] sm:$0xff] %v6525_v49  ;;  %v1768_v58 = vsel %vm1249_vm2, %v1035_v16, %v1098_v10  ;;  %v1173_v9 = vsel %vm1157_vm10, %v9808_v61, %v9807_v27 }
 0x3b6   : > { %2068 = vrot.lane.b32.xlu2 %v6259_v19, %s4545_s11  ;;  %2066 = vrot.lane.b32.xlu1 %v6261_v7, %s4545_s11 }
 0x3b7   : > { %2064 = vrot.lane.b32.xlu0 %v6263_v52, %s4545_s11  ;;  %3541 = vmatpush.bf16.msra.mxu2 %v1256_v21  ;;  %v9806_v21 = vld [vmem:[#allocation231_spill] sm:$0xff] }
 0x3b8   : > { %3515 = vmatpush.bf16.msra.mxu0 %v1252_v34  ;;  %v6546_v31 = vpop.permute.xlu2 %1924  ;;  %v1210_v59 = vpop.permute.xlu1 %1209  ;;  %v1174_v34 = vsel %vm1157_vm10, %v9807_v27, %v9806_v21  ;;  %v9820_v27 = vld [vmem:[#allocation239_spill] sm:$0xff] }
 0x3b9   : > { %9792 = vst [vmem:[#allocation64_spill] sm:$0xff] %v6546_v31  ;;  %v1241_v50 = vsel %vm1227_vm9, %v1210_v59, %v6374_v15  ;;  %v1208_v23 = vpop.permute.xlu0 %1207 }
 0x3ba   : > { %v1239_v26 = vsel %vm1227_vm9, %v6331_v43, %v1208_v23  ;;  %v1240_v56 = vsel %vm1227_vm9, %v1208_v23, %v1210_v59  ;;  %v6567_v2 = vsel %vm1249_vm2, %v1171_v62, %v1241_v50  ;;  %v9800_v43 = vld [vmem:[#allocation194_spill] sm:$0xff]  ;;  %v1172_v59 = vsel %vm1157_vm10, %v6214_v8, %v9808_v61  ;;  %v9810_v50 = vld [vmem:[#allocation156_spill] sm:$0xff] }
 0x3bb   : > { %9794 = vst [vmem:[#allocation74_spill] sm:$0xff] %v6567_v2  ;;  %v6573_v37 = vsel %vm1249_vm2, %v1169_v38, %v1239_v26  ;;  %v6576_v13 = vsel %vm1249_vm2, %v1170_v24, %v1240_v56  ;;  %v972_v41 = vsel %vm968_vm11, %v9800_v43, %v9799_v28  ;;  %v9809_v38 = vld [vmem:[#allocation155_spill] sm:$0xff]  ;;  %v9812_v26 = vld [vmem:[#allocation136_spill] sm:$0xff]  ;;  %v9813_v56 = vld [vmem:[#allocation137_spill] sm:$0xff] }
 0x3bc   : > { %3586 = vmatpush.bf16.msrb.mxu0 %v1852_v25  ;;  %9797 = vst [vmem:[#allocation75_spill] sm:$0xff] %v6573_v37  ;;  %v1684_v6 = vsel %vm1249_vm2, %v909_v20, %v972_v41  ;;  %v846_v23 = vsel %vm842_vm13, %v9810_v50, %v9809_v38  ;;  %v775_v3 = vsel %vm771_vm14, %v9813_v56, %v9812_v26  ;;  %v9816_v41 = vld [vmem:[#allocation109_spill] sm:$0xff]  ;;  %v9822_v61 = vld [vmem:[#allocation106_spill] sm:$0xff] }
 0x3bd   : > { %9798 = vst [vmem:[#allocation50_spill] sm:$0xff] %v6576_v13 }
 0x3be   : > { %2074 = vrot.lane.b32.xlu2 %v6279_v44, %s4545_s11  ;;  %2072 = vrot.lane.b32.xlu1 %v9801_v12, %s4545_s11 }
 0x3bf   : > { %2070 = vrot.lane.b32.xlu0 %v9802_v18, %s4545_s11 }
 0x3c0   : > { %3587 = vmatpush.bf16.msrb.mxu0 %v1768_v58  ;;  %v6591_v17 = vpop.permute.xlu2 %1987  ;;  %v1216_v60 = vpop.permute.xlu1 %1215  ;;  %v1600_v58 = vsel %vm1249_vm2, %v775_v3, %v846_v23  ;;  %v9826_v3 = vld [vmem:[#allocation241_spill] sm:$0xff] }
 0x3c1   : > { %9805 = vst [vmem:[#allocation51_spill] sm:$0xff] %v6591_v17  ;;  %v1244_v25 = vsel %vm1227_vm9, %v1216_v60, %v6435_v39  ;;  %v1214_v62 = vpop.permute.xlu0 %1213 }
 0x3c2   : > { %v1242_v10 = vsel %vm1227_vm9, %v6374_v15, %v1214_v62  ;;  %v1243_v24 = vsel %vm1227_vm9, %v1214_v62, %v1216_v60  ;;  %v6612_v8 = vsel %vm1249_vm2, %v1174_v34, %v1244_v25  ;;  %v9817_v15 = vld [vmem:[#allocation110_spill] sm:$0xff]  ;;  %v9818_v60 = vld [vmem:[#allocation237_spill] sm:$0xff] }
 0x3c3   : > { %9811 = vst [vmem:[#allocation45_spill] sm:$0xff] %v6612_v8  ;;  %v6618_v14 = vsel %vm1249_vm2, %v1172_v59, %v1242_v10  ;;  %v6621_v16 = vsel %vm1249_vm2, %v1173_v9, %v1243_v24  ;;  %v712_v20 = vsel %vm708_vm6, %v9817_v15, %v9816_v41  ;;  %v9821_v34 = vld [vmem:[#allocation105_spill] sm:$0xff]  ;;  %v9824_v9 = vld [vmem:[#allocation232_spill] sm:$0xff]  ;;  %v9827_v8 = vld [vmem:[#allocation82_spill] sm:$0xff]  ;;  %vm2344_vm6 = vcmask 629760  }
 0x3c4   : > { %3588 = vmatpush.bf16.msrb.mxu0 %v1684_v6  ;;  %9814 = vst [vmem:[#allocation46_spill] sm:$0xff] %v6618_v14  ;;  %v9819_v6 = vld [vmem:[#allocation238_spill] sm:$0xff]  ;;  %v649_v59 = vsel %vm645_vm5, %v9822_v61, %v9821_v34  ;;  %v9825_v10 = vld [vmem:[#allocation240_spill] sm:$0xff]  ;;  %v9828_v34 = vld [vmem:[#allocation83_spill] sm:$0xff]  ;;  %vm2281_vm5 = vcmask 637952  }
 0x3c5   : > { %9815 = vst [vmem:[#allocation52_spill] sm:$0xff] %v6621_v16  ;;  %v1516_v23 = vsel %vm1249_vm2, %v649_v59, %v712_v20  ;;  %v1177_v24 = vsel %vm1157_vm10, %v9825_v10, %v9824_v9  ;;  %v586_v61 = vsel %vm582_vm4, %v9828_v34, %v9827_v8  ;;  %v1176_v20 = vsel %vm1157_vm10, %v9826_v3, %v9825_v10  ;;  %v9830_v16 = vld [vmem:[#allocation76_spill] sm:$0xff] }
 0x3c6   : > { %2080 = vrot.lane.b32.xlu2 %v9818_v60, %s4545_s11  ;;  %2078 = vrot.lane.b32.xlu1 %v9819_v6, %s4545_s11  ;;  %vm2218_vm4 = vcmask 646144  }
 0x3c7   : > { %2076 = vrot.lane.b32.xlu0 %v9820_v27, %s4545_s11 }
 0x3c8   : > { %3589 = vmatpush.bf16.msrb.mxu0 %v1600_v58  ;;  %v6636_v25 = vpop.permute.xlu2 %1993  ;;  %v1222_v62 = vpop.permute.xlu1 %1221  ;;  %v1175_v58 = vsel %vm1157_vm10, %v9806_v21, %v9826_v3  ;;  %v9834_v3 = vld [vmem:[#allocation53_spill] sm:$0xff]  ;;  %vm3442_vm10 = vcmask 719872  }
 0x3c9   : > { %9823 = vst [vmem:[#allocation38_spill] sm:$0xff] %v6636_v25  ;;  %v1247_v41 = vsel %vm1227_vm9, %v1222_v62, %v6494_v0  ;;  %v1220_v15 = vpop.permute.xlu0 %1219  ;;  %v9831_v0 = vld [vmem:[#allocation77_spill] sm:$0xff] }
 0x3ca   : > { %v1245_v59 = vsel %vm1227_vm9, %v6435_v39, %v1220_v15  ;;  %v1246_v9 = vsel %vm1227_vm9, %v1220_v15, %v1222_v62  ;;  %v6657_v21 = vsel %vm1249_vm2, %v1177_v24, %v1247_v41  ;;  %v9835_v39 = vld [vmem:[#allocation54_spill] sm:$0xff]  ;;  %v9837_v41 = vld [vmem:[#allocation243_spill] sm:$0xff] }
 0x3cb   : > { %9829 = vst [vmem:[#allocation31_spill] sm:$0xff] %v6657_v21  ;;  %v6663_v14 = vsel %vm1249_vm2, %v1175_v58, %v1245_v59  ;;  %v6666_v8 = vsel %vm1249_vm2, %v1176_v20, %v1246_v9  ;;  %v460_v62 = vsel %vm456_vm1, %v9835_v39, %v9834_v3  ;;  %v9836_v24 = vld [vmem:[#allocation242_spill] sm:$0xff]  ;;  %v9840_v58 = vld [vmem:[#allocation48_spill] sm:$0xff]  ;;  %v9843_v59 = vld [vmem:[#allocation23_spill] sm:$0xff]  ;;  %vm2092_vm1 = vcmask 785408  }
 0x3cc   : > { %3590 = vmatpush.bf16.msrb.mxu0 %v1516_v23  ;;  %v523_v23 = vsel %vm519_vm3, %v9831_v0, %v9830_v16  ;;  %9832 = vst [vmem:[#allocation28_spill] sm:$0xff] %v6663_v14  ;;  %v9838_v0 = vld [vmem:[#allocation244_spill] sm:$0xff]  ;;  %v9839_v16 = vld [vmem:[#allocation47_spill] sm:$0xff]  ;;  %v9845_v3 = vld [vmem:[#allocation6_spill] sm:$0xff]  ;;  %vm2155_vm3 = vcmask 777216  }
 0x3cd   : > { %9833 = vst [vmem:[#allocation7_spill] sm:$0xff] %v6666_v8  ;;  %v1432_v10 = vsel %vm1249_vm2, %v523_v23, %v586_v61  ;;  %v397_v9 = vsel %vm393_vm0, %v9840_v58, %v9839_v16  ;;  %v9844_v23 = vld [vmem:[#allocation30_spill] sm:$0xff]  ;;  %vm2029_vm0 = vcmask 793600  }
 0x3ce   : > { %2086 = vrot.lane.b32.xlu2 %v9836_v24, %s4545_s11  ;;  %2084 = vrot.lane.b32.xlu1 %v9837_v41, %s4545_s11  ;;  %v1348_v61 = vsel %vm1249_vm2, %v397_v9, %v460_v62 }
 0x3cf   : > { %2082 = vrot.lane.b32.xlu0 %v9838_v0, %s4545_s11 }
 0x3d0   : > { %3591 = vmatpush.bf16.msrb.mxu0 %v1432_v10  ;;  %v6681_v15 = vpop.permute.xlu2 %1999  ;;  %v6683_v34 = vpop.permute.xlu1 %1922  ;;  %v334_v10 = vsel %vm330_vm15, %v9844_v23, %v9843_v59 }
 0x3d1   : > { %9841 = vst [vmem:[#allocation4_spill] sm:$0xff] %v6683_v34  ;;  %v6686_v20 = vpop.permute.xlu0 %1225  ;;  %v6693_v39 = vsel %vm1249_vm2, %v9845_v3, %v334_v10 }
 0x3d2   : > { %9842 = vst [vmem:[#allocation210_spill] sm:$0xff] %v6686_v20 }
 0x3d3   : > { %9846 = vst [vmem:[#allocation207_spill] sm:$0xff] %v6693_v39 }
 0x3d4   : > { %3592 = vmatpush.bf16.msrb.mxu0 %v1348_v61 }
 0x3d6   : > { %2113 = vrot.lane.b32.xlu2 %v6205_v1, %s4546_s12  ;;  %2090 = vrot.lane.b32.xlu1 %v6343_v29, %s4545_s11 }
 0x3d7   : > { %2088 = vrot.lane.b32.xlu0 %v6346_v36, %s4545_s11 }
 0x3d8   : > { %3593 = vmatpush.bf16.msrb.mxu0 %v6693_v39  ;;  %v6702_v62 = vpop.permute.xlu2 %2005  ;;  %v6704_v16 = vpop.permute.xlu1 %1928 }
 0x3d9   : > { %9847 = vst [vmem:[#allocation208_spill] sm:$0xff] %v6704_v16  ;;  %v6706_v58 = vpop.permute.xlu0 %1926 }
 0x3da   : > { %9848 = vst [vmem:[#allocation233_spill] sm:$0xff] %v6706_v58 }
 0x3de   : > { %2119 = vrot.lane.b32.xlu2 %v6220_v32, %s4546_s12  ;;  %2117 = vrot.lane.b32.xlu1 %v6222_v40, %s4546_s12 }
 0x3df   : > { %2115 = vrot.lane.b32.xlu0 %v6224_v45, %s4546_s12 }
 0x3e0   : > { %v6714_v9 = vpop.permute.xlu2 %2011  ;;  %v6716_v61 = vpop.permute.xlu1 %1991 }
 0x3e1   : > { %9849 = vst [vmem:[#allocation234_spill] sm:$0xff] %v6716_v61  ;;  %v6718_v10 = vpop.permute.xlu0 %1989 }
 0x3e6   : > { %2125 = vrot.lane.b32.xlu2 %v6240_v47, %s4546_s12  ;;  %2123 = vrot.lane.b32.xlu1 %v6242_v48, %s4546_s12 }
 0x3e7   : > { %2121 = vrot.lane.b32.xlu0 %v6244_v51, %s4546_s12 }
 0x3e8   : > { %v6726_v3 = vpop.permute.xlu2 %2017  ;;  %v1998_v20 = vpop.permute.xlu1 %1997 }
 0x3e9   : > { %v1996_v21 = vpop.permute.xlu0 %1995  ;;  %v2035_v55 = vsel %vm2029_vm0, %v1998_v20, %v6681_v15 }
 0x3ea   : > { %v2033_v56 = vsel %vm2029_vm0, %v6636_v25, %v1996_v21  ;;  %v2034_v33 = vsel %vm2029_vm0, %v1996_v21, %v1998_v20 }
 0x3ee   : > { %2131 = vrot.lane.b32.xlu2 %v6259_v19, %s4546_s12  ;;  %2129 = vrot.lane.b32.xlu1 %v6261_v7, %s4546_s12 }
 0x3ef   : > { %2127 = vrot.lane.b32.xlu0 %v6263_v52, %s4546_s12 }
 0x3f0   : > { %v6734_v8 = vpop.permute.xlu2 %2023  ;;  %v2004_v14 = vpop.permute.xlu1 %2003 }
 0x3f1   : > { %v2002_v16 = vpop.permute.xlu0 %2001 }
 0x3f6   : > { %2137 = vrot.lane.b32.xlu2 %v6279_v44, %s4546_s12  ;;  %2135 = vrot.lane.b32.xlu1 %v9801_v12, %s4546_s12 }
 0x3f7   : > { %2133 = vrot.lane.b32.xlu0 %v9802_v18, %s4546_s12 }
 0x3f8   : > { %v6742_v58 = vpop.permute.xlu2 %2050  ;;  %v6744_v31 = vpop.permute.xlu1 %2009 }
 0x3f9   : > { %v6746_v2 = vpop.permute.xlu0 %2007 }
 0x3fe   : > { %2143 = vrot.lane.b32.xlu2 %v9818_v60, %s4546_s12  ;;  %2141 = vrot.lane.b32.xlu1 %v9819_v6, %s4546_s12 }
 0x3ff   : > { %2139 = vrot.lane.b32.xlu0 %v9820_v27, %s4546_s12 }
 0x400   : > { %v6754_v34 = vpop.permute.xlu2 %2056  ;;  %v6756_v13 = vpop.permute.xlu1 %2015 }
 0x401   : > { %9850 = vst [vmem:[#allocation231_spill] sm:$0xff] %v6754_v34  ;;  %v6758_v37 = vpop.permute.xlu0 %2013 }
 0x406   : > { %2149 = vrot.lane.b32.xlu2 %v9836_v24, %s4546_s12  ;;  %2147 = vrot.lane.b32.xlu1 %v9837_v41, %s4546_s12 }
 0x407   : > { %2145 = vrot.lane.b32.xlu0 %v9838_v0, %s4546_s12 }
 0x408   : > { %v2063_v35 = vpop.permute.xlu2 %2062  ;;  %v6766_v49 = vpop.permute.xlu1 %2021 }
 0x409   : > { %v6768_v30 = vpop.permute.xlu0 %2019 }
 0x40e   : > { %2176 = vrot.lane.b32.xlu2 %v6205_v1, %s4547_s13  ;;  %2153 = vrot.lane.b32.xlu1 %v6343_v29, %s4546_s12 }
 0x40f   : > { %2151 = vrot.lane.b32.xlu0 %v6346_v36, %s4546_s12 }
 0x410   : > { %v2069_v63 = vpop.permute.xlu2 %2068  ;;  %v6776_v11 = vpop.permute.xlu1 %2027 }
 0x411   : > { %9851 = vst [vmem:[#allocation235_spill] sm:$0xff] %v6776_v11  ;;  %v6778_v42 = vpop.permute.xlu0 %2025 }
 0x416   : > { %2182 = vrot.lane.b32.xlu2 %v6220_v32, %s4547_s13  ;;  %2180 = vrot.lane.b32.xlu1 %v6222_v40, %s4547_s13 }
 0x417   : > { %2178 = vrot.lane.b32.xlu0 %v6224_v45, %s4547_s13 }
 0x418   : > { %v2075_v26 = vpop.permute.xlu2 %2074  ;;  %v6786_v38 = vpop.permute.xlu1 %2054 }
 0x419   : > { %9852 = vst [vmem:[#allocation236_spill] sm:$0xff] %v6786_v38  ;;  %v6788_v57 = vpop.permute.xlu0 %2052 }
 0x41e   : > { %2188 = vrot.lane.b32.xlu2 %v6240_v47, %s4547_s13  ;;  %2186 = vrot.lane.b32.xlu1 %v6242_v48, %s4547_s13 }
 0x41f   : > { %2184 = vrot.lane.b32.xlu0 %v6244_v51, %s4547_s13 }
 0x420   : > { %v6796_v28 = vpop.permute.xlu2 %2080  ;;  %v2061_v5 = vpop.permute.xlu1 %2060 }
 0x421   : > { %v2098_v53 = vsel %vm2092_vm1, %v2061_v5, %v2063_v35  ;;  %v2059_v50 = vpop.permute.xlu0 %2058 }
 0x422   : > { %v2096_v46 = vsel %vm2092_vm1, %v6754_v34, %v2059_v50  ;;  %v2097_v4 = vsel %vm2092_vm1, %v2059_v50, %v2061_v5  ;;  %v6808_v43 = vsel %vm1249_vm2, %v2035_v55, %v2098_v53  ;;  %v2038_v53 = vsel %vm2029_vm0, %v2004_v14, %v6702_v62 }
 0x423   : > { %9853 = vst [vmem:[#allocation109_spill] sm:$0xff] %v6808_v43  ;;  %v6811_v22 = vsel %vm1249_vm2, %v2033_v56, %v2096_v46  ;;  %v6814_v54 = vsel %vm1249_vm2, %v2034_v33, %v2097_v4  ;;  %v2036_v55 = vsel %vm2029_vm0, %v6681_v15, %v2002_v16  ;;  %v2037_v46 = vsel %vm2029_vm0, %v2002_v16, %v2004_v14 }
 0x424   : > { %9854 = vst [vmem:[#allocation110_spill] sm:$0xff] %v6811_v22  ;;  %v2041_v15 = vsel %vm2029_vm0, %v6744_v31, %v6714_v9  ;;  %v2039_v16 = vsel %vm2029_vm0, %v6702_v62, %v6746_v2  ;;  %v2042_v62 = vsel %vm2029_vm0, %v6714_v9, %v6758_v37 }
 0x425   : > { %9855 = vst [vmem:[#allocation239_spill] sm:$0xff] %v6814_v54 }
 0x426   : > { %2194 = vrot.lane.b32.xlu2 %v6259_v19, %s4547_s13  ;;  %2192 = vrot.lane.b32.xlu1 %v6261_v7, %s4547_s13 }
 0x427   : > { %2190 = vrot.lane.b32.xlu0 %v6263_v52, %s4547_s13 }
 0x428   : > { %v6822_v21 = vpop.permute.xlu2 %2086  ;;  %v2067_v5 = vpop.permute.xlu1 %2066 }
 0x429   : > { %v2101_v33 = vsel %vm2092_vm1, %v2067_v5, %v2069_v63  ;;  %v2065_v4 = vpop.permute.xlu0 %2064 }
 0x42a   : > { %v2099_v50 = vsel %vm2092_vm1, %v2063_v35, %v2065_v4  ;;  %v2100_v56 = vsel %vm2092_vm1, %v2065_v4, %v2067_v5  ;;  %v6833_v20 = vsel %vm1249_vm2, %v2038_v53, %v2101_v33 }
 0x42b   : > { %9856 = vst [vmem:[#allocation105_spill] sm:$0xff] %v6833_v20  ;;  %v6836_v43 = vsel %vm1249_vm2, %v2036_v55, %v2099_v50  ;;  %v6839_v54 = vsel %vm1249_vm2, %v2037_v46, %v2100_v56  ;;  %v2040_v55 = vsel %vm2029_vm0, %v6746_v2, %v6744_v31  ;;  %v2044_v2 = vsel %vm2029_vm0, %v6756_v13, %v6726_v3 }
 0x42c   : > { %9857 = vst [vmem:[#allocation106_spill] sm:$0xff] %v6836_v43 }
 0x42d   : > { %9858 = vst [vmem:[#allocation240_spill] sm:$0xff] %v6839_v54 }
 0x42e   : > { %2200 = vrot.lane.b32.xlu2 %v6279_v44, %s4547_s13  ;;  %2198 = vrot.lane.b32.xlu1 %v9801_v12, %s4547_s13 }
 0x42f   : > { %2196 = vrot.lane.b32.xlu0 %v9802_v18, %s4547_s13 }
 0x430   : > { %v6847_v35 = vpop.permute.xlu2 %2113  ;;  %v2073_v14 = vpop.permute.xlu1 %2072 }
 0x431   : > { %v2104_v5 = vsel %vm2092_vm1, %v2073_v14, %v2075_v26  ;;  %v2071_v53 = vpop.permute.xlu0 %2070 }
 0x432   : > { %v2102_v33 = vsel %vm2092_vm1, %v2069_v63, %v2071_v53  ;;  %v2103_v4 = vsel %vm2092_vm1, %v2071_v53, %v2073_v14  ;;  %v6862_v46 = vsel %vm1249_vm2, %v2041_v15, %v2104_v5 }
 0x433   : > { %9859 = vst [vmem:[#allocation241_spill] sm:$0xff] %v6862_v46  ;;  %v6865_v50 = vsel %vm1249_vm2, %v2039_v16, %v2102_v33  ;;  %v6868_v56 = vsel %vm1249_vm2, %v2040_v55, %v2103_v4  ;;  %v2043_v16 = vsel %vm2029_vm0, %v6758_v37, %v6756_v13  ;;  %v2045_v4 = vsel %vm2029_vm0, %v6726_v3, %v6768_v30 }
 0x434   : > { %9860 = vst [vmem:[#allocation82_spill] sm:$0xff] %v6865_v50 }
 0x435   : > { %9861 = vst [vmem:[#allocation83_spill] sm:$0xff] %v6868_v56 }
 0x436   : > { %2206 = vrot.lane.b32.xlu2 %v9818_v60, %s4547_s13  ;;  %2204 = vrot.lane.b32.xlu1 %v9819_v6, %s4547_s13 }
 0x437   : > { %2202 = vrot.lane.b32.xlu0 %v9820_v27, %s4547_s13 }
 0x438   : > { %v6876_v63 = vpop.permute.xlu2 %2119  ;;  %v2079_v31 = vpop.permute.xlu1 %2078 }
 0x439   : > { %v2107_v14 = vsel %vm2092_vm1, %v2079_v31, %v6796_v28  ;;  %v2077_v15 = vpop.permute.xlu0 %2076 }
 0x43a   : > { %v2105_v5 = vsel %vm2092_vm1, %v2075_v26, %v2077_v15  ;;  %v2106_v53 = vsel %vm2092_vm1, %v2077_v15, %v2079_v31  ;;  %v6892_v55 = vsel %vm1249_vm2, %v2044_v2, %v2107_v14  ;;  %v2047_v26 = vsel %vm2029_vm0, %v6766_v49, %v6734_v8 }
 0x43b   : > { %9862 = vst [vmem:[#allocation76_spill] sm:$0xff] %v6892_v55  ;;  %v6895_v33 = vsel %vm1249_vm2, %v2042_v62, %v2105_v5  ;;  %v6898_v9 = vsel %vm1249_vm2, %v2043_v16, %v2106_v53  ;;  %v2046_v62 = vsel %vm2029_vm0, %v6768_v30, %v6766_v49  ;;  %v2048_v53 = vsel %vm2029_vm0, %v6734_v8, %v6778_v42 }
 0x43c   : > { %9863 = vst [vmem:[#allocation77_spill] sm:$0xff] %v6895_v33 }
 0x43d   : > { %9864 = vst [vmem:[#allocation53_spill] sm:$0xff] %v6898_v9 }
 0x43e   : > { %2212 = vrot.lane.b32.xlu2 %v9836_v24, %s4547_s13  ;;  %2210 = vrot.lane.b32.xlu1 %v9837_v41, %s4547_s13 }
 0x43f   : > { %2208 = vrot.lane.b32.xlu0 %v9838_v0, %s4547_s13 }
 0x440   : > { %v6906_v37 = vpop.permute.xlu2 %2125  ;;  %v2085_v13 = vpop.permute.xlu1 %2084 }
 0x441   : > { %v2110_v31 = vsel %vm2092_vm1, %v2085_v13, %v6822_v21  ;;  %v2083_v2 = vpop.permute.xlu0 %2082 }
 0x442   : > { %v2108_v14 = vsel %vm2092_vm1, %v6796_v28, %v2083_v2  ;;  %v2109_v15 = vsel %vm2092_vm1, %v2083_v2, %v2085_v13  ;;  %v6923_v16 = vsel %vm1249_vm2, %v2047_v26, %v2110_v31  ;;  %v2049_v13 = vsel %vm2029_vm0, %v6778_v42, %v6776_v11 }
 0x443   : > { %9865 = vst [vmem:[#allocation54_spill] sm:$0xff] %v6923_v16  ;;  %v6926_v5 = vsel %vm1249_vm2, %v2045_v4, %v2108_v14  ;;  %v6929_v3 = vsel %vm1249_vm2, %v2046_v62, %v2109_v15 }
 0x444   : > { %9866 = vst [vmem:[#allocation47_spill] sm:$0xff] %v6926_v5 }
 0x445   : > { %9867 = vst [vmem:[#allocation48_spill] sm:$0xff] %v6929_v3 }
 0x446   : > { %2239 = vrot.lane.b32.xlu2 %v6205_v1, %s4548_s14  ;;  %2216 = vrot.lane.b32.xlu1 %v6343_v29, %s4547_s13 }
 0x447   : > { %2214 = vrot.lane.b32.xlu0 %v6346_v36, %s4547_s13 }
 0x448   : > { %v6937_v30 = vpop.permute.xlu2 %2131  ;;  %v6939_v49 = vpop.permute.xlu1 %2090 }
 0x449   : > { %9868 = vst [vmem:[#allocation6_spill] sm:$0xff] %v6939_v49  ;;  %v2089_v28 = vpop.permute.xlu0 %2088 }
 0x44a   : > { %v2111_v26 = vsel %vm2092_vm1, %v6822_v21, %v2089_v28  ;;  %v2112_v4 = vsel %vm2092_vm1, %v2089_v28, %v6939_v49 }
 0x44b   : > { %v6952_v31 = vsel %vm1249_vm2, %v2048_v53, %v2111_v26  ;;  %v6955_v2 = vsel %vm1249_vm2, %v2049_v13, %v2112_v4 }
 0x44c   : > { %9869 = vst [vmem:[#allocation249_spill] sm:$0xff] %v6952_v31 }
 0x44d   : > { %9870 = vst [vmem:[#allocation250_spill] sm:$0xff] %v6955_v2 }
 0x44e   : > { %2245 = vrot.lane.b32.xlu2 %v6220_v32, %s4548_s14  ;;  %2243 = vrot.lane.b32.xlu1 %v6222_v40, %s4548_s14 }
 0x44f   : > { %2241 = vrot.lane.b32.xlu0 %v6224_v45, %s4548_s14 }
 0x450   : > { %v6963_v42 = vpop.permute.xlu2 %2137  ;;  %v6965_v8 = vpop.permute.xlu1 %2117 }
 0x451   : > { %v6967_v21 = vpop.permute.xlu0 %2115 }
 0x456   : > { %2251 = vrot.lane.b32.xlu2 %v6240_v47, %s4548_s14  ;;  %2249 = vrot.lane.b32.xlu1 %v6242_v48, %s4548_s14 }
 0x457   : > { %2247 = vrot.lane.b32.xlu0 %v6244_v51, %s4548_s14 }
 0x458   : > { %v6975_v62 = vpop.permute.xlu2 %2143  ;;  %v2124_v14 = vpop.permute.xlu1 %2123 }
 0x459   : > { %v2122_v15 = vpop.permute.xlu0 %2121  ;;  %v2161_v43 = vsel %vm2155_vm3, %v2124_v14, %v6906_v37 }
 0x45a   : > { %v2159_v22 = vsel %vm2155_vm3, %v6876_v63, %v2122_v15  ;;  %v2160_v23 = vsel %vm2155_vm3, %v2122_v15, %v2124_v14 }
 0x45e   : > { %2257 = vrot.lane.b32.xlu2 %v6259_v19, %s4548_s14  ;;  %2255 = vrot.lane.b32.xlu1 %v6261_v7, %s4548_s14 }
 0x45f   : > { %2253 = vrot.lane.b32.xlu0 %v6263_v52, %s4548_s14 }
 0x460   : > { %v6983_v28 = vpop.permute.xlu2 %2149  ;;  %v2130_v53 = vpop.permute.xlu1 %2129 }
 0x461   : > { %v2128_v13 = vpop.permute.xlu0 %2127 }
 0x466   : > { %2263 = vrot.lane.b32.xlu2 %v6279_v44, %s4548_s14  ;;  %2261 = vrot.lane.b32.xlu1 %v9801_v12, %s4548_s14 }
 0x467   : > { %2259 = vrot.lane.b32.xlu0 %v9802_v18, %s4548_s14 }
 0x468   : > { %v6991_v26 = vpop.permute.xlu2 %2176  ;;  %v6993_v4 = vpop.permute.xlu1 %2135 }
 0x469   : > { %v6995_v11 = vpop.permute.xlu0 %2133 }
 0x46e   : > { %2269 = vrot.lane.b32.xlu2 %v9818_v60, %s4548_s14  ;;  %2267 = vrot.lane.b32.xlu1 %v9819_v6, %s4548_s14 }
 0x46f   : > { %2265 = vrot.lane.b32.xlu0 %v9820_v27, %s4548_s14 }
 0x470   : > { %v7003_v49 = vpop.permute.xlu2 %2182  ;;  %v7005_v2 = vpop.permute.xlu1 %2141 }
 0x471   : > { %v7007_v16 = vpop.permute.xlu0 %2139 }
 0x476   : > { %2275 = vrot.lane.b32.xlu2 %v9836_v24, %s4548_s14  ;;  %2273 = vrot.lane.b32.xlu1 %v9837_v41, %s4548_s14 }
 0x477   : > { %2271 = vrot.lane.b32.xlu0 %v9838_v0, %s4548_s14 }
 0x478   : > { %v2189_v31 = vpop.permute.xlu2 %2188  ;;  %v7015_v3 = vpop.permute.xlu1 %2147 }
 0x479   : > { %v7017_v5 = vpop.permute.xlu0 %2145 }
 0x47e   : > { %2302 = vrot.lane.b32.xlu2 %v6205_v1, %s4549_s17  ;;  %2279 = vrot.lane.b32.xlu1 %v6343_v29, %s4548_s14 }
 0x47f   : > { %2277 = vrot.lane.b32.xlu0 %v6346_v36, %s4548_s14 }
 0x480   : > { %v2195_v9 = vpop.permute.xlu2 %2194  ;;  %v7025_v55 = vpop.permute.xlu1 %2153 }
 0x481   : > { %9871 = vst [vmem:[#allocation251_spill] sm:$0xff] %v7025_v55  ;;  %v7027_v33 = vpop.permute.xlu0 %2151 }
 0x486   : > { %2308 = vrot.lane.b32.xlu2 %v6220_v32, %s4549_s17  ;;  %2306 = vrot.lane.b32.xlu1 %v6222_v40, %s4549_s17 }
 0x487   : > { %2304 = vrot.lane.b32.xlu0 %v6224_v45, %s4549_s17 }
 0x488   : > { %v2201_v46 = vpop.permute.xlu2 %2200  ;;  %v7035_v56 = vpop.permute.xlu1 %2180 }
 0x489   : > { %v7037_v50 = vpop.permute.xlu0 %2178 }
 0x48e   : > { %2314 = vrot.lane.b32.xlu2 %v6240_v47, %s4549_s17  ;;  %2312 = vrot.lane.b32.xlu1 %v6242_v48, %s4549_s17 }
 0x48f   : > { %2310 = vrot.lane.b32.xlu0 %v6244_v51, %s4549_s17 }
 0x490   : > { %v7045_v20 = vpop.permute.xlu2 %2206  ;;  %v2187_v54 = vpop.permute.xlu1 %2186 }
 0x491   : > { %v2224_v25 = vsel %vm2218_vm4, %v2187_v54, %v2189_v31  ;;  %v2185_v34 = vpop.permute.xlu0 %2184 }
 0x492   : > { %v2222_v59 = vsel %vm2218_vm4, %v7003_v49, %v2185_v34  ;;  %v2223_v39 = vsel %vm2218_vm4, %v2185_v34, %v2187_v54  ;;  %v7057_v61 = vsel %vm1249_vm2, %v2161_v43, %v2224_v25  ;;  %v2164_v43 = vsel %vm2155_vm3, %v2130_v53, %v6937_v30 }
 0x493   : > { %9872 = vst [vmem:[#allocation252_spill] sm:$0xff] %v7057_v61  ;;  %v7060_v38 = vsel %vm1249_vm2, %v2159_v22, %v2222_v59  ;;  %v7063_v17 = vsel %vm1249_vm2, %v2160_v23, %v2223_v39  ;;  %v2162_v22 = vsel %vm2155_vm3, %v6906_v37, %v2128_v13  ;;  %v2163_v59 = vsel %vm2155_vm3, %v2128_v13, %v2130_v53 }
 0x494   : > { %9873 = vst [vmem:[#allocation253_spill] sm:$0xff] %v7063_v17  ;;  %v2167_v53 = vsel %vm2155_vm3, %v6993_v4, %v6963_v42  ;;  %v2165_v13 = vsel %vm2155_vm3, %v6937_v30, %v6995_v11  ;;  %v2170_v30 = vsel %vm2155_vm3, %v7005_v2, %v6975_v62 }
 0x496   : > { %2320 = vrot.lane.b32.xlu2 %v6259_v19, %s4549_s17  ;;  %2318 = vrot.lane.b32.xlu1 %v6261_v7, %s4549_s17 }
 0x497   : > { %2316 = vrot.lane.b32.xlu0 %v6263_v52, %s4549_s17 }
 0x498   : > { %v7071_v14 = vpop.permute.xlu2 %2212  ;;  %v2193_v54 = vpop.permute.xlu1 %2192 }
 0x499   : > { %v2227_v25 = vsel %vm2218_vm4, %v2193_v54, %v2195_v9  ;;  %v2191_v34 = vpop.permute.xlu0 %2190 }
 0x49a   : > { %v2225_v23 = vsel %vm2218_vm4, %v2189_v31, %v2191_v34  ;;  %v2226_v39 = vsel %vm2218_vm4, %v2191_v34, %v2193_v54  ;;  %v7082_v15 = vsel %vm1249_vm2, %v2164_v43, %v2227_v25 }
 0x49b   : > { %9874 = vst [vmem:[#allocation254_spill] sm:$0xff] %v7082_v15  ;;  %v7085_v61 = vsel %vm1249_vm2, %v2162_v22, %v2225_v23  ;;  %v7088_v17 = vsel %vm1249_vm2, %v2163_v59, %v2226_v39  ;;  %v2166_v22 = vsel %vm2155_vm3, %v6995_v11, %v6993_v4  ;;  %v2168_v4 = vsel %vm2155_vm3, %v6963_v42, %v7007_v16 }
 0x49c   : > { %9875 = vst [vmem:[#allocation255_spill] sm:$0xff] %v7085_v61 }
 0x49d   : > { %9876 = vst [vmem:[#allocation256_spill] sm:$0xff] %v7088_v17 }
 0x49e   : > { %2326 = vrot.lane.b32.xlu2 %v6279_v44, %s4549_s17  ;;  %2324 = vrot.lane.b32.xlu1 %v9801_v12, %s4549_s17 }
 0x49f   : > { %2322 = vrot.lane.b32.xlu0 %v9802_v18, %s4549_s17 }
 0x4a0   : > { %v7096_v37 = vpop.permute.xlu2 %2239  ;;  %v2199_v31 = vpop.permute.xlu1 %2198 }
 0x4a1   : > { %v2230_v54 = vsel %vm2218_vm4, %v2199_v31, %v2201_v46  ;;  %v2197_v43 = vpop.permute.xlu0 %2196 }
 0x4a2   : > { %v2228_v25 = vsel %vm2218_vm4, %v2195_v9, %v2197_v43  ;;  %v2229_v34 = vsel %vm2218_vm4, %v2197_v43, %v2199_v31  ;;  %v7111_v59 = vsel %vm1249_vm2, %v2167_v53, %v2230_v54 }
 0x4a3   : > { %9877 = vst [vmem:[#allocation257_spill] sm:$0xff] %v7111_v59  ;;  %v7114_v23 = vsel %vm1249_vm2, %v2165_v13, %v2228_v25  ;;  %v7117_v39 = vsel %vm1249_vm2, %v2166_v22, %v2229_v34  ;;  %v2169_v13 = vsel %vm2155_vm3, %v7007_v16, %v7005_v2  ;;  %v2173_v2 = vsel %vm2155_vm3, %v7015_v3, %v6983_v28 }
 0x4a4   : > { %9878 = vst [vmem:[#allocation258_spill] sm:$0xff] %v7114_v23  ;;  %v2171_v34 = vsel %vm2155_vm3, %v6975_v62, %v7017_v5 }
 0x4a5   : > { %9879 = vst [vmem:[#allocation259_spill] sm:$0xff] %v7117_v39 }
 0x4a6   : > { %2332 = vrot.lane.b32.xlu2 %v9818_v60, %s4549_s17  ;;  %2330 = vrot.lane.b32.xlu1 %v9819_v6, %s4549_s17 }
 0x4a7   : > { %2328 = vrot.lane.b32.xlu0 %v9820_v27, %s4549_s17 }
 0x4a8   : > { %v7125_v11 = vpop.permute.xlu2 %2245  ;;  %v2205_v9 = vpop.permute.xlu1 %2204 }
 0x4a9   : > { %v2233_v31 = vsel %vm2218_vm4, %v2205_v9, %v7045_v20  ;;  %v2203_v53 = vpop.permute.xlu0 %2202 }
 0x4aa   : > { %v2231_v54 = vsel %vm2218_vm4, %v2201_v46, %v2203_v53  ;;  %v2232_v43 = vsel %vm2218_vm4, %v2203_v53, %v2205_v9  ;;  %v7141_v22 = vsel %vm1249_vm2, %v2170_v30, %v2233_v31 }
 0x4ab   : > { %9880 = vst [vmem:[#allocation260_spill] sm:$0xff] %v7141_v22  ;;  %v7144_v25 = vsel %vm1249_vm2, %v2168_v4, %v2231_v54  ;;  %v7147_v42 = vsel %vm1249_vm2, %v2169_v13, %v2232_v43  ;;  %v2172_v4 = vsel %vm2155_vm3, %v7017_v5, %v7015_v3  ;;  %v2174_v43 = vsel %vm2155_vm3, %v6983_v28, %v7027_v33 }
 0x4ac   : > { %9881 = vst [vmem:[#allocation261_spill] sm:$0xff] %v7144_v25 }
 0x4ad   : > { %9882 = vst [vmem:[#allocation262_spill] sm:$0xff] %v7147_v42 }
 0x4ae   : > { %2338 = vrot.lane.b32.xlu2 %v9836_v24, %s4549_s17  ;;  %2336 = vrot.lane.b32.xlu1 %v9837_v41, %s4549_s17 }
 0x4af   : > { %2334 = vrot.lane.b32.xlu0 %v9838_v0, %s4549_s17 }
 0x4b0   : > { %v7155_v46 = vpop.permute.xlu2 %2251  ;;  %v2211_v16 = vpop.permute.xlu1 %2210 }
 0x4b1   : > { %v2236_v9 = vsel %vm2218_vm4, %v2211_v16, %v7071_v14  ;;  %v2209_v30 = vpop.permute.xlu0 %2208 }
 0x4b2   : > { %v2234_v31 = vsel %vm2218_vm4, %v7045_v20, %v2209_v30  ;;  %v2235_v53 = vsel %vm2218_vm4, %v2209_v30, %v2211_v16  ;;  %v7172_v13 = vsel %vm1249_vm2, %v2173_v2, %v2236_v9  ;;  %v2175_v16 = vsel %vm2155_vm3, %v7027_v33, %v7025_v55 }
 0x4b3   : > { %9883 = vst [vmem:[#allocation263_spill] sm:$0xff] %v7172_v13  ;;  %v7175_v54 = vsel %vm1249_vm2, %v2171_v34, %v2234_v31  ;;  %v7178_v62 = vsel %vm1249_vm2, %v2172_v4, %v2235_v53 }
 0x4b4   : > { %9884 = vst [vmem:[#allocation264_spill] sm:$0xff] %v7175_v54 }
 0x4b5   : > { %9885 = vst [vmem:[#allocation265_spill] sm:$0xff] %v7178_v62 }
 0x4b6   : > { %2365 = vrot.lane.b32.xlu2 %v6205_v1, %s4550_s18  ;;  %2342 = vrot.lane.b32.xlu1 %v6343_v29, %s4549_s17 }
 0x4b7   : > { %2340 = vrot.lane.b32.xlu0 %v6346_v36, %s4549_s17 }
 0x4b8   : > { %v7186_v20 = vpop.permute.xlu2 %2257  ;;  %v7188_v5 = vpop.permute.xlu1 %2216 }
 0x4b9   : > { %9886 = vst [vmem:[#allocation266_spill] sm:$0xff] %v7188_v5  ;;  %v2215_v3 = vpop.permute.xlu0 %2214 }
 0x4ba   : > { %v2237_v2 = vsel %vm2218_vm4, %v7071_v14, %v2215_v3  ;;  %v2238_v34 = vsel %vm2218_vm4, %v2215_v3, %v7188_v5 }
 0x4bb   : > { %v7201_v9 = vsel %vm1249_vm2, %v2174_v43, %v2237_v2  ;;  %v7204_v30 = vsel %vm1249_vm2, %v2175_v16, %v2238_v34 }
 0x4bc   : > { %9887 = vst [vmem:[#allocation267_spill] sm:$0xff] %v7201_v9 }
 0x4bd   : > { %9888 = vst [vmem:[#allocation268_spill] sm:$0xff] %v7204_v30 }
 0x4be   : > { %2371 = vrot.lane.b32.xlu2 %v6220_v32, %s4550_s18  ;;  %2369 = vrot.lane.b32.xlu1 %v6222_v40, %s4550_s18 }
 0x4bf   : > { %2367 = vrot.lane.b32.xlu0 %v6224_v45, %s4550_s18 }
 0x4c0   : > { %v7212_v33 = vpop.permute.xlu2 %2263  ;;  %v7214_v28 = vpop.permute.xlu1 %2243 }
 0x4c1   : > { %v7216_v14 = vpop.permute.xlu0 %2241 }
 0x4c6   : > { %2377 = vrot.lane.b32.xlu2 %v6240_v47, %s4550_s18  ;;  %2375 = vrot.lane.b32.xlu1 %v6242_v48, %s4550_s18 }
 0x4c7   : > { %2373 = vrot.lane.b32.xlu0 %v6244_v51, %s4550_s18 }
 0x4c8   : > { %v7224_v4 = vpop.permute.xlu2 %2269  ;;  %v2250_v31 = vpop.permute.xlu1 %2249 }
 0x4c9   : > { %v2248_v53 = vpop.permute.xlu0 %2247 }
 0x4ca   : > { %v2286_v23 = vsel %vm2281_vm5, %v2248_v53, %v2250_v31 }
 0x4ce   : > { %2383 = vrot.lane.b32.xlu2 %v6259_v19, %s4550_s18  ;;  %2381 = vrot.lane.b32.xlu1 %v6261_v7, %s4550_s18 }
 0x4cf   : > { %2379 = vrot.lane.b32.xlu0 %v6263_v52, %s4550_s18 }
 0x4d0   : > { %v7232_v3 = vpop.permute.xlu2 %2275  ;;  %v2256_v43 = vpop.permute.xlu1 %2255 }
 0x4d1   : > { %v2254_v16 = vpop.permute.xlu0 %2253 }
 0x4d6   : > { %2389 = vrot.lane.b32.xlu2 %v6279_v44, %s4550_s18  ;;  %2387 = vrot.lane.b32.xlu1 %v9801_v12, %s4550_s18 }
 0x4d7   : > { %2385 = vrot.lane.b32.xlu0 %v9802_v18, %s4550_s18 }
 0x4d8   : > { %v7240_v2 = vpop.permute.xlu2 %2302  ;;  %v7242_v34 = vpop.permute.xlu1 %2261 }
 0x4d9   : > { %v7244_v55 = vpop.permute.xlu0 %2259 }
 0x4de   : > { %2395 = vrot.lane.b32.xlu2 %v9818_v60, %s4550_s18  ;;  %2393 = vrot.lane.b32.xlu1 %v9819_v6, %s4550_s18 }
 0x4df   : > { %2391 = vrot.lane.b32.xlu0 %v9820_v27, %s4550_s18 }
 0x4e0   : > { %v7252_v5 = vpop.permute.xlu2 %2308  ;;  %v7254_v30 = vpop.permute.xlu1 %2267 }
 0x4e1   : > { %v7256_v13 = vpop.permute.xlu0 %2265 }
 0x4e6   : > { %2401 = vrot.lane.b32.xlu2 %v9836_v24, %s4550_s18  ;;  %2399 = vrot.lane.b32.xlu1 %v9837_v41, %s4550_s18 }
 0x4e7   : > { %2397 = vrot.lane.b32.xlu0 %v9838_v0, %s4550_s18 }
 0x4e8   : > { %v2315_v9 = vpop.permute.xlu2 %2314  ;;  %v7264_v62 = vpop.permute.xlu1 %2273 }
 0x4e9   : > { %v7266_v54 = vpop.permute.xlu0 %2271 }
 0x4ee   : > { %2428 = vrot.lane.b32.xlu2 %v6205_v1, %s4537_s29  ;;  %2405 = vrot.lane.b32.xlu1 %v6343_v29, %s4550_s18 }
 0x4ef   : > { %2403 = vrot.lane.b32.xlu0 %v6346_v36, %s4550_s18  ;;  %v2285_v36 = vsel %vm2281_vm5, %v7125_v11, %v2248_v53 }
 0x4f0   : > { %v2321_v42 = vpop.permute.xlu2 %2320  ;;  %v7274_v22 = vpop.permute.xlu1 %2279 }
 0x4f1   : > { %9889 = vst [vmem:[#allocation269_spill] sm:$0xff] %v7274_v22  ;;  %v7276_v25 = vpop.permute.xlu0 %2277 }
 0x4f6   : > { %2490 = vrot.lane.b32.xlu1 %v6205_v1, %s4538_s30  ;;  %2492 = vrot.lane.b32.xlu2 %v6224_v45, %s4538_s30 }
 0x4f7   : > { %2430 = vrot.lane.b32.xlu0 %v6224_v45, %s4537_s29  ;;  %v2287_v45 = vsel %vm2281_vm5, %v2250_v31, %v7155_v46 }
 0x4f8   : > { %v7284_v59 = vpop.permute.xlu1 %2306  ;;  %v2327_v24 = vpop.permute.xlu2 %2326 }
 0x4f9   : > { %v7286_v29 = vpop.permute.xlu0 %2304 }
 0x4fe   : > { %2432 = vrot.lane.b32.xlu1 %v6222_v40, %s4537_s29  ;;  %2434 = vrot.lane.b32.xlu2 %v6220_v32, %s4537_s29 }
 0x4ff   : > { %2494 = vrot.lane.b32.xlu0 %v6222_v40, %s4538_s30 }
 0x500   : > { %v2313_v1 = vpop.permute.xlu1 %2312  ;;  %v2333_v6 = vpop.permute.xlu2 %2332 }
 0x501   : > { %v2350_v41 = vsel %vm2344_vm6, %v2313_v1, %v2315_v9  ;;  %v2311_v39 = vpop.permute.xlu0 %2310 }
 0x502   : > { %v2348_v0 = vsel %vm2344_vm6, %v7252_v5, %v2311_v39  ;;  %v2349_v15 = vsel %vm2344_vm6, %v2311_v39, %v2313_v1  ;;  %v7304_v40 = vsel %vm1249_vm2, %v2287_v45, %v2350_v41  ;;  %v2290_v41 = vsel %vm2281_vm5, %v2256_v43, %v7186_v20 }
 0x503   : > { %v7307_v60 = vsel %vm1249_vm2, %v2285_v36, %v2348_v0  ;;  %v7310_v17 = vsel %vm1249_vm2, %v2286_v23, %v2349_v15  ;;  %v2288_v36 = vsel %vm2281_vm5, %v7155_v46, %v2254_v16  ;;  %v2289_v23 = vsel %vm2281_vm5, %v2254_v16, %v2256_v43 }
 0x504   : > { %v2291_v43 = vsel %vm2281_vm5, %v7186_v20, %v7244_v55  ;;  %v2296_v20 = vsel %vm2281_vm5, %v7254_v30, %v7224_v4 }
 0x506   : > { %2496 = vrot.lane.b32.xlu1 %v6220_v32, %s4538_s30  ;;  %2438 = vrot.lane.b32.xlu2 %v6242_v48, %s4537_s29 }
 0x507   : > { %2436 = vrot.lane.b32.xlu0 %v6244_v51, %s4537_s29 }
 0x508   : > { %v2319_v39 = vpop.permute.xlu1 %2318  ;;  %v2339_v61 = vpop.permute.xlu2 %2338 }
 0x509   : > { %v2353_v0 = vsel %vm2344_vm6, %v2319_v39, %v2321_v42  ;;  %v2317_v15 = vpop.permute.xlu0 %2316 }
 0x50a   : > { %v2351_v32 = vsel %vm2344_vm6, %v2315_v9, %v2317_v15  ;;  %v2352_v31 = vsel %vm2344_vm6, %v2317_v15, %v2319_v39  ;;  %v7327_v53 = vsel %vm1249_vm2, %v2290_v41, %v2353_v0  ;;  %v2293_v9 = vsel %vm2281_vm5, %v7242_v34, %v7212_v33 }
 0x50b   : > { %v7330_v1 = vsel %vm1249_vm2, %v2288_v36, %v2351_v32  ;;  %v7333_v45 = vsel %vm1249_vm2, %v2289_v23, %v2352_v31  ;;  %v2292_v41 = vsel %vm2281_vm5, %v7244_v55, %v7242_v34  ;;  %v2294_v34 = vsel %vm2281_vm5, %v7212_v33, %v7256_v13 }
 0x50e   : > { %2442 = vrot.lane.b32.xlu1 %v6263_v52, %s4537_s29  ;;  %2498 = vrot.lane.b32.xlu2 %v6244_v51, %s4538_s30 }
 0x50f   : > { %2440 = vrot.lane.b32.xlu0 %v6240_v47, %s4537_s29 }
 0x510   : > { %v2325_v46 = vpop.permute.xlu1 %2324  ;;  %v7368_v55 = vpop.permute.xlu2 %2365 }
 0x511   : > { %v2356_v16 = vsel %vm2344_vm6, %v2325_v46, %v2327_v24  ;;  %v2323_v39 = vpop.permute.xlu0 %2322 }
 0x512   : > { %v2354_v51 = vsel %vm2344_vm6, %v2321_v42, %v2323_v39  ;;  %v2355_v36 = vsel %vm2344_vm6, %v2323_v39, %v2325_v46  ;;  %v7354_v0 = vsel %vm1249_vm2, %v2293_v9, %v2356_v16 }
 0x513   : > { %9890 = vst [vmem:[#allocation270_spill] sm:$0xff] %v7354_v0  ;;  %v7357_v15 = vsel %vm1249_vm2, %v2292_v41, %v2355_v36  ;;  %v7360_v23 = vsel %vm1249_vm2, %v2291_v43, %v2354_v51  ;;  %v2299_v41 = vsel %vm2281_vm5, %v7264_v62, %v7232_v3  ;;  %v2298_v51 = vsel %vm2281_vm5, %v7266_v54, %v7264_v62 }
 0x516   : > { %2446 = vrot.lane.b32.xlu1 %v6259_v19, %s4537_s29  ;;  %2500 = vrot.lane.b32.xlu2 %v6242_v48, %s4538_s30  ;;  %v2295_v48 = vsel %vm2281_vm5, %v7256_v13, %v7254_v30 }
 0x517   : > { %2444 = vrot.lane.b32.xlu0 %v6261_v7, %s4537_s29 }
 0x518   : > { %v2331_v42 = vpop.permute.xlu1 %2330  ;;  %v7401_v36 = vpop.permute.xlu2 %2371 }
 0x519   : > { %v2359_v32 = vsel %vm2344_vm6, %v2331_v42, %v2333_v6  ;;  %v2329_v31 = vpop.permute.xlu0 %2328 }
 0x51a   : > { %v2357_v46 = vsel %vm2344_vm6, %v2327_v24, %v2329_v31  ;;  %v2358_v9 = vsel %vm2344_vm6, %v2329_v31, %v2331_v42  ;;  %v7383_v43 = vsel %vm1249_vm2, %v2296_v20, %v2359_v32  ;;  %v2297_v24 = vsel %vm2281_vm5, %v7224_v4, %v7266_v54 }
 0x51b   : > { %9891 = vst [vmem:[#allocation271_spill] sm:$0xff] %v7383_v43  ;;  %v7386_v16 = vsel %vm1249_vm2, %v2294_v34, %v2357_v46  ;;  %v7389_v39 = vsel %vm1249_vm2, %v2295_v48, %v2358_v9  ;;  %v2300_v54 = vsel %vm2281_vm5, %v7232_v3, %v7276_v25 }
 0x51c   : > { %9892 = vst [vmem:[#allocation272_spill] sm:$0xff] %v7386_v16 }
 0x51d   : > { %9893 = vst [vmem:[#allocation273_spill] sm:$0xff] %v7389_v39 }
 0x520   : > { %v2337_v33 = vpop.permute.xlu1 %2336 }
 0x521   : > { %v2362_v13 = vsel %vm2344_vm6, %v2337_v33, %v2339_v61  ;;  %v2335_v30 = vpop.permute.xlu0 %2334 }
 0x522   : > { %v2360_v42 = vsel %vm2344_vm6, %v2333_v6, %v2335_v30  ;;  %v2361_v20 = vsel %vm2344_vm6, %v2335_v30, %v2337_v33  ;;  %v7406_v34 = vsel %vm1249_vm2, %v2299_v41, %v2362_v13  ;;  %v2301_v6 = vsel %vm2281_vm5, %v7276_v25, %v7274_v22  ;;  %v7431_v41 = vpop.permute.xlu2 %2377 }
 0x523   : > { %9894 = vst [vmem:[#allocation274_spill] sm:$0xff] %v7406_v34  ;;  %v7409_v32 = vsel %vm1249_vm2, %v2298_v51, %v2361_v20  ;;  %v7412_v4 = vsel %vm1249_vm2, %v2297_v24, %v2360_v42 }
 0x524   : > { %9895 = vst [vmem:[#allocation275_spill] sm:$0xff] %v7409_v32 }
 0x525   : > { %9896 = vst [vmem:[#allocation276_spill] sm:$0xff] %v7412_v4 }
 0x528   : > { %v7414_v31 = vpop.permute.xlu1 %2342 }
 0x529   : > { %9897 = vst [vmem:[#allocation277_spill] sm:$0xff] %v7414_v31  ;;  %v2341_v48 = vpop.permute.xlu0 %2340 }
 0x52a   : > { %v2363_v62 = vsel %vm2344_vm6, %v2339_v61, %v2341_v48  ;;  %v2364_v46 = vsel %vm2344_vm6, %v2341_v48, %v7414_v31  ;;  %v7435_v13 = vpop.permute.xlu2 %2383 }
 0x52b   : > { %v7426_v9 = vsel %vm1249_vm2, %v2300_v54, %v2363_v62  ;;  %v7429_v33 = vsel %vm1249_vm2, %v2301_v6, %v2364_v46 }
 0x52c   : > { %9898 = vst [vmem:[#allocation278_spill] sm:$0xff] %v7426_v9 }
 0x52d   : > { %9899 = vst [vmem:[#allocation279_spill] sm:$0xff] %v7429_v33 }
 0x530   : > { %v7433_v24 = vpop.permute.xlu1 %2369 }
 0x531   : > { %v2368_v3 = vpop.permute.xlu0 %2367 }
 0x532   : > { %v7441_v61 = vpop.permute.xlu2 %2389 }
 0x538   : > { %v7437_v30 = vpop.permute.xlu1 %2375 }
 0x539   : > { %v7439_v25 = vpop.permute.xlu0 %2373 }
 0x53a   : > { %v7451_v54 = vpop.permute.xlu2 %2395 }
 0x53b   : > { %9900 = vst [vmem:[#allocation280_spill] sm:$0xff] %v7451_v54  ;;  %v2408_v54 = vsel %vm2407_vm7, %v7368_v55, %v2368_v3 }
 0x540   : > { %v7443_v51 = vpop.permute.xlu1 %2381 }
 0x541   : > { %v7445_v42 = vpop.permute.xlu0 %2379 }
 0x542   : > { %v7457_v46 = vpop.permute.xlu2 %2401 }
 0x543   : > { %9902 = vst [vmem:[#allocation282_spill] sm:$0xff] %v7457_v46 }
 0x548   : > { %v7447_v20 = vpop.permute.xlu1 %2387 }
 0x549   : > { %v7449_v48 = vpop.permute.xlu0 %2385 }
 0x54a   : > { %v2429_v33 = vpop.permute.xlu2 %2428 }
 0x550   : > { %v7453_v6 = vpop.permute.xlu1 %2393 }
 0x551   : > { %9901 = vst [vmem:[#allocation281_spill] sm:$0xff] %v7453_v6  ;;  %v7455_v62 = vpop.permute.xlu0 %2391 }
 0x552   : > { %v2493_v4 = vpop.permute.xlu2 %2492 }
 0x558   : > { %v7459_v22 = vpop.permute.xlu1 %2399 }
 0x559   : > { %9903 = vst [vmem:[#allocation283_spill] sm:$0xff] %v7459_v22  ;;  %v7461_v31 = vpop.permute.xlu0 %2397 }
 0x55a   : > { %9904 = vst [vmem:[#allocation284_spill] sm:$0xff] %v7461_v31 }
 0x560   : > { %v7463_v34 = vpop.permute.xlu1 %2405 }
 0x561   : > { %9905 = vst [vmem:[#allocation285_spill] sm:$0xff] %v7463_v34  ;;  %v7465_v9 = vpop.permute.xlu0 %2403 }
 0x562   : > { %9906 = vst [vmem:[#allocation286_spill] sm:$0xff] %v7465_v9  ;;  %v2409_v9 = vsel %vm2407_vm7, %v2368_v3, %v7433_v24 }
 0x568   : > { %v2491_v32 = vpop.permute.xlu1 %2490 }
 0x569   : > { %v2431_v43 = vpop.permute.xlu0 %2430  ;;  %v2532_v39 = vsel %vm905_vm12, %v2491_v32, %v2493_v4 }
 0x56a   : > { %v2470_v46 = vsel %vm842_vm13, %v2429_v33, %v2431_v43  ;;  %3162 = vrot.lane.b32.xlu0 %v2532_v39, %s4551_s19  ;;  %v2282_v39 = vsel %vm2281_vm5, %v7096_v37, %v7216_v14 }
 0x56b   : > { %v2769_v22 = vsel %vm1249_vm2, %v2408_v54, %v2470_v46  ;;  %v2700_v54 = vsel %vm1249_vm2, %v7096_v37, %v7240_v2  ;;  %v9908_v46 = vld [vmem:[#allocation236_spill] sm:$0xff] }
 0x56c   : > { %3118 = vrot.lane.b32.xlu2 %v2769_v22, %s4551_s19  ;;  %v2346_v22 = vsel %vm2344_vm6, %v7286_v29, %v7284_v59 }
 0x570   : > { %v2433_v34 = vpop.permute.xlu1 %2432 }
 0x571   : > { %v2471_v31 = vsel %vm842_vm13, %v2431_v43, %v2433_v34  ;;  %v2495_v6 = vpop.permute.xlu0 %2494  ;;  %v2283_v43 = vsel %vm2281_vm5, %v7216_v14, %v7214_v28  ;;  %v2219_v14 = vsel %vm2218_vm4, %v6991_v26, %v7037_v50 }
 0x572   : > { %v2533_v16 = vsel %vm905_vm12, %v2493_v4, %v2495_v6  ;;  %v2772_v0 = vsel %vm1249_vm2, %v2409_v9, %v2471_v31  ;;  %v2766_v4 = vsel %vm1249_vm2, %v7368_v55, %v2429_v33  ;;  %v2093_v31 = vsel %vm2092_vm1, %v6742_v58, %v6788_v57  ;;  %v9907_v9 = vld [vmem:[#allocation51_spill] sm:$0xff] }
 0x573   : > { %3164 = vrot.lane.b32.xlu1 %v2533_v16, %s4551_s19  ;;  %3120 = vrot.lane.b32.xlu0 %v2772_v0, %s4551_s19  ;;  %v2706_v16 = vsel %vm1249_vm2, %v2283_v43, %v2346_v22  ;;  %v2220_v0 = vsel %vm2218_vm4, %v7037_v50, %v7035_v56  ;;  %v2156_v55 = vsel %vm2155_vm3, %v6847_v35, %v6967_v21  ;;  %v9909_v43 = vld [vmem:[#allocation234_spill] sm:$0xff] }
 0x574   : > { %2502 = vrot.lane.b32.xlu2 %v6240_v47, %s4538_s30  ;;  %v2345_v47 = vsel %vm2344_vm6, %v7240_v2, %v7286_v29  ;;  %v2030_v33 = vsel %vm2029_vm0, %v9907_v9, %v6718_v10  ;;  %v2637_v3 = vsel %vm1249_vm2, %v2156_v55, %v2219_v14  ;;  %v9910_v2 = vld [vmem:[#allocation207_spill] sm:$0xff] }
 0x575   : > { %v2571_v50 = vsel %vm1249_vm2, %v2030_v33, %v2093_v31  ;;  %v9915_v14 = vld [vmem:[#allocation27_spill] sm:$0xff]  ;;  %v2568_v33 = vsel %vm1249_vm2, %v9907_v9, %v6742_v58  ;;  %v2158_v9 = vsel %vm2155_vm3, %v6965_v8, %v6876_v63 }
 0x578   : > { %v2497_v22 = vpop.permute.xlu1 %2496 }
 0x57b   : > { %3160 = vrot.lane.b32.xlu1 %v2491_v32, %s4551_s19  ;;  %2504 = vrot.lane.b32.xlu0 %v6263_v52, %s4538_s30  ;;  %v2157_v52 = vsel %vm2155_vm3, %v6967_v21, %v6965_v8  ;;  %v2703_v32 = vsel %vm1249_vm2, %v2282_v39, %v2345_v47  ;;  %v2094_v21 = vsel %vm2092_vm1, %v6788_v57, %v9908_v46  ;;  %v9911_v39 = vld [vmem:[#allocation24_spill] sm:$0xff]  ;;  %v9918_v8 = vld [vmem:[#allocation34_spill] sm:$0xff] }
 0x57c   : > { %3076 = vrot.lane.b32.xlu2 %v2706_v16, %s4551_s19  ;;  %v2640_v29 = vsel %vm1249_vm2, %v2157_v52, %v2220_v0  ;;  %v2031_v16 = vsel %vm2029_vm0, %v6718_v10, %v9909_v43  ;;  %v2534_v47 = vsel %vm905_vm12, %v2495_v6, %v2497_v22  ;;  %v2435_v0 = vpop.permute.xlu2 %2434  ;;  %v9912_v52 = vld [vmem:[#allocation23_spill] sm:$0xff]  ;;  %v2634_v10 = vsel %vm1249_vm2, %v6847_v35, %v6991_v26 }
 0x57d   : > { %v2574_v37 = vsel %vm1249_vm2, %v2031_v16, %v2094_v21  ;;  %v335_v57 = vsel %vm330_vm15, %v9912_v52, %v9911_v39  ;;  %v2410_v35 = vsel %vm2407_vm7, %v7433_v24, %v7401_v36  ;;  %v2221_v24 = vsel %vm2218_vm4, %v7035_v56, %v7003_v49  ;;  %v9917_v49 = vld [vmem:[#allocation231_spill] sm:$0xff] }
 0x57e   : > { %v2643_v21 = vsel %vm1249_vm2, %v2158_v9, %v2221_v24  ;;  %v2095_v63 = vsel %vm2092_vm1, %v9908_v46, %v9917_v49  ;;  %v2437_v46 = vpop.permute.xlu0 %2436  ;;  %v9924_v24 = vld [vmem:[#allocation253_spill] sm:$0xff]  ;;  %vm4320_vm1 = vcmask 1045508  }
 0x583   : > { %3074 = vrot.lane.b32.xlu1 %v2703_v32, %s4551_s19  ;;  %3116 = vrot.lane.b32.xlu0 %v2766_v4, %s4551_s19  ;;  %v9913_v32 = vld [vmem:[#allocation2_spill] sm:$0xff]  ;;  %v2472_v4 = vsel %vm842_vm13, %v2433_v34, %v2435_v0 }
 0x584   : > { %3032 = vrot.lane.b32.xlu2 %v2640_v29, %s4551_s19  ;;  %v7553_v6 = vsel %vm1249_vm2, %v9913_v32, %v335_v57  ;;  %v9914_v29 = vld [vmem:[#allocation30_spill] sm:$0xff]  ;;  %v7564_v55 = vpop.permute.xlu2 %2438  ;;  %v2775_v26 = vsel %vm1249_vm2, %v2410_v35, %v2472_v4 }
 0x585   : > { %v333_v31 = vsel %vm330_vm15, %v9915_v14, %v9914_v29  ;;  %v9923_v14 = vld [vmem:[#allocation10_spill] sm:$0xff] }
 0x586   : > { %v2441_v57 = vpop.permute.xlu0 %2440 }
 0x58b   : > { %3030 = vrot.lane.b32.xlu1 %v2637_v3, %s4551_s19  ;;  %3072 = vrot.lane.b32.xlu0 %v2700_v54, %s4551_s19  ;;  %v2347_v3 = vsel %vm2344_vm6, %v7284_v59, %v7252_v5  ;;  %v2284_v54 = vsel %vm2281_vm5, %v7214_v28, %v7125_v11  ;;  %v336_v59 = vsel %vm330_vm15, %v9911_v39, %v9918_v8  ;;  %v9919_v11 = vld [vmem:[#allocation38_spill] sm:$0xff] }
 0x58c   : > { %2986 = vrot.lane.b32.xlu2 %v2571_v50, %s4551_s19  ;;  %v2499_v58 = vpop.permute.xlu2 %2498  ;;  %v2709_v50 = vsel %vm1249_vm2, %v2284_v54, %v2347_v3  ;;  %v2032_v5 = vsel %vm2029_vm0, %v9909_v43, %v9919_v11  ;;  %v2411_v43 = vsel %vm2407_vm7, %v7401_v36, %v7439_v25  ;;  %v2474_v39 = vsel %vm842_vm13, %v2437_v46, %v7564_v55  ;;  %v9925_v11 = vld [vmem:[#allocation25_spill] sm:$0xff] }
 0x58d   : > { %v2535_v56 = vsel %vm905_vm12, %v2497_v22, %v2499_v58  ;;  %v2577_v28 = vsel %vm1249_vm2, %v2032_v5, %v2095_v63  ;;  %v9920_v22 = vld [vmem:[#allocation5_spill] sm:$0xff]  ;;  %vm4316_vm0 = vcmask 1041408  }
 0x58e   : > { %v7614_v16 = vsel %vm1249_vm2, %v9920_v22, %v336_v59  ;;  %v7651_v32 = vpop.permute.xlu0 %2444 }
 0x593   : > { %3166 = vrot.lane.b32.xlu1 %v2534_v47, %s4551_s19  ;;  %2988 = vrot.lane.b32.xlu0 %v2574_v37, %s4551_s19  ;;  %v2473_v47 = vsel %vm842_vm13, %v2435_v0, %v2437_v46  ;;  %v2412_v0 = vsel %vm2407_vm7, %v7439_v25, %v7437_v30  ;;  %v9921_v25 = vld [vmem:[#allocation110_spill] sm:$0xff]  ;;  %v2475_v46 = vsel %vm842_vm13, %v7564_v55, %v2441_v57 }
 0x594   : > { %2942 = vrot.lane.b32.xlu2 %v9910_v2, %s4551_s19  ;;  %v2501_v37 = vpop.permute.xlu2 %2500  ;;  %v2778_v2 = vsel %vm1249_vm2, %v2411_v43, %v2473_v47  ;;  %v2781_v36 = vsel %vm1249_vm2, %v2412_v0, %v2474_v39  ;;  %v2413_v47 = vsel %vm2407_vm7, %v7437_v30, %v7431_v41 }
 0x595   : > { %v2784_v39 = vsel %vm1249_vm2, %v2413_v47, %v2475_v46 }
 0x59b   : > { %3028 = vrot.lane.b32.xlu1 %v2634_v10, %s4551_s19  ;;  %2944 = vrot.lane.b32.xlu0 %v7553_v6, %s4551_s19 }
 0x59c   : > { %2506 = vrot.lane.b32.xlu2 %v6261_v7, %s4538_s30  ;;  %v9916_v7 = vld [vmem:[#allocation3_spill] sm:$0xff] }
 0x59d   : > { %v7577_v34 = vsel %vm1249_vm2, %v9916_v7, %v333_v31 }
 0x5a3   : > { %3122 = vrot.lane.b32.xlu1 %v2775_v26, %s4551_s19  ;;  %2984 = vrot.lane.b32.xlu0 %v2568_v33, %s4551_s19  ;;  %v2414_v33 = vsel %vm2407_vm7, %v7431_v41, %v7445_v42 }
 0x5a4   : > { %2940 = vrot.lane.b32.xlu2 %v7577_v34, %s4551_s19 }
 0x5ab   : > { %3078 = vrot.lane.b32.xlu1 %v2709_v50, %s4551_s19  ;;  %3034 = vrot.lane.b32.xlu0 %v2643_v21, %s4551_s19 }
 0x5ac   : > { %3168 = vrot.lane.b32.xlu2 %v2535_v56, %s4551_s19 }
 0x5b3   : > { %2508 = vrot.lane.b32.xlu1 %v6259_v19, %s4538_s30  ;;  %2990 = vrot.lane.b32.xlu0 %v2577_v28, %s4551_s19  ;;  %v2536_v19 = vsel %vm905_vm12, %v2499_v58, %v2501_v37 }
 0x5b4   : > { %2946 = vrot.lane.b32.xlu2 %v7614_v16, %s4551_s19 }
 0x5bb   : > { %3124 = vrot.lane.b32.xlu1 %v2778_v2, %s4551_s19  ;;  %3170 = vrot.lane.b32.xlu0 %v2536_v19, %s4551_s19 }
 0x5bc   : > { %2510 = vrot.lane.b32.xlu2 %v9802_v18, %s4538_s30 }
 0x5c3   : > { %3080 = vrot.lane.b32.xlu1 %v7307_v60, %s4551_s19  ;;  %2512 = vrot.lane.b32.xlu0 %v9801_v12, %s4538_s30  ;;  %v7645_v60 = vpop.permute.xlu1 %2442 }
 0x5c4   : > { %3126 = vrot.lane.b32.xlu2 %v2781_v36, %s4551_s19  ;;  %v2476_v26 = vsel %vm842_vm13, %v2441_v57, %v7645_v60 }
 0x5c5   : > { %v2787_v7 = vsel %vm1249_vm2, %v2414_v33, %v2476_v26  ;;  %v9930_v26 = vld [vmem:[#allocation37_spill] sm:$0xff] }
 0x5c6   : > { %v3119_v52 = vpop.permute.xlu2 %3118  ;;  %v339_v33 = vsel %vm330_vm15, %v9925_v11, %v9930_v26 }
 0x5cb   : > { %3036 = vrot.lane.b32.xlu1 %v7060_v38, %s4551_s19  ;;  %2448 = vrot.lane.b32.xlu0 %v9802_v18, %s4537_s29  ;;  %v9922_v38 = vld [vmem:[#allocation33_spill] sm:$0xff] }
 0x5cc   : > { %2992 = vrot.lane.b32.xlu2 %v9921_v25, %s4551_s19  ;;  %v337_v18 = vsel %vm330_vm15, %v9918_v8, %v9922_v38  ;;  %v338_v5 = vsel %vm330_vm15, %v9922_v38, %v9925_v11  ;;  %v3436_v38 = vld [vmem:[%s9302_s1] sm:$0xf] }
 0x5cd   : > { %v7661_v31 = vsel %vm1249_vm2, %v9923_v14, %v337_v18  ;;  %3438 = vst [vmem:[#allocation1] ss:$4 sm:$0xff] %v3436_v38  ;;  %v9942_v38 = vld [vmem:[#allocation175_spill] sm:$0xff] }
 0x5ce   : > { %v2503_v10 = vpop.permute.xlu2 %2502 }
 0x5cf   : > { %v2537_v29 = vsel %vm905_vm12, %v2501_v37, %v2503_v10 }
 0x5d3   : > { %2450 = vrot.lane.b32.xlu1 %v9801_v12, %s4537_s29  ;;  %3082 = vrot.lane.b32.xlu0 %v7310_v17, %s4551_s19  ;;  %v7666_v17 = vpop.permute.xlu1 %2446 }
 0x5d6   : > { %v7653_v4 = vpop.permute.xlu2 %3076 }
 0x5db   : > { %3172 = vrot.lane.b32.xlu1 %v2537_v29, %s4551_s19  ;;  %2948 = vrot.lane.b32.xlu0 %v7661_v31, %s4551_s19 }
 0x5dc   : > { %v3163_v12 = vpop.permute.xlu0 %3162 }
 0x5de   : > { %v7668_v35 = vpop.permute.xlu2 %3032 }
 0x5e3   : > { %3038 = vrot.lane.b32.xlu1 %v9924_v24, %s4551_s19  ;;  %3130 = vrot.lane.b32.xlu0 %v2787_v7, %s4551_s19 }
 0x5e5   : > { %v7679_v3 = vpop.permute.xlu1 %3164  ;;  %v7681_v58 = vpop.permute.xlu0 %3120 }
 0x5e6   : > { %v7683_v9 = vpop.permute.xlu2 %2986  ;;  %v3311_v54 = vsel %vm3204_vm8, %v3163_v12, %v7679_v3  ;;  %v3290_v21 = vsel %vm3204_vm8, %v3119_v52, %v7681_v58 }
 0x5e7   : > { %v3449_v50 = vsel %vm1249_vm2, %v3311_v54, 0  ;;  %v9931_v54 = vld [vmem:[#allocation8_spill] sm:$0xff] }
 0x5e8   : > { %3549 = vmatpush.bf16.msra.mxu3 %v3449_v50  ;;  %v7757_v50 = vsel %vm1249_vm2, %v9931_v54, %v339_v33  ;;  %v9946_v54 = vld [vmem:[#allocation144_spill] sm:$0xff] }
 0x5eb   : > { %2514 = vrot.lane.b32.xlu1 %v6279_v44, %s4538_s30  ;;  %3084 = vrot.lane.b32.xlu0 %v7304_v40, %s4551_s19  ;;  %v9926_v40 = vld [vmem:[#allocation9_spill] sm:$0xff] }
 0x5ec   : > { %3550 = vmatpush.bf16.msra.mxu3 %v3290_v21  ;;  %v7705_v22 = vsel %vm1249_vm2, %v9926_v40, %v338_v5 }
 0x5ed   : > { %v3161_v56 = vpop.permute.xlu1 %3160  ;;  %v2505_v49 = vpop.permute.xlu0 %2504 }
 0x5ee   : > { %v7694_v63 = vpop.permute.xlu2 %2942  ;;  %v3310_v8 = vsel %vm3204_vm8, %v3161_v56, %v3163_v12  ;;  %v2538_v59 = vsel %vm905_vm12, %v2503_v10, %v2505_v49  ;;  %v9929_v10 = vld [vmem:[#allocation106_spill] sm:$0xff] }
 0x5ef   : > { %v3446_v28 = vsel %vm1249_vm2, %v3310_v8, 0  ;;  %3174 = vrot.lane.b32.xlu2 %v2538_v59, %s4551_s19  ;;  %v9932_v59 = vld [vmem:[#allocation36_spill] sm:$0xff] }
 0x5f0   : > { %3523 = vmatpush.bf16.msra.mxu1 %v3446_v28  ;;  %v340_v11 = vsel %vm330_vm15, %v9930_v26, %v9932_v59  ;;  %v7774_v28 = vld.sshfl [vmem:[#allocation1 + $0x8] sm:$0xff pattern:$0x73625140] }
 0x5f3   : > { %3086 = vrot.lane.b32.xlu1 %v7330_v1, %s4551_s19  ;;  %2950 = vrot.lane.b32.xlu0 %v7705_v22, %s4551_s19  ;;  %v9927_v1 = vld [vmem:[#allocation252_spill] sm:$0xff] }
 0x5f5   : > { %v3075_v37 = vpop.permute.xlu1 %3074  ;;  %v3117_v43 = vpop.permute.xlu0 %3116 }
 0x5f6   : > { %v7716_v2 = vpop.permute.xlu2 %2506  ;;  %v3269_v19 = vsel %vm3204_vm8, %v3075_v37, %v7653_v4  ;;  %v3289_v55 = vsel %vm3204_vm8, %v3117_v43, %v3119_v52  ;;  %v9928_v52 = vld [vmem:[#allocation239_spill] sm:$0xff] }
 0x5f7   : > { %3551 = vmatpush.bf16.msra.mxu3 %v3269_v19  ;;  %3128 = vrot.lane.b32.xlu2 %v2784_v39, %s4551_s19  ;;  %v2539_v25 = vsel %vm905_vm12, %v2505_v49, %v7716_v2  ;;  %v9935_v19 = vld [vmem:[#allocation109_spill] sm:$0xff]  ;;  %v9936_v39 = vld [vmem:[#allocation238_spill] sm:$0xff] }
 0x5f8   : > { %3524 = vmatpush.bf16.msra.mxu1 %v3289_v55  ;;  %v9937_v55 = vld [vmem:[#allocation256_spill] sm:$0xff] }
 0x5fb   : > { %3040 = vrot.lane.b32.xlu1 %v9927_v1, %s4551_s19  ;;  %2516 = vrot.lane.b32.xlu0 %v9820_v27, %s4538_s30 }
 0x5fd   : > { %v3031_v41 = vpop.permute.xlu1 %3030  ;;  %v3073_v30 = vpop.permute.xlu0 %3072 }
 0x5fe   : > { %v2941_v0 = vpop.permute.xlu2 %2940  ;;  %v3248_v36 = vsel %vm3204_vm8, %v3031_v41, %v7668_v35  ;;  %v3268_v57 = vsel %vm3204_vm8, %v3073_v30, %v3075_v37 }
 0x5ff   : > { %3552 = vmatpush.bf16.msra.mxu3 %v3248_v36  ;;  %2994 = vrot.lane.b32.xlu2 %v9928_v52, %s4551_s19  ;;  %v9941_v52 = vld [vmem:[#allocation182_spill] sm:$0xff] }
 0x600   : > { %3525 = vmatpush.bf16.msra.mxu1 %v3268_v57  ;;  %v9939_v57 = vld [vmem:[#allocation212_spill] sm:$0xff] }
 0x603   : > { %3176 = vrot.lane.b32.xlu1 %v2539_v25, %s4551_s19  ;;  %2998 = vrot.lane.b32.xlu0 %v9929_v10, %s4551_s19 }
 0x605   : > { %v3167_v18 = vpop.permute.xlu1 %3166  ;;  %v7740_v29 = vpop.permute.xlu0 %2988 }
 0x606   : > { %v7742_v14 = vpop.permute.xlu2 %3168  ;;  %v3227_v12 = vsel %vm3204_vm8, %v7683_v9, %v7740_v29 }
 0x607   : > { %2452 = vrot.lane.b32.xlu2 %v6279_v44, %s4537_s29  ;;  %3553 = vmatpush.bf16.msra.mxu3 %v3227_v12  ;;  %v3313_v7 = vsel %vm3204_vm8, %v3167_v18, %v7742_v14  ;;  %v3312_v44 = vsel %vm3204_vm8, %v7679_v3, %v3167_v18  ;;  %v9934_v3 = vld [vmem:[#allocation13_spill] sm:$0xff]  ;;  %v9943_v18 = vld [vmem:[#allocation163_spill] sm:$0xff] }
 0x608   : > { %v3455_v24 = vsel %vm1249_vm2, %v3313_v7, 0  ;;  %v3452_v5 = vsel %vm1249_vm2, %v3312_v44, 0  ;;  %v7778_v40 = vsel %vm1249_vm2, %v9934_v3, %v340_v11  ;;  %v908_v12 = vsel %vm905_vm12, %v9943_v18, %v9942_v38  ;;  %v9961_v38 = vld [vmem:[#allocation56_spill] sm:$0xff] }
 0x609   : > { %3601 = vmatpush.bf16.msrb.mxu2 %v3455_v24  ;;  %v9945_v24 = vld [vmem:[#allocation156_spill] sm:$0xff] }
 0x60b   : > { %2454 = vrot.lane.b32.xlu1 %v9820_v27, %s4537_s29  ;;  %2952 = vrot.lane.b32.xlu0 %v7757_v50, %s4551_s19  ;;  %v9933_v27 = vld [vmem:[#allocation255_spill] sm:$0xff] }
 0x60d   : > { %v3029_v21 = vpop.permute.xlu1 %3028  ;;  %v2945_v56 = vpop.permute.xlu0 %2944 }
 0x60e   : > { %v3247_v49 = vsel %vm3204_vm8, %v3029_v21, %v3031_v41  ;;  %v3206_v8 = vsel %vm3204_vm8, %v7694_v63, %v2945_v56  ;;  %v9938_v41 = vld [vmem:[#allocation248_spill] sm:$0xff] }
 0x60f   : > { %3526 = vmatpush.bf16.msra.mxu1 %v3247_v49  ;;  %3042 = vrot.lane.b32.xlu2 %v9933_v27, %s4551_s19  ;;  %v9947_v49 = vld [vmem:[#allocation137_spill] sm:$0xff] }
 0x610   : > { %3554 = vmatpush.bf16.msra.mxu3 %v3206_v8  ;;  %v9948_v8 = vld [vmem:[#allocation120_spill] sm:$0xff] }
 0x611   : > { %v774_v11 = vsel %vm771_vm14, %v9948_v8, %v9947_v49  ;;  %v2417_v8 = vsel %vm2407_vm7, %v7435_v13, %v7449_v48 }
 0x613   : > { %2954 = vrot.lane.b32.xlu1 %v7778_v40, %s4551_s19  ;;  %3088 = vrot.lane.b32.xlu0 %v7333_v45, %s4551_s19  ;;  %v2477_v45 = vsel %vm842_vm13, %v7645_v60, %v7651_v32 }
 0x614   : > { %3575 = vmatpush.bf16.msrb.mxu3 %v3452_v5 }
 0x615   : > { %4464 = vmatmul.msk.bf16.vlgmr.msra.gmra.mxu3 %vm3442_vm10, %v7774_v28  ;;  %v3123_v46 = vpop.permute.xlu1 %3122  ;;  %v2985_v47 = vpop.permute.xlu0 %2984 }
 0x616   : > { %v3291_v37 = vsel %vm3204_vm8, %v7681_v58, %v3123_v46  ;;  %v3226_v43 = vsel %vm3204_vm8, %v2985_v47, %v7683_v9  ;;  %v3205_v58 = vsel %vm3204_vm8, %v2941_v0, %v7694_v63  ;;  %v2415_v9 = vsel %vm2407_vm7, %v7445_v42, %v7443_v51  ;;  %v7817_v42 = vpop.permute.xlu2 %2946  ;;  %v9949_v47 = vld [vmem:[#allocation240_spill] sm:$0xff] }
 0x617   : > { %2996 = vrot.lane.b32.xlu2 %v9935_v19, %s4551_s19  ;;  %3527 = vmatpush.bf16.msra.mxu1 %v3226_v43  ;;  %v2790_v36 = vsel %vm1249_vm2, %v2415_v9, %v2477_v45  ;;  %v2478_v63 = vsel %vm842_vm13, %v7651_v32, %v7666_v17  ;;  %v2416_v0 = vsel %vm2407_vm7, %v7443_v51, %v7435_v13  ;;  %v9944_v51 = vld [vmem:[#allocation237_spill] sm:$0xff]  ;;  %v9951_v43 = vld [vmem:[#allocation112_spill] sm:$0xff] }
 0x618   : > { %3576 = vmatpush.bf16.msrb.mxu3 %v3291_v37  ;;  %v2793_v32 = vsel %vm1249_vm2, %v2416_v0, %v2478_v63  ;;  %v3207_v3 = vsel %vm3204_vm8, %v2945_v56, %v7817_v42  ;;  %v7869_v56 = vld.sshfl [vmem:[#allocation1] sm:$0xff pattern:$0x73625140] }
 0x619   : > { %3516 = vmatmul.bf16.vlgmr.msra.gmra.mxu0 %v7869_v56  ;;  %3542 = vmatmul.bf16.vlgmr.msra.gmra.mxu2 %v7869_v56 }
 0x61b   : > { %2518 = vrot.lane.b32.xlu1 %v9936_v39, %s4538_s30  ;;  %3044 = vrot.lane.b32.xlu0 %v9937_v55, %s4551_s19  ;;  %v9952_v55 = vld [vmem:[#allocation185_spill] sm:$0xff] }
 0x61c   : > { %3528 = vmatpush.bf16.msra.mxu1 %v3205_v58  ;;  %v9953_v58 = vld [vmem:[#allocation193_spill] sm:$0xff] }
 0x61d   : > { %v7804_v1 = vpop.permute.xlu1 %3078  ;;  %v7807_v30 = vpop.permute.xlu0 %3034  ;;  %v973_v9 = vsel %vm968_vm11, %v9953_v58, %v9952_v55  ;;  %v2418_v58 = vsel %vm2407_vm7, %v7449_v48, %v7447_v20  ;;  %v9972_v48 = vld [vmem:[#allocation104_spill] sm:$0xff] }
 0x61e   : > { %v3270_v60 = vsel %vm3204_vm8, %v7653_v4, %v7804_v1  ;;  %v9940_v4 = vld [vmem:[#allocation194_spill] sm:$0xff]  ;;  %v3249_v10 = vsel %vm3204_vm8, %v7668_v35, %v7807_v30  ;;  %v845_v35 = vsel %vm842_vm13, %v9946_v54, %v9945_v24  ;;  %v2511_v5 = vpop.permute.xlu2 %2510 }
 0x61f   : > { %3577 = vmatpush.bf16.msrb.mxu3 %v3270_v60  ;;  %3132 = vrot.lane.b32.xlu2 %v2790_v36, %s4551_s19  ;;  %v971_v25 = vsel %vm968_vm11, %v9941_v52, %v9940_v4  ;;  %v1596_v27 = vsel %vm1249_vm2, %v774_v11, %v845_v35  ;;  %v9955_v60 = vld [vmem:[#allocation85_spill] sm:$0xff]  ;;  %v9957_v36 = vld [vmem:[#allocation174_spill] sm:$0xff]  ;;  %v9959_v4 = vld [vmem:[#allocation155_spill] sm:$0xff] }
 0x620   : > { %3560 = vmatpush.bf16.msrb.mxu1 %v9938_v41  ;;  %v1680_v26 = vsel %vm1249_vm2, %v908_v12, %v971_v25  ;;  %v9954_v41 = vld [vmem:[#allocation211_spill] sm:$0xff]  ;;  %v9962_v12 = vld [vmem:[#allocation124_spill] sm:$0xff] }
 0x621   : > { %4463 = vmatmul.msk.bf16.vlgmr.msra.gmra.mxu1 %vm3442_vm10, %v7774_v28 }
 0x623   : > { %3134 = vrot.lane.b32.xlu1 %v2793_v32, %s4551_s19  ;;  %3578 = vmatpush.bf16.msrb.mxu3 %v3249_v10  ;;  %v9960_v32 = vld [vmem:[#allocation254_spill] sm:$0xff] }
 0x624   : > { %3561 = vmatpush.bf16.msrb.mxu1 %v9939_v57  ;;  %2458 = vrot.lane.b32.xlu0 %v9944_v51, %s4537_s29  ;;  %v9958_v57 = vld [vmem:[#allocation147_spill] sm:$0xff] }
 0x625   : > { %v2509_v33 = vpop.permute.xlu1 %2508  ;;  %v7839_v7 = vpop.permute.xlu0 %2990  ;;  %v847_v52 = vsel %vm842_vm13, %v9959_v4, %v9958_v57 }
 0x626   : > { %v2540_v21 = vsel %vm905_vm12, %v7716_v2, %v2509_v33  ;;  %v3228_v44 = vsel %vm3204_vm8, %v7740_v29, %v7839_v7  ;;  %v2541_v2 = vsel %vm905_vm12, %v2509_v33, %v2511_v5  ;;  %v9950_v29 = vld [vmem:[#allocation247_spill] sm:$0xff]  ;;  %v7885_v25 = vpop.permute.xlu2 %3126 }
 0x627   : > { %3178 = vrot.lane.b32.xlu2 %v2540_v21, %s4551_s19  ;;  %3579 = vmatpush.bf16.msrb.mxu3 %v3228_v44  ;;  %v9965_v44 = vld [vmem:[#allocation111_spill] sm:$0xff] }
 0x628   : > { %3562 = vmatpush.bf16.msrb.mxu1 %v1680_v26 }
 0x629   : > { %3594 = vmatmul.bf16.vlgmr.msrb.gmra.mxu0 %v7869_v56 }
 0x62b   : > { %3000 = vrot.lane.b32.xlu1 %v9949_v47, %s4551_s19  ;;  %3580 = vmatpush.bf16.msrb.mxu3 %v3207_v3  ;;  %v9966_v3 = vld [vmem:[#allocation84_spill] sm:$0xff] }
 0x62c   : > { %3563 = vmatpush.bf16.msrb.mxu1 %v1596_v27  ;;  %3180 = vrot.lane.b32.xlu0 %v2541_v2, %s4551_s19 }
 0x62d   : > { %v3125_v37 = vpop.permute.xlu1 %3124  ;;  %v7862_v19 = vpop.permute.xlu0 %3170 }
 0x62e   : > { %v3292_v45 = vsel %vm3204_vm8, %v3123_v46, %v3125_v37  ;;  %4465 = vmatmul.msk.bf16.vlgmr.msrb.gmra.mxu3 %vm3442_vm10, %v7774_v28  ;;  %v9956_v46 = vld [vmem:[#allocation166_spill] sm:$0xff]  ;;  %v3314_v33 = vsel %vm3204_vm8, %v7742_v14, %v7862_v19  ;;  %v9964_v14 = vld [vmem:[#allocation244_spill] sm:$0xff]  ;;  %v3293_v49 = vsel %vm3204_vm8, %v3125_v37, %v7885_v25  ;;  %v2993_v27 = vpop.permute.xlu2 %2992 }
 0x62f   : > { %3612 = vmatpush.bf16.msra.mxu3 %v9950_v29  ;;  %3602 = vmatpush.bf16.msrb.mxu2 %v3292_v45  ;;  %v910_v63 = vsel %vm905_vm12, %v9957_v36, %v9956_v46  ;;  %v3458_v21 = vsel %vm1249_vm2, %v3314_v33, 0  ;;  %v3229_v13 = vsel %vm3204_vm8, %v7839_v7, %v2993_v27  ;;  %v9969_v29 = vld [vmem:[#allocation12_spill] sm:$0xff]  ;;  %v9971_v45 = vld [vmem:[#allocation258_spill] sm:$0xff] }
 0x630   : > { %3564 = vmatpush.bf16.msrb.mxu1 %v9951_v43  ;;  %2520 = vrot.lane.b32.xlu2 %v9944_v51, %s4538_s30  ;;  %v1688_v0 = vsel %vm1249_vm2, %v910_v63, %v973_v9  ;;  %v9963_v51 = vld [vmem:[#allocation136_spill] sm:$0xff] }
 0x631   : > { %v776_v26 = vsel %vm771_vm14, %v9963_v51, %v9962_v12 }
 0x632   : > { %v1604_v35 = vsel %vm1249_vm2, %v776_v26, %v847_v52 }
 0x633   : > { %3613 = vmatpush.bf16.msra.mxu3 %v9954_v41 }
 0x634   : > { %3565 = vmatpush.bf16.msrb.mxu1 %v9955_v60  ;;  %3046 = vrot.lane.b32.xlu0 %v9960_v32, %s4551_s19 }
 0x635   : > { %v3081_v10 = vpop.permute.xlu1 %3080  ;;  %v7890_v18 = vpop.permute.xlu0 %2512 }
 0x636   : > { %v2542_v24 = vsel %vm905_vm12, %v2511_v5, %v7890_v18  ;;  %v3271_v54 = vsel %vm3204_vm8, %v7804_v1, %v3081_v10 }
 0x637   : > { %3614 = vmatpush.bf16.msra.mxu3 %v1688_v0  ;;  %3603 = vmatpush.bf16.msrb.mxu2 %v3271_v54  ;;  %v9976_v54 = vld [vmem:[#allocation159_spill] sm:$0xff] }
 0x638   : > { %3566 = vmatpush.bf16.msrb.mxu1 %v9961_v38  ;;  %2456 = vrot.lane.b32.xlu2 %v9936_v39, %s4537_s29  ;;  %v9974_v38 = vld [vmem:[#allocation214_spill] sm:$0xff] }
 0x639   : > { %3182 = vrot.lane.b32.xlu1 %v2542_v24, %s4551_s19  ;;  %v9975_v24 = vld [vmem:[#allocation178_spill] sm:$0xff] }
 0x63b   : > { %3615 = vmatpush.bf16.msra.mxu3 %v1604_v35  ;;  %v848_v35 = vsel %vm842_vm13, %v9958_v57, %v9976_v54 }
 0x63c   : > { %3567 = vmatpush.bf16.msrb.mxu1 %v7577_v34  ;;  %2522 = vrot.lane.b32.xlu0 %v9964_v14, %s4538_s30 }
 0x63d   : > { %v3037_v1 = vpop.permute.xlu1 %3036  ;;  %v2449_v39 = vpop.permute.xlu0 %2448 }
 0x63e   : > { %v2479_v34 = vsel %vm842_vm13, %v7666_v17, %v2449_v39  ;;  %v3250_v11 = vsel %vm3204_vm8, %v7807_v30, %v3037_v1  ;;  %v9967_v17 = vld [vmem:[#allocation26_spill] sm:$0xff] }
 0x63f   : > { %3616 = vmatpush.bf16.msra.mxu3 %v9965_v44  ;;  %3568 = vmatmul.bf16.vlgmr.msrb.gmra.mxu1 %v7869_v56  ;;  %v2796_v5 = vsel %vm1249_vm2, %v2417_v8, %v2479_v34  ;;  %v341_v30 = vsel %vm330_vm15, %v9932_v59, %v9967_v17  ;;  %v9970_v59 = vld [vmem:[#allocation105_spill] sm:$0xff] }
 0x640   : > { %3627 = vmatpush.bf16.msra.mxu1 %v3458_v21  ;;  %3604 = vmatpush.bf16.msrb.mxu2 %v3250_v11  ;;  %v7939_v37 = vsel %vm1249_vm2, %v9969_v29, %v341_v30  ;;  %v9977_v21 = vld [vmem:[#allocation259_spill] sm:$0xff] }
 0x641   : > { %3090 = vrot.lane.b32.xlu2 %v7327_v53, %s4551_s19  ;;  %3136 = vrot.lane.b32.xlu1 %v2796_v5, %s4551_s19  ;;  %v9968_v53 = vld [vmem:[#allocation55_spill] sm:$0xff] }
 0x642   : > { %v9980_v11 = vld [vmem:[#allocation11_spill] sm:$0xff] }
 0x643   : > { %3617 = vmatpush.bf16.msra.mxu3 %v9966_v3  ;;  %v9982_v3 = vld [vmem:[#allocation114_spill] sm:$0xff]  ;;  %v9983_v30 = vld [vmem:[#allocation87_spill] sm:$0xff] }
 0x644   : > { %3628 = vmatpush.bf16.msra.mxu1 %v3293_v49  ;;  %3605 = vmatpush.bf16.msrb.mxu2 %v3229_v13  ;;  %v9979_v49 = vld [vmem:[#allocation140_spill] sm:$0xff] }
 0x645   : > { %3094 = vrot.lane.b32.xlu0 %v7357_v15, %s4551_s19  ;;  %v7935_v2 = vpop.permute.xlu1 %2450  ;;  %v3083_v47 = vpop.permute.xlu0 %3082 }
 0x646   : > { %v3272_v43 = vsel %vm3204_vm8, %v3081_v10, %v3083_v47  ;;  %v2480_v7 = vsel %vm842_vm13, %v2449_v39, %v7935_v2 }
 0x647   : > { %3618 = vmatpush.bf16.msra.mxu3 %v9968_v53  ;;  %v2799_v36 = vsel %vm1249_vm2, %v2418_v58, %v2480_v7  ;;  %v9985_v7 = vld [vmem:[#allocation58_spill] sm:$0xff]  ;;  %v9986_v58 = vld [vmem:[#allocation29_spill] sm:$0xff] }
 0x648   : > { %3629 = vmatpush.bf16.msra.mxu1 %v3272_v43  ;;  %v2419_v43 = vsel %vm2407_vm7, %v7447_v20, %v7441_v61 }
 0x649   : > { %2956 = vrot.lane.b32.xlu2 %v7939_v37, %s4551_s19  ;;  %3002 = vrot.lane.b32.xlu1 %v9970_v59, %s4551_s19  ;;  %v7947_v15 = vpop.permute.xlu2 %3174  ;;  %v9984_v59 = vld [vmem:[#allocation243_spill] sm:$0xff] }
 0x64b   : > { %3619 = vmatpush.bf16.msra.mxu3 %v7553_v6 }
 0x64d   : > { %3048 = vrot.lane.b32.xlu0 %v9971_v45, %s4551_s19  ;;  %v3173_v9 = vpop.permute.xlu1 %3172  ;;  %v2949_v41 = vpop.permute.xlu0 %2948 }
 0x64e   : > { %3620 = vmatmul.bf16.vlgmr.msra.gmra.mxu3 %v7869_v56  ;;  %v3315_v6 = vsel %vm3204_vm8, %v7862_v19, %v3173_v9  ;;  %v3316_v60 = vsel %vm3204_vm8, %v3173_v9, %v7947_v15  ;;  %v3208_v63 = vsel %vm3204_vm8, %v7817_v42, %v2949_v41  ;;  %v9973_v42 = vld [vmem:[#allocation197_spill] sm:$0xff]  ;;  %v9987_v9 = vld [vmem:[#allocation39_spill] sm:$0xff] }
 0x64f   : > { %v3461_v0 = vsel %vm1249_vm2, %v3315_v6, 0  ;;  %v3464_v4 = vsel %vm1249_vm2, %v3316_v60, 0  ;;  %3606 = vmatpush.bf16.msrb.mxu2 %v3208_v63  ;;  %v974_v32 = vsel %vm968_vm11, %v9952_v55, %v9973_v42  ;;  %v344_v20 = vsel %vm330_vm15, %v9987_v9, %v9986_v58 }
 0x650   : > { %3653 = vmatpush.bf16.msra.mxu0 %v3461_v0  ;;  %3679 = vmatpush.bf16.msrb.mxu3 %v3464_v4  ;;  %v9990_v0 = vld [vmem:[#allocation196_spill] sm:$0xff] }
 0x651   : > { %3138 = vrot.lane.b32.xlu2 %v2799_v36, %s4551_s19  ;;  %2460 = vrot.lane.b32.xlu1 %v9964_v14, %s4537_s29  ;;  %v3129_v19 = vpop.permute.xlu2 %3128  ;;  %v9989_v36 = vld [vmem:[#allocation15_spill] sm:$0xff]  ;;  %v975_v4 = vsel %vm968_vm11, %v9973_v42, %v9990_v0 }
 0x652   : > { %v3294_v52 = vsel %vm3204_vm8, %v7885_v25, %v3129_v19  ;;  %4466 = vmatmul.msk.bf16.vlgmr.msrb.gmra.mxu2 %vm3442_vm10, %v7774_v28  ;;  %v911_v25 = vsel %vm905_vm12, %v9956_v46, %v9975_v24  ;;  %v8049_v63 = vsel %vm1249_vm2, %v9989_v36, %v344_v20  ;;  %v9993_v42 = vld [vmem:[#allocation83_spill] sm:$0xff]  ;;  %v10005_v20 = vld [vmem:[#allocation188_spill] sm:$0xff] }
 0x653   : > { %3638 = vmatpush.bf16.msra.mxu2 %v9972_v48  ;;  %v1692_v55 = vsel %vm1249_vm2, %v911_v25, %v974_v32  ;;  %v9991_v48 = vld [vmem:[#allocation215_spill] sm:$0xff]  ;;  %v9992_v32 = vld [vmem:[#allocation177_spill] sm:$0xff] }
 0x654   : > { %3654 = vmatpush.bf16.msra.mxu0 %v3294_v52 }
 0x655   : > { %v3039_v10 = vpop.permute.xlu1 %3038  ;;  %v7978_v51 = vpop.permute.xlu0 %3130 }
 0x656   : > { %v3251_v26 = vsel %vm3204_vm8, %v3037_v1, %v3039_v10  ;;  %v3295_v33 = vsel %vm3204_vm8, %v3129_v19, %v7978_v51  ;;  %v9978_v1 = vld [vmem:[#allocation40_spill] sm:$0xff] }
 0x657   : > { %3639 = vmatpush.bf16.msra.mxu2 %v9974_v38  ;;  %3630 = vmatpush.bf16.msra.mxu1 %v3251_v26  ;;  %v342_v46 = vsel %vm330_vm15, %v9967_v17, %v9978_v1  ;;  %v912_v38 = vsel %vm905_vm12, %v9975_v24, %v9992_v32  ;;  %v343_v24 = vsel %vm330_vm15, %v9978_v1, %v9987_v9  ;;  %v9996_v1 = vld [vmem:[#allocation242_spill] sm:$0xff] }
 0x658   : > { %3680 = vmatpush.bf16.msrb.mxu3 %v3295_v33  ;;  %v1696_v26 = vsel %vm1249_vm2, %v912_v38, %v975_v4  ;;  %v9994_v33 = vld [vmem:[#allocation158_spill] sm:$0xff]  ;;  %v10006_v4 = vld [vmem:[#allocation169_spill] sm:$0xff] }
 0x659   : > { %3092 = vrot.lane.b32.xlu2 %v7360_v23, %s4551_s19  ;;  %3050 = vrot.lane.b32.xlu1 %v9977_v21, %s4551_s19  ;;  %v2995_v14 = vpop.permute.xlu2 %2994  ;;  %v777_v23 = vsel %vm771_vm14, %v9962_v12, %v9979_v49  ;;  %v9981_v12 = vld [vmem:[#allocation82_spill] sm:$0xff]  ;;  %v849_v25 = vsel %vm842_vm13, %v9976_v54, %v9994_v33 }
 0x65a   : > { %v3230_v44 = vsel %vm3204_vm8, %v2993_v27, %v2995_v14  ;;  %v1608_v39 = vsel %vm1249_vm2, %v777_v23, %v848_v35  ;;  %v8006_v27 = vsel %vm1249_vm2, %v9980_v11, %v342_v46  ;;  %v9995_v35 = vld [vmem:[#allocation139_spill] sm:$0xff] }
 0x65b   : > { %3640 = vmatpush.bf16.msra.mxu2 %v1692_v55  ;;  %3631 = vmatpush.bf16.msra.mxu1 %v3230_v44  ;;  %v778_v21 = vsel %vm771_vm14, %v9979_v49, %v9995_v35 }
 0x65c   : > { %v1612_v46 = vsel %vm1249_vm2, %v778_v21, %v849_v25 }
 0x65d   : > { %v2515_v8 = vpop.permute.xlu1 %2514  ;;  %v3085_v57 = vpop.permute.xlu0 %3084 }
 0x65e   : > { %v2543_v34 = vsel %vm905_vm12, %v7890_v18, %v2515_v8  ;;  %v3273_v5 = vsel %vm3204_vm8, %v3083_v47, %v3085_v57 }
 0x65f   : > { %3641 = vmatpush.bf16.msra.mxu2 %v1608_v39  ;;  %3184 = vrot.lane.b32.xlu0 %v2543_v34, %s4551_s19  ;;  %v9999_v34 = vld [vmem:[#allocation115_spill] sm:$0xff] }
 0x660   : > { %3655 = vmatpush.bf16.msra.mxu0 %v3273_v5 }
 0x661   : > { %2958 = vrot.lane.b32.xlu2 %v8006_v27, %s4551_s19  ;;  %3004 = vrot.lane.b32.xlu1 %v9981_v12, %s4551_s19  ;;  %v8015_v13 = vpop.permute.xlu2 %2452 }
 0x662   : > { %v2481_v18 = vsel %vm842_vm13, %v7935_v2, %v8015_v13 }
 0x663   : > { %3642 = vmatpush.bf16.msra.mxu2 %v9982_v3  ;;  %v2802_v2 = vsel %vm1249_vm2, %v2419_v43, %v2481_v18  ;;  %v2420_v3 = vsel %vm2407_vm7, %v7441_v61, %v7455_v62  ;;  %v10002_v43 = vld [vmem:[#allocation103_spill] sm:$0xff] }
 0x665   : > { %v8020_v17 = vpop.permute.xlu1 %3086  ;;  %v2951_v53 = vpop.permute.xlu0 %2950 }
 0x666   : > { %v3274_v47 = vsel %vm3204_vm8, %v3085_v57, %v8020_v17  ;;  %v3209_v29 = vsel %vm3204_vm8, %v2949_v41, %v2951_v53  ;;  %v9988_v41 = vld [vmem:[#allocation108_spill] sm:$0xff] }
 0x667   : > { %3643 = vmatpush.bf16.msra.mxu2 %v9983_v30  ;;  %2462 = vrot.lane.b32.xlu0 %v9984_v59, %s4537_s29  ;;  %v10000_v30 = vld [vmem:[#allocation88_spill] sm:$0xff] }
 0x668   : > { %3681 = vmatpush.bf16.msrb.mxu3 %v3274_v47  ;;  %3632 = vmatpush.bf16.msra.mxu1 %v3209_v29 }
 0x669   : > { %2524 = vrot.lane.b32.xlu2 %v9984_v59, %s4538_s30  ;;  %3140 = vrot.lane.b32.xlu1 %v2802_v2, %s4551_s19  ;;  %v8036_v45 = vpop.permute.xlu2 %3042 }
 0x66b   : > { %3644 = vmatpush.bf16.msra.mxu2 %v9985_v7  ;;  %4467 = vmatmul.msk.bf16.vlgmr.msra.gmra.mxu1 %vm3442_vm10, %v7774_v28  ;;  %v10004_v7 = vld [vmem:[#allocation213_spill] sm:$0xff] }
 0x66c   : > { %3664 = vmatpush.bf16.msrb.mxu1 %v9988_v41  ;;  %v976_v41 = vsel %vm968_vm11, %v9990_v0, %v10005_v20 }
 0x66d   : > { %v3041_v6 = vpop.permute.xlu1 %3040  ;;  %v8045_v60 = vpop.permute.xlu0 %2516 }
 0x66e   : > { %v2544_v19 = vsel %vm905_vm12, %v2515_v8, %v8045_v60  ;;  %v3252_v52 = vsel %vm3204_vm8, %v3039_v10, %v3041_v6  ;;  %v9997_v8 = vld [vmem:[#allocation16_spill] sm:$0xff] }
 0x66f   : > { %3645 = vmatpush.bf16.msra.mxu2 %v7614_v16  ;;  %v3253_v16 = vsel %vm3204_vm8, %v3041_v6, %v8036_v45  ;;  %2962 = vrot.lane.b32.xlu0 %v8049_v63, %s4551_s19  ;;  %v8092_v49 = vsel %vm1249_vm2, %v9997_v8, %v343_v24 }
 0x670   : > { %3665 = vmatpush.bf16.msrb.mxu1 %v9991_v48  ;;  %3656 = vmatpush.bf16.msra.mxu0 %v3252_v52  ;;  %v913_v48 = vsel %vm905_vm12, %v9992_v32, %v10006_v4  ;;  %v10008_v52 = vld [vmem:[#allocation257_spill] sm:$0xff]  ;;  %v10012_v32 = vld [vmem:[#allocation130_spill] sm:$0xff] }
 0x671   : > { %3682 = vmatpush.bf16.msrb.mxu3 %v3253_v16  ;;  %3006 = vrot.lane.b32.xlu2 %v9993_v42, %s4551_s19  ;;  %v2997_v10 = vpop.permute.xlu2 %2996  ;;  %v1700_v0 = vsel %vm1249_vm2, %v913_v48, %v976_v41  ;;  %v10011_v42 = vld [vmem:[#allocation272_spill] sm:$0xff] }
 0x672   : > { %3186 = vrot.lane.b32.xlu1 %v2544_v19, %s4551_s19  ;;  %3646 = vmatmul.bf16.vlgmr.msra.gmra.mxu2 %v7869_v56  ;;  %v3231_v55 = vsel %vm3204_vm8, %v2995_v14, %v2997_v10  ;;  %v10007_v19 = vld [vmem:[#allocation241_spill] sm:$0xff] }
 0x674   : > { %3666 = vmatpush.bf16.msrb.mxu1 %v1696_v26  ;;  %3657 = vmatpush.bf16.msra.mxu0 %v3231_v55  ;;  %v779_v26 = vsel %vm771_vm14, %v9995_v35, %v10012_v32  ;;  %v10014_v55 = vld [vmem:[#allocation218_spill] sm:$0xff] }
 0x675   : > { %v3177_v44 = vpop.permute.xlu1 %3176  ;;  %v8081_v23 = vpop.permute.xlu0 %2998 }
 0x676   : > { %v3317_v54 = vsel %vm3204_vm8, %v7947_v15, %v3177_v44  ;;  %v3232_v14 = vsel %vm3204_vm8, %v2997_v10, %v8081_v23  ;;  %v9998_v15 = vld [vmem:[#allocation246_spill] sm:$0xff]  ;;  %v10013_v10 = vld [vmem:[#allocation200_spill] sm:$0xff] }
 0x677   : > { %v3467_v39 = vsel %vm1249_vm2, %v3317_v54, 0  ;;  %2526 = vrot.lane.b32.xlu0 %v9996_v1, %s4538_s30  ;;  %3683 = vmatpush.bf16.msrb.mxu3 %v3232_v14  ;;  %v977_v25 = vsel %vm968_vm11, %v10005_v20, %v10013_v10  ;;  %v10016_v14 = vld [vmem:[#allocation181_spill] sm:$0xff] }
 0x678   : > { %3667 = vmatpush.bf16.msrb.mxu1 %v1612_v46  ;;  %3705 = vmatpush.bf16.msrb.mxu2 %v3467_v39  ;;  %v914_v39 = vsel %vm905_vm12, %v10006_v4, %v10016_v14  ;;  %v10026_v4 = vld [vmem:[#allocation91_spill] sm:$0xff] }
 0x679   : > { %2960 = vrot.lane.b32.xlu2 %v8092_v49, %s4551_s19  ;;  %v8098_v57 = vpop.permute.xlu2 %3132 }
 0x67a   : > { %2528 = vrot.lane.b32.xlu1 %v9998_v15, %s4538_s30  ;;  %v3296_v11 = vsel %vm3204_vm8, %v7978_v51, %v8098_v57  ;;  %v10001_v51 = vld [vmem:[#allocation270_spill] sm:$0xff] }
 0x67c   : > { %3668 = vmatpush.bf16.msrb.mxu1 %v9999_v34  ;;  %3706 = vmatpush.bf16.msrb.mxu2 %v3296_v11  ;;  %v10018_v34 = vld [vmem:[#allocation14_spill] sm:$0xff] }
 0x67d   : > { %v2455_v5 = vpop.permute.xlu1 %2454  ;;  %v2953_v12 = vpop.permute.xlu0 %2952 }
 0x67e   : > { %v2482_v18 = vsel %vm842_vm13, %v8015_v13, %v2455_v5  ;;  %v3210_v47 = vsel %vm3204_vm8, %v2951_v53, %v2953_v12  ;;  %v10003_v13 = vld [vmem:[#allocation59_spill] sm:$0xff] }
 0x67f   : > { %v2805_v29 = vsel %vm1249_vm2, %v2420_v3, %v2482_v18  ;;  %3658 = vmatpush.bf16.msra.mxu0 %v3210_v47  ;;  %v10020_v3 = vld [vmem:[#allocation143_spill] sm:$0xff] }
 0x680   : > { %3669 = vmatpush.bf16.msrb.mxu1 %v10000_v30  ;;  %3142 = vrot.lane.b32.xlu0 %v2805_v29, %s4551_s19  ;;  %v10021_v29 = vld [vmem:[#allocation281_spill] sm:$0xff] }
 0x681   : > { %3096 = vrot.lane.b32.xlu2 %v10001_v51, %s4551_s19  ;;  %v8118_v61 = vpop.permute.xlu2 %3178  ;;  %v2421_v51 = vsel %vm2407_vm7, %v7455_v62, %v10021_v29 }
 0x682   : > { %2464 = vrot.lane.b32.xlu1 %v9996_v1, %s4537_s29  ;;  %v3318_v53 = vsel %vm3204_vm8, %v3177_v44, %v8118_v61  ;;  %4468 = vmatmul.msk.bf16.vlgmr.msra.gmra.mxu0 %vm3442_vm10, %v7774_v28  ;;  %v10015_v44 = vld [vmem:[#allocation42_spill] sm:$0xff]  ;;  %v1704_v1 = vsel %vm1249_vm2, %v914_v39, %v977_v25 }
 0x683   : > { %3690 = vmatpush.bf16.msrb.mxu0 %v10002_v43  ;;  %v3470_v59 = vsel %vm1249_vm2, %v3318_v53, 0  ;;  %v345_v46 = vsel %vm330_vm15, %v9986_v58, %v10015_v44  ;;  %v10017_v58 = vld [vmem:[#allocation162_spill] sm:$0xff] }
 0x684   : > { %3670 = vmatpush.bf16.msrb.mxu1 %v10003_v13  ;;  %v10022_v43 = vld [vmem:[#allocation86_spill] sm:$0xff] }
 0x685   : > { %v8126_v2 = vpop.permute.xlu1 %2954  ;;  %v3089_v9 = vpop.permute.xlu0 %3088 }
 0x686   : > { %v3211_v6 = vsel %vm3204_vm8, %v2953_v12, %v8126_v2  ;;  %v3275_v36 = vsel %vm3204_vm8, %v8020_v17, %v3089_v9  ;;  %v10010_v17 = vld [vmem:[#allocation150_spill] sm:$0xff]  ;;  %v10019_v12 = vld [vmem:[#allocation113_spill] sm:$0xff] }
 0x687   : > { %3691 = vmatpush.bf16.msrb.mxu0 %v10004_v7  ;;  %3684 = vmatpush.bf16.msrb.mxu3 %v3211_v6  ;;  %v850_v38 = vsel %vm842_vm13, %v9994_v33, %v10010_v17  ;;  %v851_v8 = vsel %vm842_vm13, %v10010_v17, %v10017_v58  ;;  %v10028_v17 = vld [vmem:[#allocation261_spill] sm:$0xff] }
 0x688   : > { %3671 = vmatpush.bf16.msrb.mxu1 %v7661_v31  ;;  %3008 = vrot.lane.b32.xlu0 %v10007_v19, %s4551_s19  ;;  %v10009_v31 = vld [vmem:[#allocation80_spill] sm:$0xff]  ;;  %v1616_v24 = vsel %vm1249_vm2, %v779_v26, %v850_v38  ;;  %v10029_v38 = vld [vmem:[#allocation62_spill] sm:$0xff] }
 0x689   : > { %3052 = vrot.lane.b32.xlu2 %v10008_v52, %s4551_s19  ;;  %3707 = vmatpush.bf16.msrb.mxu2 %v3275_v36  ;;  %v10025_v36 = vld [vmem:[#allocation57_spill] sm:$0xff] }
 0x68a   : > { %v8146_v16 = vpop.permute.xlu2 %2520  ;;  %3098 = vrot.lane.b32.xlu1 %v10011_v42, %s4551_s19  ;;  %4469 = vmatmul.msk.bf16.vlgmr.msrb.gmra.mxu3 %vm3442_vm10, %v7774_v28  ;;  %v10030_v42 = vld [vmem:[#allocation273_spill] sm:$0xff] }
 0x68b   : > { %3716 = vmatpush.bf16.msra.mxu3 %v10009_v31  ;;  %3692 = vmatpush.bf16.msrb.mxu0 %v1700_v0 }
 0x68c   : > { %3731 = vmatpush.bf16.msra.mxu1 %v3470_v59  ;;  %v10023_v59 = vld [vmem:[#allocation280_spill] sm:$0xff] }
 0x68d   : > { %3672 = vmatmul.bf16.vlgmr.msrb.gmra.mxu1 %v7869_v56  ;;  %v2519_v33 = vpop.permute.xlu1 %2518  ;;  %v3045_v21 = vpop.permute.xlu0 %3044 }
 0x68e   : > { %v2546_v54 = vsel %vm905_vm12, %v2519_v33, %v8146_v16  ;;  %v3254_v35 = vsel %vm3204_vm8, %v8036_v45, %v3045_v21  ;;  %v8183_v45 = vsel %vm1249_vm2, %v10018_v34, %v345_v46  ;;  %v2545_v7 = vsel %vm905_vm12, %v8045_v60, %v2519_v33  ;;  %v10033_v33 = vld [vmem:[#allocation245_spill] sm:$0xff] }
 0x68f   : > { %3717 = vmatpush.bf16.msra.mxu3 %v10014_v55  ;;  %3693 = vmatpush.bf16.msrb.mxu0 %v1616_v24  ;;  %v10035_v24 = vld [vmem:[#allocation219_spill] sm:$0xff]  ;;  %v10038_v34 = vld [vmem:[#allocation161_spill] sm:$0xff] }
 0x690   : > { %3708 = vmatpush.bf16.msrb.mxu2 %v3254_v35  ;;  %3190 = vrot.lane.b32.xlu0 %v2546_v54, %s4551_s19  ;;  %v10037_v35 = vld [vmem:[#allocation180_spill] sm:$0xff] }
 0x691   : > { %2466 = vrot.lane.b32.xlu2 %v9998_v15, %s4537_s29  ;;  %v780_v15 = vsel %vm771_vm14, %v10012_v32, %v10020_v3  ;;  %v10032_v32 = vld [vmem:[#allocation41_spill] sm:$0xff] }
 0x692   : > { %v2457_v11 = vpop.permute.xlu2 %2456  ;;  %2964 = vrot.lane.b32.xlu1 %v8183_v45, %s4551_s19  ;;  %v1620_v30 = vsel %vm1249_vm2, %v780_v15, %v851_v8  ;;  %v346_v26 = vsel %vm330_vm15, %v10015_v44, %v10032_v32  ;;  %v10036_v44 = vld [vmem:[#allocation19_spill] sm:$0xff]  ;;  %v10039_v15 = vld [vmem:[#allocation142_spill] sm:$0xff] }
 0x693   : > { %3718 = vmatpush.bf16.msra.mxu3 %v1704_v1  ;;  %3694 = vmatpush.bf16.msrb.mxu0 %v10019_v12  ;;  %v2483_v18 = vsel %vm842_vm13, %v2455_v5, %v2457_v11  ;;  %v2422_v5 = vsel %vm2407_vm7, %v10021_v29, %v10023_v59  ;;  %v8263_v46 = vsel %vm1249_vm2, %v10036_v44, %v346_v26  ;;  %v10041_v29 = vld [vmem:[#allocation271_spill] sm:$0xff] }
 0x694   : > { %v2808_v62 = vsel %vm1249_vm2, %v2421_v51, %v2483_v18  ;;  %v781_v18 = vsel %vm771_vm14, %v10020_v3, %v10039_v15 }
 0x695   : > { %v8193_v47 = vpop.permute.xlu1 %3134 }
 0x696   : > { %v8199_v13 = vpop.permute.xlu0 %2458  ;;  %v3297_v53 = vsel %vm3204_vm8, %v8098_v57, %v8193_v47  ;;  %v10024_v57 = vld [vmem:[#allocation118_spill] sm:$0xff] }
 0x697   : > { %3719 = vmatpush.bf16.msra.mxu3 %v1620_v30  ;;  %3695 = vmatpush.bf16.msrb.mxu0 %v10022_v43  ;;  %v2484_v20 = vsel %vm842_vm13, %v2457_v11, %v8199_v13  ;;  %v852_v11 = vsel %vm842_vm13, %v10017_v58, %v10038_v34  ;;  %v10040_v30 = vld [vmem:[#allocation260_spill] sm:$0xff] }
 0x698   : > { %3732 = vmatpush.bf16.msra.mxu1 %v3297_v53  ;;  %3144 = vrot.lane.b32.xlu0 %v2808_v62, %s4551_s19  ;;  %v2811_v41 = vsel %vm1249_vm2, %v2422_v5, %v2484_v20  ;;  %v1624_v51 = vsel %vm1249_vm2, %v781_v18, %v852_v11  ;;  %v10043_v20 = vld [vmem:[#allocation76_spill] sm:$0xff]  ;;  %v10044_v62 = vld [vmem:[#allocation262_spill] sm:$0xff] }
 0x699   : > { %3188 = vrot.lane.b32.xlu2 %v2545_v7, %s4551_s19  ;;  %v10059_v18 = vld [vmem:[#allocation134_spill] sm:$0xff] }
 0x69a   : > { %3146 = vrot.lane.b32.xlu1 %v2811_v41, %s4551_s19  ;;  %v10045_v41 = vld [vmem:[#allocation92_spill] sm:$0xff] }
 0x69b   : > { %3720 = vmatpush.bf16.msra.mxu3 %v10024_v57  ;;  %v8216_v6 = vpop.permute.xlu2 %3090  ;;  %3696 = vmatpush.bf16.msrb.mxu0 %v10025_v36 }
 0x69c   : > { %v3276_v60 = vsel %vm3204_vm8, %v3089_v9, %v8216_v6  ;;  %v10027_v9 = vld [vmem:[#allocation77_spill] sm:$0xff] }
 0x69d   : > { %3733 = vmatpush.bf16.msra.mxu1 %v3276_v60  ;;  %v8223_v48 = vpop.permute.xlu1 %3000 }
 0x69e   : > { %v3181_v19 = vpop.permute.xlu0 %3180  ;;  %v3233_v52 = vsel %vm3204_vm8, %v8081_v23, %v8223_v48 }
 0x69f   : > { %3721 = vmatpush.bf16.msra.mxu3 %v10026_v4  ;;  %3697 = vmatpush.bf16.msrb.mxu0 %v7705_v22  ;;  %v3319_v31 = vsel %vm3204_vm8, %v8118_v61, %v3181_v19  ;;  %v10031_v61 = vld [vmem:[#allocation81_spill] sm:$0xff]  ;;  %v10046_v4 = vld [vmem:[#allocation44_spill] sm:$0xff] }
 0x6a0   : > { %3709 = vmatpush.bf16.msrb.mxu2 %v3233_v52  ;;  %v3473_v0 = vsel %vm1249_vm2, %v3319_v31, 0  ;;  %3010 = vrot.lane.b32.xlu0 %v10027_v9, %s4551_s19  ;;  %v10048_v31 = vld [vmem:[#allocation63_spill] sm:$0xff]  ;;  %v10049_v9 = vld [vmem:[#allocation17_spill] sm:$0xff] }
 0x6a1   : > { %3054 = vrot.lane.b32.xlu2 %v10028_v17, %s4551_s19 }
 0x6a2   : > { %3100 = vrot.lane.b32.xlu1 %v10030_v42, %s4551_s19  ;;  %3698 = vmatmul.bf16.vlgmr.msrb.gmra.mxu0 %v7869_v56 }
 0x6a3   : > { %3722 = vmatpush.bf16.msra.mxu3 %v10029_v38  ;;  %3757 = vmatpush.bf16.msra.mxu0 %v3473_v0  ;;  %v8237_v22 = vpop.permute.xlu2 %2956  ;;  %v10050_v38 = vld [vmem:[#allocation53_spill] sm:$0xff] }
 0x6a4   : > { %v3212_v23 = vsel %vm3204_vm8, %v8126_v2, %v8237_v22  ;;  %v10034_v2 = vld [vmem:[#allocation199_spill] sm:$0xff] }
 0x6a5   : > { %3710 = vmatpush.bf16.msrb.mxu2 %v3212_v23  ;;  %v10051_v23 = vld [vmem:[#allocation79_spill] sm:$0xff] }
 0x6a6   : > { %v3047_v25 = vpop.permute.xlu0 %3046 }
 0x6a7   : > { %3723 = vmatpush.bf16.msra.mxu3 %v7757_v50  ;;  %v3255_v55 = vsel %vm3204_vm8, %v3045_v21, %v3047_v25  ;;  %v978_v50 = vsel %vm968_vm11, %v10013_v10, %v10034_v2  ;;  %v915_v10 = vsel %vm905_vm12, %v10016_v14, %v10037_v35 }
 0x6a8   : > { %4470 = vmatmul.msk.bf16.vlgmr.msrb.gmra.mxu2 %vm3442_vm10, %v7774_v28  ;;  %2468 = vrot.lane.b32.xlu0 %v10033_v33, %s4537_s29  ;;  %v1708_v8 = vsel %vm1249_vm2, %v915_v10, %v978_v50  ;;  %v10057_v10 = vld [vmem:[#allocation264_spill] sm:$0xff] }
 0x6a9   : > { %3742 = vmatpush.bf16.msra.mxu2 %v10031_v61  ;;  %2530 = vrot.lane.b32.xlu2 %v10033_v33, %s4538_s30  ;;  %v10053_v33 = vld [vmem:[#allocation191_spill] sm:$0xff] }
 0x6aa   : > { %3734 = vmatpush.bf16.msra.mxu1 %v3255_v55  ;;  %2966 = vrot.lane.b32.xlu1 %v8263_v46, %s4551_s19  ;;  %v979_v50 = vsel %vm968_vm11, %v10034_v2, %v10053_v33 }
 0x6ab   : > { %v8265_v54 = vpop.permute.xlu2 %3138  ;;  %v8269_v21 = vpop.permute.xlu1 %3182  ;;  %3724 = vmatmul.bf16.vlgmr.msra.gmra.mxu3 %v7869_v56 }
 0x6ac   : > { %v3320_v39 = vsel %vm3204_vm8, %v3181_v19, %v8269_v21  ;;  %v10047_v19 = vld [vmem:[#allocation32_spill] sm:$0xff] }
 0x6ad   : > { %3743 = vmatpush.bf16.msra.mxu2 %v10035_v24  ;;  %v3476_v1 = vsel %vm1249_vm2, %v3320_v39, 0  ;;  %v348_v52 = vsel %vm330_vm15, %v10047_v19, %v10046_v4  ;;  %v347_v26 = vsel %vm330_vm15, %v10032_v32, %v10047_v19  ;;  %v10054_v24 = vld [vmem:[#allocation217_spill] sm:$0xff]  ;;  %v10055_v32 = vld [vmem:[#allocation18_spill] sm:$0xff]  ;;  %v10067_v19 = vld [vmem:[#allocation283_spill] sm:$0xff] }
 0x6ae   : > { %3783 = vmatpush.bf16.msrb.mxu3 %v3476_v1  ;;  %v2523_v12 = vpop.permute.xlu0 %2522  ;;  %v10058_v39 = vld [vmem:[#allocation153_spill] sm:$0xff] }
 0x6af   : > { %v2547_v14 = vsel %vm905_vm12, %v8146_v16, %v2523_v12  ;;  %v10042_v16 = vld [vmem:[#allocation119_spill] sm:$0xff]  ;;  %v853_v1 = vsel %vm842_vm13, %v10038_v34, %v10058_v39 }
 0x6b0   : > { %3058 = vrot.lane.b32.xlu0 %v10040_v30, %s4551_s19  ;;  %v10060_v34 = vld [vmem:[#allocation275_spill] sm:$0xff] }
 0x6b1   : > { %3744 = vmatpush.bf16.msra.mxu2 %v1708_v8  ;;  %3102 = vrot.lane.b32.xlu2 %v10041_v29, %s4551_s19 }
 0x6b2   : > { %3192 = vrot.lane.b32.xlu1 %v2547_v14, %s4551_s19 }
 0x6b3   : > { %v3093_v58 = vpop.permute.xlu2 %3092  ;;  %v3137_v43 = vpop.permute.xlu1 %3136 }
 0x6b4   : > { %v3298_v53 = vsel %vm3204_vm8, %v8193_v47, %v3137_v43  ;;  %v3299_v3 = vsel %vm3204_vm8, %v3137_v43, %v8265_v54  ;;  %v3277_v47 = vsel %vm3204_vm8, %v8216_v6, %v3093_v58  ;;  %v8319_v6 = vsel %vm1249_vm2, %v10049_v9, %v348_v52  ;;  %v10068_v9 = vld [vmem:[#allocation61_spill] sm:$0xff] }
 0x6b5   : > { %3745 = vmatpush.bf16.msra.mxu2 %v1624_v51  ;;  %3758 = vmatpush.bf16.msra.mxu0 %v3298_v53  ;;  %v10061_v51 = vld [vmem:[#allocation276_spill] sm:$0xff]  ;;  %v10062_v53 = vld [vmem:[#allocation117_spill] sm:$0xff] }
 0x6b6   : > { %3784 = vmatpush.bf16.msrb.mxu3 %v3299_v3 }
 0x6b7   : > { %v8298_v5 = vpop.permute.xlu0 %3094 }
 0x6b8   : > { %v3278_v7 = vsel %vm3204_vm8, %v3093_v58, %v8298_v5  ;;  %3014 = vrot.lane.b32.xlu0 %v10043_v20, %s4551_s19 }
 0x6b9   : > { %3746 = vmatpush.bf16.msra.mxu2 %v10042_v16  ;;  %3056 = vrot.lane.b32.xlu2 %v10044_v62, %s4551_s19  ;;  %v10063_v16 = vld [vmem:[#allocation43_spill] sm:$0xff] }
 0x6ba   : > { %3759 = vmatpush.bf16.msra.mxu0 %v3277_v47  ;;  %3785 = vmatpush.bf16.msrb.mxu3 %v3278_v7  ;;  %v349_v7 = vsel %vm330_vm15, %v10046_v4, %v10063_v16  ;;  %v10064_v47 = vld [vmem:[#allocation90_spill] sm:$0xff] }
 0x6bb   : > { %v8309_v57 = vpop.permute.xlu2 %2958  ;;  %v3003_v36 = vpop.permute.xlu1 %3002 }
 0x6bc   : > { %v3234_v60 = vsel %vm3204_vm8, %v8223_v48, %v3003_v36  ;;  %v3213_v48 = vsel %vm3204_vm8, %v8237_v22, %v8309_v57 }
 0x6bd   : > { %3747 = vmatpush.bf16.msra.mxu2 %v10045_v41  ;;  %3735 = vmatpush.bf16.msra.mxu1 %v3234_v60  ;;  %v10066_v60 = vld [vmem:[#allocation47_spill] sm:$0xff] }
 0x6bf   : > { %v3049_v0 = vpop.permute.xlu0 %3048 }
 0x6c0   : > { %v3256_v17 = vsel %vm3204_vm8, %v3047_v25, %v3049_v0  ;;  %2970 = vrot.lane.b32.xlu0 %v8319_v6, %s4551_s19  ;;  %v10052_v25 = vld [vmem:[#allocation284_spill] sm:$0xff] }
 0x6c1   : > { %3748 = vmatpush.bf16.msra.mxu2 %v10048_v31  ;;  %3012 = vrot.lane.b32.xlu2 %v10050_v38, %s4551_s19  ;;  %v2423_v55 = vsel %vm2407_vm7, %v10023_v59, %v10052_v25  ;;  %v8352_v59 = vsel %vm1249_vm2, %v10055_v32, %v347_v26  ;;  %v2424_v52 = vsel %vm2407_vm7, %v10052_v25, %v10067_v19  ;;  %v10071_v26 = vld [vmem:[#allocation221_spill] sm:$0xff]  ;;  %v10072_v25 = vld [vmem:[#allocation184_spill] sm:$0xff] }
 0x6c2   : > { %3760 = vmatpush.bf16.msra.mxu0 %v3256_v17  ;;  %3736 = vmatpush.bf16.msra.mxu1 %v3213_v48  ;;  %v10069_v17 = vld [vmem:[#allocation75_spill] sm:$0xff] }
 0x6c3   : > { %v8330_v42 = vpop.permute.xlu2 %2524  ;;  %v2461_v61 = vpop.permute.xlu1 %2460 }
 0x6c4   : > { %v2485_v22 = vsel %vm842_vm13, %v8199_v13, %v2461_v61  ;;  %v10056_v13 = vld [vmem:[#allocation172_spill] sm:$0xff]  ;;  %v2548_v30 = vsel %vm905_vm12, %v2523_v12, %v8330_v42 }
 0x6c5   : > { %3749 = vmatpush.bf16.msra.mxu2 %v7778_v40  ;;  %4471 = vmatmul.msk.bf16.vlgmr.msra.gmra.mxu1 %vm3442_vm10, %v7774_v28  ;;  %v2814_v40 = vsel %vm1249_vm2, %v2423_v55, %v2485_v22  ;;  %v916_v44 = vsel %vm905_vm12, %v10037_v35, %v10056_v13  ;;  %v782_v35 = vsel %vm771_vm14, %v10039_v15, %v10059_v18 }
 0x6c6   : > { %3768 = vmatpush.bf16.msrb.mxu1 %v10051_v23  ;;  %3148 = vrot.lane.b32.xlu1 %v2814_v40, %s4551_s19  ;;  %v1712_v2 = vsel %vm1249_vm2, %v916_v44, %v979_v50  ;;  %v1628_v29 = vsel %vm1249_vm2, %v782_v35, %v853_v1  ;;  %v10070_v23 = vld [vmem:[#allocation202_spill] sm:$0xff]  ;;  %v917_v55 = vsel %vm905_vm12, %v10056_v13, %v10072_v25  ;;  %v10076_v35 = vld [vmem:[#allocation201_spill] sm:$0xff] }
 0x6c7   : > { %v10074_v13 = vld [vmem:[#allocation146_spill] sm:$0xff] }
 0x6c8   : > { %3750 = vmatmul.bf16.vlgmr.msra.gmra.mxu2 %v7869_v56  ;;  %3060 = vrot.lane.b32.xlu0 %v10057_v10, %s4551_s19  ;;  %v783_v44 = vsel %vm771_vm14, %v10059_v18, %v10074_v13 }
 0x6c9   : > { %2968 = vrot.lane.b32.xlu2 %v8352_v59, %s4551_s19 }
 0x6ca   : > { %3769 = vmatpush.bf16.msrb.mxu1 %v10054_v24 }
 0x6cb   : > { %v8365_v8 = vpop.permute.xlu2 %3006  ;;  %v3051_v11 = vpop.permute.xlu1 %3050 }
 0x6cc   : > { %v3257_v14 = vsel %vm3204_vm8, %v3049_v0, %v3051_v11 }
 0x6cd   : > { %3786 = vmatpush.bf16.msrb.mxu3 %v3257_v14  ;;  %v10077_v14 = vld [vmem:[#allocation222_spill] sm:$0xff] }
 0x6ce   : > { %3770 = vmatpush.bf16.msrb.mxu1 %v1712_v2  ;;  %3194 = vrot.lane.b32.xlu1 %v2548_v30, %s4551_s19  ;;  %v10075_v2 = vld [vmem:[#allocation50_spill] sm:$0xff]  ;;  %v10078_v30 = vld [vmem:[#allocation183_spill] sm:$0xff] }
 0x6d0   : > { %3106 = vrot.lane.b32.xlu0 %v10060_v34, %s4551_s19 }
 0x6d1   : > { %3104 = vrot.lane.b32.xlu2 %v10061_v51, %s4551_s19  ;;  %v3185_v58 = vpop.permute.xlu0 %3184 }
 0x6d2   : > { %3771 = vmatpush.bf16.msrb.mxu1 %v1628_v29  ;;  %v3321_v15 = vsel %vm3204_vm8, %v8269_v21, %v3185_v58  ;;  %v10065_v21 = vld [vmem:[#allocation22_spill] sm:$0xff]  ;;  %v918_v29 = vsel %vm905_vm12, %v10072_v25, %v10078_v30 }
 0x6d3   : > { %v2961_v43 = vpop.permute.xlu2 %2960  ;;  %v3479_v12 = vsel %vm1249_vm2, %v3321_v15, 0  ;;  %v3005_v3 = vpop.permute.xlu1 %3004  ;;  %v8392_v41 = vsel %vm1249_vm2, %v10065_v21, %v349_v7  ;;  %v10082_v7 = vld [vmem:[#allocation95_spill] sm:$0xff] }
 0x6d4   : > { %3809 = vmatpush.bf16.msrb.mxu2 %v3479_v12  ;;  %v3235_v20 = vsel %vm3204_vm8, %v3003_v36, %v3005_v3  ;;  %v3236_v62 = vsel %vm3204_vm8, %v3005_v3, %v8365_v8  ;;  %v3214_v36 = vsel %vm3204_vm8, %v8309_v57, %v2961_v43 }
 0x6d5   : > { %3761 = vmatpush.bf16.msra.mxu0 %v3235_v20  ;;  %3787 = vmatpush.bf16.msrb.mxu3 %v3236_v62 }
 0x6d6   : > { %3772 = vmatpush.bf16.msrb.mxu1 %v10062_v53 }
 0x6d8   : > { %2972 = vrot.lane.b32.xlu0 %v8392_v41, %s4551_s19 }
 0x6d9   : > { %3016 = vrot.lane.b32.xlu2 %v10066_v60, %s4551_s19  ;;  %3762 = vmatpush.bf16.msra.mxu0 %v3214_v36  ;;  %v8400_v4 = vpop.permute.xlu0 %2462  ;;  %v10084_v60 = vld [vmem:[#allocation282_spill] sm:$0xff] }
 0x6da   : > { %3773 = vmatpush.bf16.msrb.mxu1 %v10064_v47  ;;  %v2486_v31 = vsel %vm842_vm13, %v2461_v61, %v8400_v4  ;;  %v980_v61 = vsel %vm968_vm11, %v10053_v33, %v10070_v23  ;;  %v10073_v33 = vld [vmem:[#allocation165_spill] sm:$0xff]  ;;  %v10083_v47 = vld [vmem:[#allocation66_spill] sm:$0xff]  ;;  %v2425_v36 = vsel %vm2407_vm7, %v10067_v19, %v10084_v60  ;;  %v10087_v19 = vld [vmem:[#allocation123_spill] sm:$0xff] }
 0x6db   : > { %v8407_v0 = vpop.permute.xlu2 %3096  ;;  %v3141_v38 = vpop.permute.xlu1 %3140  ;;  %v2817_v48 = vsel %vm1249_vm2, %v2424_v52, %v2486_v31 }
 0x6dc   : > { %3150 = vrot.lane.b32.xlu1 %v2817_v48, %s4551_s19  ;;  %4472 = vmatmul.msk.bf16.vlgmr.msra.gmra.mxu0 %vm3442_vm10, %v7774_v28  ;;  %v3300_v57 = vsel %vm3204_vm8, %v8265_v54, %v3141_v38  ;;  %v3279_v22 = vsel %vm3204_vm8, %v8298_v5, %v8407_v0  ;;  %v1716_v54 = vsel %vm1249_vm2, %v917_v55, %v980_v61  ;;  %v10086_v48 = vld [vmem:[#allocation286_spill] sm:$0xff] }
 0x6dd   : > { %3794 = vmatpush.bf16.msrb.mxu0 %v10069_v17  ;;  %3810 = vmatpush.bf16.msrb.mxu2 %v3300_v57  ;;  %v2426_v57 = vsel %vm2407_vm7, %v10084_v60, %v10086_v48  ;;  %v8557_v60 = vld.sshfl [vmem:[#allocation1 + $0x8] sm:$0xff pattern:$0x73625140] }
 0x6de   : > { %3774 = vmatpush.bf16.msrb.mxu1 %v10068_v9  ;;  %v10085_v9 = vld [vmem:[#allocation265_spill] sm:$0xff] }
 0x6e1   : > { %3795 = vmatpush.bf16.msrb.mxu0 %v10071_v26  ;;  %3811 = vmatpush.bf16.msrb.mxu2 %v3279_v22  ;;  %v8428_v40 = vpop.permute.xlu0 %2962  ;;  %v3556_v22 = vpop.f32.mrf.mxu3 }
 0x6e2   : > { %3775 = vmatpush.bf16.msrb.mxu1 %v7939_v37  ;;  %v854_v37 = vsel %vm842_vm13, %v10058_v39, %v10073_v33  ;;  %v3215_v24 = vsel %vm3204_vm8, %v2961_v43, %v8428_v40  ;;  %v10080_v43 = vld [vmem:[#allocation164_spill] sm:$0xff] }
 0x6e3   : > { %v8435_v50 = vpop.permute.xlu2 %3052  ;;  %3788 = vmatpush.bf16.msrb.mxu3 %v3215_v24  ;;  %v1632_v1 = vsel %vm1249_vm2, %v783_v44, %v854_v37  ;;  %v855_v53 = vsel %vm842_vm13, %v10073_v33, %v10080_v43  ;;  %v10089_v37 = vld [vmem:[#allocation48_spill] sm:$0xff]  ;;  %v3517_v24 = vpop.f32.mrf.mxu0 }
 0x6e4   : > { %v3187_v32 = vpop.permute.xlu1 %3186  ;;  %v3258_v5 = vsel %vm3204_vm8, %v3051_v11, %v8435_v50  ;;  %v981_v11 = vsel %vm968_vm11, %v10070_v23, %v10076_v35 }
 0x6e5   : > { %3776 = vmatmul.bf16.vlgmr.msrb.gmra.mxu1 %v7869_v56  ;;  %3796 = vmatpush.bf16.msrb.mxu0 %v1716_v54  ;;  %v3322_v10 = vsel %vm3204_vm8, %v3185_v58, %v3187_v32  ;;  %v10079_v58 = vld [vmem:[#allocation122_spill] sm:$0xff]  ;;  %v1720_v15 = vsel %vm1249_vm2, %v918_v29, %v981_v11  ;;  %v10094_v29 = vld [vmem:[#allocation21_spill] sm:$0xff] }
 0x6e6   : > { %v3482_v39 = vsel %vm1249_vm2, %v3322_v10, 0  ;;  %3812 = vmatpush.bf16.msrb.mxu2 %v3258_v5  ;;  %4473 = vmatmul.msk.bf16.vlgmr.msrb.gmra.mxu3 %vm3442_vm10, %v7774_v28  ;;  %v10091_v10 = vld [vmem:[#allocation278_spill] sm:$0xff] }
 0x6e7   : > { %3820 = vmatpush.bf16.msra.mxu3 %v10075_v2  ;;  %3835 = vmatpush.bf16.msra.mxu1 %v3482_v39  ;;  %v10092_v2 = vld [vmem:[#allocation4_spill] sm:$0xff] }
 0x6e8   : > { %v1930_v39 = vsel %vm330_vm15, %v10063_v16, %v10092_v2 }
 0x6e9   : > { %3797 = vmatpush.bf16.msrb.mxu0 %v1632_v1  ;;  %v2527_v18 = vpop.permute.xlu0 %2526  ;;  %v3558_v11 = vpop.f32.mrf.mxu3 }
 0x6ea   : > { %v2549_v34 = vsel %vm905_vm12, %v8330_v42, %v2527_v18  ;;  %v10081_v42 = vld [vmem:[#allocation145_spill] sm:$0xff] }
 0x6eb   : > { %3821 = vmatpush.bf16.msra.mxu3 %v10077_v14  ;;  %v8459_v51 = vpop.permute.xlu2 %2466  ;;  %3196 = vrot.lane.b32.xlu1 %v2549_v34, %s4551_s19  ;;  %v784_v3 = vsel %vm771_vm14, %v10074_v13, %v10081_v42  ;;  %v10090_v13 = vld [vmem:[#allocation67_spill] sm:$0xff]  ;;  %v2553_v34 = vsel %vm1249_vm2, %v10094_v29, %v1930_v39 }
 0x6ec   : > { %v8462_v28 = vpop.permute.xlu1 %2528  ;;  %v1636_v20 = vsel %vm1249_vm2, %v784_v3, %v855_v53  ;;  %v10104_v39 = vld [vmem:[#allocation135_spill] sm:$0xff] }
 0x6ed   : > { %3798 = vmatpush.bf16.msrb.mxu0 %v10079_v58  ;;  %v2550_v12 = vsel %vm905_vm12, %v2527_v18, %v8462_v28 }
 0x6ee   : > { %3198 = vrot.lane.b32.xlu2 %v2550_v12, %s4551_s19 }
 0x6ef   : > { %3822 = vmatpush.bf16.msra.mxu3 %v1720_v15 }
 0x6f1   : > { %3799 = vmatpush.bf16.msrb.mxu0 %v10082_v7 }
 0x6f2   : > { %v8478_v21 = vpop.permute.xlu0 %3142 }
 0x6f3   : > { %3823 = vmatpush.bf16.msra.mxu3 %v1636_v20  ;;  %v3189_v62 = vpop.permute.xlu2 %3188  ;;  %3062 = vrot.lane.b32.xlu1 %v10085_v9, %s4551_s19  ;;  %v3301_v17 = vsel %vm3204_vm8, %v3141_v38, %v8478_v21  ;;  %v3530_v38 = vpop.f32.mrf.mxu1  ;;  %v10095_v20 = vld [vmem:[#allocation267_spill] sm:$0xff] }
 0x6f4   : > { %v3323_v52 = vsel %vm3204_vm8, %v3187_v32, %v3189_v62  ;;  %v2465_v31 = vpop.permute.xlu1 %2464  ;;  %3836 = vmatpush.bf16.msra.mxu1 %v3301_v17  ;;  %v3543_v32 = vpop.f32.mrf.mxu2  ;;  %v8543_v12 = vadd.f32 %v3530_v38, %v3517_v24  ;;  %v10100_v38 = vld [vmem:[#allocation173_spill] sm:$0xff]  ;;  %v10102_v24 = vld [vmem:[#allocation154_spill] sm:$0xff] }
 0x6f5   : > { %3800 = vmatpush.bf16.msrb.mxu0 %v10083_v47  ;;  %v2487_v23 = vsel %vm842_vm13, %v8400_v4, %v2465_v31  ;;  %v2488_v61 = vsel %vm842_vm13, %v2465_v31, %v8459_v51  ;;  %v3485_v55 = vsel %vm1249_vm2, %v3323_v52, 0  ;;  %v10088_v4 = vld [vmem:[#allocation96_spill] sm:$0xff]  ;;  %v8545_v3 = vadd.f32 %v3556_v22, %v3543_v32 }
 0x6f6   : > { %v2823_v26 = vsel %vm1249_vm2, %v2426_v57, %v2488_v61  ;;  %v2820_v25 = vsel %vm1249_vm2, %v2425_v36, %v2487_v23  ;;  %v10098_v57 = vld [vmem:[#allocation192_spill] sm:$0xff]  ;;  %v919_v22 = vsel %vm905_vm12, %v10078_v30, %v10100_v38  ;;  %v856_v32 = vsel %vm842_vm13, %v10080_v43, %v10102_v24  ;;  %v10103_v30 = vld [vmem:[#allocation54_spill] sm:$0xff] }
 0x6f7   : > { %3824 = vmatpush.bf16.msra.mxu3 %v10087_v19  ;;  %3154 = vrot.lane.b32.xlu0 %v2823_v26, %s4551_s19  ;;  %v4278_v47 = vpack.c.bf16 %v8545_v3, %v8543_v12  ;;  %v982_v23 = vsel %vm968_vm11, %v10076_v35, %v10098_v57  ;;  %v10099_v61 = vld [vmem:[#allocation220_spill] sm:$0xff] }
 0x6f8   : > { %3152 = vrot.lane.b32.xlu2 %v2820_v25, %s4551_s19 }
 0x6f9   : > { %3801 = vmatpush.bf16.msrb.mxu0 %v8006_v27 }
 0x6fa   : > { %v8506_v33 = vpop.permute.xlu0 %3008 }
 0x6fb   : > { %3825 = vmatpush.bf16.msra.mxu3 %v10088_v4  ;;  %v8504_v54 = vpop.permute.xlu2 %3054  ;;  %3018 = vrot.lane.b32.xlu1 %v10089_v37, %s4551_s19  ;;  %v3237_v27 = vsel %vm3204_vm8, %v8365_v8, %v8506_v33  ;;  %v10093_v8 = vld [vmem:[#allocation274_spill] sm:$0xff]  ;;  %v3532_v1 = vpop.f32.mrf.mxu1  ;;  %v1724_v37 = vsel %vm1249_vm2, %v919_v22, %v982_v23  ;;  %v10109_v23 = vld [vmem:[#allocation121_spill] sm:$0xff] }
 0x6fc   : > { %3802 = vmatmul.bf16.vlgmr.msrb.gmra.mxu0 %v7869_v56  ;;  %v8513_v5 = vpop.permute.xlu1 %3098  ;;  %3813 = vmatpush.bf16.msrb.mxu2 %v3237_v27  ;;  %v3259_v14 = vsel %vm3204_vm8, %v8435_v50, %v8504_v54  ;;  %v3545_v15 = vpop.f32.mrf.mxu2 }
 0x6fd   : > { %3861 = vmatpush.bf16.msra.mxu0 %v3485_v55  ;;  %v3280_v44 = vsel %vm3204_vm8, %v8407_v0, %v8513_v5  ;;  %v4300_v55 = vrot.slane %v4278_v47, 2 }
 0x6fe   : > { %3837 = vmatpush.bf16.msra.mxu1 %v3280_v44 }
 0x6ff   : > { %3826 = vmatpush.bf16.msra.mxu3 %v10090_v13  ;;  %3110 = vrot.lane.b32.xlu0 %v10091_v10, %s4551_s19  ;;  %v4319_v13 = vsel %vm4316_vm0, %v4278_v47, %v4300_v55  ;;  %v10110_v55 = vld [vmem:[#allocation285_spill] sm:$0xff] }
 0x700   : > { %3108 = vrot.lane.b32.xlu2 %v10093_v8, %s4551_s19  ;;  %v785_v8 = vsel %vm771_vm14, %v10081_v42, %v10104_v39  ;;  %v2427_v22 = vsel %vm2407_vm7, %v10086_v48, %v10110_v55  ;;  %v10112_v48 = vld [vmem:[#allocation268_spill] sm:$0xff] }
 0x702   : > { %3838 = vmatpush.bf16.msra.mxu1 %v3259_v14  ;;  %v8532_v18 = vpop.permute.xlu0 %3190  ;;  %v1640_v14 = vsel %vm1249_vm2, %v785_v8, %v856_v32  ;;  %v10111_v32 = vld [vmem:[#allocation94_spill] sm:$0xff] }
 0x703   : > { %3827 = vmatpush.bf16.msra.mxu3 %v8092_v49  ;;  %v8530_v0 = vpop.permute.xlu2 %2530  ;;  %v3324_v58 = vsel %vm3204_vm8, %v3189_v62, %v8532_v18  ;;  %2974 = vrot.lane.b32.xlu1 %v2553_v34, %s4551_s19  ;;  %v3519_v49 = vpop.f32.mrf.mxu0  ;;  %v10097_v62 = vld [vmem:[#allocation74_spill] sm:$0xff] }
 0x704   : > { %v3488_v53 = vsel %vm1249_vm2, %v3324_v58, 0  ;;  %v8541_v50 = vpop.permute.xlu1 %2964  ;;  %v3569_v36 = vpop.f32.mrf.mxu1  ;;  %v2551_v52 = vsel %vm905_vm12, %v8462_v28, %v8530_v0  ;;  %v10105_v49 = vld [vmem:[#allocation64_spill] sm:$0xff] }
 0x705   : > { %v3216_v7 = vsel %vm3204_vm8, %v8428_v40, %v8541_v50  ;;  %v3582_v40 = vpop.f32.mrf.mxu3  ;;  %v3608_v25 = vpop.f32.mrf.mxu2  ;;  %v1931_v15 = vsel %vm330_vm15, %v10092_v2, %v10105_v49 }
 0x706   : > { %3828 = vmatmul.bf16.vlgmr.msra.gmra.mxu3 %v7869_v56  ;;  %3814 = vmatpush.bf16.msrb.mxu2 %v3216_v7  ;;  %v10096_v56 = vld [vmem:[#allocation263_spill] sm:$0xff]  ;;  %v8566_v17 = vadd.f32 %v3582_v40, %v3569_v36  ;;  %v10107_v40 = vld [vmem:[#allocation125_spill] sm:$0xff] }
 0x707   : > { %3887 = vmatpush.bf16.msrb.mxu3 %v3488_v53  ;;  %3066 = vrot.lane.b32.xlu0 %v10095_v20, %s4551_s19  ;;  %v10106_v53 = vld [vmem:[#allocation233_spill] sm:$0xff] }
 0x708   : > { %3064 = vrot.lane.b32.xlu2 %v10096_v56, %s4551_s19  ;;  %v1932_v42 = vsel %vm330_vm15, %v10105_v49, %v10106_v53 }
 0x709   : > { %4474 = vmatmul.msk.bf16.vlgmr.msrb.gmra.mxu2 %vm3442_vm10, %v8557_v60 }
 0x70a   : > { %3846 = vmatpush.bf16.msra.mxu2 %v10097_v62  ;;  %v3145_v9 = vpop.permute.xlu0 %3144 }
 0x70b   : > { %v8564_v31 = vpop.permute.xlu2 %3102  ;;  %3200 = vrot.lane.b32.xlu1 %v2551_v52, %s4551_s19  ;;  %v3302_v19 = vsel %vm3204_vm8, %v8478_v21, %v3145_v9  ;;  %v3595_v26 = vpop.f32.mrf.mxu0  ;;  %v10101_v21 = vld [vmem:[#allocation249_spill] sm:$0xff]  ;;  %v2559_v52 = vsel %vm1249_vm2, %v10107_v40, %v1932_v42 }
 0x70c   : > { %v8575_v28 = vpop.permute.xlu1 %3146  ;;  %3862 = vmatpush.bf16.msra.mxu0 %v3302_v19  ;;  %v8577_v4 = vadd.f32 %v3608_v25, %v3595_v26  ;;  %v3571_v43 = vpop.f32.mrf.mxu1 }
 0x70d   : > { %v3303_v35 = vsel %vm3204_vm8, %v3145_v9, %v8575_v28  ;;  %v3584_v1 = vpop.f32.mrf.mxu3  ;;  %v3610_v62 = vpop.f32.mrf.mxu2  ;;  %v10108_v9 = vld [vmem:[#allocation127_spill] sm:$0xff] }
 0x70e   : > { %3847 = vmatpush.bf16.msra.mxu2 %v10099_v61  ;;  %3888 = vmatpush.bf16.msrb.mxu3 %v3303_v35  ;;  %v4279_v27 = vpack.c.bf16 %v8577_v4, %v8566_v17 }
 0x70f   : > { %3022 = vrot.lane.b32.xlu0 %v10101_v21, %s4551_s19 }
 0x710   : > { %3020 = vrot.lane.b32.xlu2 %v10103_v30, %s4551_s19  ;;  %v4301_v44 = vrot.slane %v4279_v27, 4  ;;  %v4302_v10 = vrot.slane %v4279_v27, 6 }
 0x712   : > { %3848 = vmatpush.bf16.msra.mxu2 %v1724_v37  ;;  %v3011_v34 = vpop.permute.xlu0 %3010  ;;  %v4323_v58 = vsel %vm4320_vm1, %v4301_v44, %v4302_v10  ;;  %v10114_v44 = vld [vmem:[#allocation65_spill] sm:$0xff]  ;;  %v10115_v10 = vld [vmem:[#allocation46_spill] sm:$0xff] }
 0x713   : > { %v3057_v11 = vpop.permute.xlu2 %3056  ;;  %v3238_v7 = vsel %vm3204_vm8, %v8506_v33, %v3011_v34  ;;  %v4324_v20 = vsel %vm1249_vm2, %v4319_v13, %v4323_v58  ;;  %v3597_v56 = vpop.f32.mrf.mxu0  ;;  %v2556_v33 = vsel %vm1249_vm2, %v10108_v9, %v1931_v15  ;;  %v10116_v15 = vld [vmem:[#allocation204_spill] sm:$0xff] }
 0x714   : > { %v3101_v47 = vpop.permute.xlu1 %3100  ;;  %3839 = vmatpush.bf16.msra.mxu1 %v3238_v7  ;;  %4362 = vst [vmem:[%s8602_s25] sm:$0xff] %v4324_v20  ;;  %v3634_v19 = vpop.f32.mrf.mxu1  ;;  %v983_v42 = vsel %vm968_vm11, %v10098_v57, %v10116_v15  ;;  %v10117_v7 = vld [vmem:[#allocation225_spill] sm:$0xff]  ;;  %v10118_v56 = vld [vmem:[#allocation187_spill] sm:$0xff]  ;;  %v10122_v9 = vld [vmem:[#allocation168_spill] sm:$0xff] }
 0x715   : > { %v3281_v36 = vsel %vm3204_vm8, %v8513_v5, %v3101_v47  ;;  %v3282_v2 = vsel %vm3204_vm8, %v3101_v47, %v8564_v31  ;;  %v3260_v5 = vsel %vm3204_vm8, %v8504_v54, %v3057_v11  ;;  %v3621_v61 = vpop.f32.mrf.mxu3  ;;  %v3647_v37 = vpop.f32.mrf.mxu2  ;;  %v920_v62 = vsel %vm905_vm12, %v10100_v38, %v10118_v56  ;;  %v10121_v57 = vld [vmem:[#allocation269_spill] sm:$0xff] }
 0x716   : > { %3849 = vmatpush.bf16.msra.mxu2 %v1640_v14  ;;  %3863 = vmatpush.bf16.msra.mxu0 %v3281_v36  ;;  %v10119_v36 = vld [vmem:[#allocation52_spill] sm:$0xff]  ;;  %v8679_v40 = vadd.f32 %v3634_v19, %v3621_v61  ;;  %v10124_v19 = vld [vmem:[#allocation149_spill] sm:$0xff] }
 0x717   : > { %3889 = vmatpush.bf16.msrb.mxu3 %v3282_v2  ;;  %2978 = vrot.lane.b32.xlu0 %v2559_v52, %s4551_s19  ;;  %v8683_v52 = vld.sshfl [vmem:[#allocation1] sm:$0xff pattern:$0x73625140] }
 0x718   : > { %2976 = vrot.lane.b32.xlu2 %v2556_v33, %s4551_s19  ;;  %v10123_v33 = vld [vmem:[#allocation250_spill] sm:$0xff] }
 0x71a   : > { %3850 = vmatpush.bf16.msra.mxu2 %v10109_v23  ;;  %3864 = vmatpush.bf16.msra.mxu0 %v3260_v5  ;;  %v8629_v25 = vpop.permute.xlu0 %2468 }
 0x71b   : > { %v3013_v26 = vpop.permute.xlu2 %3012  ;;  %v2489_v35 = vsel %vm842_vm13, %v8459_v51, %v8629_v25  ;;  %v3660_v27 = vpop.f32.mrf.mxu0  ;;  %v10113_v51 = vld [vmem:[#allocation279_spill] sm:$0xff] }
 0x71c   : > { %v3239_v21 = vsel %vm3204_vm8, %v3011_v34, %v3013_v26  ;;  %v2967_v54 = vpop.permute.xlu1 %2966  ;;  %v2826_v30 = vsel %vm1249_vm2, %v2427_v22, %v2489_v35  ;;  %v3636_v43 = vpop.f32.mrf.mxu1  ;;  %v8681_v38 = vadd.f32 %v3660_v27, %v3647_v37  ;;  %v786_v22 = vsel %vm771_vm14, %v10104_v39, %v10124_v19  ;;  %v10125_v35 = vld [vmem:[#allocation203_spill] sm:$0xff] }
 0x71d   : > { %v3217_v13 = vsel %vm3204_vm8, %v8541_v50, %v2967_v54  ;;  %3156 = vrot.lane.b32.xlu1 %v2826_v30, %s4551_s19  ;;  %v3623_v8 = vpop.f32.mrf.mxu3  ;;  %v3649_v58 = vpop.f32.mrf.mxu2 }
 0x71e   : > { %3851 = vmatpush.bf16.msra.mxu2 %v10111_v32  ;;  %3840 = vmatpush.bf16.msra.mxu1 %v3217_v13  ;;  %v4280_v23 = vpack.c.bf16 %v8681_v38, %v8679_v40  ;;  %v10127_v13 = vld [vmem:[#allocation186_spill] sm:$0xff] }
 0x71f   : > { %3865 = vmatpush.bf16.msra.mxu0 %v3239_v21  ;;  %3068 = vrot.lane.b32.xlu0 %v10112_v48, %s4551_s19  ;;  %v10126_v21 = vld [vmem:[#allocation226_spill] sm:$0xff]  ;;  %v921_v48 = vsel %vm905_vm12, %v10118_v56, %v10127_v13  ;;  %v10134_v56 = vld [vmem:[#allocation128_spill] sm:$0xff] }
 0x720   : > { %3112 = vrot.lane.b32.xlu2 %v10113_v51, %s4551_s19  ;;  %v4303_v39 = vrot.slane %v4280_v23, 2 }
 0x721   : > { %4475 = vmatmul.msk.bf16.vlgmr.msra.gmra.mxu1 %vm3442_vm10, %v8557_v60 }
 0x722   : > { %3852 = vmatpush.bf16.msra.mxu2 %v10114_v44  ;;  %3872 = vmatpush.bf16.msrb.mxu1 %v10115_v10  ;;  %v8653_v1 = vpop.permute.xlu0 %3058  ;;  %v2829_v10 = vsel %vm1249_vm2, %v10110_v55, %v8629_v25  ;;  %v10132_v25 = vld [vmem:[#allocation251_spill] sm:$0xff] }
 0x723   : > { %v8651_v50 = vpop.permute.xlu2 %2968  ;;  %v3261_v34 = vsel %vm3204_vm8, %v3057_v11, %v8653_v1  ;;  %v3662_v49 = vpop.f32.mrf.mxu0 }
 0x724   : > { %v3218_v14 = vsel %vm3204_vm8, %v2967_v54, %v8651_v50  ;;  %v8664_v20 = vpop.permute.xlu1 %3192  ;;  %3890 = vmatpush.bf16.msrb.mxu3 %v3261_v34  ;;  %v3673_v5 = vpop.f32.mrf.mxu1  ;;  %v10130_v34 = vld [vmem:[#allocation235_spill] sm:$0xff] }
 0x725   : > { %v3325_v11 = vsel %vm3204_vm8, %v8532_v18, %v8664_v20  ;;  %3866 = vmatpush.bf16.msra.mxu0 %v3218_v14  ;;  %3202 = vrot.lane.b32.xlu1 %v8530_v0, %s4551_s19  ;;  %v1728_v18 = vsel %vm1249_vm2, %v920_v62, %v983_v42  ;;  %v857_v0 = vsel %vm842_vm13, %v10102_v24, %v10122_v9  ;;  %v3686_v61 = vpop.f32.mrf.mxu3  ;;  %v10129_v14 = vld [vmem:[#allocation6_spill] sm:$0xff]  ;;  %v10133_v42 = vld [vmem:[#allocation148_spill] sm:$0xff] }
 0x726   : > { %3853 = vmatpush.bf16.msra.mxu2 %v8049_v63  ;;  %3873 = vmatpush.bf16.msrb.mxu1 %v10117_v7  ;;  %v3491_v47 = vsel %vm1249_vm2, %v3325_v11, 0  ;;  %v10120_v63 = vld [vmem:[#allocation277_spill] sm:$0xff]  ;;  %v984_v24 = vsel %vm968_vm11, %v10116_v15, %v10125_v35  ;;  %v1644_v27 = vsel %vm1249_vm2, %v786_v22, %v857_v0  ;;  %v8712_v51 = vadd.f32 %v3686_v61, %v3673_v5  ;;  %v10131_v15 = vld [vmem:[#allocation266_spill] sm:$0xff] }
 0x727   : > { %v2763_v2 = vsel %vm1249_vm2, %v10121_v57, %v10120_v63  ;;  %v1732_v8 = vsel %vm1249_vm2, %v921_v48, %v984_v24  ;;  %v2631_v58 = vsel %vm1249_vm2, %v10130_v34, %v10129_v14  ;;  %v2697_v55 = vsel %vm1249_vm2, %v10132_v25, %v10131_v15  ;;  %v10137_v24 = vld [vmem:[#allocation223_spill] sm:$0xff]  ;;  %v10142_v48 = vld [vmem:[#allocation224_spill] sm:$0xff]  ;;  %v10147_v25 = vld [vmem:[#allocation70_spill] sm:$0xff] }
 0x728   : > { %3114 = vrot.lane.b32.xlu0 %v2763_v2, %s4551_s19  ;;  %3024 = vrot.lane.b32.xlu2 %v10123_v33, %s4551_s19  ;;  %v787_v7 = vsel %vm771_vm14, %v10124_v19, %v10133_v42  ;;  %v4327_v62 = vsel %vm4316_vm0, %v4280_v23, %v4303_v39  ;;  %v10135_v2 = vld [vmem:[#allocation208_spill] sm:$0xff]  ;;  %v10136_v19 = vld [vmem:[#allocation98_spill] sm:$0xff] }
 0x729   : > { %3898 = vmatpush.bf16.msrb.mxu0 %v10119_v36  ;;  %3854 = vmatmul.bf16.vlgmr.msra.gmra.mxu2 %v8683_v52  ;;  %v10144_v14 = vld [vmem:[#allocation176_spill] sm:$0xff] }
 0x72a   : > { %3874 = vmatpush.bf16.msrb.mxu1 %v1728_v18  ;;  %3913 = vmatpush.bf16.msrb.mxu2 %v3491_v47  ;;  %v8704_v37 = vpop.permute.xlu0 %3014  ;;  %v1933_v18 = vsel %vm330_vm15, %v10106_v53, %v10135_v2  ;;  %v922_v34 = vsel %vm905_vm12, %v10127_v13, %v10144_v14 }
 0x72b   : > { %4476 = vmatmul.msk.bf16.vlgmr.msra.gmra.mxu0 %vm3442_vm10, %v8557_v60  ;;  %v3240_v32 = vsel %vm3204_vm8, %v3013_v26, %v8704_v37  ;;  %v3699_v54 = vpop.f32.mrf.mxu0  ;;  %v3712_v30 = vpop.f32.mrf.mxu2  ;;  %v10128_v26 = vld [vmem:[#allocation167_spill] sm:$0xff]  ;;  %v2562_v53 = vsel %vm1249_vm2, %v10137_v24, %v1933_v18  ;;  %v10150_v18 = vld [vmem:[#allocation97_spill] sm:$0xff]  ;;  %v10153_v24 = vld [vmem:[#allocation206_spill] sm:$0xff] }
 0x72c   : > { %3891 = vmatpush.bf16.msrb.mxu3 %v3240_v32  ;;  %v8714_v44 = vadd.f32 %v3712_v30, %v3699_v54  ;;  %v858_v43 = vsel %vm842_vm13, %v10122_v9, %v10128_v26  ;;  %v3675_v63 = vpop.f32.mrf.mxu1  ;;  %v8749_v22 = vpop.permute.xlu2 %3104  ;;  %v10141_v54 = vld [vmem:[#allocation195_spill] sm:$0xff] }
 0x72d   : > { %3899 = vmatpush.bf16.msrb.mxu0 %v10126_v21  ;;  %3158 = vrot.lane.b32.xlu1 %v2829_v10, %s4551_s19  ;;  %v1648_v36 = vsel %vm1249_vm2, %v787_v7, %v858_v43  ;;  %v3688_v57 = vpop.f32.mrf.mxu3  ;;  %v10138_v21 = vld [vmem:[#allocation45_spill] sm:$0xff]  ;;  %v985_v30 = vsel %vm968_vm11, %v10125_v35, %v10141_v54  ;;  %v3283_v13 = vsel %vm3204_vm8, %v8564_v31, %v8749_v22 }
 0x72e   : > { %3875 = vmatpush.bf16.msrb.mxu1 %v1644_v27  ;;  %v4281_v49 = vpack.c.bf16 %v8714_v44, %v8712_v51  ;;  %v10139_v27 = vld [vmem:[#allocation129_spill] sm:$0xff]  ;;  %v10149_v57 = vld [vmem:[#allocation126_spill] sm:$0xff] }
 0x72f   : > { %v10145_v35 = vld [vmem:[#allocation157_spill] sm:$0xff] }
 0x730   : > { %3026 = vrot.lane.b32.xlu0 %v2631_v58, %s4551_s19  ;;  %3070 = vrot.lane.b32.xlu2 %v2697_v55, %s4551_s19  ;;  %v4304_v11 = vrot.slane %v4281_v49, 4  ;;  %v4305_v47 = vrot.slane %v4281_v49, 6  ;;  %v1736_v58 = vsel %vm1249_vm2, %v922_v34, %v985_v30  ;;  %v859_v49 = vsel %vm842_vm13, %v10128_v26, %v10145_v35  ;;  %v10158_v34 = vld [vmem:[#allocation132_spill] sm:$0xff] }
 0x731   : > { %3900 = vmatpush.bf16.msrb.mxu0 %v1732_v8  ;;  %v10143_v8 = vld [vmem:[#allocation99_spill] sm:$0xff] }
 0x732   : > { %3876 = vmatpush.bf16.msrb.mxu1 %v10134_v56  ;;  %v2971_v9 = vpop.permute.xlu0 %2970  ;;  %v4330_v0 = vsel %vm4320_vm1, %v4304_v11, %v4305_v47 }
 0x733   : > { %v3219_v33 = vsel %vm3204_vm8, %v8651_v50, %v2971_v9  ;;  %v4331_v23 = vsel %vm1249_vm2, %v4327_v62, %v4330_v0  ;;  %v3701_v5 = vpop.f32.mrf.mxu0  ;;  %v3714_v61 = vpop.f32.mrf.mxu2  ;;  %v10140_v50 = vld [vmem:[#allocation69_spill] sm:$0xff] }
 0x734   : > { %3892 = vmatpush.bf16.msrb.mxu3 %v3219_v33  ;;  %4363 = vst [vmem:[%s8602_s25 + $0x8] sm:$0xff] %v4331_v23  ;;  %v8787_v7 = vpop.permute.xlu2 %3016  ;;  %v10151_v23 = vld [vmem:[#allocation68_spill] sm:$0xff] }
 0x735   : > { %3901 = vmatpush.bf16.msrb.mxu0 %v1648_v36  ;;  %2980 = vrot.lane.b32.xlu1 %v2562_v53, %s4551_s19  ;;  %v3725_v10 = vpop.f32.mrf.mxu3  ;;  %v10152_v5 = vld [vmem:[#allocation28_spill] sm:$0xff]  ;;  %v986_v53 = vsel %vm968_vm11, %v10141_v54, %v10153_v24 }
 0x736   : > { %3877 = vmatpush.bf16.msrb.mxu1 %v10136_v19 }
 0x737   : > { %4477 = vmatmul.msk.bf16.vlgmr.msrb.gmra.mxu3 %vm3442_vm10, %v8557_v60 }
 0x738   : > { %3924 = vmatpush.bf16.msra.mxu3 %v10138_v21  ;;  %v3149_v32 = vpop.permute.xlu1 %3148 }
 0x739   : > { %3902 = vmatpush.bf16.msrb.mxu0 %v10139_v27  ;;  %v3304_v39 = vsel %vm3204_vm8, %v8575_v28, %v3149_v32  ;;  %v10146_v28 = vld [vmem:[#allocation228_spill] sm:$0xff]  ;;  %v10155_v27 = vld [vmem:[#allocation190_spill] sm:$0xff] }
 0x73a   : > { %3878 = vmatpush.bf16.msrb.mxu1 %v10140_v50  ;;  %3914 = vmatpush.bf16.msrb.mxu2 %v3304_v39  ;;  %v8766_v43 = vpop.permute.xlu0 %3060  ;;  %v2565_v15 = vsel %vm1249_vm2, %v10146_v28, %v10135_v2  ;;  %v923_v50 = vsel %vm905_vm12, %v10144_v14, %v10155_v27 }
 0x73c   : > { %3925 = vmatpush.bf16.msra.mxu3 %v10142_v48  ;;  %v10156_v48 = vld [vmem:[#allocation171_spill] sm:$0xff] }
 0x73d   : > { %3903 = vmatpush.bf16.msrb.mxu0 %v10143_v8  ;;  %2982 = vrot.lane.b32.xlu1 %v2565_v15, %s4551_s19  ;;  %v3727_v47 = vpop.f32.mrf.mxu3  ;;  %v860_v54 = vsel %vm842_vm13, %v10145_v35, %v10156_v48 }
 0x73e   : > { %3879 = vmatpush.bf16.msrb.mxu1 %v8183_v45  ;;  %v10148_v45 = vld [vmem:[#allocation138_spill] sm:$0xff]  ;;  %3915 = vmatpush.bf16.msrb.mxu2 %v3283_v13  ;;  %v10159_v13 = vld [vmem:[#allocation101_spill] sm:$0xff] }
 0x73f   : > { %v788_v55 = vsel %vm771_vm14, %v10133_v42, %v10148_v45  ;;  %v3262_v42 = vsel %vm3204_vm8, %v8653_v1, %v8766_v43 }
 0x740   : > { %3926 = vmatpush.bf16.msra.mxu3 %v1736_v58  ;;  %v3195_v26 = vpop.permute.xlu1 %3194  ;;  %v1652_v56 = vsel %vm1249_vm2, %v788_v55, %v859_v49 }
 0x741   : > { %3904 = vmatpush.bf16.msrb.mxu0 %v10147_v25  ;;  %3880 = vmatmul.bf16.vlgmr.msrb.gmra.mxu1 %v8683_v52  ;;  %v3326_v62 = vsel %vm3204_vm8, %v8664_v20, %v3195_v26  ;;  %v3241_v20 = vsel %vm3204_vm8, %v8704_v37, %v8787_v7 }
 0x742   : > { %v3738_v11 = vpop.f32.mrf.mxu1  ;;  %v3494_v31 = vsel %vm1249_vm2, %v3326_v62, 0  ;;  %v3107_v36 = vpop.permute.xlu0 %3106  ;;  %3916 = vmatpush.bf16.msrb.mxu2 %v3262_v42 }
 0x743   : > { %v8798_v63 = vadd.f32 %v3738_v11, %v3725_v10  ;;  %3939 = vmatpush.bf16.msra.mxu1 %v3494_v31  ;;  %v3284_v30 = vsel %vm3204_vm8, %v8749_v22, %v3107_v36 }
 0x744   : > { %3927 = vmatpush.bf16.msra.mxu3 %v1652_v56 }
 0x745   : > { %3905 = vmatpush.bf16.msrb.mxu0 %v8263_v46 }
 0x746   : > { %3917 = vmatpush.bf16.msrb.mxu2 %v3241_v20 }
 0x748   : > { %3928 = vmatpush.bf16.msra.mxu3 %v10149_v57  ;;  %3906 = vmatmul.bf16.vlgmr.msrb.gmra.mxu0 %v8683_v52  ;;  %v8805_v2 = vpop.permute.xlu2 %3198 }
 0x74a   : > { %v3740_v1 = vpop.f32.mrf.mxu1  ;;  %v8810_v0 = vpop.permute.xlu0 %2972 }
 0x74b   : > { %v8807_v46 = vpop.f32.mrf.mxu2  ;;  %v3220_v33 = vsel %vm3204_vm8, %v2971_v9, %v8810_v0  ;;  %v10154_v9 = vld [vmem:[#allocation229_spill] sm:$0xff] }
 0x74c   : > { %3929 = vmatpush.bf16.msra.mxu3 %v10150_v18  ;;  %3918 = vmatpush.bf16.msrb.mxu2 %v3220_v33 }
 0x74e   : > { %v3151_v61 = vpop.permute.xlu1 %3150 }
 0x74f   : > { %4478 = vmatmul.msk.bf16.vlgmr.msrb.gmra.mxu2 %vm3442_vm10, %v8557_v60  ;;  %v3305_v37 = vsel %vm3204_vm8, %v3149_v32, %v3151_v61  ;;  %v1740_v32 = vsel %vm1249_vm2, %v923_v50, %v986_v53 }
 0x750   : > { %3930 = vmatpush.bf16.msra.mxu3 %v10151_v23  ;;  %3950 = vmatpush.bf16.msra.mxu2 %v10152_v5 }
 0x751   : > { %3940 = vmatpush.bf16.msra.mxu1 %v3305_v37 }
 0x752   : > { %v3153_v21 = vpop.permute.xlu2 %3152 }
 0x753   : > { %v3753_v19 = vpop.f32.mrf.mxu2  ;;  %v3306_v55 = vsel %vm3204_vm8, %v3151_v61, %v3153_v21 }
 0x754   : > { %3931 = vmatpush.bf16.msra.mxu3 %v8352_v59  ;;  %3951 = vmatpush.bf16.msra.mxu2 %v10154_v9  ;;  %v10157_v59 = vld [vmem:[#allocation152_spill] sm:$0xff] }
 0x755   : > { %3941 = vmatpush.bf16.msra.mxu1 %v3284_v30  ;;  %v789_v39 = vsel %vm771_vm14, %v10148_v45, %v10157_v59  ;;  %v10164_v30 = vld [vmem:[#allocation205_spill] sm:$0xff] }
 0x756   : > { %v1656_v10 = vsel %vm1249_vm2, %v789_v39, %v860_v54  ;;  %v987_v54 = vsel %vm968_vm11, %v10153_v24, %v10164_v30  ;;  %v10165_v39 = vld [vmem:[#allocation230_spill] sm:$0xff] }
 0x757   : > { %3932 = vmatmul.bf16.vlgmr.msra.gmra.mxu3 %v8683_v52 }
 0x758   : > { %3952 = vmatpush.bf16.msra.mxu2 %v1740_v32 }
 0x759   : > { %v8838_v14 = vpop.f32.mrf.mxu0 }
 0x75a   : > { %v3109_v8 = vpop.permute.xlu2 %3108 }
 0x75b   : > { %v3285_v47 = vsel %vm3204_vm8, %v3107_v36, %v3109_v8 }
 0x75c   : > { %3953 = vmatpush.bf16.msra.mxu2 %v1656_v10  ;;  %v10166_v10 = vld [vmem:[#allocation227_spill] sm:$0xff] }
 0x75d   : > { %v3197_v22 = vpop.permute.xlu1 %3196 }
 0x75e   : > { %v3327_v58 = vsel %vm3204_vm8, %v3195_v26, %v3197_v22  ;;  %v3328_v49 = vsel %vm3204_vm8, %v3197_v22, %v8805_v2  ;;  %v10160_v26 = vld [vmem:[#allocation72_spill] sm:$0xff]  ;;  %v10167_v22 = vld [vmem:[#allocation179_spill] sm:$0xff] }
 0x75f   : > { %v3497_v28 = vsel %vm1249_vm2, %v3327_v58, 0  ;;  %v3500_v15 = vsel %vm1249_vm2, %v3328_v49, 0 }
 0x760   : > { %3954 = vmatpush.bf16.msra.mxu2 %v10158_v34  ;;  %3965 = vmatpush.bf16.msra.mxu0 %v3497_v28  ;;  %v10168_v34 = vld [vmem:[#allocation189_spill] sm:$0xff] }
 0x761   : > { %3991 = vmatpush.bf16.msrb.mxu3 %v3500_v15  ;;  %v3766_v45 = vpop.f32.mrf.mxu0  ;;  %v925_v58 = vsel %vm905_vm12, %v10168_v34, %v10167_v22  ;;  %v924_v49 = vsel %vm905_vm12, %v10155_v27, %v10168_v34  ;;  %vm4274_vm12 = vcmask 7168  }
 0x762   : > { %v8844_v35 = vpop.f32.mrf.mxu1  ;;  %v3065_v25 = vpop.permute.xlu2 %3064  ;;  %v10169_v45 = vld [vmem:[#allocation160_spill] sm:$0xff] }
 0x764   : > { %3955 = vmatpush.bf16.msra.mxu2 %v10159_v13  ;;  %3966 = vmatpush.bf16.msra.mxu0 %v3306_v55  ;;  %v10170_v55 = vld [vmem:[#allocation170_spill] sm:$0xff] }
 0x765   : > { %v3063_v56 = vpop.permute.xlu1 %3062 }
 0x766   : > { %v3263_v62 = vsel %vm3204_vm8, %v8766_v43, %v3063_v56  ;;  %v3264_v18 = vsel %vm3204_vm8, %v3063_v56, %v3065_v25  ;;  %v862_v56 = vsel %vm842_vm13, %v10170_v55, %v10169_v45 }
 0x767   : > { %3942 = vmatpush.bf16.msra.mxu1 %v3263_v62  ;;  %v10171_v62 = vld [vmem:[#allocation141_spill] sm:$0xff] }
 0x768   : > { %3956 = vmatpush.bf16.msra.mxu2 %v10160_v26  ;;  %3967 = vmatpush.bf16.msra.mxu0 %v3285_v47  ;;  %v861_v26 = vsel %vm842_vm13, %v10156_v48, %v10170_v55  ;;  %vm4276_vm13 = vcmask 11264  }
 0x769   : > { %v8854_v31 = vpop.permute.xlu0 %3154  ;;  %v8856_v42 = vpop.f32.mrf.mxu3 }
 0x76a   : > { %v3779_v11 = vpop.f32.mrf.mxu1  ;;  %v3307_v57 = vsel %vm3204_vm8, %v3153_v21, %v8854_v31  ;;  %v3021_v20 = vpop.permute.xlu2 %3020  ;;  %v10162_v21 = vld [vmem:[#allocation31_spill] sm:$0xff] }
 0x76b   : > { %3992 = vmatpush.bf16.msrb.mxu3 %v3307_v57  ;;  %v10172_v11 = vld [vmem:[#allocation151_spill] sm:$0xff] }
 0x76c   : > { %3957 = vmatpush.bf16.msra.mxu2 %v8319_v6  ;;  %3968 = vmatpush.bf16.msra.mxu0 %v3264_v18  ;;  %v791_v47 = vsel %vm771_vm14, %v10172_v11, %v10171_v62  ;;  %v790_v57 = vsel %vm771_vm14, %v10157_v59, %v10172_v11  ;;  %v10176_v59 = vld [vmem:[#allocation131_spill] sm:$0xff] }
 0x76d   : > { %v3019_v43 = vpop.permute.xlu1 %3018  ;;  %v1660_v18 = vsel %vm1249_vm2, %v790_v57, %v861_v26  ;;  %v1664_v48 = vsel %vm1249_vm2, %v791_v47, %v862_v56 }
 0x76e   : > { %v3242_v36 = vsel %vm3204_vm8, %v8787_v7, %v3019_v43  ;;  %v3243_v1 = vsel %vm3204_vm8, %v3019_v43, %v3021_v20  ;;  %v10161_v7 = vld [vmem:[#allocation7_spill] sm:$0xff] }
 0x76f   : > { %3958 = vmatmul.bf16.vlgmr.msra.gmra.mxu2 %v8683_v52  ;;  %3943 = vmatpush.bf16.msra.mxu1 %v3242_v36  ;;  %v10173_v36 = vld [vmem:[#allocation210_spill] sm:$0xff] }
 0x770   : > { %3969 = vmatpush.bf16.msra.mxu0 %v3243_v1  ;;  %v10174_v1 = vld [vmem:[#allocation93_spill] sm:$0xff] }
 0x771   : > { %v8866_v33 = vpop.permute.xlu0 %3110  ;;  %v3792_v23 = vpop.f32.mrf.mxu3 }
 0x772   : > { %v3286_v6 = vsel %vm3204_vm8, %v3109_v8, %v8866_v33  ;;  %v2977_v5 = vpop.permute.xlu2 %2976  ;;  %v10175_v23 = vld [vmem:[#allocation133_spill] sm:$0xff] }
 0x773   : > { %3993 = vmatpush.bf16.msrb.mxu3 %v3286_v6  ;;  %v1248_v6 = vsel %vm1227_vm9, %v10174_v1, %v10173_v36  ;;  %v10188_v1 = vld [vmem:[#allocation78_spill] sm:$0xff]  ;;  %vm4162_vm9 = vcmask 257024  }
 0x775   : > { %v2975_v61 = vpop.permute.xlu1 %2974 }
 0x776   : > { %v3221_v37 = vsel %vm3204_vm8, %v8810_v0, %v2975_v61  ;;  %v3222_v19 = vsel %vm3204_vm8, %v2975_v61, %v2977_v5  ;;  %v10163_v0 = vld [vmem:[#allocation198_spill] sm:$0xff] }
 0x777   : > { %3944 = vmatpush.bf16.msra.mxu1 %v3221_v37  ;;  %3970 = vmatpush.bf16.msra.mxu0 %v3222_v19  ;;  %v988_v32 = vsel %vm968_vm11, %v10164_v30, %v10163_v0  ;;  %v8945_v30 = vadd.f32 %v8856_v42, %v8844_v35  ;;  %v10182_v35 = vld [vmem:[#allocation73_spill] sm:$0xff]  ;;  %v1752_v26 = vsel %vm1249_vm2, %v10167_v22, %v10163_v0  ;;  %vm4367_vm11 = vcmask 254976  }
 0x778   : > { %v1748_v13 = vsel %vm1249_vm2, %v925_v58, %v988_v32  ;;  %v10180_v58 = vld [vmem:[#allocation216_spill] sm:$0xff]  ;;  %v1668_v0 = vsel %vm1249_vm2, %v10171_v62, %v10169_v45  ;;  %v10187_v62 = vld [vmem:[#allocation89_spill] sm:$0xff] }
 0x779   : > { %v3803_v53 = vpop.f32.mrf.mxu0  ;;  %v8875_v9 = vpop.permute.xlu0 %3066 }
 0x77a   : > { %v3265_v50 = vsel %vm3204_vm8, %v3065_v25, %v8875_v9  ;;  %4479 = vmatmul.msk.bf16.vlgmr.msra.gmra.mxu1 %vm3442_vm10, %v8557_v60  ;;  %4480 = vmatmul.msk.bf16.vlgmr.msra.gmra.mxu0 %vm3442_vm10, %v8557_v60  ;;  %v1744_v25 = vsel %vm1249_vm2, %v924_v49, %v987_v54  ;;  %v10179_v54 = vld [vmem:[#allocation100_spill] sm:$0xff]  ;;  %v10181_v49 = vld [vmem:[#allocation209_spill] sm:$0xff] }
 0x77b   : > { %3976 = vmatpush.bf16.msrb.mxu1 %v10161_v7  ;;  %4002 = vmatpush.bf16.msrb.mxu0 %v10162_v21  ;;  %v10177_v7 = vld [vmem:[#allocation232_spill] sm:$0xff]  ;;  %v10178_v21 = vld [vmem:[#allocation102_spill] sm:$0xff] }
 0x77c   : > { %3994 = vmatpush.bf16.msrb.mxu3 %v3265_v50 }
 0x77d   : > { %v8891_v8 = vpop.permute.xlu1 %3200 }
 0x77e   : > { %v3329_v28 = vsel %vm3204_vm8, %v8805_v2, %v8891_v8 }
 0x77f   : > { %3977 = vmatpush.bf16.msrb.mxu1 %v10165_v39  ;;  %4003 = vmatpush.bf16.msrb.mxu0 %v10166_v10  ;;  %v3503_v24 = vsel %vm1249_vm2, %v3329_v28, 0  ;;  %v3113_v39 = vpop.permute.xlu2 %3112  ;;  %v1836_v28 = vsel %vm1249_vm2, %v10181_v49, %v10180_v58 }
 0x780   : > { %4017 = vmatpush.bf16.msrb.mxu2 %v3503_v24  ;;  %v3287_v11 = vsel %vm3204_vm8, %v8866_v33, %v3113_v39 }
 0x781   : > { %v3805_v15 = vpop.f32.mrf.mxu0  ;;  %v8911_v27 = vpop.permute.xlu0 %3022 }
 0x782   : > { %v3244_v2 = vsel %vm3204_vm8, %v3021_v20, %v8911_v27  ;;  %v8927_v20 = vadd.f32 %v8838_v14, %v8807_v46  ;;  %v1920_v46 = vsel %vm1249_vm2, %v10177_v7, %v1248_v6  ;;  %v1500_v6 = vsel %vm1249_vm2, %v10188_v1, %v10187_v62 }
 0x783   : > { %3978 = vmatpush.bf16.msrb.mxu1 %v1744_v25  ;;  %4004 = vmatpush.bf16.msrb.mxu0 %v1748_v13  ;;  %v10183_v25 = vld [vmem:[#allocation71_spill] sm:$0xff] }
 0x784   : > { %3995 = vmatpush.bf16.msrb.mxu3 %v3244_v2  ;;  %v4282_v61 = vpack.c.bf16 %v8927_v20, %v8798_v63  ;;  %v10184_v13 = vld [vmem:[#allocation35_spill] sm:$0xff] }
 0x785   : > { %v350_v55 = vsel %vm330_vm15, %v10063_v16, %v10184_v13 }
 0x786   : > { %v4306_v50 = vrot.slane %v4282_v61, 2 }
 0x787   : > { %3979 = vmatpush.bf16.msrb.mxu1 %v1660_v18  ;;  %4005 = vmatpush.bf16.msrb.mxu0 %v1664_v48  ;;  %v10185_v18 = vld [vmem:[#allocation116_spill] sm:$0xff]  ;;  %v10186_v48 = vld [vmem:[#allocation107_spill] sm:$0xff] }
 0x788   : > { %v1584_v36 = vsel %vm1249_vm2, %v10186_v48, %v10185_v18  ;;  %v9036_v48 = vld [vmem:[%s9303_s2] sm:$0xff] }
 0x789   : > { %v8923_v43 = vpop.f32.mrf.mxu3  ;;  %v8936_v37 = vpop.permute.xlu0 %2978 }
 0x78a   : > { %v3223_v19 = vsel %vm3204_vm8, %v2977_v5, %v8936_v37 }
 0x78b   : > { %3980 = vmatpush.bf16.msrb.mxu1 %v10175_v23  ;;  %4006 = vmatpush.bf16.msrb.mxu0 %v10176_v59 }
 0x78c   : > { %3996 = vmatpush.bf16.msrb.mxu3 %v3223_v19  ;;  %v3816_v14 = vpop.f32.mrf.mxu2  ;;  %v10190_v19 = vld [vmem:[#allocation49_spill] sm:$0xff] }
 0x78d   : > { %v8947_v32 = vadd.f32 %v3816_v14, %v3803_v53  ;;  %v4334_v53 = vsel %vm4316_vm0, %v4282_v61, %v4306_v50  ;;  %v10189_v61 = vld [vmem:[#allocation60_spill] sm:$0xff] }
 0x78e   : > { %v1416_v7 = vsel %vm1249_vm2, %v10190_v19, %v10189_v61 }
 0x78f   : > { %3981 = vmatpush.bf16.msrb.mxu1 %v10178_v21  ;;  %4007 = vmatpush.bf16.msrb.mxu0 %v10179_v54  ;;  %v4283_v10 = vpack.c.bf16 %v8947_v32, %v8945_v30  ;;  %v3157_v34 = vpop.permute.xlu1 %3156  ;;  %v10191_v21 = vld [vmem:[#allocation20_spill] sm:$0xff] }
 0x790   : > { %4028 = vmatpush.bf16.msra.mxu3 %v1920_v46  ;;  %v3308_v42 = vsel %vm3204_vm8, %v8854_v31, %v3157_v34  ;;  %v1328_v31 = vsel %vm1249_vm2, %v10094_v29, %v350_v55  ;;  %v3025_v29 = vpop.permute.xlu2 %3024  ;;  %v1332_v50 = vsel %vm1249_vm2, %v10191_v21, %v10184_v13 }
 0x791   : > { %4481 = vmatmul.msk.bf16.vlgmr.msrb.gmra.mxu3 %vm3442_vm10, %v8557_v60  ;;  %v3831_v5 = vpop.f32.mrf.mxu3  ;;  %v4307_v15 = vrot.slane %v4283_v10, 4  ;;  %v4308_v24 = vrot.slane %v4283_v10, 6  ;;  %4018 = vmatpush.bf16.msrb.mxu2 %v3308_v42  ;;  %v3069_v16 = vpop.permute.xlu0 %3068  ;;  %v3245_v45 = vsel %vm3204_vm8, %v8911_v27, %v3025_v29 }
 0x793   : > { %3982 = vmatpush.bf16.msrb.mxu1 %v10182_v35  ;;  %4008 = vmatpush.bf16.msrb.mxu0 %v10183_v25  ;;  %v4337_v56 = vsel %vm4320_vm1, %v4307_v15, %v4308_v24 }
 0x794   : > { %4029 = vmatpush.bf16.msra.mxu3 %v1836_v28  ;;  %v4338_v2 = vsel %vm1249_vm2, %v4334_v53, %v4337_v56  ;;  %v3818_v47 = vpop.f32.mrf.mxu2 }
 0x795   : > { %4364 = vst [vmem:[%s8602_s25 + $0x10] sm:$0xff] %v4338_v2  ;;  %4019 = vmatpush.bf16.msrb.mxu2 %v3287_v11 }
 0x797   : > { %3983 = vmatpush.bf16.msrb.mxu1 %v8392_v41  ;;  %4009 = vmatpush.bf16.msrb.mxu0 %v1328_v31  ;;  %v3203_v22 = vpop.permute.xlu1 %3202  ;;  %v3266_v41 = vsel %vm3204_vm8, %v8875_v9, %v3069_v16 }
 0x798   : > { %4030 = vmatpush.bf16.msra.mxu3 %v1752_v26  ;;  %v3330_v33 = vsel %vm3204_vm8, %v8891_v8, %v3203_v22  ;;  %v3071_v54 = vpop.permute.xlu2 %3070 }
 0x799   : > { %4020 = vmatpush.bf16.msrb.mxu2 %v3266_v41  ;;  %v3506_v57 = vsel %vm1249_vm2, %v3330_v33, 0 }
 0x79a   : > { %3984 = vmatmul.bf16.vlgmr.msrb.gmra.mxu1 %v8683_v52  ;;  %4010 = vmatmul.bf16.vlgmr.msrb.gmra.mxu0 %v8683_v52  ;;  %v3115_v23 = vpop.permute.xlu0 %3114 }
 0x79b   : > { %4043 = vmatpush.bf16.msra.mxu1 %v3506_v57  ;;  %v3288_v46 = vsel %vm3204_vm8, %v3113_v39, %v3115_v23 }
 0x79c   : > { %4031 = vmatpush.bf16.msra.mxu3 %v1668_v0 }
 0x79d   : > { %4021 = vmatpush.bf16.msrb.mxu2 %v3245_v45  ;;  %v4061_v45 = vperm.slane %v9036_v48, 1 }
 0x79e   : > { %v3842_v9 = vpop.f32.mrf.mxu1 }
 0x79f   : > { %v3159_v8 = vpop.permute.xlu1 %3158  ;;  %v9013_v55 = vadd.f32 %v3842_v9, %v8923_v43  ;;  %v4103_v23 = vmul.f32 %v4061_v45, %v8545_v3 }
 0x7a0   : > { %4032 = vmatpush.bf16.msra.mxu3 %v1584_v36  ;;  %v3309_v59 = vsel %vm3204_vm8, %v3157_v34, %v3159_v8  ;;  %v3267_v34 = vsel %vm3204_vm8, %v3069_v16, %v3071_v54  ;;  %v4060_v36 = vperm.slane %v9036_v48, 0  ;;  %v4062_v8 = vperm.slane %v9036_v48, 2 }
 0x7a1   : > { %4044 = vmatpush.bf16.msra.mxu1 %v3309_v59  ;;  %v4124_v61 = vsel %vm1249_vm2, %v4103_v23, 0.0  ;;  %v4064_v54 = vperm.slane %v9036_v48, 4 }
 0x7a2   : > { %v3027_v58 = vpop.permute.xlu0 %3026  ;;  %v4104_v19 = vmul.f32 %v4062_v8, %v8566_v17 }
 0x7a3   : > { %v3246_v39 = vsel %vm3204_vm8, %v3025_v29, %v3027_v58  ;;  %v4065_v58 = vperm.slane %v9036_v48, 5 }
 0x7a4   : > { %4033 = vmatpush.bf16.msra.mxu3 %v1500_v6  ;;  %v4102_v6 = vmul.f32 %v4060_v36, %v8543_v12  ;;  %v4126_v21 = vsel %vm1249_vm2, %v4104_v19, 0.0 }
 0x7a5   : > { %4045 = vmatpush.bf16.msra.mxu1 %v3288_v46 }
 0x7a6   : > { %v3844_v14 = vpop.f32.mrf.mxu1  ;;  %v4123_v59 = vsel %vm1249_vm2, %v4102_v6, 0.0 }
 0x7a7   : > { %v2981_v5 = vpop.permute.xlu1 %2980 }
 0x7a8   : > { %4034 = vmatpush.bf16.msra.mxu3 %v1416_v7  ;;  %v3868_v27 = vpop.f32.mrf.mxu0  ;;  %v3224_v10 = vsel %vm3204_vm8, %v8936_v37, %v2981_v5  ;;  %v4063_v7 = vperm.slane %v9036_v48, 3 }
 0x7a9   : > { %4022 = vmatpush.bf16.msrb.mxu2 %v3224_v10  ;;  %4046 = vmatpush.bf16.msra.mxu1 %v3267_v34  ;;  %v4106_v34 = vmul.f32 %v4064_v54, %v8679_v40 }
 0x7ac   : > { %4035 = vmatpush.bf16.msra.mxu3 %v1332_v50  ;;  %v3855_v49 = vpop.f32.mrf.mxu2  ;;  %4482 = vmatmul.msk.bf16.vlgmr.msrb.gmra.mxu2 %vm3442_vm10, %v8557_v60  ;;  %v4105_v50 = vmul.f32 %v4063_v7, %v8577_v4 }
 0x7ad   : > { %4047 = vmatpush.bf16.msra.mxu1 %v3246_v39  ;;  %v9015_v56 = vadd.f32 %v3868_v27, %v3855_v49  ;;  %v4125_v27 = vadd.f32 %v4124_v61, %v4123_v59  ;;  %v4130_v39 = vsel %vm1249_vm2, %v4106_v34, 0.0 }
 0x7ae   : > { %v4128_v10 = vsel %vm1249_vm2, %v4105_v50, 0.0 }
 0x7af   : > { %4036 = vmatmul.bf16.vlgmr.msra.gmra.mxu3 %v8683_v52  ;;  %v2983_v35 = vpop.permute.xlu1 %2982  ;;  %v4284_v26 = vpack.c.bf16 %v9015_v56, %v9013_v55 }
 0x7b0   : > { %v3870_v28 = vpop.f32.mrf.mxu0  ;;  %v3225_v42 = vsel %vm3204_vm8, %v2981_v5, %v2983_v35  ;;  %v4127_v5 = vadd.f32 %v4126_v21, %v4125_v27  ;;  %v4066_v35 = vperm.slane %v9036_v48, 6 }
 0x7b1   : > { %4048 = vmatpush.bf16.msra.mxu1 %v3225_v42  ;;  %v4309_v31 = vrot.slane %v4284_v26, 2  ;;  %v4107_v28 = vmul.f32 %v4065_v58, %v8681_v38 }
 0x7b2   : > { %v4129_v49 = vadd.f32 %v4128_v10, %v4127_v5 }
 0x7b3   : > { %v4341_v16 = vsel %vm4316_vm0, %v4284_v26, %v4309_v31 }
 0x7b4   : > { %v3857_v37 = vpop.f32.mrf.mxu2  ;;  %4483 = vmatmul.msk.bf16.vlgmr.msra.gmra.mxu1 %vm3442_vm10, %v8557_v60  ;;  %v4131_v42 = vadd.f32 %v4130_v39, %v4129_v49  ;;  %v9115_v39 = vld [vmem:[%s9303_s2 + $0x10] sm:$0x1f] }
 0x7b5   : > { %v4132_v37 = vsel %vm1249_vm2, %v4107_v28, 0.0 }
 0x7ba   : > { %v3894_v53 = vpop.f32.mrf.mxu3 }
 0x7be   : > { %v3881_v15 = vpop.f32.mrf.mxu1 }
 0x7bf   : > { %v9019_v11 = vadd.f32 %v3894_v53, %v3881_v15  ;;  %v4108_v53 = vmul.f32 %v4066_v35, %v8712_v51  ;;  %v4067_v15 = vperm.slane %v9036_v48, 7 }
 0x7c2   : > { %v3896_v25 = vpop.f32.mrf.mxu3 }
 0x7c3   : > { %v4133_v25 = vadd.f32 %v4132_v37, %v4131_v42 }
 0x7c5   : > { %v3907_v24 = vpop.f32.mrf.mxu0 }
 0x7c6   : > { %v3883_v52 = vpop.f32.mrf.mxu1 }
 0x7c7   : > { %v4134_v52 = vsel %vm1249_vm2, %v4108_v53, 0.0 }
 0x7c8   : > { %v4135_v31 = vadd.f32 %v4134_v52, %v4133_v25 }
 0x7cd   : > { %v3909_v13 = vpop.f32.mrf.mxu0 }
 0x7ce   : > { %v4109_v13 = vmul.f32 %v4067_v15, %v8714_v44 }
 0x7d2   : > { %v3920_v2 = vpop.f32.mrf.mxu2 }
 0x7d3   : > { %v9021_v60 = vadd.f32 %v3920_v2, %v3907_v24  ;;  %v9080_v24 = vld [vmem:[%s9303_s2 + $0x8] sm:$0xff] }
 0x7d4   : > { %v4068_v26 = vperm.slane %v9080_v24, 0  ;;  %v4071_v6 = vperm.slane %v9080_v24, 3  ;;  %v4072_v61 = vperm.slane %v9080_v24, 4  ;;  %v4073_v21 = vperm.slane %v9080_v24, 5 }
 0x7d5   : > { %v4285_v47 = vpack.c.bf16 %v9021_v60, %v9019_v11  ;;  %v4074_v34 = vperm.slane %v9080_v24, 6  ;;  %v4075_v37 = vperm.slane %v9080_v24, 7 }
 0x7d6   : > { %v4114_v10 = vmul.f32 %v4072_v61, %v9013_v55  ;;  %v4115_v42 = vmul.f32 %v4073_v21, %v9015_v56 }
 0x7d7   : > { %v4310_v0 = vrot.slane %v4285_v47, 4  ;;  %v4311_v22 = vrot.slane %v4285_v47, 6  ;;  %v4116_v52 = vmul.f32 %v4074_v34, %v9019_v11 }
 0x7d8   : > { %v4146_v25 = vsel %vm1249_vm2, %v4114_v10, 0.0 }
 0x7d9   : > { %v4344_v41 = vsel %vm4320_vm1, %v4310_v0, %v4311_v22  ;;  %v4110_v0 = vmul.f32 %v4068_v26, %v8798_v63  ;;  %v4069_v22 = vperm.slane %v9080_v24, 1 }
 0x7da   : > { %v9026_v43 = vpop.f32.mrf.mxu3  ;;  %v4345_v29 = vsel %vm1249_vm2, %v4341_v16, %v4344_v41  ;;  %v3922_v33 = vpop.f32.mrf.mxu2  ;;  %v4136_v16 = vsel %vm1249_vm2, %v4109_v13, 0.0 }
 0x7db   : > { %4365 = vst [vmem:[%s8602_s25 + $0x18] sm:$0xff] %v4345_v29  ;;  %v4070_v29 = vperm.slane %v9080_v24, 2  ;;  %v4137_v33 = vadd.f32 %v4136_v16, %v4135_v31  ;;  %v4076_v31 = vperm.slane %v9115_v39, 0 }
 0x7dd   : > { %v4112_v59 = vmul.f32 %v4070_v29, %v8945_v30 }
 0x7df   : > { %v4142_v5 = vsel %vm1249_vm2, %v4112_v59, 0.0 }
 0x7e2   : > { %v3935_v57 = vpop.f32.mrf.mxu3 }
 0x7e3   : > { %v4138_v57 = vsel %vm1249_vm2, %v4110_v0, 0.0  ;;  %v4148_v0 = vsel %vm1249_vm2, %v4115_v42, 0.0 }
 0x7e4   : > { %v4139_v19 = vadd.f32 %v4138_v57, %v4137_v33  ;;  %v4117_v33 = vmul.f32 %v4075_v37, %v9021_v60 }
 0x7f2   : > { %v9031_v18 = vpop.f32.mrf.mxu2 }
 0x7f7   : > { %v9040_v9 = vpop.f32.mrf.mxu1  ;;  %v9042_v1 = vpop.f32.mrf.mxu0 }
 0x7f8   : > { %v9128_v13 = vadd.f32 %v9040_v9, %v9026_v43  ;;  %v9141_v43 = vadd.f32 %v9042_v1, %v9031_v18  ;;  %v4077_v9 = vperm.slane %v9115_v39, 1 }
 0x7fa   : > { %v3961_v62 = vpop.f32.mrf.mxu2 }
 0x7fb   : > { %v4111_v62 = vmul.f32 %v4069_v22, %v8927_v20 }
 0x7fd   : > { %v4140_v27 = vsel %vm1249_vm2, %v4111_v62, 0.0  ;;  %v4150_v62 = vsel %vm1249_vm2, %v4116_v52, 0.0  ;;  %v9516_v52 = vperm.slane %v9115_v39, 4 }
 0x7fe   : > { %v4141_v49 = vadd.f32 %v4140_v27, %v4139_v19  ;;  %v4152_v19 = vsel %vm1249_vm2, %v4117_v33, 0.0  ;;  %v4078_v27 = vperm.slane %v9115_v39, 2 }
 0x7ff   : > { %v3948_v46 = vpop.f32.mrf.mxu1  ;;  %v3974_v14 = vpop.f32.mrf.mxu0 }
 0x800   : > { %v4113_v14 = vmul.f32 %v4071_v6, %v8947_v32  ;;  %v4143_v53 = vadd.f32 %v4142_v5, %v4141_v49  ;;  %v4119_v5 = vmul.f32 %v4077_v9, %v9141_v43  ;;  %v4286_v49 = vpack.c.bf16 %v9141_v43, %v9128_v13 }
 0x802   : > { %v4144_v28 = vsel %vm1249_vm2, %v4113_v14, 0.0 }
 0x803   : > { %v4145_v16 = vadd.f32 %v4144_v28, %v4143_v53  ;;  %v4079_v28 = vperm.slane %v9115_v39, 3 }
 0x805   : > { %v4147_v57 = vadd.f32 %v4146_v25, %v4145_v16 }
 0x807   : > { %v4149_v59 = vadd.f32 %v4148_v0, %v4147_v57  ;;  %v4312_v0 = vrot.slane %v4286_v49, 2 }
 0x809   : > { %v4151_v14 = vadd.f32 %v4150_v62, %v4149_v59 }
 0x80b   : > { %v4153_v10 = vadd.f32 %v4152_v19, %v4151_v14 }
 0x814   : > { %v3998_v2 = vpop.f32.mrf.mxu3 }
 0x817   : > { %v3985_v47 = vpop.f32.mrf.mxu1  ;;  %v4011_v41 = vpop.f32.mrf.mxu0 }
 0x81c   : > { %v4000_v23 = vpop.f32.mrf.mxu3 }
 0x81d   : > { %v4118_v23 = vmul.f32 %v4076_v31, %v9128_v13 }
 0x81f   : > { %v3987_v46 = vpop.f32.mrf.mxu1  ;;  %v4013_v50 = vpop.f32.mrf.mxu0 }
 0x820   : > { %v9145_v46 = vadd.f32 %v3998_v2, %v3985_v47  ;;  %v4154_v50 = vsel %vm1249_vm2, %v4118_v23, 0.0  ;;  %v4156_v47 = vsel %vm1249_vm2, %v4119_v5, 0.0  ;;  %v4348_v5 = vsel %vm4316_vm0, %v4286_v49, %v4312_v0 }
 0x821   : > { %v4155_v1 = vadd.f32 %v4154_v50, %v4153_v10 }
 0x822   : > { %v4120_v18 = vmul.f32 %v4078_v27, %v9145_v46 }
 0x823   : > { %v4157_v16 = vadd.f32 %v4156_v47, %v4155_v1 }
 0x824   : > { %v4158_v53 = vsel %vm1249_vm2, %v4120_v18, 0.0 }
 0x825   : > { %v4159_v59 = vadd.f32 %v4158_v53, %v4157_v16 }
 0x82f   : > { %v4024_v42 = vpop.f32.mrf.mxu2 }
 0x830   : > { %v9160_v25 = vadd.f32 %v4024_v42, %v4011_v41 }
 0x831   : > { %v4050_v33 = vpop.f32.mrf.mxu1 }
 0x832   : > { %v4037_v2 = vpop.f32.mrf.mxu3  ;;  %v4121_v57 = vmul.f32 %v4079_v28, %v9160_v25  ;;  %v4287_v62 = vpack.c.bf16 %v9160_v25, %v9145_v46 }
 0x833   : > { %v9168_v23 = vadd.f32 %v4050_v33, %v4037_v2 }
 0x834   : > { %v4313_v19 = vrot.slane %v4287_v62, 4  ;;  %v4314_v41 = vrot.slane %v4287_v62, 6  ;;  %v4160_v18 = vsel %vm1249_vm2, %v4121_v57, 0.0 }
 0x835   : > { %v4122_v14 = vmul.f32 %v9516_v52, %v9168_v23  ;;  %v4288_v50 = vpack.c.bf16 %v9168_v23, %v9168_v23  ;;  %v4161_v47 = vadd.f32 %v4160_v18, %v4159_v59 }
 0x836   : > { %v4351_v1 = vsel %vm4320_vm1, %v4313_v19, %v4314_v41 }
 0x837   : > { %v4315_v2 = vrot.slane %v4288_v50, 2  ;;  %v4163_v42 = vsel %vm4162_vm9, %v4122_v14, 0.0  ;;  %v4352_v53 = vsel %vm1249_vm2, %v4348_v5, %v4351_v1  ;;  %v4026_v16 = vpop.f32.mrf.mxu2 }
 0x838   : > { %4366 = vst [vmem:[%s8602_s25 + $0x20] sm:$0xff] %v4352_v53  ;;  %v4164_v62 = vadd.f32 %v4163_v42, %v4161_v47 }
 0x839   : > { %v4355_v33 = vsel %vm4316_vm0, %v4288_v50, %v4315_v2  ;;  %v4052_v52 = vpop.f32.mrf.mxu1 }
 0x83a   : > { %v4039_v10 = vpop.f32.mrf.mxu3  ;;  %4368 = vst.msk [vmem:[%s8602_s25 + $0x28] sm:$0x3] %vm4367_vm11, %v4355_v33  ;;  %4165 = vadd.xlane.f32.xlu2 %v4164_v62 }
 0x8ad   : > { %v9183_v49 = vpop.xlane.xlu2 %4165 }
 0x8ae   : > { %v9186_v0 = vmul.f32 0.00048828125, %v9183_v49 }
 0x8b0   : > { %v4168_v57 = vsub.f32 %v8543_v12, %v9186_v0  ;;  %v4169_v59 = vsub.f32 %v8545_v3, %v9186_v0  ;;  %v4170_v19 = vsub.f32 %v8566_v17, %v9186_v0  ;;  %v4171_v52 = vsub.f32 %v8577_v4, %v9186_v0 }
 0x8b1   : > { %v4172_v50 = vsub.f32 %v8679_v40, %v9186_v0  ;;  %v4173_v3 = vsub.f32 %v8681_v38, %v9186_v0  ;;  %v4174_v4 = vsub.f32 %v8712_v51, %v9186_v0  ;;  %v4176_v2 = vsub.f32 %v8798_v63, %v9186_v0 }
 0x8b2   : > { %v4189_v41 = vmul.f32 %v4168_v57, %v4060_v36  ;;  %v4190_v14 = vmul.f32 %v4169_v59, %v4061_v45  ;;  %v4191_v12 = vmul.f32 %v4170_v19, %v4062_v8  ;;  %v4192_v17 = vmul.f32 %v4171_v52, %v4063_v7 }
 0x8b3   : > { %v4193_v45 = vmul.f32 %v4172_v50, %v4064_v54  ;;  %v4175_v8 = vsub.f32 %v8714_v44, %v9186_v0  ;;  %v4194_v18 = vmul.f32 %v4173_v3, %v4065_v58  ;;  %v4195_v51 = vmul.f32 %v4174_v4, %v4066_v35 }
 0x8b4   : > { %v4210_v5 = vmul.f32 %v4189_v41, %v4189_v41  ;;  %v4211_v36 = vmul.f32 %v4190_v14, %v4190_v14  ;;  %v4212_v10 = vmul.f32 %v4191_v12, %v4191_v12  ;;  %v4213_v38 = vmul.f32 %v4192_v17, %v4192_v17 }
 0x8b5   : > { %v4214_v54 = vmul.f32 %v4193_v45, %v4193_v45  ;;  %v4177_v44 = vsub.f32 %v8927_v20, %v9186_v0  ;;  %v4196_v58 = vmul.f32 %v4175_v8, %v4067_v15  ;;  %v4215_v53 = vmul.f32 %v4194_v18, %v4194_v18 }
 0x8b6   : > { %v4231_v40 = vsel %vm1249_vm2, %v4210_v5, 0.0  ;;  %v4232_v1 = vsel %vm1249_vm2, %v4211_v36, 0.0  ;;  %v4234_v47 = vsel %vm1249_vm2, %v4212_v10, 0.0  ;;  %v4236_v16 = vsel %vm1249_vm2, %v4213_v38, 0.0 }
 0x8b7   : > { %v4233_v7 = vadd.f32 %v4232_v1, %v4231_v40  ;;  %v4178_v63 = vsub.f32 %v8945_v30, %v9186_v0  ;;  %v4197_v35 = vmul.f32 %v4176_v2, %v4068_v26  ;;  %v4216_v62 = vmul.f32 %v4195_v51, %v4195_v51 }
 0x8b8   : > { %v4238_v57 = vsel %vm1249_vm2, %v4214_v54, 0.0  ;;  %v4179_v20 = vsub.f32 %v8947_v32, %v9186_v0  ;;  %v4198_v48 = vmul.f32 %v4177_v44, %v4069_v22  ;;  %v4217_v15 = vmul.f32 %v4196_v58, %v4196_v58 }
 0x8b9   : > { %v4235_v42 = vadd.f32 %v4234_v47, %v4233_v7  ;;  %v4240_v19 = vsel %vm1249_vm2, %v4215_v53, 0.0  ;;  %v4180_v30 = vsub.f32 %v9013_v55, %v9186_v0  ;;  %v4199_v26 = vmul.f32 %v4178_v63, %v4070_v29 }
 0x8ba   : > { %v4218_v52 = vmul.f32 %v4197_v35, %v4197_v35  ;;  %v4242_v14 = vsel %vm1249_vm2, %v4216_v62, 0.0  ;;  %v4181_v32 = vsub.f32 %v9015_v56, %v9186_v0  ;;  %v4200_v22 = vmul.f32 %v4179_v20, %v4071_v6 }
 0x8bb   : > { %v4237_v33 = vadd.f32 %v4236_v16, %v4235_v42  ;;  %v4219_v12 = vmul.f32 %v4198_v48, %v4198_v48  ;;  %v4244_v5 = vsel %vm1249_vm2, %v4217_v15, 0.0  ;;  %v4182_v55 = vsub.f32 %v9019_v11, %v9186_v0 }
 0x8bc   : > { %v4201_v29 = vmul.f32 %v4180_v30, %v4072_v61  ;;  %v4220_v17 = vmul.f32 %v4199_v26, %v4199_v26  ;;  %v4246_v36 = vsel %vm1249_vm2, %v4218_v52, 0.0  ;;  %v4183_v56 = vsub.f32 %v9021_v60, %v9186_v0 }
 0x8bd   : > { %v4239_v59 = vadd.f32 %v4238_v57, %v4237_v33  ;;  %v4202_v6 = vmul.f32 %v4181_v32, %v4073_v21  ;;  %v4221_v45 = vmul.f32 %v4200_v22, %v4200_v22  ;;  %v4248_v10 = vsel %vm1249_vm2, %v4219_v12, 0.0 }
 0x8be   : > { %v4184_v11 = vsub.f32 %v9128_v13, %v9186_v0  ;;  %v4203_v61 = vmul.f32 %v4182_v55, %v4074_v34  ;;  %v4222_v8 = vmul.f32 %v4201_v29, %v4201_v29  ;;  %v4250_v18 = vsel %vm1249_vm2, %v4220_v17, 0.0 }
 0x8bf   : > { %v4241_v41 = vadd.f32 %v4240_v19, %v4239_v59  ;;  %v4185_v60 = vsub.f32 %v9141_v43, %v9186_v0  ;;  %v4204_v21 = vmul.f32 %v4183_v56, %v4075_v37  ;;  %v4223_v1 = vmul.f32 %v4202_v6, %v4202_v6 }
 0x8c0   : > { %v4252_v7 = vsel %vm1249_vm2, %v4221_v45, 0.0  ;;  %v4186_v13 = vsub.f32 %v9145_v46, %v9186_v0  ;;  %v4205_v34 = vmul.f32 %v4184_v11, %v4076_v31  ;;  %v4224_v51 = vmul.f32 %v4203_v61, %v4203_v61 }
 0x8c1   : > { %v4243_v50 = vadd.f32 %v4242_v14, %v4241_v41  ;;  %v4254_v54 = vsel %vm1249_vm2, %v4222_v8, 0.0  ;;  %v4187_v43 = vsub.f32 %v9160_v25, %v9186_v0  ;;  %v4206_v24 = vmul.f32 %v4185_v60, %v4077_v9 }
 0x8c2   : > { %v4225_v37 = vmul.f32 %v4204_v21, %v4204_v21  ;;  %v4256_v42 = vsel %vm1249_vm2, %v4223_v1, 0.0  ;;  %v4188_v46 = vsub.f32 %v9168_v23, %v9186_v0  ;;  %v4207_v31 = vmul.f32 %v4186_v13, %v4078_v27 }
 0x8c3   : > { %v4245_v3 = vadd.f32 %v4244_v5, %v4243_v50  ;;  %v4226_v58 = vmul.f32 %v4205_v34, %v4205_v34  ;;  %v4258_v53 = vsel %vm1249_vm2, %v4224_v51, 0.0  ;;  %v4208_v25 = vmul.f32 %v4187_v43, %v4079_v28 }
 0x8c4   : > { %v4227_v33 = vmul.f32 %v4206_v24, %v4206_v24  ;;  %v4260_v9 = vsel %vm1249_vm2, %v4225_v37, 0.0  ;;  %v10192_v35 = vperm.slane %v9115_v39, 4  ;;  %v4228_v57 = vmul.f32 %v4207_v31, %v4207_v31 }
 0x8c5   : > { %v4247_v4 = vadd.f32 %v4246_v36, %v4245_v3  ;;  %v4262_v23 = vsel %vm1249_vm2, %v4226_v58, 0.0  ;;  %v4229_v27 = vmul.f32 %v4208_v25, %v4208_v25 }
 0x8c6   : > { %v4209_v62 = vmul.f32 %v4188_v46, %v10192_v35  ;;  %v4264_v59 = vsel %vm1249_vm2, %v4227_v33, 0.0  ;;  %v4266_v15 = vsel %vm1249_vm2, %v4228_v57, 0.0 }
 0x8c7   : > { %v4249_v40 = vadd.f32 %v4248_v10, %v4247_v4  ;;  %v4268_v19 = vsel %vm1249_vm2, %v4229_v27, 0.0 }
 0x8c8   : > { %v4230_v48 = vmul.f32 %v4209_v62, %v4209_v62 }
 0x8c9   : > { %v4251_v38 = vadd.f32 %v4250_v18, %v4249_v40 }
 0x8ca   : > { %v4270_v30 = vsel %vm4162_vm9, %v4230_v48, 0.0 }
 0x8cb   : > { %v4253_v2 = vadd.f32 %v4252_v7, %v4251_v38 }
 0x8cd   : > { %v4255_v47 = vadd.f32 %v4254_v54, %v4253_v2 }
 0x8cf   : > { %v4257_v44 = vadd.f32 %v4256_v42, %v4255_v47 }
 0x8d1   : > { %v4259_v16 = vadd.f32 %v4258_v53, %v4257_v44 }
 0x8d3   : > { %v4261_v63 = vadd.f32 %v4260_v9, %v4259_v16 }
 0x8d5   : > { %v4263_v0 = vadd.f32 %v4262_v23, %v4261_v63 }
 0x8d7   : > { %v4265_v20 = vadd.f32 %v4264_v59, %v4263_v0 }
 0x8d9   : > { %v4267_v28 = vadd.f32 %v4266_v15, %v4265_v20 }
 0x8db   : > { %v4269_v41 = vadd.f32 %v4268_v19, %v4267_v28 }
 0x8dd   : > { %v4271_v39 = vadd.f32 %v4270_v30, %v4269_v41 }
 0x8df   : > { %4272 = vadd.xlane.f32.xlu0 %v4271_v39 }
 0x952   : > { %v4273_v26 = vpop.xlane.xlu0 %4272 }
 0x953   : > { %v4275_v52 = vsel %vm4274_vm12, %v9183_v49, %v4273_v26 }
 0x954   : > { %4277 = vst.msk [vmem:[%s208_s9] sm:$0xf] %vm4276_vm13, %v4275_v52 }
 0x955 PF: > { %s15_s15 = sadd.s32 1, %s4527_s15  }
 0x956   : > { %p12_p4 = scmp.ge.s32.totalorder %s15_s15, 4  }
 0x958   :  { %14 = sbr.rel (!%p12_p4) target bundleno = 1 (0x1), region = 74 }

</bundles_post_ra>
